<compile_context>
chip_gen: v7x
topology: tpu7x:2x2x1
jax: 0.10.0
libtpu: 0.0.40
codegen_flags: <defaults>
</compile_context>

<pallas_src>
import functools

import jax
import jax.numpy as jnp
from jax.experimental import pallas as pl
from jax.experimental.pallas import tpu as pltpu

LATENT_DIMS = 32          # stand-in for config['model_params']['latent_dim']
BN_EPS = 1e-5
LEAKY_SLOPE = 0.01        # F.leaky_relu default

# Final feature-map geometry for a 96x64 input after five stride-2 convs.
C_LAST, H_LAST, W_LAST = 512, 3, 2
CONV_COUT = [32, 64, 128, 256, 512]
# (lane-pack factor, padded im2col K, M-tiles, N-tiles) per conv layer 1..4.
CONV_CFG = [
    (4, 32, 2, 1),    # conv1: K 27->32, out lanes 4*32 = 128, M split in 2
    (2, None, 2, 1),  # conv2: out lanes 2*64 = 128, M split in 2
    (1, None, 2, 1),  # conv3: N = 128, M split in 2
    (1, None, 1, 2),  # conv4: N = 256 -> two 128-lane tiles (v5e/v7x friendly)
]


# ---------------------------------------------------------------------------
# Pallas kernel 1: fused  Y = leaky_relu( X @ W + shift )   (conv1..conv4)
#   X, W bf16 (BN scale folded into W); accumulate + epilogue in f32.
# ---------------------------------------------------------------------------
def _fused_matmul_kernel(x_ref, w_ref, shift_ref, o_ref, *, leaky):
    y = jnp.dot(x_ref[...], w_ref[...], preferred_element_type=jnp.float32)
    y = y + shift_ref[...]
    if leaky:
        y = jnp.where(y > 0, y, LEAKY_SLOPE * y)
    o_ref[...] = y.astype(o_ref.dtype)


def fused_matmul_bias(x, w, shift, *, leaky, out_dtype, m_tiles=1, n_tiles=1):
    """x: (M, K) bf16, w: (K, N) bf16, shift: (1, N) f32 -> (M, N) out_dtype."""
    M, K = x.shape
    Kw, N = w.shape
    assert K == Kw and M % m_tiles == 0 and N % n_tiles == 0
    tm, tn = M // m_tiles, N // n_tiles
    assert m_tiles == 1 or tm % 8 == 0, "M tile must be a multiple of 8"
    assert n_tiles == 1 or tn % 128 == 0, "N tile must be a multiple of 128"
    grid = (m_tiles, n_tiles)
    return pl.pallas_call(
        functools.partial(_fused_matmul_kernel, leaky=leaky),
        out_shape=jax.ShapeDtypeStruct((M, N), out_dtype),
        grid_spec=pltpu.PrefetchScalarGridSpec(
            num_scalar_prefetch=0,
            grid=grid,
            in_specs=[
                pl.BlockSpec((tm, K), lambda i, j: (i, 0)),   # patches tile
                pl.BlockSpec((K, tn), lambda i, j: (0, j)),   # weights (BN folded)
                pl.BlockSpec((1, tn), lambda i, j: (0, j)),   # bias/BN shift
            ],
            out_specs=pl.BlockSpec((tm, tn), lambda i, j: (i, j)),
        ),
        compiler_params=pltpu.CompilerParams(
            dimension_semantics=("parallel", "parallel")),
    )(x, w, shift)


# ---------------------------------------------------------------------------
# Pallas kernel 2: fused conv5 + fc_mu/fc_logvar head.
#   patches: (6*B, 2304) rows ordered (position p, batch b)  -> conv5 out in
#   VMEM scratch -> FC consumes it as six unit-stride (B, 512) row slabs.
# ---------------------------------------------------------------------------
def _conv5_fc_kernel(p_ref, w5_ref, s5_ref, wfc_ref, sfc_ref, o_ref, y5_ref,
                     *, n_pos, batch, c5):
    y = jnp.dot(p_ref[...], w5_ref[...], preferred_element_type=jnp.float32)
    y = y + s5_ref[...]
    y = jnp.where(y > 0, y, LEAKY_SLOPE * y)
    y5_ref[...] = y.astype(y5_ref.dtype)              # conv5 act stays in VMEM
    acc = jnp.zeros(o_ref.shape, jnp.float32)
    for p in range(n_pos):                             # 6 positions, unrolled
        acc = acc + jnp.dot(y5_ref[pl.ds(p * batch, batch), :],
                            wfc_ref[pl.ds(p * c5, c5), :],
                            preferred_element_type=jnp.float32)
    o_ref[...] = (acc + sfc_ref[...]).astype(o_ref.dtype)


def conv5_fc_fused(patches, w5, s5, wfc, sfc, batch):
    Mp, K5 = patches.shape                   # (6*B, 2304)
    C5 = w5.shape[1]                         # 512
    Nfc = wfc.shape[1]                       # 2 * latent
    n_pos = Mp // batch                      # 6
    return pl.pallas_call(
        functools.partial(_conv5_fc_kernel, n_pos=n_pos, batch=batch, c5=C5),
        out_shape=jax.ShapeDtypeStruct((batch, Nfc), jnp.float32),
        grid_spec=pltpu.PrefetchScalarGridSpec(
            num_scalar_prefetch=0,
            grid=(1,),
            in_specs=[
                pl.BlockSpec((Mp, K5), lambda i: (0, 0)),      # conv5 patches
                pl.BlockSpec((K5, C5), lambda i: (0, 0)),      # conv5 weights
                pl.BlockSpec((1, C5), lambda i: (0, 0)),       # conv5 shift
                pl.BlockSpec((n_pos * C5, Nfc), lambda i: (0, 0)),  # fc weights
                pl.BlockSpec((1, Nfc), lambda i: (0, 0)),      # fc bias
            ],
            out_specs=pl.BlockSpec((batch, Nfc), lambda i: (0, 0)),
            scratch_shapes=[pltpu.VMEM((Mp, C5), jnp.bfloat16)],
        ),
        compiler_params=pltpu.CompilerParams(
            dimension_semantics=("arbitrary",)),
    )(patches, w5, s5, wfc, sfc)


# ---------------------------------------------------------------------------
# im2col glue in NHWC (kernel=3, stride=2, pad=1) — plain-JAX wrapper glue.
# Column order is (kh, kw, Cin), matching the prepared weight layout.
# ---------------------------------------------------------------------------
def im2col_nhwc_3x3_s2_p1(x):
    B, H, W, C = x.shape
    xp = jnp.pad(x, ((0, 0), (1, 1), (1, 1), (0, 0)))
    Ho = (H + 2 - 3) // 2 + 1
    Wo = (W + 2 - 3) // 2 + 1
    cols = []
    for di in range(3):
        for dj in range(3):
            cols.append(xp[:, di:di + 2 * Ho:2, dj:dj + 2 * Wo:2, :])
    p = jnp.stack(cols, axis=3)                  # (B, Ho, Wo, 9, C)
    return p.reshape(B * Ho * Wo, 9 * C), Ho, Wo


# ---------------------------------------------------------------------------
# Parameter construction (deterministic, synthetic; PyTorch layouts)
# ---------------------------------------------------------------------------
def make_params(key):
    chans = [(3, 32), (32, 64), (64, 128), (128, 256), (256, 512)]
    params = {}
    keys = jax.random.split(key, 5 * 6 + 4)
    k = 0
    for li, (cin, cout) in enumerate(chans, start=1):
        fan_in = cin * 9
        params[f"conv{li}_w"] = jax.random.normal(keys[k], (cout, cin, 3, 3),
                                                  jnp.float32) / jnp.sqrt(fan_in); k += 1
        params[f"conv{li}_b"] = 0.1 * jax.random.normal(keys[k], (cout,), jnp.float32); k += 1
        params[f"bn{li}_gamma"] = 0.5 + jax.random.uniform(keys[k], (cout,), jnp.float32); k += 1
        params[f"bn{li}_beta"] = 0.1 * jax.random.normal(keys[k], (cout,), jnp.float32); k += 1
        params[f"bn{li}_mean"] = 0.1 * jax.random.normal(keys[k], (cout,), jnp.float32); k += 1
        params[f"bn{li}_var"] = 0.5 + jax.random.uniform(keys[k], (cout,), jnp.float32); k += 1
    in_feat = C_LAST * H_LAST * W_LAST          # 512 * 6 = 3072
    params["fc_mu_w"] = jax.random.normal(keys[k], (LATENT_DIMS, in_feat),
                                          jnp.float32) / jnp.sqrt(in_feat); k += 1
    params["fc_mu_b"] = 0.1 * jax.random.normal(keys[k], (LATENT_DIMS,), jnp.float32); k += 1
    params["fc_logvar_w"] = jax.random.normal(keys[k], (LATENT_DIMS, in_feat),
                                              jnp.float32) / jnp.sqrt(in_feat); k += 1
    params["fc_logvar_b"] = 0.1 * jax.random.normal(keys[k], (LATENT_DIMS,), jnp.float32); k += 1
    return params


# ---------------------------------------------------------------------------
# One-time parameter prep: fold eval-mode BN into weights, reorder for NHWC,
# zero-pad conv1's K to 32, build block-diagonal (lane-dense) weights for
# conv1/conv2, fuse the two FC heads, cast operands to bf16.
# ---------------------------------------------------------------------------
def prepare_params(params):
    prep = {}
    packs = {1: 4, 2: 2, 3: 1, 4: 1, 5: 1}
    kpads = {1: 32}
    for li in range(1, 6):
        w = params[f"conv{li}_w"]                 # (Cout, Cin, 3, 3)
        b = params[f"conv{li}_b"]
        gamma, beta = params[f"bn{li}_gamma"], params[f"bn{li}_beta"]
        mean, var = params[f"bn{li}_mean"], params[f"bn{li}_var"]
        cout = w.shape[0]
        scale = gamma / jnp.sqrt(var + BN_EPS)                 # (Cout,)
        shift = (b - mean) * scale + beta                      # (Cout,)
        # (Cout, Cin, kh, kw) -> (kh, kw, Cin, Cout) -> (9*Cin, Cout); fold scale.
        wmat = w.transpose(2, 3, 1, 0).reshape(-1, cout) * scale[None, :]
        prep[f"conv{li}_w_ref"] = wmat.astype(jnp.bfloat16)    # for the reference
        prep[f"conv{li}_shift"] = shift[None, :].astype(jnp.float32)

        wk = wmat
        if li in kpads:                          # conv1: K 27 -> 32 (aligned lanes)
            wk = jnp.pad(wk, ((0, kpads[li] - wk.shape[0]), (0, 0)))
        pack = packs[li]
        if pack > 1:                             # lane-dense output: blockdiag x pack
            wk = jnp.kron(jnp.eye(pack, dtype=wk.dtype), wk)
            prep[f"conv{li}_shift_packed"] = jnp.tile(prep[f"conv{li}_shift"], (1, pack))
        else:
            prep[f"conv{li}_shift_packed"] = prep[f"conv{li}_shift"]
        prep[f"conv{li}_w"] = wk.astype(jnp.bfloat16)

    # FC heads: permute columns from NCHW flatten order (c, h, w) to (h, w, c)
    # so rows line up with the kernel's (position, channel) slicing, then fuse
    # mu / logvar along the output dim.
    def reorder(wfc):  # (latent, C*H*W) -> (H*W*C, latent)
        return (wfc.reshape(LATENT_DIMS, C_LAST, H_LAST, W_LAST)
                   .transpose(2, 3, 1, 0)
                   .reshape(H_LAST * W_LAST * C_LAST, LATENT_DIMS))
    wmu = reorder(params["fc_mu_w"])
    wlv = reorder(params["fc_logvar_w"])
    prep["fc_w"] = jnp.concatenate([wmu, wlv], axis=1).astype(jnp.bfloat16)   # (3072, 64)
    prep["fc_shift"] = jnp.concatenate(
        [params["fc_mu_b"], params["fc_logvar_b"]])[None, :].astype(jnp.float32)  # (1, 64)
    return prep


# ---------------------------------------------------------------------------
# Forward passes
# ---------------------------------------------------------------------------
def encoder_forward_pallas(x_nchw, prep):
    B = x_nchw.shape[0]
    x = x_nchw.transpose(0, 2, 3, 1).astype(jnp.bfloat16)     # NHWC bf16, once

    # conv1 .. conv4 : im2col (wrapper) + fused matmul/BN/leaky kernels,
    # lane-dense (>=128) outputs via block-diagonal packed weights.
    for li, (pack, k_pad, m_t, n_t) in enumerate(CONV_CFG, start=1):
        patches, Ho, Wo = im2col_nhwc_3x3_s2_p1(x)            # (M, 9*Cin) bf16
        if k_pad is not None:
            patches = jnp.pad(patches, ((0, 0), (0, k_pad - patches.shape[1])))
        M = patches.shape[0]
        patches = patches.reshape(M // pack, pack * patches.shape[1])  # free view
        y = fused_matmul_bias(patches, prep[f"conv{li}_w"],
                              prep[f"conv{li}_shift_packed"],
                              leaky=True, out_dtype=jnp.bfloat16,
                              m_tiles=m_t, n_tiles=n_t)
        x = y.reshape(B, Ho, Wo, CONV_COUT[li - 1])           # free view, NHWC

    # conv5 + fc_mu/fc_logvar fused tail: patches reordered (position, batch)
    # so the in-kernel FC reads unit-stride row slabs of conv5's VMEM output.
    patches, Ho, Wo = im2col_nhwc_3x3_s2_p1(x)                # (B*6, 2304)
    Mp, K5 = patches.shape
    patches = (patches.reshape(B, Ho * Wo, K5)
                      .transpose(1, 0, 2)
                      .reshape(Mp, K5))
    out = conv5_fc_fused(patches, prep["conv5_w"], prep["conv5_shift"],
                         prep["fc_w"], prep["fc_shift"], B)   # (B, 2*latent) f32
    return out[:, :LATENT_DIMS], out[:, LATENT_DIMS:2 * LATENT_DIMS]


def encoder_forward_ref(x_nchw, prep):
    """Pure-JAX reference of the same math (unpacked weights, f32 compute)."""
    B = x_nchw.shape[0]
    x = x_nchw.transpose(0, 2, 3, 1).astype(jnp.bfloat16)
    for li in range(1, 6):
        patches, Ho, Wo = im2col_nhwc_3x3_s2_p1(x)
        y = jnp.dot(patches.astype(jnp.float32),
                    prep[f"conv{li}_w_ref"].astype(jnp.float32)) + prep[f"conv{li}_shift"]
        y = jnp.where(y > 0, y, LEAKY_SLOPE * y)
        x = y.astype(jnp.bfloat16).reshape(B, Ho, Wo, -1)
    flat = x.reshape(B, -1)                                   # (h, w, c) flatten
    out = jnp.dot(flat.astype(jnp.float32),
                  prep["fc_w"].astype(jnp.float32)) + prep["fc_shift"]
    return out[:, :LATENT_DIMS], out[:, LATENT_DIMS:2 * LATENT_DIMS]


if __name__ == "__main__":
    key = jax.random.PRNGKey(0)
    k_param, k_x = jax.random.split(key)
    params = make_params(k_param)
    prep = prepare_params(params)            # one-time BN fold / pack / bf16 cast

    # Input: batch=2, 3 channels, 96x64 spatial -> after 5 stride-2 convs:
    # (2, 3, 2, 512) NHWC -> flatten 512*6 = 3072, matching fc in_features.
    x = jax.random.normal(k_x, (2, 3, 96, 64), jnp.float32)

    fwd = jax.jit(encoder_forward_pallas)
    mu, logvar = fwd(x, prep)
    mu = jax.block_until_ready(mu)
    logvar = jax.block_until_ready(logvar)

    mu_ref, logvar_ref = jax.jit(encoder_forward_ref)(x, prep)
    mu_ref = jax.block_until_ready(mu_ref)
    logvar_ref = jax.block_until_ready(logvar_ref)

    assert mu.shape == (2, LATENT_DIMS) and logvar.shape == (2, LATENT_DIMS)
    assert bool(jnp.all(jnp.isfinite(mu))) and bool(jnp.all(jnp.isfinite(logvar)))
    assert bool(jnp.allclose(mu, mu_ref, rtol=2e-2, atol=2e-2))
    assert bool(jnp.allclose(logvar, logvar_ref, rtol=2e-2, atol=2e-2))

    print("KERNEL_OK")
</pallas_src>

<mosaic_0001>
module attributes {stable_mosaic.version = 11 : i64} {
  func.func @_fused_matmul_kernel(%arg0: i32, %arg1: i32, %arg2: memref<384x128xbf16, #tpu.memory_space<vmem>>, %arg3: memref<128x128xbf16, #tpu.memory_space<vmem>>, %arg4: memref<1x128xf32, #tpu.memory_space<vmem>>, %arg5: memref<384x128xbf16, #tpu.memory_space<vmem>>) attributes {dimension_semantics = [#tpu.dimension_semantics<parallel>, #tpu.dimension_semantics<parallel>], iteration_bounds = array<i64: 2, 1>, scalar_prefetch = 0 : i64, scratch_operands = 0 : i64, tpu.core_type = #tpu.core_type<tc>, window_params = [{transform_indices = @transform_0, window_bounds = array<i64: 384, 128>}, {transform_indices = @transform_1, window_bounds = array<i64: 128, 128>}, {transform_indices = @transform_2, window_bounds = array<i64: 1, 128>}, {transform_indices = @transform_3, window_bounds = array<i64: 384, 128>}]} {
    %c0 = arith.constant 0 : index
    %c0_0 = arith.constant 0 : index
    %0 = vector.load %arg2[%c0, %c0_0] : memref<384x128xbf16, #tpu.memory_space<vmem>>, vector<384x128xbf16>
    %c0_1 = arith.constant 0 : index
    %c0_2 = arith.constant 0 : index
    %1 = vector.load %arg3[%c0_1, %c0_2] : memref<128x128xbf16, #tpu.memory_space<vmem>>, vector<128x128xbf16>
    %cst = arith.constant dense<0.000000e+00> : vector<384x128xf32>
    %2 = tpu.matmul %0, %1, %cst {dimension_numbers = #tpu.dot_dimension_numbers<[1], [0], [0], [1], [0, 0, 1, 1], [], []>} : vector<384x128xbf16>, vector<128x128xbf16>, vector<384x128xf32> -> vector<384x128xf32>
    %c0_3 = arith.constant 0 : index
    %c0_4 = arith.constant 0 : index
    %3 = vector.load %arg4[%c0_3, %c0_4] : memref<1x128xf32, #tpu.memory_space<vmem>>, vector<1x128xf32>
    %4 = vector.broadcast %3 : vector<1x128xf32> to vector<384x128xf32>
    %5 = arith.addf %2, %4 : vector<384x128xf32>
    %cst_5 = arith.constant 0.000000e+00 : f32
    %6 = vector.broadcast %cst_5 : f32 to vector<384x128xf32>
    %7 = arith.cmpf ogt, %5, %6 : vector<384x128xf32>
    %cst_6 = arith.constant 0.00999999977 : f32
    %8 = vector.broadcast %cst_6 : f32 to vector<384x128xf32>
    %9 = arith.mulf %8, %5 : vector<384x128xf32>
    %10 = arith.select %7, %5, %9 : vector<384x128xi1>, vector<384x128xf32>
    %11 = arith.truncf %10 : vector<384x128xf32> to vector<384x128xbf16>
    %c0_7 = arith.constant 0 : index
    %c0_8 = arith.constant 0 : index
    %12 = vector.load %arg5[%c0_7, %c0_8] : memref<384x128xbf16, #tpu.memory_space<vmem>>, vector<384x128xbf16>
    tpu.vector_store %arg5[%c0_7, %c0_8], %11 {strides = array<i32>} : memref<384x128xbf16, #tpu.memory_space<vmem>>, vector<384x128xbf16>,
    return
  }
  func.func @transform_0(%arg0: i32, %arg1: i32) -> (i32, i32) {
    %c0_i32 = arith.constant 0 : i32
    %c0_i32_0 = arith.constant 0 : i32
    return %arg0, %c0_i32 : i32, i32
  }
  func.func @transform_1(%arg0: i32, %arg1: i32) -> (i32, i32) {
    %c0_i32 = arith.constant 0 : i32
    %c0_i32_0 = arith.constant 0 : i32
    return %c0_i32, %arg1 : i32, i32
  }
  func.func @transform_2(%arg0: i32, %arg1: i32) -> (i32, i32) {
    %c0_i32 = arith.constant 0 : i32
    %c0_i32_0 = arith.constant 0 : i32
    return %c0_i32, %arg1 : i32, i32
  }
  func.func @transform_3(%arg0: i32, %arg1: i32) -> (i32, i32) {
    %c0_i32 = arith.constant 0 : i32
    return %arg0, %arg1 : i32, i32
  }
}

module attributes {stable_mosaic.version = 11 : i64} {
  func.func @_fused_matmul_kernel(%arg0: i32, %arg1: i32, %arg2: memref<192x576xbf16, #tpu.memory_space<vmem>>, %arg3: memref<576x128xbf16, #tpu.memory_space<vmem>>, %arg4: memref<1x128xf32, #tpu.memory_space<vmem>>, %arg5: memref<192x128xbf16, #tpu.memory_space<vmem>>) attributes {dimension_semantics = [#tpu.dimension_semantics<parallel>, #tpu.dimension_semantics<parallel>], iteration_bounds = array<i64: 2, 1>, scalar_prefetch = 0 : i64, scratch_operands = 0 : i64, tpu.core_type = #tpu.core_type<tc>, window_params = [{transform_indices = @transform_0, window_bounds = array<i64: 192, 576>}, {transform_indices = @transform_1, window_bounds = array<i64: 576, 128>}, {transform_indices = @transform_2, window_bounds = array<i64: 1, 128>}, {transform_indices = @transform_3, window_bounds = array<i64: 192, 128>}]} {
    %c0 = arith.constant 0 : index
    %c0_0 = arith.constant 0 : index
    %0 = vector.load %arg2[%c0, %c0_0] : memref<192x576xbf16, #tpu.memory_space<vmem>>, vector<192x576xbf16>
    %c0_1 = arith.constant 0 : index
    %c0_2 = arith.constant 0 : index
    %1 = vector.load %arg3[%c0_1, %c0_2] : memref<576x128xbf16, #tpu.memory_space<vmem>>, vector<576x128xbf16>
    %cst = arith.constant dense<0.000000e+00> : vector<192x128xf32>
    %2 = tpu.matmul %0, %1, %cst {dimension_numbers = #tpu.dot_dimension_numbers<[1], [0], [0], [1], [0, 0, 1, 1], [], []>} : vector<192x576xbf16>, vector<576x128xbf16>, vector<192x128xf32> -> vector<192x128xf32>
    %c0_3 = arith.constant 0 : index
    %c0_4 = arith.constant 0 : index
    %3 = vector.load %arg4[%c0_3, %c0_4] : memref<1x128xf32, #tpu.memory_space<vmem>>, vector<1x128xf32>
    %4 = vector.broadcast %3 : vector<1x128xf32> to vector<192x128xf32>
    %5 = arith.addf %2, %4 : vector<192x128xf32>
    %cst_5 = arith.constant 0.000000e+00 : f32
    %6 = vector.broadcast %cst_5 : f32 to vector<192x128xf32>
    %7 = arith.cmpf ogt, %5, %6 : vector<192x128xf32>
    %cst_6 = arith.constant 0.00999999977 : f32
    %8 = vector.broadcast %cst_6 : f32 to vector<192x128xf32>
    %9 = arith.mulf %8, %5 : vector<192x128xf32>
    %10 = arith.select %7, %5, %9 : vector<192x128xi1>, vector<192x128xf32>
    %11 = arith.truncf %10 : vector<192x128xf32> to vector<192x128xbf16>
    %c0_7 = arith.constant 0 : index
    %c0_8 = arith.constant 0 : index
    %12 = vector.load %arg5[%c0_7, %c0_8] : memref<192x128xbf16, #tpu.memory_space<vmem>>, vector<192x128xbf16>
    tpu.vector_store %arg5[%c0_7, %c0_8], %11 {strides = array<i32>} : memref<192x128xbf16, #tpu.memory_space<vmem>>, vector<192x128xbf16>,
    return
  }
  func.func @transform_0(%arg0: i32, %arg1: i32) -> (i32, i32) {
    %c0_i32 = arith.constant 0 : i32
    %c0_i32_0 = arith.constant 0 : i32
    return %arg0, %c0_i32 : i32, i32
  }
  func.func @transform_1(%arg0: i32, %arg1: i32) -> (i32, i32) {
    %c0_i32 = arith.constant 0 : i32
    %c0_i32_0 = arith.constant 0 : i32
    return %c0_i32, %arg1 : i32, i32
  }
  func.func @transform_2(%arg0: i32, %arg1: i32) -> (i32, i32) {
    %c0_i32 = arith.constant 0 : i32
    %c0_i32_0 = arith.constant 0 : i32
    return %c0_i32, %arg1 : i32, i32
  }
  func.func @transform_3(%arg0: i32, %arg1: i32) -> (i32, i32) {
    %c0_i32 = arith.constant 0 : i32
    return %arg0, %arg1 : i32, i32
  }
}

module attributes {stable_mosaic.version = 11 : i64} {
  func.func @_fused_matmul_kernel(%arg0: i32, %arg1: i32, %arg2: memref<96x576xbf16, #tpu.memory_space<vmem>>, %arg3: memref<576x128xbf16, #tpu.memory_space<vmem>>, %arg4: memref<1x128xf32, #tpu.memory_space<vmem>>, %arg5: memref<96x128xbf16, #tpu.memory_space<vmem>>) attributes {dimension_semantics = [#tpu.dimension_semantics<parallel>, #tpu.dimension_semantics<parallel>], iteration_bounds = array<i64: 2, 1>, scalar_prefetch = 0 : i64, scratch_operands = 0 : i64, tpu.core_type = #tpu.core_type<tc>, window_params = [{transform_indices = @transform_0, window_bounds = array<i64: 96, 576>}, {transform_indices = @transform_1, window_bounds = array<i64: 576, 128>}, {transform_indices = @transform_2, window_bounds = array<i64: 1, 128>}, {transform_indices = @transform_3, window_bounds = array<i64: 96, 128>}]} {
    %c0 = arith.constant 0 : index
    %c0_0 = arith.constant 0 : index
    %0 = vector.load %arg2[%c0, %c0_0] : memref<96x576xbf16, #tpu.memory_space<vmem>>, vector<96x576xbf16>
    %c0_1 = arith.constant 0 : index
    %c0_2 = arith.constant 0 : index
    %1 = vector.load %arg3[%c0_1, %c0_2] : memref<576x128xbf16, #tpu.memory_space<vmem>>, vector<576x128xbf16>
    %cst = arith.constant dense<0.000000e+00> : vector<96x128xf32>
    %2 = tpu.matmul %0, %1, %cst {dimension_numbers = #tpu.dot_dimension_numbers<[1], [0], [0], [1], [0, 0, 1, 1], [], []>} : vector<96x576xbf16>, vector<576x128xbf16>, vector<96x128xf32> -> vector<96x128xf32>
    %c0_3 = arith.constant 0 : index
    %c0_4 = arith.constant 0 : index
    %3 = vector.load %arg4[%c0_3, %c0_4] : memref<1x128xf32, #tpu.memory_space<vmem>>, vector<1x128xf32>
    %4 = vector.broadcast %3 : vector<1x128xf32> to vector<96x128xf32>
    %5 = arith.addf %2, %4 : vector<96x128xf32>
    %cst_5 = arith.constant 0.000000e+00 : f32
    %6 = vector.broadcast %cst_5 : f32 to vector<96x128xf32>
    %7 = arith.cmpf ogt, %5, %6 : vector<96x128xf32>
    %cst_6 = arith.constant 0.00999999977 : f32
    %8 = vector.broadcast %cst_6 : f32 to vector<96x128xf32>
    %9 = arith.mulf %8, %5 : vector<96x128xf32>
    %10 = arith.select %7, %5, %9 : vector<96x128xi1>, vector<96x128xf32>
    %11 = arith.truncf %10 : vector<96x128xf32> to vector<96x128xbf16>
    %c0_7 = arith.constant 0 : index
    %c0_8 = arith.constant 0 : index
    %12 = vector.load %arg5[%c0_7, %c0_8] : memref<96x128xbf16, #tpu.memory_space<vmem>>, vector<96x128xbf16>
    tpu.vector_store %arg5[%c0_7, %c0_8], %11 {strides = array<i32>} : memref<96x128xbf16, #tpu.memory_space<vmem>>, vector<96x128xbf16>,
    return
  }
  func.func @transform_0(%arg0: i32, %arg1: i32) -> (i32, i32) {
    %c0_i32 = arith.constant 0 : i32
    %c0_i32_0 = arith.constant 0 : i32
    return %arg0, %c0_i32 : i32, i32
  }
  func.func @transform_1(%arg0: i32, %arg1: i32) -> (i32, i32) {
    %c0_i32 = arith.constant 0 : i32
    %c0_i32_0 = arith.constant 0 : i32
    return %c0_i32, %arg1 : i32, i32
  }
  func.func @transform_2(%arg0: i32, %arg1: i32) -> (i32, i32) {
    %c0_i32 = arith.constant 0 : i32
    %c0_i32_0 = arith.constant 0 : i32
    return %c0_i32, %arg1 : i32, i32
  }
  func.func @transform_3(%arg0: i32, %arg1: i32) -> (i32, i32) {
    %c0_i32 = arith.constant 0 : i32
    return %arg0, %arg1 : i32, i32
  }
}

module attributes {stable_mosaic.version = 11 : i64} {
  func.func @_fused_matmul_kernel(%arg0: i32, %arg1: i32, %arg2: memref<48x1152xbf16, #tpu.memory_space<vmem>>, %arg3: memref<1152x128xbf16, #tpu.memory_space<vmem>>, %arg4: memref<1x128xf32, #tpu.memory_space<vmem>>, %arg5: memref<48x128xbf16, #tpu.memory_space<vmem>>) attributes {dimension_semantics = [#tpu.dimension_semantics<parallel>, #tpu.dimension_semantics<parallel>], iteration_bounds = array<i64: 1, 2>, scalar_prefetch = 0 : i64, scratch_operands = 0 : i64, tpu.core_type = #tpu.core_type<tc>, window_params = [{transform_indices = @transform_0, window_bounds = array<i64: 48, 1152>}, {transform_indices = @transform_1, window_bounds = array<i64: 1152, 128>}, {transform_indices = @transform_2, window_bounds = array<i64: 1, 128>}, {transform_indices = @transform_3, window_bounds = array<i64: 48, 128>}]} {
    %c0 = arith.constant 0 : index
    %c0_0 = arith.constant 0 : index
    %0 = vector.load %arg2[%c0, %c0_0] : memref<48x1152xbf16, #tpu.memory_space<vmem>>, vector<48x1152xbf16>
    %c0_1 = arith.constant 0 : index
    %c0_2 = arith.constant 0 : index
    %1 = vector.load %arg3[%c0_1, %c0_2] : memref<1152x128xbf16, #tpu.memory_space<vmem>>, vector<1152x128xbf16>
    %cst = arith.constant dense<0.000000e+00> : vector<48x128xf32>
    %2 = tpu.matmul %0, %1, %cst {dimension_numbers = #tpu.dot_dimension_numbers<[1], [0], [0], [1], [0, 0, 1, 1], [], []>} : vector<48x1152xbf16>, vector<1152x128xbf16>, vector<48x128xf32> -> vector<48x128xf32>
    %c0_3 = arith.constant 0 : index
    %c0_4 = arith.constant 0 : index
    %3 = vector.load %arg4[%c0_3, %c0_4] : memref<1x128xf32, #tpu.memory_space<vmem>>, vector<1x128xf32>
    %4 = vector.broadcast %3 : vector<1x128xf32> to vector<48x128xf32>
    %5 = arith.addf %2, %4 : vector<48x128xf32>
    %cst_5 = arith.constant 0.000000e+00 : f32
    %6 = vector.broadcast %cst_5 : f32 to vector<48x128xf32>
    %7 = arith.cmpf ogt, %5, %6 : vector<48x128xf32>
    %cst_6 = arith.constant 0.00999999977 : f32
    %8 = vector.broadcast %cst_6 : f32 to vector<48x128xf32>
    %9 = arith.mulf %8, %5 : vector<48x128xf32>
    %10 = arith.select %7, %5, %9 : vector<48x128xi1>, vector<48x128xf32>
    %11 = arith.truncf %10 : vector<48x128xf32> to vector<48x128xbf16>
    %c0_7 = arith.constant 0 : index
    %c0_8 = arith.constant 0 : index
    %12 = vector.load %arg5[%c0_7, %c0_8] : memref<48x128xbf16, #tpu.memory_space<vmem>>, vector<48x128xbf16>
    tpu.vector_store %arg5[%c0_7, %c0_8], %11 {strides = array<i32>} : memref<48x128xbf16, #tpu.memory_space<vmem>>, vector<48x128xbf16>,
    return
  }
  func.func @transform_0(%arg0: i32, %arg1: i32) -> (i32, i32) {
    %c0_i32 = arith.constant 0 : i32
    %c0_i32_0 = arith.constant 0 : i32
    return %arg0, %c0_i32 : i32, i32
  }
  func.func @transform_1(%arg0: i32, %arg1: i32) -> (i32, i32) {
    %c0_i32 = arith.constant 0 : i32
    %c0_i32_0 = arith.constant 0 : i32
    return %c0_i32, %arg1 : i32, i32
  }
  func.func @transform_2(%arg0: i32, %arg1: i32) -> (i32, i32) {
    %c0_i32 = arith.constant 0 : i32
    %c0_i32_0 = arith.constant 0 : i32
    return %c0_i32, %arg1 : i32, i32
  }
  func.func @transform_3(%arg0: i32, %arg1: i32) -> (i32, i32) {
    %c0_i32 = arith.constant 0 : i32
    return %arg0, %arg1 : i32, i32
  }
}

module attributes {stable_mosaic.version = 11 : i64} {
  func.func @_conv5_fc_kernel(%arg0: i32, %arg1: memref<12x2304xbf16, #tpu.memory_space<vmem>>, %arg2: memref<2304x512xbf16, #tpu.memory_space<vmem>>, %arg3: memref<1x512xf32, #tpu.memory_space<vmem>>, %arg4: memref<3072x64xbf16, #tpu.memory_space<vmem>>, %arg5: memref<1x64xf32, #tpu.memory_space<vmem>>, %arg6: memref<2x64xf32, #tpu.memory_space<vmem>>, %arg7: memref<12x512xbf16, #tpu.memory_space<vmem>>) attributes {dimension_semantics = [#tpu.dimension_semantics<arbitrary>], iteration_bounds = array<i64: 1>, scalar_prefetch = 0 : i64, scratch_operands = 1 : i64, tpu.core_type = #tpu.core_type<tc>, window_params = [{pipeline_mode = #tpu.pipeline_mode<synchronous>, transform_indices = @transform_0, window_bounds = array<i64: 12, 2304>}, {pipeline_mode = #tpu.pipeline_mode<synchronous>, transform_indices = @transform_1, window_bounds = array<i64: 2304, 512>}, {pipeline_mode = #tpu.pipeline_mode<synchronous>, transform_indices = @transform_2, window_bounds = array<i64: 1, 512>}, {pipeline_mode = #tpu.pipeline_mode<synchronous>, transform_indices = @transform_3, window_bounds = array<i64: 3072, 64>}, {pipeline_mode = #tpu.pipeline_mode<synchronous>, transform_indices = @transform_4, window_bounds = array<i64: 1, 64>}, {pipeline_mode = #tpu.pipeline_mode<synchronous>, transform_indices = @transform_5, window_bounds = array<i64: 2, 64>}]} {
    %c0 = arith.constant 0 : index
    %c0_0 = arith.constant 0 : index
    %0 = vector.load %arg1[%c0, %c0_0] : memref<12x2304xbf16, #tpu.memory_space<vmem>>, vector<12x2304xbf16>
    %c0_1 = arith.constant 0 : index
    %c0_2 = arith.constant 0 : index
    %1 = vector.load %arg2[%c0_1, %c0_2] : memref<2304x512xbf16, #tpu.memory_space<vmem>>, vector<2304x512xbf16>
    %cst = arith.constant dense<0.000000e+00> : vector<12x512xf32>
    %2 = tpu.matmul %0, %1, %cst {dimension_numbers = #tpu.dot_dimension_numbers<[1], [0], [0], [1], [0, 0, 1, 1], [], []>} : vector<12x2304xbf16>, vector<2304x512xbf16>, vector<12x512xf32> -> vector<12x512xf32>
    %c0_3 = arith.constant 0 : index
    %c0_4 = arith.constant 0 : index
    %3 = vector.load %arg3[%c0_3, %c0_4] : memref<1x512xf32, #tpu.memory_space<vmem>>, vector<1x512xf32>
    %4 = vector.broadcast %3 : vector<1x512xf32> to vector<12x512xf32>
    %5 = arith.addf %2, %4 : vector<12x512xf32>
    %cst_5 = arith.constant 0.000000e+00 : f32
    %6 = vector.broadcast %cst_5 : f32 to vector<12x512xf32>
    %7 = arith.cmpf ogt, %5, %6 : vector<12x512xf32>
    %cst_6 = arith.constant 0.00999999977 : f32
    %8 = vector.broadcast %cst_6 : f32 to vector<12x512xf32>
    %9 = arith.mulf %8, %5 : vector<12x512xf32>
    %10 = arith.select %7, %5, %9 : vector<12x512xi1>, vector<12x512xf32>
    %11 = arith.truncf %10 : vector<12x512xf32> to vector<12x512xbf16>
    %c0_7 = arith.constant 0 : index
    %c0_8 = arith.constant 0 : index
    %12 = vector.load %arg7[%c0_7, %c0_8] : memref<12x512xbf16, #tpu.memory_space<vmem>>, vector<12x512xbf16>
    tpu.vector_store %arg7[%c0_7, %c0_8], %11 {strides = array<i32>} : memref<12x512xbf16, #tpu.memory_space<vmem>>, vector<12x512xbf16>,
    %cst_9 = arith.constant 0.000000e+00 : f32
    %13 = vector.broadcast %cst_9 : f32 to vector<2x64xf32>
    %c0_10 = arith.constant 0 : index
    %c0_11 = arith.constant 0 : index
    %14 = vector.load %arg7[%c0_10, %c0_11] : memref<12x512xbf16, #tpu.memory_space<vmem>>, vector<2x512xbf16>
    %c0_12 = arith.constant 0 : index
    %c0_13 = arith.constant 0 : index
    %15 = vector.load %arg4[%c0_12, %c0_13] : memref<3072x64xbf16, #tpu.memory_space<vmem>>, vector<512x64xbf16>
    %cst_14 = arith.constant dense<0.000000e+00> : vector<2x64xf32>
    %16 = tpu.matmul %14, %15, %cst_14 {dimension_numbers = #tpu.dot_dimension_numbers<[1], [0], [0], [1], [0, 0, 1, 1], [], []>} : vector<2x512xbf16>, vector<512x64xbf16>, vector<2x64xf32> -> vector<2x64xf32>
    %17 = arith.addf %13, %16 : vector<2x64xf32>
    %c2 = arith.constant 2 : index
    %c0_15 = arith.constant 0 : index
    %18 = vector.load %arg7[%c2, %c0_15] : memref<12x512xbf16, #tpu.memory_space<vmem>>, vector<2x512xbf16>
    %c512 = arith.constant 512 : index
    %c0_16 = arith.constant 0 : index
    %19 = vector.load %arg4[%c512, %c0_16] : memref<3072x64xbf16, #tpu.memory_space<vmem>>, vector<512x64xbf16>
    %cst_17 = arith.constant dense<0.000000e+00> : vector<2x64xf32>
    %20 = tpu.matmul %18, %19, %cst_17 {dimension_numbers = #tpu.dot_dimension_numbers<[1], [0], [0], [1], [0, 0, 1, 1], [], []>} : vector<2x512xbf16>, vector<512x64xbf16>, vector<2x64xf32> -> vector<2x64xf32>
    %21 = arith.addf %17, %20 : vector<2x64xf32>
    %c4 = arith.constant 4 : index
    %c0_18 = arith.constant 0 : index
    %22 = vector.load %arg7[%c4, %c0_18] : memref<12x512xbf16, #tpu.memory_space<vmem>>, vector<2x512xbf16>
    %c1024 = arith.constant 1024 : index
    %c0_19 = arith.constant 0 : index
    %23 = vector.load %arg4[%c1024, %c0_19] : memref<3072x64xbf16, #tpu.memory_space<vmem>>, vector<512x64xbf16>
    %cst_20 = arith.constant dense<0.000000e+00> : vector<2x64xf32>
    %24 = tpu.matmul %22, %23, %cst_20 {dimension_numbers = #tpu.dot_dimension_numbers<[1], [0], [0], [1], [0, 0, 1, 1], [], []>} : vector<2x512xbf16>, vector<512x64xbf16>, vector<2x64xf32> -> vector<2x64xf32>
    %25 = arith.addf %21, %24 : vector<2x64xf32>
    %c6 = arith.constant 6 : index
    %c0_21 = arith.constant 0 : index
    %26 = vector.load %arg7[%c6, %c0_21] : memref<12x512xbf16, #tpu.memory_space<vmem>>, vector<2x512xbf16>
    %c1536 = arith.constant 1536 : index
    %c0_22 = arith.constant 0 : index
    %27 = vector.load %arg4[%c1536, %c0_22] : memref<3072x64xbf16, #tpu.memory_space<vmem>>, vector<512x64xbf16>
    %cst_23 = arith.constant dense<0.000000e+00> : vector<2x64xf32>
    %28 = tpu.matmul %26, %27, %cst_23 {dimension_numbers = #tpu.dot_dimension_numbers<[1], [0], [0], [1], [0, 0, 1, 1], [], []>} : vector<2x512xbf16>, vector<512x64xbf16>, vector<2x64xf32> -> vector<2x64xf32>
    %29 = arith.addf %25, %28 : vector<2x64xf32>
    %c8 = arith.constant 8 : index
    %c0_24 = arith.constant 0 : index
    %30 = vector.load %arg7[%c8, %c0_24] : memref<12x512xbf16, #tpu.memory_space<vmem>>, vector<2x512xbf16>
    %c2048 = arith.constant 2048 : index
    %c0_25 = arith.constant 0 : index
    %31 = vector.load %arg4[%c2048, %c0_25] : memref<3072x64xbf16, #tpu.memory_space<vmem>>, vector<512x64xbf16>
    %cst_26 = arith.constant dense<0.000000e+00> : vector<2x64xf32>
    %32 = tpu.matmul %30, %31, %cst_26 {dimension_numbers = #tpu.dot_dimension_numbers<[1], [0], [0], [1], [0, 0, 1, 1], [], []>} : vector<2x512xbf16>, vector<512x64xbf16>, vector<2x64xf32> -> vector<2x64xf32>
    %33 = arith.addf %29, %32 : vector<2x64xf32>
    %c10 = arith.constant 10 : index
    %c0_27 = arith.constant 0 : index
    %34 = vector.load %arg7[%c10, %c0_27] : memref<12x512xbf16, #tpu.memory_space<vmem>>, vector<2x512xbf16>
    %c2560 = arith.constant 2560 : index
    %c0_28 = arith.constant 0 : index
    %35 = vector.load %arg4[%c2560, %c0_28] : memref<3072x64xbf16, #tpu.memory_space<vmem>>, vector<512x64xbf16>
    %cst_29 = arith.constant dense<0.000000e+00> : vector<2x64xf32>
    %36 = tpu.matmul %34, %35, %cst_29 {dimension_numbers = #tpu.dot_dimension_numbers<[1], [0], [0], [1], [0, 0, 1, 1], [], []>} : vector<2x512xbf16>, vector<512x64xbf16>, vector<2x64xf32> -> vector<2x64xf32>
    %37 = arith.addf %33, %36 : vector<2x64xf32>
    %c0_30 = arith.constant 0 : index
    %c0_31 = arith.constant 0 : index
    %38 = vector.load %arg5[%c0_30, %c0_31] : memref<1x64xf32, #tpu.memory_space<vmem>>, vector<1x64xf32>
    %39 = vector.broadcast %38 : vector<1x64xf32> to vector<2x64xf32>
    %40 = arith.addf %37, %39 : vector<2x64xf32>
    %c0_32 = arith.constant 0 : index
    %c0_33 = arith.constant 0 : index
    %41 = vector.load %arg6[%c0_32, %c0_33] : memref<2x64xf32, #tpu.memory_space<vmem>>, vector<2x64xf32>
    tpu.vector_store %arg6[%c0_32, %c0_33], %40 {strides = array<i32>} : memref<2x64xf32, #tpu.memory_space<vmem>>, vector<2x64xf32>,
    return
  }
  func.func @transform_0(%arg0: i32) -> (i32, i32) {
    %c0_i32 = arith.constant 0 : i32
    %c0_i32_0 = arith.constant 0 : i32
    %c0_i32_1 = arith.constant 0 : i32
    return %c0_i32, %c0_i32_0 : i32, i32
  }
  func.func @transform_1(%arg0: i32) -> (i32, i32) {
    %c0_i32 = arith.constant 0 : i32
    %c0_i32_0 = arith.constant 0 : i32
    %c0_i32_1 = arith.constant 0 : i32
    return %c0_i32, %c0_i32_0 : i32, i32
  }
  func.func @transform_2(%arg0: i32) -> (i32, i32) {
    %c0_i32 = arith.constant 0 : i32
    %c0_i32_0 = arith.constant 0 : i32
    %c0_i32_1 = arith.constant 0 : i32
    return %c0_i32, %c0_i32_0 : i32, i32
  }
  func.func @transform_3(%arg0: i32) -> (i32, i32) {
    %c0_i32 = arith.constant 0 : i32
    %c0_i32_0 = arith.constant 0 : i32
    %c0_i32_1 = arith.constant 0 : i32
    return %c0_i32, %c0_i32_0 : i32, i32
  }
  func.func @transform_4(%arg0: i32) -> (i32, i32) {
    %c0_i32 = arith.constant 0 : i32
    %c0_i32_0 = arith.constant 0 : i32
    %c0_i32_1 = arith.constant 0 : i32
    return %c0_i32, %c0_i32_0 : i32, i32
  }
  func.func @transform_5(%arg0: i32) -> (i32, i32) {
    %c0_i32 = arith.constant 0 : i32
    %c0_i32_0 = arith.constant 0 : i32
    %c0_i32_1 = arith.constant 0 : i32
    return %c0_i32, %c0_i32_0 : i32, i32
  }
}

</mosaic_0001>

<bundles_post_ra>
// kernel: encoder_forward_pallas.5
= control target key start
LH: loop header
LB: loop body
LE: loop exit
PB: predicated region body
PF: predicated region fallthrough
CT: control target
= control target key end

     0   :  { %s1695_s12 = smov 0   ;;  %s1697_s13 = smov 0   ;;  %s1869_s0 = inlined_call_operand.vmem [shape: bf16[768,128], index: 0, kind: input, shape index: {}]   ;;  %s1870_s1 = inlined_call_operand.vmem [shape: bf16[128,128], index: 1, kind: input, shape index: {}]   ;;  %s1871_s2 = inlined_call_operand.vmem [shape: f32[1,128], index: 2, kind: input, shape index: {}]   ;;  %s1872_s3 = inlined_call_operand.vmem [shape: bf16[768,128], index: 3, kind: output, shape index: {}]  }
   0x1   :  { %s1699_s14 = smov 0  }
   0x2 LB: > { %s25_s15 = sadd.s32 1, %s1669_s13  ;;  %p1206_p0 = scmp.ge.s32.totalorder %s1673_s14, 1  ;;  %s1673_s14 = sphi %s1699_s14, %s13_s14   ;;  %s1669_s13 = sphi %s1697_s13, %s1874_s13   ;;  %s1665_s12 = sphi %s1695_s12, %s1873_s12  }
   0x3   : > { %p27_p1 = scmp.ge.s32.totalorder %s25_s15, 2  ;;  %p169_p2 = scmp.lt.s32.totalorder %s1673_s14, 3 }
   0x5   : > { %s1876_s15 = smov (%p27_p1, %s25_s15), 0  ;;  %p170_p3 = pnand %p1206_p0, %p169_p2 }
   0x6   : > { %v1619_v0 = vld [vmem:[%s1870_s1] sm:$0xff] (!%p170_p3)   ;;  %s203_s18 = smul.u32 (!%p170_p3), 48, %s1665_s12  ;;  %v1620_v1 = vld [vmem:[%s1870_s1 + $0x8] sm:$0xff] (!%p170_p3)   ;;  %v1621_v2 = vld [vmem:[%s1870_s1 + $0x10] sm:$0xff] (!%p170_p3)  }
   0x7   : > { %173 = sbr.rel (%p170_p3) target bundleno = 310 (0x136), region = 32  ;;  %1515 = vmatprep.subr.bf16.mxu0 (!%p170_p3), %v1619_v0  ;;  %1579 = vmatprep.subr.bf16.mxu1 (!%p170_p3), %v1619_v0  ;;  %v1622_v3 = vld [vmem:[%s1870_s1 + $0x18] sm:$0xff] (!%p170_p3)   ;;  %v1623_v6 = vld [vmem:[%s1870_s1 + $0x20] sm:$0xff] (!%p170_p3)   ;;  %v1624_v7 = vld [vmem:[%s1870_s1 + $0x28] sm:$0xff] (!%p170_p3)  }
   0x8   : > { %p204_p4 = scmp.lt.s32.totalorder (!%p170_p3), %s203_s18, 95  ;;  %1516 = vmatpush3.bf16.msra.mxu0 (!%p170_p3), %v1619_v0  ;;  %1587 = vmatpush3.bf16.msra.mxu1 (!%p170_p3), %v1619_v0  ;;  %v1625_v8 = vld [vmem:[%s1870_s1 + $0x30] sm:$0xff] (!%p170_p3)   ;;  %v1626_v9 = vld [vmem:[%s1870_s1 + $0x38] sm:$0xff] (!%p170_p3)   ;;  %v1774_v32 = vld [vmem:[%s1871_s2] ss:$0 sm:$0xff] (!%p170_p3) }
   0x9   : > { %1517 = vmatprep.subr.bf16.mxu0 (!%p170_p3), %v1620_v1  ;;  %1580 = vmatprep.subr.bf16.mxu1 (!%p170_p3), %v1620_v1 }
   0xc   : > { %1518 = vmatpush3.bf16.msra.mxu0 (!%p170_p3), %v1620_v1  ;;  %1588 = vmatpush3.bf16.msra.mxu1 (!%p170_p3), %v1620_v1 }
   0xd   : > { %1519 = vmatprep.subr.bf16.mxu0 (!%p170_p3), %v1621_v2  ;;  %1581 = vmatprep.subr.bf16.mxu1 (!%p170_p3), %v1621_v2 }
   0xe   : > { %s1878_s18 = smov (!%p204_p4, %s203_s18), 95 }
   0xf   : > { %s1207_s23 = sshll.u32 %s1878_s18, 2 }
  0x10   : > { %s1733_s28 = scalar_lea.vmem %s1869_s0, %s1207_s23  ;;  %1520 = vmatpush3.bf16.msra.mxu0 %v1621_v2  ;;  %1589 = vmatpush3.bf16.msra.mxu1 %v1621_v2  ;;  %s1791_s17 = scalar_lea.vmem %s1872_s3, %s1207_s23 }
  0x11   : > { %v1627_v4 = vld [vmem:[%s1733_s28] sm:$0xff]   ;;  %1521 = vmatprep.subr.bf16.mxu0 %v1622_v3  ;;  %1582 = vmatprep.subr.bf16.mxu1 %v1622_v3  ;;  %v1629_v10 = vld [vmem:[%s1733_s28 + $0x8] sm:$0xff]   ;;  %v1631_v12 = vld [vmem:[%s1733_s28 + $0x10] sm:$0xff]  }
  0x12   : > { %v1628_v5 = vld [vmem:[%s1733_s28 + $0x60] sm:$0xff]   ;;  %1531 = vmatprep.mubr.bf16.mxu0 %v1627_v4  ;;  %v1630_v11 = vld [vmem:[%s1733_s28 + $0x68] sm:$0xff]   ;;  %v1632_v13 = vld [vmem:[%s1733_s28 + $0x70] sm:$0xff]  }
  0x13   : > { %1555 = vmatprep.mubr.bf16.mxu1 %v1628_v5  ;;  %v1633_v14 = vld [vmem:[%s1733_s28 + $0x18] sm:$0xff]   ;;  %v1635_v16 = vld [vmem:[%s1733_s28 + $0x20] sm:$0xff]   ;;  %v1637_v18 = vld [vmem:[%s1733_s28 + $0x28] sm:$0xff]  }
  0x14   : > { %1522 = vmatpush3.bf16.msra.mxu0 %v1622_v3  ;;  %1590 = vmatpush3.bf16.msra.mxu1 %v1622_v3  ;;  %v1634_v15 = vld [vmem:[%s1733_s28 + $0x78] sm:$0xff]   ;;  %v1636_v17 = vld [vmem:[%s1733_s28 + $0x80] sm:$0xff]   ;;  %v1638_v19 = vld [vmem:[%s1733_s28 + $0x88] sm:$0xff]  }
  0x15   : > { %1523 = vmatprep.subr.bf16.mxu0 %v1623_v6  ;;  %1583 = vmatprep.subr.bf16.mxu1 %v1623_v6  ;;  %v1639_v20 = vld [vmem:[%s1733_s28 + $0x30] sm:$0xff]   ;;  %v1641_v22 = vld [vmem:[%s1733_s28 + $0x38] sm:$0xff]   ;;  %v1643_v24 = vld [vmem:[%s1733_s28 + $0x40] sm:$0xff]  }
  0x16   : > { %v1640_v21 = vld [vmem:[%s1733_s28 + $0x90] sm:$0xff]   ;;  %v1642_v23 = vld [vmem:[%s1733_s28 + $0x98] sm:$0xff]   ;;  %v1644_v25 = vld [vmem:[%s1733_s28 + $0xa0] sm:$0xff]  }
  0x17   : > { %v1645_v26 = vld [vmem:[%s1733_s28 + $0x48] sm:$0xff]   ;;  %v1647_v28 = vld [vmem:[%s1733_s28 + $0x50] sm:$0xff]   ;;  %v1649_v30 = vld [vmem:[%s1733_s28 + $0x58] sm:$0xff]  }
  0x18   : > { %1524 = vmatpush3.bf16.msra.mxu0 %v1623_v6  ;;  %1591 = vmatpush3.bf16.msra.mxu1 %v1623_v6  ;;  %v1646_v27 = vld [vmem:[%s1733_s28 + $0xa8] sm:$0xff]   ;;  %v1648_v29 = vld [vmem:[%s1733_s28 + $0xb0] sm:$0xff]   ;;  %v1650_v31 = vld [vmem:[%s1733_s28 + $0xb8] sm:$0xff]  }
  0x19   : > { %1525 = vmatprep.subr.bf16.mxu0 %v1624_v7  ;;  %1584 = vmatprep.subr.bf16.mxu1 %v1624_v7 }
  0x1c   : > { %1526 = vmatpush3.bf16.msra.mxu0 %v1624_v7  ;;  %1592 = vmatpush3.bf16.msra.mxu1 %v1624_v7 }
  0x1d   : > { %1527 = vmatprep.subr.bf16.mxu0 %v1625_v8  ;;  %1585 = vmatprep.subr.bf16.mxu1 %v1625_v8 }
  0x20   : > { %1528 = vmatpush3.bf16.msra.mxu0 %v1625_v8  ;;  %1593 = vmatpush3.bf16.msra.mxu1 %v1625_v8 }
  0x21   : > { %1529 = vmatprep.subr.bf16.mxu0 %v1626_v9  ;;  %1586 = vmatprep.subr.bf16.mxu1 %v1626_v9 }
  0x24   : > { %1530 = vmatpush3.bf16.msra.mxu0 %v1626_v9  ;;  %1594 = vmatpush3.bf16.msra.mxu1 %v1626_v9 }
  0x27   : > { %1532 = vmatmul.mubr.bf16.vlgmr.msra.gmra.mrb[0].mxu0 %v1629_v10  ;;  %1556 = vmatmul.mubr.bf16.vlgmr.msra.gmra.mrb[0].mxu1 %v1630_v11 }
  0x28   : > { %1535 = vmatprep.mubr.bf16.mxu0 %v1631_v12  ;;  %1559 = vmatprep.mubr.bf16.mxu1 %v1632_v13 }
  0x2f   : > { %1536 = vmatmul.mubr.bf16.gmra.mrb[4].mxu0 %v1633_v14  ;;  %1560 = vmatmul.mubr.bf16.gmra.mrb[4].mxu1 %v1634_v15 }
  0x30   : > { %1539 = vmatprep.mubr.bf16.mxu0 %v1635_v16  ;;  %1563 = vmatprep.mubr.bf16.mxu1 %v1636_v17 }
  0x37   : > { %1540 = vmatmul.mubr.bf16.gmra.mrb[8].mxu0 %v1637_v18  ;;  %1564 = vmatmul.mubr.bf16.gmra.mrb[8].mxu1 %v1638_v19 }
  0x38   : > { %1543 = vmatprep.mubr.bf16.mxu0 %v1639_v20  ;;  %1567 = vmatprep.mubr.bf16.mxu1 %v1640_v21 }
  0x3f   : > { %1544 = vmatmul.mubr.bf16.gmra.mrb[12].mxu0 %v1641_v22  ;;  %1568 = vmatmul.mubr.bf16.gmra.mrb[12].mxu1 %v1642_v23 }
  0x40   : > { %1547 = vmatprep.mubr.bf16.mxu0 %v1643_v24  ;;  %1571 = vmatprep.mubr.bf16.mxu1 %v1644_v25 }
  0x47   : > { %1548 = vmatmul.mubr.bf16.gmra.mrb[16].mxu0 %v1645_v26  ;;  %1572 = vmatmul.mubr.bf16.gmra.mrb[16].mxu1 %v1646_v27 }
  0x48   : > { %1551 = vmatprep.mubr.bf16.mxu0 %v1647_v28  ;;  %1575 = vmatprep.mubr.bf16.mxu1 %v1648_v29 }
  0x4f   : > { %1552 = vmatmul.mubr.bf16.gmra.mrb[20].mxu0 %v1649_v30  ;;  %1576 = vmatmul.mubr.bf16.gmra.mrb[20].mxu1 %v1650_v31 }
  0xfa   : > { %v1533_v33 = vpop.f32.mrb[0].mxu0  ;;  %v1557_v34 = vpop.f32.mrb[0].mxu1 }
  0xfb   : > { %v532_v35 = vadd.f32 %v1533_v33, %v1774_v32  ;;  %v628_v36 = vadd.f32 %v1557_v34, %v1774_v32  ;;  %v523_v37 = vpop.f32.mrb[1].mxu0  ;;  %v619_v38 = vpop.f32.mrb[1].mxu1 }
  0xfc   : > { %v524_v39 = vadd.f32 %v1774_v32, %v523_v37  ;;  %v620_v40 = vadd.f32 %v1774_v32, %v619_v38  ;;  %v1534_v41 = vpop.f32.mrb[2].mxu0  ;;  %v1558_v42 = vpop.f32.mrb[2].mxu1 }
  0xfd   : > { %vm716_vm0 = vcmp.gt.f32.partialorder %v532_v35, 0.0  ;;  %v764_v43 = vmul.f32 0.01, %v532_v35  ;;  %vm740_vm1 = vcmp.gt.f32.partialorder %v628_v36, 0.0  ;;  %v788_v44 = vmul.f32 0.01, %v628_v36 }
  0xfe   : > { %vm714_vm2 = vcmp.gt.f32.partialorder %v524_v39, 0.0  ;;  %v762_v45 = vmul.f32 0.01, %v524_v39  ;;  %vm738_vm3 = vcmp.gt.f32.partialorder %v620_v40, 0.0  ;;  %v786_v46 = vmul.f32 0.01, %v620_v40 }
  0xff   : > { %v535_v47 = vadd.f32 %v1534_v41, %v1774_v32  ;;  %v631_v48 = vadd.f32 %v1558_v42, %v1774_v32  ;;  %v526_v49 = vpop.f32.mrb[3].mxu0  ;;  %v622_v50 = vpop.f32.mrb[3].mxu1  ;;  %v812_v51 = vsel %vm716_vm0, %v532_v35, %v764_v43  ;;  %v836_v52 = vsel %vm740_vm1, %v628_v36, %v788_v44 }
 0x100   : > { %v527_v53 = vadd.f32 %v1774_v32, %v526_v49  ;;  %v623_v54 = vadd.f32 %v1774_v32, %v622_v50  ;;  %v810_v59 = vsel %vm714_vm2, %v524_v39, %v762_v45  ;;  %v834_v60 = vsel %vm738_vm3, %v620_v40, %v786_v46 }
 0x101   : > { %vm717_vm4 = vcmp.gt.f32.partialorder %v535_v47, 0.0  ;;  %v765_v55 = vmul.f32 0.01, %v535_v47  ;;  %vm741_vm5 = vcmp.gt.f32.partialorder %v631_v48, 0.0  ;;  %v789_v56 = vmul.f32 0.01, %v631_v48 }
 0x102   : > { %vm715_vm6 = vcmp.gt.f32.partialorder %v527_v53, 0.0  ;;  %v763_v57 = vmul.f32 0.01, %v527_v53  ;;  %vm739_vm7 = vcmp.gt.f32.partialorder %v623_v54, 0.0  ;;  %v787_v58 = vmul.f32 0.01, %v623_v54 }
 0x103   : > { %v813_v61 = vsel %vm717_vm4, %v535_v47, %v765_v55  ;;  %v837_v62 = vsel %vm741_vm5, %v631_v48, %v789_v56  ;;  %v1537_v63 = vpop.f32.mrb[4].mxu0  ;;  %v1561_v0 = vpop.f32.mrb[4].mxu1 }
 0x104   : > { %v1348_v1 = vpack.c.bf16 %v813_v61, %v812_v51  ;;  %v1408_v2 = vpack.c.bf16 %v837_v62, %v836_v52  ;;  %v811_v3 = vsel %vm715_vm6, %v527_v53, %v763_v57  ;;  %v835_v4 = vsel %vm739_vm7, %v623_v54, %v787_v58  ;;  %v539_v5 = vpop.f32.mrb[5].mxu0  ;;  %v635_v6 = vpop.f32.mrb[5].mxu1 }
 0x105   : > { %v1343_v7 = vpack.c.bf16 %v811_v3, %v810_v59  ;;  %v1403_v8 = vpack.c.bf16 %v835_v4, %v834_v60  ;;  %v548_v9 = vadd.f32 %v1537_v63, %v1774_v32  ;;  %v644_v10 = vadd.f32 %v1561_v0, %v1774_v32  ;;  %v1538_v11 = vpop.f32.mrb[6].mxu0  ;;  %v1562_v12 = vpop.f32.mrb[6].mxu1 }
 0x106   : > { %1460 = vst [vmem:[%s1791_s17 + $0x8] sm:$0xff] %v1348_v1   ;;  %1472 = vst [vmem:[%s1791_s17 + $0x68] sm:$0xff] %v1408_v2   ;;  %v540_v13 = vadd.f32 %v1774_v32, %v539_v5  ;;  %v636_v14 = vadd.f32 %v1774_v32, %v635_v6  ;;  %v551_v15 = vadd.f32 %v1538_v11, %v1774_v32  ;;  %v542_v17 = vpop.f32.mrb[7].mxu0  ;;  %v638_v18 = vpop.f32.mrb[7].mxu1 }
 0x107   : > { %v647_v16 = vadd.f32 %v1562_v12, %v1774_v32  ;;  %1344 = vst [vmem:[%s1791_s17] sm:$0xff] %v1343_v7   ;;  %1471 = vst [vmem:[%s1791_s17 + $0x60] sm:$0xff] %v1403_v8   ;;  %vm720_vm8 = vcmp.gt.f32.partialorder %v548_v9, 0.0  ;;  %v768_v19 = vmul.f32 0.01, %v548_v9  ;;  %vm744_vm9 = vcmp.gt.f32.partialorder %v644_v10, 0.0 }
 0x108   : > { %v792_v20 = vmul.f32 0.01, %v644_v10  ;;  %vm718_vm10 = vcmp.gt.f32.partialorder %v540_v13, 0.0  ;;  %v766_v21 = vmul.f32 0.01, %v540_v13  ;;  %vm742_vm11 = vcmp.gt.f32.partialorder %v636_v14, 0.0 }
 0x109   : > { %v790_v22 = vmul.f32 0.01, %v636_v14  ;;  %v816_v23 = vsel %vm720_vm8, %v548_v9, %v768_v19  ;;  %vm721_vm12 = vcmp.gt.f32.partialorder %v551_v15, 0.0  ;;  %v769_v25 = vmul.f32 0.01, %v551_v15 }
 0x10a   : > { %v840_v24 = vsel %vm744_vm9, %v644_v10, %v792_v20  ;;  %v814_v26 = vsel %vm718_vm10, %v540_v13, %v766_v21  ;;  %vm745_vm13 = vcmp.gt.f32.partialorder %v647_v16, 0.0  ;;  %v793_v28 = vmul.f32 0.01, %v647_v16  ;;  %v1541_v29 = vpop.f32.mrb[8].mxu0  ;;  %v1565_v30 = vpop.f32.mrb[8].mxu1 }
 0x10b   : > { %v838_v27 = vsel %vm742_vm11, %v636_v14, %v790_v22  ;;  %v817_v31 = vsel %vm721_vm12, %v551_v15, %v769_v25  ;;  %v543_v33 = vadd.f32 %v1774_v32, %v542_v17  ;;  %v639_v34 = vadd.f32 %v1774_v32, %v638_v18  ;;  %v555_v36 = vpop.f32.mrb[9].mxu0  ;;  %v651_v37 = vpop.f32.mrb[9].mxu1 }
 0x10c   : > { %v564_v35 = vadd.f32 %v1541_v29, %v1774_v32  ;;  %v1358_v38 = vpack.c.bf16 %v817_v31, %v816_v23  ;;  %v841_v39 = vsel %vm745_vm13, %v647_v16, %v793_v28  ;;  %v660_v40 = vadd.f32 %v1565_v30, %v1774_v32  ;;  %v1542_v42 = vpop.f32.mrb[10].mxu0  ;;  %v1566_v43 = vpop.f32.mrb[10].mxu1 }
 0x10d   : > { %v556_v41 = vadd.f32 %v1774_v32, %v555_v36  ;;  %v1418_v44 = vpack.c.bf16 %v841_v39, %v840_v24  ;;  %vm719_vm14 = vcmp.gt.f32.partialorder %v543_v33, 0.0  ;;  %v767_v45 = vmul.f32 0.01, %v543_v33  ;;  %v558_v46 = vpop.f32.mrb[11].mxu0  ;;  %v654_v47 = vpop.f32.mrb[11].mxu1 }
 0x10e   : > { %vm743_vm15 = vcmp.gt.f32.partialorder %v639_v34, 0.0  ;;  %1462 = vst [vmem:[%s1791_s17 + $0x18] sm:$0xff] %v1358_v38   ;;  %v791_v48 = vmul.f32 0.01, %v639_v34  ;;  %vm724_vm0 = vcmp.gt.f32.partialorder %v564_v35, 0.0  ;;  %vm748_vm1 = vcmp.gt.f32.partialorder %v660_v40, 0.0 }
 0x10f   : > { %v772_v49 = vmul.f32 0.01, %v564_v35  ;;  %1474 = vst [vmem:[%s1791_s17 + $0x78] sm:$0xff] %v1418_v44   ;;  %v815_v50 = vsel %vm719_vm14, %v543_v33, %v767_v45  ;;  %v796_v51 = vmul.f32 0.01, %v660_v40  ;;  %vm722_vm2 = vcmp.gt.f32.partialorder %v556_v41, 0.0 }
 0x110   : > { %v770_v52 = vmul.f32 0.01, %v556_v41  ;;  %v1353_v53 = vpack.c.bf16 %v815_v50, %v814_v26  ;;  %v839_v54 = vsel %vm743_vm15, %v639_v34, %v791_v48  ;;  %v652_v56 = vadd.f32 %v1774_v32, %v651_v37 }
 0x111   : > { %v820_v55 = vsel %vm724_vm0, %v564_v35, %v772_v49  ;;  %v1413_v57 = vpack.c.bf16 %v839_v54, %v838_v27  ;;  %v844_v58 = vsel %vm748_vm1, %v660_v40, %v796_v51  ;;  %v567_v60 = vadd.f32 %v1542_v42, %v1774_v32 }
 0x112   : > { %v818_v59 = vsel %vm722_vm2, %v556_v41, %v770_v52  ;;  %1461 = vst [vmem:[%s1791_s17 + $0x10] sm:$0xff] %v1353_v53   ;;  %vm746_vm3 = vcmp.gt.f32.partialorder %v652_v56, 0.0  ;;  %v794_v61 = vmul.f32 0.01, %v652_v56  ;;  %v663_v62 = vadd.f32 %v1566_v43, %v1774_v32  ;;  %v1545_v0 = vpop.f32.mrb[12].mxu0  ;;  %v1569_v1 = vpop.f32.mrb[12].mxu1 }
 0x113   : > { %v559_v63 = vadd.f32 %v1774_v32, %v558_v46  ;;  %1473 = vst [vmem:[%s1791_s17 + $0x70] sm:$0xff] %v1413_v57   ;;  %vm725_vm4 = vcmp.gt.f32.partialorder %v567_v60, 0.0  ;;  %v773_v2 = vmul.f32 0.01, %v567_v60  ;;  %v655_v3 = vadd.f32 %v1774_v32, %v654_v47  ;;  %v571_v5 = vpop.f32.mrb[13].mxu0  ;;  %v667_v6 = vpop.f32.mrb[13].mxu1 }
 0x114   : > { %v580_v4 = vadd.f32 %v1545_v0, %v1774_v32  ;;  %v842_v7 = vsel %vm746_vm3, %v652_v56, %v794_v61  ;;  %vm749_vm5 = vcmp.gt.f32.partialorder %v663_v62, 0.0  ;;  %v797_v8 = vmul.f32 0.01, %v663_v62  ;;  %v1546_v9 = vpop.f32.mrb[14].mxu0  ;;  %v1570_v10 = vpop.f32.mrb[14].mxu1 }
 0x115   : > { %vm723_vm6 = vcmp.gt.f32.partialorder %v559_v63, 0.0  ;;  %v821_v11 = vsel %vm725_vm4, %v567_v60, %v773_v2  ;;  %v771_v12 = vmul.f32 0.01, %v559_v63  ;;  %vm747_vm7 = vcmp.gt.f32.partialorder %v655_v3, 0.0  ;;  %v574_v14 = vpop.f32.mrb[15].mxu0  ;;  %v670_v18 = vpop.f32.mrb[15].mxu1 }
 0x116   : > { %v795_v13 = vmul.f32 0.01, %v655_v3  ;;  %v1368_v15 = vpack.c.bf16 %v821_v11, %v820_v55  ;;  %v845_v16 = vsel %vm749_vm5, %v663_v62, %v797_v8  ;;  %vm728_vm8 = vcmp.gt.f32.partialorder %v580_v4, 0.0 }
 0x117   : > { %v776_v17 = vmul.f32 0.01, %v580_v4  ;;  %v1428_v19 = vpack.c.bf16 %v845_v16, %v844_v58  ;;  %v819_v20 = vsel %vm723_vm6, %v559_v63, %v771_v12  ;;  %v676_v22 = vadd.f32 %v1569_v1, %v1774_v32 }
 0x118   : > { %v843_v21 = vsel %vm747_vm7, %v655_v3, %v795_v13  ;;  %1464 = vst [vmem:[%s1791_s17 + $0x28] sm:$0xff] %v1368_v15   ;;  %v1363_v23 = vpack.c.bf16 %v819_v20, %v818_v59  ;;  %v572_v26 = vadd.f32 %v1774_v32, %v571_v5  ;;  %v668_v28 = vadd.f32 %v1774_v32, %v667_v6 }
 0x119   : > { %v1423_v24 = vpack.c.bf16 %v843_v21, %v842_v7  ;;  %v824_v25 = vsel %vm728_vm8, %v580_v4, %v776_v17  ;;  %1476 = vst [vmem:[%s1791_s17 + $0x88] sm:$0xff] %v1428_v19   ;;  %vm752_vm9 = vcmp.gt.f32.partialorder %v676_v22, 0.0  ;;  %v800_v27 = vmul.f32 0.01, %v676_v22 }
 0x11a   : > { %v583_v29 = vadd.f32 %v1546_v9, %v1774_v32  ;;  %1463 = vst [vmem:[%s1791_s17 + $0x20] sm:$0xff] %v1363_v23   ;;  %vm726_vm10 = vcmp.gt.f32.partialorder %v572_v26, 0.0  ;;  %v774_v30 = vmul.f32 0.01, %v572_v26  ;;  %v679_v31 = vadd.f32 %v1570_v10, %v1774_v32  ;;  %v1549_v34 = vpop.f32.mrb[16].mxu0  ;;  %v1573_v35 = vpop.f32.mrb[16].mxu1 }
 0x11b   : > { %1475 = vst [vmem:[%s1791_s17 + $0x80] sm:$0xff] %v1423_v24   ;;  %v575_v33 = vadd.f32 %v1774_v32, %v574_v14  ;;  %v848_v36 = vsel %vm752_vm9, %v676_v22, %v800_v27  ;;  %vm750_vm11 = vcmp.gt.f32.partialorder %v668_v28, 0.0  ;;  %v798_v37 = vmul.f32 0.01, %v668_v28  ;;  %v587_v38 = vpop.f32.mrb[17].mxu0  ;;  %v683_v39 = vpop.f32.mrb[17].mxu1 }
 0x11c   : > { %vm729_vm12 = vcmp.gt.f32.partialorder %v583_v29, 0.0  ;;  %v822_v40 = vsel %vm726_vm10, %v572_v26, %v774_v30  ;;  %v777_v41 = vmul.f32 0.01, %v583_v29  ;;  %vm753_vm13 = vcmp.gt.f32.partialorder %v679_v31, 0.0  ;;  %v1550_v43 = vpop.f32.mrb[18].mxu0  ;;  %v1574_v47 = vpop.f32.mrb[18].mxu1 }
 0x11d   : > { %v801_v42 = vmul.f32 0.01, %v679_v31  ;;  %v846_v44 = vsel %vm750_vm11, %v668_v28, %v798_v37  ;;  %vm727_vm14 = vcmp.gt.f32.partialorder %v575_v33, 0.0  ;;  %v775_v45 = vmul.f32 0.01, %v575_v33  ;;  %v590_v48 = vpop.f32.mrb[19].mxu0 }
 0x11e   : > { %v671_v46 = vadd.f32 %v1774_v32, %v670_v18  ;;  %v825_v49 = vsel %vm729_vm12, %v583_v29, %v777_v41  ;;  %v596_v51 = vadd.f32 %v1549_v34, %v1774_v32  ;;  %v692_v52 = vadd.f32 %v1573_v35, %v1774_v32  ;;  %v686_v53 = vpop.f32.mrb[19].mxu1 }
 0x11f   : > { %v849_v50 = vsel %vm753_vm13, %v679_v31, %v801_v42  ;;  %v1378_v54 = vpack.c.bf16 %v825_v49, %v824_v25  ;;  %v823_v56 = vsel %vm727_vm14, %v575_v33, %v775_v45  ;;  %v588_v61 = vadd.f32 %v1774_v32, %v587_v38 }
 0x120   : > { %v1438_v55 = vpack.c.bf16 %v849_v50, %v848_v36  ;;  %vm751_vm15 = vcmp.gt.f32.partialorder %v671_v46, 0.0  ;;  %v1373_v57 = vpack.c.bf16 %v823_v56, %v822_v40  ;;  %v799_v58 = vmul.f32 0.01, %v671_v46 }
 0x121   : > { %vm732_vm0 = vcmp.gt.f32.partialorder %v596_v51, 0.0  ;;  %v780_v59 = vmul.f32 0.01, %v596_v51  ;;  %1466 = vst [vmem:[%s1791_s17 + $0x38] sm:$0xff] %v1378_v54   ;;  %vm756_vm1 = vcmp.gt.f32.partialorder %v692_v52, 0.0  ;;  %v684_v62 = vadd.f32 %v1774_v32, %v683_v39 }
 0x122   : > { %1478 = vst [vmem:[%s1791_s17 + $0x98] sm:$0xff] %v1438_v55   ;;  %v804_v60 = vmul.f32 0.01, %v692_v52  ;;  %1465 = vst [vmem:[%s1791_s17 + $0x30] sm:$0xff] %v1373_v57   ;;  %v847_v63 = vsel %vm751_vm15, %v671_v46, %v799_v58  ;;  %v599_v1 = vadd.f32 %v1550_v43, %v1774_v32  ;;  %v695_v2 = vadd.f32 %v1574_v47, %v1774_v32  ;;  %v1553_v3 = vpop.f32.mrb[20].mxu0  ;;  %v1577_v4 = vpop.f32.mrb[20].mxu1 }
 0x123   : > { %v828_v0 = vsel %vm732_vm0, %v596_v51, %v780_v59  ;;  %v1433_v5 = vpack.c.bf16 %v847_v63, %v846_v44  ;;  %vm730_vm2 = vcmp.gt.f32.partialorder %v588_v61, 0.0  ;;  %v778_v7 = vmul.f32 0.01, %v588_v61  ;;  %v603_v8 = vpop.f32.mrb[21].mxu0  ;;  %v699_v9 = vpop.f32.mrb[21].mxu1 }
 0x124   : > { %v852_v6 = vsel %vm756_vm1, %v692_v52, %v804_v60  ;;  %vm754_vm3 = vcmp.gt.f32.partialorder %v684_v62, 0.0  ;;  %v802_v10 = vmul.f32 0.01, %v684_v62  ;;  %vm733_vm4 = vcmp.gt.f32.partialorder %v599_v1, 0.0  ;;  %v1554_v15 = vpop.f32.mrb[22].mxu0  ;;  %v1578_v16 = vpop.f32.mrb[22].mxu1 }
 0x125   : > { %v781_v11 = vmul.f32 0.01, %v599_v1  ;;  %1477 = vst [vmem:[%s1791_s17 + $0x90] sm:$0xff] %v1433_v5   ;;  %v826_v12 = vsel %vm730_vm2, %v588_v61, %v778_v7  ;;  %vm757_vm5 = vcmp.gt.f32.partialorder %v695_v2, 0.0  ;;  %v805_v13 = vmul.f32 0.01, %v695_v2 }
 0x126   : > { %v591_v14 = vadd.f32 %v1774_v32, %v590_v48  ;;  %v850_v17 = vsel %vm754_vm3, %v684_v62, %v802_v10  ;;  %v687_v19 = vadd.f32 %v1774_v32, %v686_v53  ;;  %v612_v20 = vadd.f32 %v1553_v3, %v1774_v32  ;;  %v606_v21 = vpop.f32.mrb[23].mxu0  ;;  %v702_v22 = vpop.f32.mrb[23].mxu1 }
 0x127   : > { %v829_v18 = vsel %vm733_vm4, %v599_v1, %v781_v11  ;;  %v853_v24 = vsel %vm757_vm5, %v695_v2, %v805_v13  ;;  %v708_v30 = vadd.f32 %v1577_v4, %v1774_v32  ;;  %v604_v31 = vadd.f32 %v1774_v32, %v603_v8 }
 0x128   : > { %v1388_v23 = vpack.c.bf16 %v829_v18, %v828_v0  ;;  %vm731_vm6 = vcmp.gt.f32.partialorder %v591_v14, 0.0  ;;  %v779_v25 = vmul.f32 0.01, %v591_v14  ;;  %v1448_v26 = vpack.c.bf16 %v853_v24, %v852_v6 }
 0x129   : > { %vm755_vm7 = vcmp.gt.f32.partialorder %v687_v19, 0.0  ;;  %v803_v27 = vmul.f32 0.01, %v687_v19  ;;  %vm736_vm8 = vcmp.gt.f32.partialorder %v612_v20, 0.0  ;;  %v784_v29 = vmul.f32 0.01, %v612_v20 }
 0x12a   : > { %1468 = vst [vmem:[%s1791_s17 + $0x48] sm:$0xff] %v1388_v23   ;;  %v827_v28 = vsel %vm731_vm6, %v591_v14, %v779_v25  ;;  %1480 = vst [vmem:[%s1791_s17 + $0xa8] sm:$0xff] %v1448_v26   ;;  %v700_v35 = vadd.f32 %v1774_v32, %v699_v9  ;;  %v615_v36 = vadd.f32 %v1554_v15, %v1774_v32  ;;  %vm760_vm9 = vcmp.gt.f32.partialorder %v708_v30, 0.0 }
 0x12b   : > { %v1383_v33 = vpack.c.bf16 %v827_v28, %v826_v12  ;;  %v851_v34 = vsel %vm755_vm7, %v687_v19, %v803_v27  ;;  %v832_v38 = vsel %vm736_vm8, %v612_v20, %v784_v29  ;;  %v808_v39 = vmul.f32 0.01, %v708_v30 }
 0x12c   : > { %v1443_v37 = vpack.c.bf16 %v851_v34, %v850_v17  ;;  %vm734_vm10 = vcmp.gt.f32.partialorder %v604_v31, 0.0  ;;  %vm737_vm11 = vcmp.gt.f32.partialorder %v615_v36, 0.0  ;;  %v785_v40 = vmul.f32 0.01, %v615_v36 }
 0x12d   : > { %1467 = vst [vmem:[%s1791_s17 + $0x40] sm:$0xff] %v1383_v33   ;;  %v711_v41 = vadd.f32 %v1578_v16, %v1774_v32  ;;  %v782_v42 = vmul.f32 0.01, %v604_v31  ;;  %vm758_vm12 = vcmp.gt.f32.partialorder %v700_v35, 0.0  ;;  %v607_v43 = vadd.f32 %v1774_v32, %v606_v21 }
 0x12e   : > { %1479 = vst [vmem:[%s1791_s17 + $0xa0] sm:$0xff] %v1443_v37   ;;  %v703_v44 = vadd.f32 %v1774_v32, %v702_v22  ;;  %v806_v45 = vmul.f32 0.01, %v700_v35  ;;  %v833_v46 = vsel %vm737_vm11, %v615_v36, %v785_v40  ;;  %v856_v50 = vsel %vm760_vm9, %v708_v30, %v808_v39 }
 0x12f   : > { %vm761_vm13 = vcmp.gt.f32.partialorder %v711_v41, 0.0  ;;  %v809_v47 = vmul.f32 0.01, %v711_v41  ;;  %v1398_v48 = vpack.c.bf16 %v833_v46, %v832_v38  ;;  %vm735_vm14 = vcmp.gt.f32.partialorder %v607_v43, 0.0 }
 0x130   : > { %v783_v49 = vmul.f32 0.01, %v607_v43  ;;  %vm759_vm15 = vcmp.gt.f32.partialorder %v703_v44, 0.0  ;;  %v807_v52 = vmul.f32 0.01, %v703_v44  ;;  %v830_v53 = vsel %vm734_vm10, %v604_v31, %v782_v42 }
 0x131   : > { %v857_v51 = vsel %vm761_vm13, %v711_v41, %v809_v47  ;;  %1470 = vst [vmem:[%s1791_s17 + $0x58] sm:$0xff] %v1398_v48   ;;  %v854_v55 = vsel %vm758_vm12, %v700_v35, %v806_v45 }
 0x132   : > { %v1458_v54 = vpack.c.bf16 %v857_v51, %v856_v50  ;;  %v831_v32 = vsel %vm735_vm14, %v607_v43, %v783_v49  ;;  %v855_v57 = vsel %vm759_vm15, %v703_v44, %v807_v52 }
 0x133   : > { %v1393_v56 = vpack.c.bf16 %v831_v32, %v830_v53  ;;  %v1453_v58 = vpack.c.bf16 %v855_v57, %v854_v55 }
 0x134   : > { %1482 = vst [vmem:[%s1791_s17 + $0xb8] sm:$0xff] %v1458_v54  }
 0x135   : > { %1469 = vst [vmem:[%s1791_s17 + $0x50] sm:$0xff] %v1393_v56   ;;  %1481 = vst [vmem:[%s1791_s17 + $0xb0] sm:$0xff] %v1453_v58  }
 0x136 PF: > { %s13_s14 = sadd.s32 1, %s1673_s14   ;;  %s1873_s12 = smov %s1669_s13 }
 0x137   : > { %p10_p5 = scmp.ge.s32.totalorder %s13_s14, 4   ;;  %s1874_s13 = smov %s1876_s15 }
 0x139   :  { %12 = sbr.rel (!%p10_p5) target bundleno = 2 (0x2), region = 68 }

// kernel: encoder_forward_pallas.6
= control target key start
LH: loop header
LB: loop body
LE: loop exit
PB: predicated region body
PF: predicated region fallthrough
CT: control target
= control target key end

     0   :  { %s2274_s12 = smov 0   ;;  %s2276_s13 = smov 0   ;;  %s2614_s0 = inlined_call_operand.vmem [shape: bf16[384,576], index: 0, kind: input, shape index: {}]   ;;  %s2615_s1 = inlined_call_operand.vmem [shape: bf16[576,128], index: 1, kind: input, shape index: {}]   ;;  %s2616_s2 = inlined_call_operand.vmem [shape: f32[1,128], index: 2, kind: input, shape index: {}]   ;;  %s2617_s3 = inlined_call_operand.vmem [shape: bf16[384,128], index: 3, kind: output, shape index: {}]  }
   0x1   :  { %s2278_s14 = smov 0  }
   0x2 LB: > { %s25_s15 = sadd.s32 1, %s2248_s13  ;;  %p1620_p0 = scmp.ge.s32.totalorder %s2252_s14, 1  ;;  %s2252_s14 = sphi %s2278_s14, %s13_s14   ;;  %s2248_s13 = sphi %s2276_s13, %s2619_s13   ;;  %s2244_s12 = sphi %s2274_s12, %s2618_s12  }
   0x3   : > { %p27_p1 = scmp.ge.s32.totalorder %s25_s15, 2  ;;  %p170_p2 = scmp.lt.s32.totalorder %s2252_s14, 3 }
   0x5   : > { %s2621_s15 = smov (%p27_p1, %s25_s15), 0  ;;  %p171_p3 = pnand %p1620_p0, %p170_p2 }
   0x6   : > { %v2110_v0 = vld [vmem:[%s2615_s1 + $0x40] sm:$0xff] (!%p171_p3)   ;;  %v2114_v4 = vld [vmem:[%s2615_s1 + $0x48] sm:$0xff] (!%p171_p3)   ;;  %v2118_v8 = vld [vmem:[%s2615_s1 + $0x50] sm:$0xff] (!%p171_p3)   ;;  %s205_s21 = smul.u32 (!%p171_p3), 24, %s2244_s12  ;;  %vm896_vm0 = vcmask (!%p171_p3), 523264  }
   0x7   : > { %174 = sbr.rel (%p171_p3) target bundleno = 380 (0x17c), region = 32  ;;  %v2111_v1 = vld [vmem:[%s2615_s1 + $0xc0] sm:$0xff] (!%p171_p3)   ;;  %1853 = vmatprep.subr.bf16.mxu0 (!%p171_p3), %v2110_v0  ;;  %v2115_v5 = vld [vmem:[%s2615_s1 + $0xc8] sm:$0xff] (!%p171_p3)   ;;  %v2119_v9 = vld [vmem:[%s2615_s1 + $0xd0] sm:$0xff] (!%p171_p3)  }
   0x8   : > { %v2112_v2 = vld [vmem:[%s2615_s1] sm:$0xff] (!%p171_p3)   ;;  %1941 = vmatprep.subr.bf16.mxu1 (!%p171_p3), %v2111_v1  ;;  %v2116_v6 = vld [vmem:[%s2615_s1 + $0x8] sm:$0xff] (!%p171_p3)   ;;  %v2120_v10 = vld [vmem:[%s2615_s1 + $0x10] sm:$0xff] (!%p171_p3)   ;;  %p206_p4 = scmp.lt.s32.totalorder (!%p171_p3), %s205_s21, 47 }
   0x9   : > { %v2113_v3 = vld [vmem:[%s2615_s1 + $0x80] sm:$0xff] (!%p171_p3)   ;;  %1854 = vmatpush3.bf16.msra.mxu0 (!%p171_p3), %v2112_v2  ;;  %v2117_v7 = vld [vmem:[%s2615_s1 + $0x88] sm:$0xff] (!%p171_p3)   ;;  %v2121_v11 = vld [vmem:[%s2615_s1 + $0x90] sm:$0xff] (!%p171_p3)  }
   0xa   : > { %1942 = vmatpush3.bf16.msra.mxu1 (!%p171_p3), %v2113_v3  ;;  %1855 = vmatprep.subr.bf16.mxu0 (!%p171_p3), %v2114_v4  ;;  %v2122_v12 = vld [vmem:[%s2615_s1 + $0x58] sm:$0xff] (!%p171_p3)   ;;  %v2126_v16 = vld [vmem:[%s2615_s1 + $0x60] sm:$0xff] (!%p171_p3)   ;;  %v2130_v20 = vld [vmem:[%s2615_s1 + $0x68] sm:$0xff] (!%p171_p3)  }
   0xb   : > { %1943 = vmatprep.subr.bf16.mxu1 (!%p171_p3), %v2115_v5  ;;  %v2123_v13 = vld [vmem:[%s2615_s1 + $0xd8] sm:$0xff] (!%p171_p3)   ;;  %v2127_v17 = vld [vmem:[%s2615_s1 + $0xe0] sm:$0xff] (!%p171_p3)   ;;  %v2131_v21 = vld [vmem:[%s2615_s1 + $0xe8] sm:$0xff] (!%p171_p3)  }
   0xc   : > { %v2124_v14 = vld [vmem:[%s2615_s1 + $0x18] sm:$0xff] (!%p171_p3)   ;;  %v2128_v18 = vld [vmem:[%s2615_s1 + $0x20] sm:$0xff] (!%p171_p3)   ;;  %v2132_v22 = vld [vmem:[%s2615_s1 + $0x28] sm:$0xff] (!%p171_p3)  }
   0xd   : > { %1856 = vmatpush3.bf16.msra.mxu0 (!%p171_p3), %v2116_v6  ;;  %v2125_v15 = vld [vmem:[%s2615_s1 + $0x98] sm:$0xff] (!%p171_p3)   ;;  %v2129_v19 = vld [vmem:[%s2615_s1 + $0xa0] sm:$0xff] (!%p171_p3)   ;;  %v2133_v23 = vld [vmem:[%s2615_s1 + $0xa8] sm:$0xff] (!%p171_p3)  }
   0xe   : > { %1944 = vmatpush3.bf16.msra.mxu1 %v2117_v7  ;;  %1857 = vmatprep.subr.bf16.mxu0 %v2118_v8  ;;  %s2623_s21 = smov (!%p206_p4, %s205_s21), 47  ;;  %v2134_v24 = vld [vmem:[%s2615_s1 + $0x70] sm:$0xff]   ;;  %v2138_v28 = vld [vmem:[%s2615_s1 + $0x78] sm:$0xff]   ;;  %v2148_v36 = vld [vmem:[%s2615_s1 + $0x100] sm:$0xff]  }
   0xf   : > { %1945 = vmatprep.subr.bf16.mxu1 %v2119_v9  ;;  %v2135_v25 = vld [vmem:[%s2615_s1 + $0xf0] sm:$0xff]   ;;  %s2085_s23 = smul.u32 20, %s2623_s21  ;;  %v2139_v29 = vld [vmem:[%s2615_s1 + $0xf8] sm:$0xff]   ;;  %v2167_v43 = vld [vmem:[%s2615_s1 + $0x108] sm:$0xff]   ;;  %s1622_s26 = sshll.u32 %s2623_s21, 2 }
  0x10   : > { %v2136_v26 = vld [vmem:[%s2615_s1 + $0x30] sm:$0xff]   ;;  %v2140_v30 = vld [vmem:[%s2615_s1 + $0x38] sm:$0xff]   ;;  %s2572_s29 = scalar_lea.vmem %s2617_s3, %s1622_s26 }
  0x11   : > { %1858 = vmatpush3.bf16.msra.mxu0 %v2120_v10  ;;  %v2137_v27 = vld [vmem:[%s2615_s1 + $0xb0] sm:$0xff]   ;;  %s2391_s6 = scalar_lea.vmem %s2614_s0, %s2085_s23  ;;  %v2141_v31 = vld [vmem:[%s2615_s1 + $0xb8] sm:$0xff]  }
  0x12   : > { %1946 = vmatpush3.bf16.msra.mxu1 %v2121_v11  ;;  %1859 = vmatprep.subr.bf16.mxu0 %v2122_v12  ;;  %v2142_v32 = vld [vmem:[%s2391_s6] ss:$20 sps:$4 sm:$0xff]   ;;  %v2144_v33 = vld [vmem:[%s2391_s6 + $0x4] ss:$20 sps:$4 sm:$0xff]   ;;  %v2145_v34 = vld [vmem:[%s2391_s6 + $0x8] ss:$20 sps:$4 sm:$0xff]  }
  0x13   : > { %1947 = vmatprep.subr.bf16.mxu1 %v2123_v13  ;;  %v2147_v35 = vld [vmem:[%s2391_s6 + $0xc] ss:$20 sps:$4 sm:$0xff]   ;;  %965 = vmatprep.mubr.bf16.mxu0 %v2144_v33  ;;  %v2151_v38 = vld [vmem:[%s2391_s6 + $0x34] ss:$20 sps:$4 sm:$0xff]   ;;  %v2154_v40 = vld [vmem:[%s2391_s6 + $0x30] ss:$20 sps:$4 sm:$0xff]  }
  0x14   : > { %1094 = vmatprep.mubr.bf16.mxu1 %v2147_v35  ;;  %v2149_v37 = vld [vmem:[%s2391_s6 + $0x2c] ss:$20 sps:$4 sm:$0xff]   ;;  %v2153_v39 = vld [vmem:[%s2391_s6 + $0x28] ss:$20 sps:$4 sm:$0xff]   ;;  %v2159_v44 = vld [vmem:[%s2391_s6 + $0x50] ss:$20 sps:$4 sm:$0xff]  }
  0x15   : > { %1860 = vmatpush3.bf16.msra.mxu0 %v2124_v14  ;;  %v2155_v41 = vld [vmem:[%s2391_s6 + $0x54] ss:$20 sps:$4 sm:$0xff]   ;;  %v2157_v42 = vld [vmem:[%s2391_s6 + $0x5c] ss:$20 sps:$4 sm:$0xff]   ;;  %v2160_v45 = vld [vmem:[%s2391_s6 + $0x58] ss:$20 sps:$4 sm:$0xff]  }
  0x16   : > { %1948 = vmatpush3.bf16.msra.mxu1 %v2125_v15  ;;  %1861 = vmatprep.subr.bf16.mxu0 %v2126_v16  ;;  %v2161_v46 = vld [vmem:[%s2391_s6 + $0x7c] ss:$20 sps:$4 sm:$0xff]   ;;  %v2163_v47 = vld [vmem:[%s2391_s6 + $0x84] ss:$20 sps:$4 sm:$0xff]   ;;  %v2166_v50 = vld [vmem:[%s2391_s6 + $0x80] ss:$20 sps:$4 sm:$0xff]  }
  0x17   : > { %1949 = vmatprep.subr.bf16.mxu1 %v2127_v17  ;;  %v2186_v48 = vld [vmem:[%s2615_s1 + $0x110] sm:$0xff]   ;;  %v2165_v49 = vld [vmem:[%s2391_s6 + $0x78] ss:$20 sps:$4 sm:$0xff]   ;;  %v2173_v55 = vld [vmem:[%s2391_s6 + $0xa8] ss:$20 sps:$4 sm:$0xff]  }
  0x18   : > { %v2168_v51 = vld [vmem:[%s2391_s6 + $0xa4] ss:$20 sps:$4 sm:$0xff]   ;;  %v2170_v52 = vld [vmem:[%s2391_s6 + $0xac] ss:$20 sps:$4 sm:$0xff]   ;;  %v2176_v57 = vld [vmem:[%s2391_s6 + $0xd4] ss:$20 sps:$4 sm:$0xff]  }
  0x19   : > { %1862 = vmatpush3.bf16.msra.mxu0 %v2128_v18  ;;  %v2205_v53 = vld [vmem:[%s2615_s1 + $0x118] sm:$0xff]   ;;  %v2172_v54 = vld [vmem:[%s2391_s6 + $0xa0] ss:$20 sps:$4 sm:$0xff]   ;;  %v2179_v59 = vld [vmem:[%s2391_s6 + $0xd0] ss:$20 sps:$4 sm:$0xff]  }
  0x1a   : > { %1950 = vmatpush3.bf16.msra.mxu1 %v2129_v19  ;;  %1863 = vmatprep.subr.bf16.mxu0 %v2130_v20  ;;  %v2174_v56 = vld [vmem:[%s2391_s6 + $0xcc] ss:$20 sps:$4 sm:$0xff]   ;;  %v2178_v58 = vld [vmem:[%s2391_s6 + $0xc8] ss:$20 sps:$4 sm:$0xff]   ;;  %v2184_v62 = vld [vmem:[%s2391_s6 + $0xf0] ss:$20 sps:$4 sm:$0xff]  }
  0x1b   : > { %1951 = vmatprep.subr.bf16.mxu1 %v2131_v21  ;;  %v2180_v60 = vld [vmem:[%s2391_s6 + $0xf4] ss:$20 sps:$4 sm:$0xff]   ;;  %v2182_v61 = vld [vmem:[%s2391_s6 + $0xfc] ss:$20 sps:$4 sm:$0xff]   ;;  %v2185_v63 = vld [vmem:[%s2391_s6 + $0xf8] ss:$20 sps:$4 sm:$0xff]  }
  0x1c   : > { %v2187_v0 = vld [vmem:[%s2391_s6 + $0x11c] ss:$20 sps:$4 sm:$0xff]   ;;  %v2189_v1 = vld [vmem:[%s2391_s6 + $0x124] ss:$20 sps:$4 sm:$0xff]   ;;  %v2192_v3 = vld [vmem:[%s2391_s6 + $0x120] ss:$20 sps:$4 sm:$0xff]  }
  0x1d   : > { %1864 = vmatpush3.bf16.msra.mxu0 %v2132_v22  ;;  %v2191_v2 = vld [vmem:[%s2391_s6 + $0x118] ss:$20 sps:$4 sm:$0xff]   ;;  %v2197_v6 = vld [vmem:[%s2391_s6 + $0x140] ss:$20 sps:$4 sm:$0xff]   ;;  %v2198_v7 = vld [vmem:[%s2391_s6 + $0x148] ss:$20 sps:$4 sm:$0xff]  }
  0x1e   : > { %1952 = vmatpush3.bf16.msra.mxu1 %v2133_v23  ;;  %1865 = vmatprep.subr.bf16.mxu0 %v2134_v24  ;;  %v2193_v4 = vld [vmem:[%s2391_s6 + $0x144] ss:$20 sps:$4 sm:$0xff]   ;;  %v2195_v5 = vld [vmem:[%s2391_s6 + $0x14c] ss:$20 sps:$4 sm:$0xff]   ;;  %v2201_v9 = vld [vmem:[%s2391_s6 + $0x174] ss:$20 sps:$4 sm:$0xff]  }
  0x1f   : > { %1953 = vmatprep.subr.bf16.mxu1 %v2135_v25  ;;  %v2199_v8 = vld [vmem:[%s2391_s6 + $0x16c] ss:$20 sps:$4 sm:$0xff]   ;;  %v2203_v10 = vld [vmem:[%s2391_s6 + $0x168] ss:$20 sps:$4 sm:$0xff]   ;;  %v2204_v11 = vld [vmem:[%s2391_s6 + $0x170] ss:$20 sps:$4 sm:$0xff]  }
  0x20   : > { %v2206_v12 = vld [vmem:[%s2391_s6 + $0x194] ss:$20 sps:$4 sm:$0xff]   ;;  %v2208_v13 = vld [vmem:[%s2391_s6 + $0x19c] ss:$20 sps:$4 sm:$0xff]   ;;  %v2211_v15 = vld [vmem:[%s2391_s6 + $0x198] ss:$20 sps:$4 sm:$0xff]  }
  0x21   : > { %1866 = vmatpush3.bf16.msra.mxu0 %v2136_v26  ;;  %v2210_v14 = vld [vmem:[%s2391_s6 + $0x190] ss:$20 sps:$4 sm:$0xff]   ;;  %v2216_v18 = vld [vmem:[%s2391_s6 + $0x1b8] ss:$20 sps:$4 sm:$0xff]   ;;  %v2217_v19 = vld [vmem:[%s2391_s6 + $0x1c0] ss:$20 sps:$4 sm:$0xff]  }
  0x22   : > { %1954 = vmatpush3.bf16.msra.mxu1 %v2137_v27  ;;  %1867 = vmatprep.subr.bf16.mxu0 %v2138_v28  ;;  %v2212_v16 = vld [vmem:[%s2391_s6 + $0x1bc] ss:$20 sps:$4 sm:$0xff]   ;;  %v2214_v17 = vld [vmem:[%s2391_s6 + $0x1c4] ss:$20 sps:$4 sm:$0xff]   ;;  %v2219_v21 = vld [vmem:[%s2391_s6 + $0x100] ss:$20 sps:$4 sm:$0xff]  }
  0x23   : > { %1955 = vmatprep.subr.bf16.mxu1 %v2139_v29  ;;  %v2218_v20 = vld [vmem:[%s2391_s6 + $0x10] ss:$20 sps:$4 sm:$0xff]   ;;  %v2220_v22 = vld [vmem:[%s2391_s6 + $0x38] ss:$20 sps:$4 sm:$0xff]   ;;  %v2221_v23 = vld [vmem:[%s2391_s6 + $0x128] ss:$20 sps:$4 sm:$0xff]  }
  0x24   : > { %v2222_v24 = vld [vmem:[%s2391_s6 + $0x60] ss:$20 sps:$4 sm:$0xff]   ;;  %v2223_v25 = vld [vmem:[%s2391_s6 + $0x150] ss:$20 sps:$4 sm:$0xff]   ;;  %v2224_v26 = vld [vmem:[%s2391_s6 + $0x88] ss:$20 sps:$4 sm:$0xff]  }
  0x25   : > { %1868 = vmatpush3.bf16.msra.mxu0 %v2140_v30  ;;  %v2225_v27 = vld [vmem:[%s2391_s6 + $0x178] ss:$20 sps:$4 sm:$0xff]   ;;  %v2226_v28 = vld [vmem:[%s2391_s6 + $0xb0] ss:$20 sps:$4 sm:$0xff]   ;;  %v2227_v29 = vld [vmem:[%s2391_s6 + $0x1a0] ss:$20 sps:$4 sm:$0xff]  }
  0x26   : > { %1956 = vmatpush3.bf16.msra.mxu1 %v2141_v31  ;;  %2045 = vmatprep.subr.bf16.mxu0 %v2148_v36  ;;  %v2228_v30 = vld [vmem:[%s2391_s6 + $0xd8] ss:$20 sps:$4 sm:$0xff]   ;;  %v2229_v31 = vld [vmem:[%s2391_s6 + $0x1c8] ss:$20 sps:$4 sm:$0xff]  }
  0x27   : > { %2077 = vmatprep.subr.bf16.mxu1 %v2148_v36 }
  0x28   : > { %966 = vmatmul.mubr.bf16.vlgmr.msra.gmra.mrb[0].mxu0 %v2142_v32 }
  0x29   : > { %1095 = vmatmul.mubr.bf16.vlgmr.msra.gmra.mrb[0].mxu1 %v2145_v34  ;;  %2046 = vmatpush3.bf16.msra.mxu0 %v2148_v36  ;;  %v2486_v34 = vld [vmem:[%s2616_s2] ss:$0 sm:$0xff] }
  0x2a   : > { %2081 = vmatpush3.bf16.msra.mxu1 %v2148_v36  ;;  %973 = vmatprep.mubr.bf16.mxu0 %v2149_v37 }
  0x2b   : > { %1102 = vmatprep.mubr.bf16.mxu1 %v2151_v38  ;;  %2047 = vmatprep.subr.bf16.mxu0 %v2167_v43 }
  0x2c   : > { %2078 = vmatprep.subr.bf16.mxu1 %v2167_v43 }
  0x2d   : > { %2048 = vmatpush3.bf16.msra.mxu0 %v2167_v43 }
  0x2e   : > { %2082 = vmatpush3.bf16.msra.mxu1 %v2167_v43  ;;  %2049 = vmatprep.subr.bf16.mxu0 %v2186_v48 }
  0x2f   : > { %2079 = vmatprep.subr.bf16.mxu1 %v2186_v48 }
  0x30   : > { %974 = vmatmul.mubr.bf16.gmra.mrb[4].mxu0 %v2153_v39 }
  0x31   : > { %1103 = vmatmul.mubr.bf16.gmra.mrb[4].mxu1 %v2154_v40  ;;  %981 = vmatprep.mubr.bf16.mxu0 %v2155_v41 }
  0x32   : > { %1110 = vmatprep.mubr.bf16.mxu1 %v2157_v42  ;;  %2050 = vmatpush3.bf16.msra.mxu0 %v2186_v48 }
  0x33   : > { %2083 = vmatpush3.bf16.msra.mxu1 %v2186_v48  ;;  %2051 = vmatprep.subr.bf16.mxu0 %v2205_v53 }
  0x34   : > { %2080 = vmatprep.subr.bf16.mxu1 %v2205_v53 }
  0x36   : > { %2052 = vmatpush3.bf16.msra.mxu0 %v2205_v53 }
  0x37   : > { %2084 = vmatpush3.bf16.msra.mxu1 %v2205_v53 }
  0x38   : > { %982 = vmatmul.mubr.bf16.gmra.mrb[8].mxu0 %v2159_v44 }
  0x39   : > { %1111 = vmatmul.mubr.bf16.gmra.mrb[8].mxu1 %v2160_v45  ;;  %989 = vmatprep.mubr.bf16.mxu0 %v2161_v46 }
  0x3a   : > { %1118 = vmatprep.mubr.bf16.mxu1 %v2163_v47 }
  0x40   : > { %990 = vmatmul.mubr.bf16.gmra.mrb[12].mxu0 %v2165_v49 }
  0x41   : > { %1119 = vmatmul.mubr.bf16.gmra.mrb[12].mxu1 %v2166_v50  ;;  %997 = vmatprep.mubr.bf16.mxu0 %v2168_v51 }
  0x42   : > { %1126 = vmatprep.mubr.bf16.mxu1 %v2170_v52 }
  0x48   : > { %998 = vmatmul.mubr.bf16.gmra.mrb[16].mxu0 %v2172_v54 }
  0x49   : > { %1127 = vmatmul.mubr.bf16.gmra.mrb[16].mxu1 %v2173_v55  ;;  %1005 = vmatprep.mubr.bf16.mxu0 %v2174_v56 }
  0x4a   : > { %1134 = vmatprep.mubr.bf16.mxu1 %v2176_v57 }
  0x50   : > { %1006 = vmatmul.mubr.bf16.gmra.mrb[20].mxu0 %v2178_v58 }
  0x51   : > { %1135 = vmatmul.mubr.bf16.gmra.mrb[20].mxu1 %v2179_v59  ;;  %1013 = vmatprep.mubr.bf16.mxu0 %v2180_v60 }
  0x52   : > { %1142 = vmatprep.mubr.bf16.mxu1 %v2182_v61 }
  0x58   : > { %1014 = vmatmul.mubr.bf16.gmra.mrb[24].mxu0 %v2184_v62 }
  0x59   : > { %1143 = vmatmul.mubr.bf16.gmra.mrb[24].mxu1 %v2185_v63  ;;  %1021 = vmatprep.mubr.bf16.mxu0 %v2187_v0 }
  0x5a   : > { %1150 = vmatprep.mubr.bf16.mxu1 %v2189_v1 }
  0x60   : > { %1022 = vmatmul.mubr.bf16.gmra.mrb[28].mxu0 %v2191_v2 }
  0x61   : > { %1151 = vmatmul.mubr.bf16.gmra.mrb[28].mxu1 %v2192_v3  ;;  %1029 = vmatprep.mubr.bf16.mxu0 %v2193_v4 }
  0x62   : > { %1158 = vmatprep.mubr.bf16.mxu1 %v2195_v5 }
  0x68   : > { %1030 = vmatmul.mubr.bf16.gmra.mrb[32].mxu0 %v2197_v6 }
  0x69   : > { %1159 = vmatmul.mubr.bf16.gmra.mrb[32].mxu1 %v2198_v7  ;;  %1037 = vmatprep.mubr.bf16.mxu0 %v2199_v8 }
  0x6a   : > { %1166 = vmatprep.mubr.bf16.mxu1 %v2201_v9 }
  0x70   : > { %1038 = vmatmul.mubr.bf16.gmra.mrb[36].mxu0 %v2203_v10 }
  0x71   : > { %1167 = vmatmul.mubr.bf16.gmra.mrb[36].mxu1 %v2204_v11  ;;  %1045 = vmatprep.mubr.bf16.mxu0 %v2206_v12 }
  0x72   : > { %1174 = vmatprep.mubr.bf16.mxu1 %v2208_v13 }
  0x78   : > { %1046 = vmatmul.mubr.bf16.gmra.mrb[40].mxu0 %v2210_v14 }
  0x79   : > { %1175 = vmatmul.mubr.bf16.gmra.mrb[40].mxu1 %v2211_v15  ;;  %1053 = vmatprep.mubr.bf16.mxu0 %v2212_v16 }
  0x7a   : > { %1182 = vmatprep.mubr.bf16.mxu1 %v2214_v17 }
  0x80   : > { %1054 = vmatmul.mubr.bf16.gmra.mrb[44].mxu0 %v2216_v18 }
  0x81   : > { %1183 = vmatmul.mubr.bf16.gmra.mrb[44].mxu1 %v2217_v19  ;;  %2053 = vmatprep.mubr.msk.bf16.mxu0 %vm896_vm0, %v2218_v20 }
  0x82   : > { %2065 = vmatprep.mubr.msk.bf16.mxu1 %vm896_vm0, %v2219_v21 }
  0x88   : > { %2054 = vmatmul.mubr.msk.bf16.vlgmr.msra.gmra.mrb[48].mxu0 %vm896_vm0, %v2220_v22 }
  0x89   : > { %2066 = vmatmul.mubr.msk.bf16.vlgmr.msra.gmra.mrb[48].mxu1 %vm896_vm0, %v2221_v23  ;;  %2057 = vmatprep.mubr.msk.bf16.mxu0 %vm896_vm0, %v2222_v24 }
  0x8a   : > { %2069 = vmatprep.mubr.msk.bf16.mxu1 %vm896_vm0, %v2223_v25 }
  0x90   : > { %2058 = vmatmul.mubr.msk.bf16.gmra.mrb[52].mxu0 %vm896_vm0, %v2224_v26 }
  0x91   : > { %2070 = vmatmul.mubr.msk.bf16.gmra.mrb[52].mxu1 %vm896_vm0, %v2225_v27  ;;  %2061 = vmatprep.mubr.msk.bf16.mxu0 %vm896_vm0, %v2226_v28 }
  0x92   : > { %2073 = vmatprep.mubr.msk.bf16.mxu1 %vm896_vm0, %v2227_v29 }
  0x98   : > { %2062 = vmatmul.mubr.msk.bf16.gmra.mrb[56].mxu0 %vm896_vm0, %v2228_v30 }
  0x99   : > { %2074 = vmatmul.mubr.msk.bf16.gmra.mrb[56].mxu1 %vm896_vm0, %v2229_v31 }
  0xfb   : > { %v1869_v32 = vpop.f32.mrb[0].mxu0 }
  0xfc   : > { %v1957_v33 = vpop.f32.mrb[0].mxu1  ;;  %v1870_v35 = vpop.f32.mrb[1].mxu0 }
  0xfd   : > { %v1871_v36 = vadd.f32 %v1870_v35, %v1869_v32  ;;  %v1958_v37 = vpop.f32.mrb[1].mxu1  ;;  %v1872_v38 = vpop.f32.mrb[2].mxu0 }
  0xfe   : > { %v1959_v39 = vadd.f32 %v1958_v37, %v1957_v33  ;;  %v1960_v40 = vpop.f32.mrb[2].mxu1  ;;  %v1873_v41 = vpop.f32.mrb[3].mxu0 }
  0xff   : > { %v968_v42 = vadd.f32 %v1871_v36, %v2486_v34  ;;  %v1874_v43 = vadd.f32 %v1873_v41, %v1872_v38  ;;  %v1961_v44 = vpop.f32.mrb[3].mxu1 }
 0x100   : > { %v1962_v45 = vadd.f32 %v1961_v44, %v1960_v40 }
 0x101   : > { %v971_v46 = vadd.f32 %v1874_v43, %v2486_v34  ;;  %v2490_v47 = vadd.f32 %v1959_v39, %v968_v42 }
 0x103   : > { %v1875_v48 = vpop.f32.mrb[4].mxu0  ;;  %v2492_v49 = vadd.f32 %v1962_v45, %v971_v46 }
 0x104   : > { %v1963_v50 = vpop.f32.mrb[4].mxu1  ;;  %v1876_v51 = vpop.f32.mrb[5].mxu0 }
 0x105   : > { %v1877_v52 = vadd.f32 %v1876_v51, %v1875_v48  ;;  %v1964_v53 = vpop.f32.mrb[5].mxu1  ;;  %v1878_v54 = vpop.f32.mrb[6].mxu0 }
 0x106   : > { %v1965_v55 = vadd.f32 %v1964_v53, %v1963_v50  ;;  %v1966_v56 = vpop.f32.mrb[6].mxu1  ;;  %v1879_v57 = vpop.f32.mrb[7].mxu0 }
 0x107   : > { %v976_v58 = vadd.f32 %v1877_v52, %v2486_v34  ;;  %v1880_v59 = vadd.f32 %v1879_v57, %v1878_v54  ;;  %v1967_v60 = vpop.f32.mrb[7].mxu1 }
 0x108   : > { %v1968_v61 = vadd.f32 %v1967_v60, %v1966_v56 }
 0x109   : > { %v979_v62 = vadd.f32 %v1880_v59, %v2486_v34  ;;  %v2496_v63 = vadd.f32 %v1965_v55, %v976_v58 }
 0x10b   : > { %v1881_v0 = vpop.f32.mrb[8].mxu0  ;;  %v2498_v1 = vadd.f32 %v1968_v61, %v979_v62 }
 0x10c   : > { %v1969_v2 = vpop.f32.mrb[8].mxu1  ;;  %v1882_v3 = vpop.f32.mrb[9].mxu0 }
 0x10d   : > { %v1883_v4 = vadd.f32 %v1882_v3, %v1881_v0  ;;  %v1970_v5 = vpop.f32.mrb[9].mxu1  ;;  %v1884_v6 = vpop.f32.mrb[10].mxu0 }
 0x10e   : > { %v1971_v7 = vadd.f32 %v1970_v5, %v1969_v2  ;;  %v1972_v8 = vpop.f32.mrb[10].mxu1  ;;  %v1885_v9 = vpop.f32.mrb[11].mxu0 }
 0x10f   : > { %v984_v10 = vadd.f32 %v1883_v4, %v2486_v34  ;;  %v1886_v11 = vadd.f32 %v1885_v9, %v1884_v6  ;;  %v1973_v12 = vpop.f32.mrb[11].mxu1 }
 0x110   : > { %v1974_v13 = vadd.f32 %v1973_v12, %v1972_v8 }
 0x111   : > { %v987_v14 = vadd.f32 %v1886_v11, %v2486_v34  ;;  %v2502_v15 = vadd.f32 %v1971_v7, %v984_v10 }
 0x113   : > { %v1887_v16 = vpop.f32.mrb[12].mxu0  ;;  %v2504_v17 = vadd.f32 %v1974_v13, %v987_v14 }
 0x114   : > { %v1975_v18 = vpop.f32.mrb[12].mxu1  ;;  %v1888_v19 = vpop.f32.mrb[13].mxu0 }
 0x115   : > { %v1889_v20 = vadd.f32 %v1888_v19, %v1887_v16  ;;  %v1976_v21 = vpop.f32.mrb[13].mxu1  ;;  %v1890_v22 = vpop.f32.mrb[14].mxu0 }
 0x116   : > { %v1977_v23 = vadd.f32 %v1976_v21, %v1975_v18  ;;  %v1978_v24 = vpop.f32.mrb[14].mxu1  ;;  %v1891_v25 = vpop.f32.mrb[15].mxu0 }
 0x117   : > { %v992_v26 = vadd.f32 %v1889_v20, %v2486_v34  ;;  %v1892_v27 = vadd.f32 %v1891_v25, %v1890_v22  ;;  %v1979_v28 = vpop.f32.mrb[15].mxu1 }
 0x118   : > { %v1980_v29 = vadd.f32 %v1979_v28, %v1978_v24 }
 0x119   : > { %v995_v30 = vadd.f32 %v1892_v27, %v2486_v34  ;;  %v2508_v31 = vadd.f32 %v1977_v23, %v992_v26 }
 0x11b   : > { %v1893_v32 = vpop.f32.mrb[16].mxu0  ;;  %v2510_v33 = vadd.f32 %v1980_v29, %v995_v30 }
 0x11c   : > { %v1981_v35 = vpop.f32.mrb[16].mxu1  ;;  %v1894_v36 = vpop.f32.mrb[17].mxu0 }
 0x11d   : > { %v1895_v37 = vadd.f32 %v1894_v36, %v1893_v32  ;;  %v1982_v38 = vpop.f32.mrb[17].mxu1  ;;  %v1896_v39 = vpop.f32.mrb[18].mxu0 }
 0x11e   : > { %v1983_v40 = vadd.f32 %v1982_v38, %v1981_v35  ;;  %v1984_v41 = vpop.f32.mrb[18].mxu1  ;;  %v1897_v42 = vpop.f32.mrb[19].mxu0 }
 0x11f   : > { %v1000_v43 = vadd.f32 %v1895_v37, %v2486_v34  ;;  %v1898_v44 = vadd.f32 %v1897_v42, %v1896_v39  ;;  %v1985_v45 = vpop.f32.mrb[19].mxu1 }
 0x120   : > { %v1986_v46 = vadd.f32 %v1985_v45, %v1984_v41 }
 0x121   : > { %v1003_v48 = vadd.f32 %v1898_v44, %v2486_v34  ;;  %v2514_v50 = vadd.f32 %v1983_v40, %v1000_v43 }
 0x123   : > { %v1899_v51 = vpop.f32.mrb[20].mxu0  ;;  %v2516_v52 = vadd.f32 %v1986_v46, %v1003_v48 }
 0x124   : > { %v1987_v53 = vpop.f32.mrb[20].mxu1  ;;  %v1900_v54 = vpop.f32.mrb[21].mxu0 }
 0x125   : > { %v1901_v55 = vadd.f32 %v1900_v54, %v1899_v51  ;;  %v1988_v56 = vpop.f32.mrb[21].mxu1  ;;  %v1902_v57 = vpop.f32.mrb[22].mxu0 }
 0x126   : > { %v1989_v58 = vadd.f32 %v1988_v56, %v1987_v53  ;;  %v1990_v59 = vpop.f32.mrb[22].mxu1  ;;  %v1903_v60 = vpop.f32.mrb[23].mxu0 }
 0x127   : > { %v1008_v61 = vadd.f32 %v1901_v55, %v2486_v34  ;;  %v1904_v62 = vadd.f32 %v1903_v60, %v1902_v57  ;;  %v1991_v0 = vpop.f32.mrb[23].mxu1 }
 0x128   : > { %v1992_v2 = vadd.f32 %v1991_v0, %v1990_v59 }
 0x129   : > { %v1011_v3 = vadd.f32 %v1904_v62, %v2486_v34  ;;  %v2520_v4 = vadd.f32 %v1989_v58, %v1008_v61 }
 0x12b   : > { %v1905_v5 = vpop.f32.mrb[24].mxu0  ;;  %v2522_v6 = vadd.f32 %v1992_v2, %v1011_v3 }
 0x12c   : > { %v1993_v7 = vpop.f32.mrb[24].mxu1  ;;  %v1906_v8 = vpop.f32.mrb[25].mxu0 }
 0x12d   : > { %v1907_v9 = vadd.f32 %v1906_v8, %v1905_v5  ;;  %v1994_v10 = vpop.f32.mrb[25].mxu1  ;;  %v1908_v11 = vpop.f32.mrb[26].mxu0 }
 0x12e   : > { %v1995_v12 = vadd.f32 %v1994_v10, %v1993_v7  ;;  %v1996_v13 = vpop.f32.mrb[26].mxu1  ;;  %v1909_v14 = vpop.f32.mrb[27].mxu0 }
 0x12f   : > { %v1016_v16 = vadd.f32 %v1907_v9, %v2486_v34  ;;  %v1910_v18 = vadd.f32 %v1909_v14, %v1908_v11  ;;  %v1997_v19 = vpop.f32.mrb[27].mxu1 }
 0x130   : > { %v1998_v20 = vadd.f32 %v1997_v19, %v1996_v13 }
 0x131   : > { %v1019_v21 = vadd.f32 %v1910_v18, %v2486_v34  ;;  %v2526_v22 = vadd.f32 %v1995_v12, %v1016_v16 }
 0x133   : > { %v1911_v23 = vpop.f32.mrb[28].mxu0  ;;  %v2528_v24 = vadd.f32 %v1998_v20, %v1019_v21 }
 0x134   : > { %v1999_v25 = vpop.f32.mrb[28].mxu1  ;;  %v1912_v26 = vpop.f32.mrb[29].mxu0 }
 0x135   : > { %v1913_v27 = vadd.f32 %v1912_v26, %v1911_v23  ;;  %v2000_v28 = vpop.f32.mrb[29].mxu1  ;;  %v1914_v29 = vpop.f32.mrb[30].mxu0 }
 0x136   : > { %v2001_v30 = vadd.f32 %v2000_v28, %v1999_v25  ;;  %v2002_v32 = vpop.f32.mrb[30].mxu1  ;;  %v1915_v35 = vpop.f32.mrb[31].mxu0 }
 0x137   : > { %v1024_v36 = vadd.f32 %v1913_v27, %v2486_v34  ;;  %v1916_v37 = vadd.f32 %v1915_v35, %v1914_v29  ;;  %v2003_v38 = vpop.f32.mrb[31].mxu1 }
 0x138   : > { %v2004_v39 = vadd.f32 %v2003_v38, %v2002_v32 }
 0x139   : > { %v1027_v40 = vadd.f32 %v1916_v37, %v2486_v34  ;;  %v2532_v41 = vadd.f32 %v2001_v30, %v1024_v36 }
 0x13b   : > { %v1917_v42 = vpop.f32.mrb[32].mxu0  ;;  %v2534_v43 = vadd.f32 %v2004_v39, %v1027_v40 }
 0x13c   : > { %v2005_v44 = vpop.f32.mrb[32].mxu1  ;;  %v1918_v45 = vpop.f32.mrb[33].mxu0 }
 0x13d   : > { %v1919_v46 = vadd.f32 %v1918_v45, %v1917_v42  ;;  %v2006_v48 = vpop.f32.mrb[33].mxu1  ;;  %v1920_v51 = vpop.f32.mrb[34].mxu0 }
 0x13e   : > { %v2007_v53 = vadd.f32 %v2006_v48, %v2005_v44  ;;  %v2008_v54 = vpop.f32.mrb[34].mxu1  ;;  %v1921_v55 = vpop.f32.mrb[35].mxu0 }
 0x13f   : > { %v1032_v56 = vadd.f32 %v1919_v46, %v2486_v34  ;;  %v1922_v57 = vadd.f32 %v1921_v55, %v1920_v51  ;;  %v2009_v58 = vpop.f32.mrb[35].mxu1 }
 0x140   : > { %v2010_v59 = vadd.f32 %v2009_v58, %v2008_v54 }
 0x141   : > { %v1035_v60 = vadd.f32 %v1922_v57, %v2486_v34  ;;  %v2538_v61 = vadd.f32 %v2007_v53, %v1032_v56 }
 0x143   : > { %v1923_v62 = vpop.f32.mrb[36].mxu0  ;;  %v2540_v0 = vadd.f32 %v2010_v59, %v1035_v60 }
 0x144   : > { %v2011_v2 = vpop.f32.mrb[36].mxu1  ;;  %v1924_v3 = vpop.f32.mrb[37].mxu0 }
 0x145   : > { %v1925_v5 = vadd.f32 %v1924_v3, %v1923_v62  ;;  %v2012_v7 = vpop.f32.mrb[37].mxu1  ;;  %v1926_v8 = vpop.f32.mrb[38].mxu0 }
 0x146   : > { %v2013_v9 = vadd.f32 %v2012_v7, %v2011_v2  ;;  %v2014_v10 = vpop.f32.mrb[38].mxu1  ;;  %v1927_v11 = vpop.f32.mrb[39].mxu0 }
 0x147   : > { %v1040_v12 = vadd.f32 %v1925_v5, %v2486_v34  ;;  %v1928_v13 = vadd.f32 %v1927_v11, %v1926_v8  ;;  %v2015_v14 = vpop.f32.mrb[39].mxu1 }
 0x148   : > { %v2016_v16 = vadd.f32 %v2015_v14, %v2014_v10 }
 0x149   : > { %v1043_v18 = vadd.f32 %v1928_v13, %v2486_v34  ;;  %v2544_v19 = vadd.f32 %v2013_v9, %v1040_v12 }
 0x14b   : > { %v1929_v20 = vpop.f32.mrb[40].mxu0  ;;  %v2546_v21 = vadd.f32 %v2016_v16, %v1043_v18 }
 0x14c   : > { %v2017_v23 = vpop.f32.mrb[40].mxu1  ;;  %v1930_v25 = vpop.f32.mrb[41].mxu0 }
 0x14d   : > { %v1931_v26 = vadd.f32 %v1930_v25, %v1929_v20  ;;  %v2018_v27 = vpop.f32.mrb[41].mxu1  ;;  %v1932_v28 = vpop.f32.mrb[42].mxu0 }
 0x14e   : > { %v2019_v29 = vadd.f32 %v2018_v27, %v2017_v23  ;;  %v2020_v30 = vpop.f32.mrb[42].mxu1  ;;  %v1933_v32 = vpop.f32.mrb[43].mxu0 }
 0x14f   : > { %v1048_v35 = vadd.f32 %v1931_v26, %v2486_v34  ;;  %v1934_v36 = vadd.f32 %v1933_v32, %v1932_v28  ;;  %v2021_v37 = vpop.f32.mrb[43].mxu1 }
 0x150   : > { %v2022_v38 = vadd.f32 %v2021_v37, %v2020_v30 }
 0x151   : > { %v1051_v39 = vadd.f32 %v1934_v36, %v2486_v34  ;;  %v2550_v40 = vadd.f32 %v2019_v29, %v1048_v35 }
 0x153   : > { %v1935_v42 = vpop.f32.mrb[44].mxu0  ;;  %v2552_v44 = vadd.f32 %v2022_v38, %v1051_v39 }
 0x154   : > { %v2023_v45 = vpop.f32.mrb[44].mxu1  ;;  %v1936_v46 = vpop.f32.mrb[45].mxu0 }
 0x155   : > { %v1937_v48 = vadd.f32 %v1936_v46, %v1935_v42  ;;  %v2024_v51 = vpop.f32.mrb[45].mxu1  ;;  %v1938_v53 = vpop.f32.mrb[46].mxu0 }
 0x156   : > { %v2025_v54 = vadd.f32 %v2024_v51, %v2023_v45  ;;  %v2026_v55 = vpop.f32.mrb[46].mxu1  ;;  %v1939_v56 = vpop.f32.mrb[47].mxu0 }
 0x157   : > { %v1056_v57 = vadd.f32 %v1937_v48, %v2486_v34  ;;  %v1940_v58 = vadd.f32 %v1939_v56, %v1938_v53  ;;  %v2027_v59 = vpop.f32.mrb[47].mxu1 }
 0x158   : > { %v2028_v60 = vadd.f32 %v2027_v59, %v2026_v55 }
 0x159   : > { %v1059_v62 = vadd.f32 %v1940_v58, %v2486_v34  ;;  %v2556_v2 = vadd.f32 %v2025_v54, %v1056_v57 }
 0x15b   : > { %v2055_v3 = vpop.f32.mrb[48].mxu0  ;;  %v2558_v5 = vadd.f32 %v2028_v60, %v1059_v62 }
 0x15c   : > { %v1234_v7 = vadd.f32 %v2055_v3, %v2496_v63  ;;  %v2067_v8 = vpop.f32.mrb[48].mxu1  ;;  %v1225_v9 = vpop.f32.mrb[49].mxu0 }
 0x15d   : > { %v1282_v10 = vadd.f32 %v2067_v8, %v2532_v41  ;;  %v1226_v11 = vadd.f32 %v1225_v9, %v2490_v47  ;;  %v1273_v12 = vpop.f32.mrb[49].mxu1  ;;  %v2056_v13 = vpop.f32.mrb[50].mxu0 }
 0x15e   : > { %vm1322_vm1 = vcmp.gt.f32.partialorder %v1234_v7, 0.0  ;;  %v1346_v14 = vmul.f32 0.01, %v1234_v7  ;;  %v1274_v34 = vadd.f32 %v1273_v12, %v2526_v22  ;;  %v1237_v16 = vadd.f32 %v2056_v13, %v2498_v1  ;;  %v2068_v18 = vpop.f32.mrb[50].mxu1  ;;  %v1228_v20 = vpop.f32.mrb[51].mxu0 }
 0x15f   : > { %vm1334_vm2 = vcmp.gt.f32.partialorder %v1282_v10, 0.0  ;;  %v1358_v23 = vmul.f32 0.01, %v1282_v10  ;;  %vm1320_vm3 = vcmp.gt.f32.partialorder %v1226_v11, 0.0  ;;  %v1344_v63 = vmul.f32 0.01, %v1226_v11 }
 0x160   : > { %vm1332_vm4 = vcmp.gt.f32.partialorder %v1274_v34, 0.0  ;;  %v1356_v25 = vmul.f32 0.01, %v1274_v34  ;;  %vm1323_vm5 = vcmp.gt.f32.partialorder %v1237_v16, 0.0  ;;  %v1276_v41 = vpop.f32.mrb[51].mxu1  ;;  %v1370_v47 = vsel %vm1322_vm1, %v1234_v7, %v1346_v14 }
 0x161   : > { %v1347_v26 = vmul.f32 0.01, %v1237_v16  ;;  %v1285_v27 = vadd.f32 %v2068_v18, %v2534_v43  ;;  %v1382_v28 = vsel %vm1334_vm2, %v1282_v10, %v1358_v23  ;;  %v1368_v29 = vsel %vm1320_vm3, %v1226_v11, %v1344_v63 }
 0x162   : > { %v1229_v22 = vadd.f32 %v1228_v20, %v2492_v49  ;;  %v1277_v1 = vadd.f32 %v1276_v41, %v2528_v24  ;;  %v1380_v30 = vsel %vm1332_vm4, %v1274_v34, %v1356_v25 }
 0x163   : > { %v1371_v32 = vsel %vm1323_vm5, %v1237_v16, %v1347_v26  ;;  %vm1335_vm6 = vcmp.gt.f32.partialorder %v1285_v27, 0.0  ;;  %v1359_v35 = vmul.f32 0.01, %v1285_v27  ;;  %v2059_v36 = vpop.f32.mrb[52].mxu0 }
 0x164   : > { %v1790_v37 = vpack.c.bf16 %v1371_v32, %v1370_v47  ;;  %vm1321_vm7 = vcmp.gt.f32.partialorder %v1229_v22, 0.0  ;;  %v1345_v43 = vmul.f32 0.01, %v1229_v22  ;;  %vm1333_vm8 = vcmp.gt.f32.partialorder %v1277_v1, 0.0  ;;  %v2071_v38 = vpop.f32.mrb[52].mxu1  ;;  %v1241_v39 = vpop.f32.mrb[53].mxu0 }
 0x165   : > { %v1383_v49 = vsel %vm1335_vm6, %v1285_v27, %v1359_v35  ;;  %v1357_v42 = vmul.f32 0.01, %v1277_v1  ;;  %v1250_v24 = vadd.f32 %v2059_v36, %v2508_v31  ;;  %v1298_v45 = vadd.f32 %v2071_v38, %v2544_v19  ;;  %v1289_v46 = vpop.f32.mrb[53].mxu1  ;;  %v2060_v48 = vpop.f32.mrb[54].mxu0 }
 0x166   : > { %1842 = vst [vmem:[%s2572_s29 + $0x8] sm:$0xff] %v1790_v37   ;;  %v1820_v51 = vpack.c.bf16 %v1383_v49, %v1382_v28  ;;  %v1369_v53 = vsel %vm1321_vm7, %v1229_v22, %v1345_v43  ;;  %v1242_v54 = vadd.f32 %v1241_v39, %v2502_v15  ;;  %v1290_v55 = vadd.f32 %v1289_v46, %v2538_v61  ;;  %v2072_v56 = vpop.f32.mrb[54].mxu1  ;;  %v1244_v57 = vpop.f32.mrb[55].mxu0 }
 0x167   : > { %v1785_v58 = vpack.c.bf16 %v1369_v53, %v1368_v29  ;;  %v1381_v59 = vsel %vm1333_vm8, %v1277_v1, %v1357_v42  ;;  %vm1326_vm9 = vcmp.gt.f32.partialorder %v1250_v24, 0.0  ;;  %v1350_v31 = vmul.f32 0.01, %v1250_v24  ;;  %v1292_v60 = vpop.f32.mrb[55].mxu1 }
 0x168   : > { %1848 = vst [vmem:[%s2572_s29 + $0x38] sm:$0xff] %v1820_v51   ;;  %v1815_v19 = vpack.c.bf16 %v1381_v59, %v1380_v30  ;;  %vm1338_vm10 = vcmp.gt.f32.partialorder %v1298_v45, 0.0  ;;  %v1362_v62 = vmul.f32 0.01, %v1298_v45  ;;  %vm1324_vm11 = vcmp.gt.f32.partialorder %v1242_v54, 0.0 }
 0x169   : > { %1786 = vst [vmem:[%s2572_s29] sm:$0xff] %v1785_v58   ;;  %v1374_v3 = vsel %vm1326_vm9, %v1250_v24, %v1350_v31  ;;  %v1348_v7 = vmul.f32 0.01, %v1242_v54  ;;  %v1360_v15 = vmul.f32 0.01, %v1290_v55  ;;  %v1253_v61 = vadd.f32 %v2060_v48, %v2510_v33 }
 0x16a   : > { %1847 = vst [vmem:[%s2572_s29 + $0x30] sm:$0xff] %v1815_v19   ;;  %v1301_v8 = vadd.f32 %v2072_v56, %v2546_v21  ;;  %v1245_v9 = vadd.f32 %v1244_v57, %v2504_v17  ;;  %v1386_v10 = vsel %vm1338_vm10, %v1298_v45, %v1362_v62  ;;  %vm1336_vm12 = vcmp.gt.f32.partialorder %v1290_v55, 0.0 }
 0x16b   : > { %v1372_v11 = vsel %vm1324_vm11, %v1242_v54, %v1348_v7  ;;  %v1293_v12 = vadd.f32 %v1292_v60, %v2540_v0  ;;  %v2063_v13 = vpop.f32.mrb[56].mxu0  ;;  %vm1327_vm13 = vcmp.gt.f32.partialorder %v1253_v61, 0.0  ;;  %v1351_v14 = vmul.f32 0.01, %v1253_v61 }
 0x16c   : > { %vm1339_vm14 = vcmp.gt.f32.partialorder %v1301_v8, 0.0  ;;  %v1363_v34 = vmul.f32 0.01, %v1301_v8  ;;  %vm1325_vm15 = vcmp.gt.f32.partialorder %v1245_v9, 0.0  ;;  %v1349_v16 = vmul.f32 0.01, %v1245_v9 }
 0x16d   : > { %vm1337_vm0 = vcmp.gt.f32.partialorder %v1293_v12, 0.0  ;;  %v1361_v18 = vmul.f32 0.01, %v1293_v12  ;;  %v1384_v20 = vsel %vm1336_vm12, %v1290_v55, %v1360_v15  ;;  %v1375_v33 = vsel %vm1327_vm13, %v1253_v61, %v1351_v14  ;;  %v2075_v21 = vpop.f32.mrb[56].mxu1  ;;  %v1257_v63 = vpop.f32.mrb[57].mxu0 }
 0x16e   : > { %v1387_v23 = vsel %vm1339_vm14, %v1301_v8, %v1363_v34  ;;  %v1266_v17 = vadd.f32 %v2063_v13, %v2520_v4  ;;  %v1800_v25 = vpack.c.bf16 %v1375_v33, %v1374_v3  ;;  %v1373_v41 = vsel %vm1325_vm15, %v1245_v9, %v1349_v16  ;;  %v1305_v26 = vpop.f32.mrb[57].mxu1  ;;  %v2064_v27 = vpop.f32.mrb[58].mxu0 }
 0x16f   : > { %v1830_v0 = vpack.c.bf16 %v1387_v23, %v1386_v10  ;;  %v1385_v47 = vsel %vm1337_vm0, %v1293_v12, %v1361_v18  ;;  %v1795_v28 = vpack.c.bf16 %v1373_v41, %v1372_v11  ;;  %v2076_v1 = vpop.f32.mrb[58].mxu1  ;;  %v1260_v30 = vpop.f32.mrb[59].mxu0  ;;  %v1314_v4 = vadd.f32 %v2075_v21, %v2556_v2 }
 0x170   : > { %v1825_v29 = vpack.c.bf16 %v1385_v47, %v1384_v20  ;;  %vm1330_vm1 = vcmp.gt.f32.partialorder %v1266_v17, 0.0  ;;  %v1354_v22 = vmul.f32 0.01, %v1266_v17  ;;  %1844 = vst [vmem:[%s2572_s29 + $0x18] sm:$0xff] %v1800_v25   ;;  %v1258_v32 = vadd.f32 %v1257_v63, %v2514_v50  ;;  %v1308_v37 = vpop.f32.mrb[59].mxu1 }
 0x171   : > { %1850 = vst [vmem:[%s2572_s29 + $0x48] sm:$0xff] %v1830_v0   ;;  %v1306_v35 = vadd.f32 %v1305_v26, %v2550_v40  ;;  %v1269_v36 = vadd.f32 %v2064_v27, %v2522_v6  ;;  %1843 = vst [vmem:[%s2572_s29 + $0x10] sm:$0xff] %v1795_v28   ;;  %v1317_v43 = vadd.f32 %v2076_v1, %v2558_v5  ;;  %vm1342_vm2 = vcmp.gt.f32.partialorder %v1314_v4, 0.0 }
 0x172   : > { %1849 = vst [vmem:[%s2572_s29 + $0x40] sm:$0xff] %v1825_v29   ;;  %v1261_v38 = vadd.f32 %v1260_v30, %v2516_v52  ;;  %v1309_v39 = vadd.f32 %v1308_v37, %v2552_v44  ;;  %v1378_v49 = vsel %vm1330_vm1, %v1266_v17, %v1354_v22  ;;  %v1366_v42 = vmul.f32 0.01, %v1314_v4 }
 0x173   : > { %vm1328_vm3 = vcmp.gt.f32.partialorder %v1258_v32, 0.0  ;;  %v1352_v2 = vmul.f32 0.01, %v1258_v32  ;;  %vm1331_vm4 = vcmp.gt.f32.partialorder %v1269_v36, 0.0  ;;  %v1355_v50 = vmul.f32 0.01, %v1269_v36 }
 0x174   : > { %vm1340_vm5 = vcmp.gt.f32.partialorder %v1306_v35, 0.0  ;;  %v1364_v6 = vmul.f32 0.01, %v1306_v35  ;;  %vm1343_vm6 = vcmp.gt.f32.partialorder %v1317_v43, 0.0  ;;  %v1367_v40 = vmul.f32 0.01, %v1317_v43 }
 0x175   : > { %v1390_v24 = vsel %vm1342_vm2, %v1314_v4, %v1366_v42  ;;  %v1379_v5 = vsel %vm1331_vm4, %v1269_v36, %v1355_v50  ;;  %vm1329_vm7 = vcmp.gt.f32.partialorder %v1261_v38, 0.0  ;;  %v1353_v52 = vmul.f32 0.01, %v1261_v38 }
 0x176   : > { %v1810_v44 = vpack.c.bf16 %v1379_v5, %v1378_v49  ;;  %v1391_v45 = vsel %vm1343_vm6, %v1317_v43, %v1367_v40  ;;  %vm1341_vm8 = vcmp.gt.f32.partialorder %v1309_v39, 0.0  ;;  %v1365_v46 = vmul.f32 0.01, %v1309_v39 }
 0x177   : > { %v1376_v48 = vsel %vm1328_vm3, %v1258_v32, %v1352_v2  ;;  %v1840_v51 = vpack.c.bf16 %v1391_v45, %v1390_v24  ;;  %v1377_v53 = vsel %vm1329_vm7, %v1261_v38, %v1353_v52  ;;  %v1388_v54 = vsel %vm1340_vm5, %v1306_v35, %v1364_v6 }
 0x178   : > { %1846 = vst [vmem:[%s2572_s29 + $0x28] sm:$0xff] %v1810_v44   ;;  %v1805_v55 = vpack.c.bf16 %v1377_v53, %v1376_v48  ;;  %v1389_v56 = vsel %vm1341_vm8, %v1309_v39, %v1365_v46 }
 0x179   : > { %1852 = vst [vmem:[%s2572_s29 + $0x58] sm:$0xff] %v1840_v51   ;;  %v1835_v57 = vpack.c.bf16 %v1389_v56, %v1388_v54 }
 0x17a   : > { %1845 = vst [vmem:[%s2572_s29 + $0x20] sm:$0xff] %v1805_v55  }
 0x17b   : > { %1851 = vst [vmem:[%s2572_s29 + $0x50] sm:$0xff] %v1835_v57  }
 0x17c PF: > { %s13_s14 = sadd.s32 1, %s2252_s14   ;;  %s2618_s12 = smov %s2248_s13 }
 0x17d   : > { %p10_p5 = scmp.ge.s32.totalorder %s13_s14, 4   ;;  %s2619_s13 = smov %s2621_s15 }
 0x17f   :  { %12 = sbr.rel (!%p10_p5) target bundleno = 2 (0x2), region = 68 }

// kernel: encoder_forward_pallas.7
= control target key start
LH: loop header
LB: loop body
LE: loop exit
PB: predicated region body
PF: predicated region fallthrough
CT: control target
= control target key end

     0   :  { %s1602_s12 = smov 0   ;;  %s1604_s13 = smov 0   ;;  %s1831_s0 = inlined_call_operand.vmem [shape: bf16[192,576], index: 0, kind: input, shape index: {}]   ;;  %s1832_s1 = inlined_call_operand.vmem [shape: bf16[576,128], index: 1, kind: input, shape index: {}]   ;;  %s1833_s2 = inlined_call_operand.vmem [shape: f32[1,128], index: 2, kind: input, shape index: {}]   ;;  %s1834_s3 = inlined_call_operand.vmem [shape: bf16[192,128], index: 3, kind: output, shape index: {}]  }
   0x1   :  { %s1606_s14 = smov 0  }
   0x2 LB: > { %s25_s15 = sadd.s32 1, %s1576_s13  ;;  %p1176_p0 = scmp.ge.s32.totalorder %s1580_s14, 1  ;;  %s1580_s14 = sphi %s1606_s14, %s13_s14   ;;  %s1576_s13 = sphi %s1604_s13, %s1836_s13   ;;  %s1572_s12 = sphi %s1602_s12, %s1835_s12  }
   0x3   : > { %p27_p1 = scmp.ge.s32.totalorder %s25_s15, 2  ;;  %p170_p2 = scmp.lt.s32.totalorder %s1580_s14, 3 }
   0x5   : > { %s1838_s15 = smov (%p27_p1, %s25_s15), 0  ;;  %p171_p3 = pnand %p1176_p0, %p170_p2 }
   0x6   : > { %v1480_v0 = vld [vmem:[%s1832_s1 + $0x40] sm:$0xff] (!%p171_p3)   ;;  %v1484_v4 = vld [vmem:[%s1832_s1 + $0x48] sm:$0xff] (!%p171_p3)   ;;  %v1488_v8 = vld [vmem:[%s1832_s1 + $0x50] sm:$0xff] (!%p171_p3)   ;;  %s205_s21 = smul.u32 (!%p171_p3), 12, %s1572_s12  ;;  %vm710_vm0 = vcmask (!%p171_p3), 523264  }
   0x7   : > { %174 = sbr.rel (%p171_p3) target bundleno = 320 (0x140), region = 32  ;;  %v1481_v1 = vld [vmem:[%s1832_s1 + $0xc0] sm:$0xff] (!%p171_p3)   ;;  %1313 = vmatprep.subr.bf16.mxu0 (!%p171_p3), %v1480_v0  ;;  %v1485_v5 = vld [vmem:[%s1832_s1 + $0xc8] sm:$0xff] (!%p171_p3)   ;;  %v1489_v9 = vld [vmem:[%s1832_s1 + $0xd0] sm:$0xff] (!%p171_p3)  }
   0x8   : > { %v1482_v2 = vld [vmem:[%s1832_s1] sm:$0xff] (!%p171_p3)   ;;  %1365 = vmatprep.subr.bf16.mxu1 (!%p171_p3), %v1481_v1  ;;  %v1486_v6 = vld [vmem:[%s1832_s1 + $0x8] sm:$0xff] (!%p171_p3)   ;;  %v1490_v10 = vld [vmem:[%s1832_s1 + $0x10] sm:$0xff] (!%p171_p3)   ;;  %p206_p4 = scmp.lt.s32.totalorder (!%p171_p3), %s205_s21, 23 }
   0x9   : > { %v1483_v3 = vld [vmem:[%s1832_s1 + $0x80] sm:$0xff] (!%p171_p3)   ;;  %1314 = vmatpush3.bf16.msra.mxu0 (!%p171_p3), %v1482_v2  ;;  %v1487_v7 = vld [vmem:[%s1832_s1 + $0x88] sm:$0xff] (!%p171_p3)   ;;  %v1491_v11 = vld [vmem:[%s1832_s1 + $0x90] sm:$0xff] (!%p171_p3)  }
   0xa   : > { %1366 = vmatpush3.bf16.msra.mxu1 (!%p171_p3), %v1483_v3  ;;  %1315 = vmatprep.subr.bf16.mxu0 (!%p171_p3), %v1484_v4  ;;  %v1492_v12 = vld [vmem:[%s1832_s1 + $0x58] sm:$0xff] (!%p171_p3)   ;;  %v1496_v16 = vld [vmem:[%s1832_s1 + $0x60] sm:$0xff] (!%p171_p3)   ;;  %v1500_v20 = vld [vmem:[%s1832_s1 + $0x68] sm:$0xff] (!%p171_p3)  }
   0xb   : > { %1367 = vmatprep.subr.bf16.mxu1 (!%p171_p3), %v1485_v5  ;;  %v1493_v13 = vld [vmem:[%s1832_s1 + $0xd8] sm:$0xff] (!%p171_p3)   ;;  %v1497_v17 = vld [vmem:[%s1832_s1 + $0xe0] sm:$0xff] (!%p171_p3)   ;;  %v1501_v21 = vld [vmem:[%s1832_s1 + $0xe8] sm:$0xff] (!%p171_p3)  }
   0xc   : > { %v1494_v14 = vld [vmem:[%s1832_s1 + $0x18] sm:$0xff] (!%p171_p3)   ;;  %v1498_v18 = vld [vmem:[%s1832_s1 + $0x20] sm:$0xff] (!%p171_p3)   ;;  %v1502_v22 = vld [vmem:[%s1832_s1 + $0x28] sm:$0xff] (!%p171_p3)  }
   0xd   : > { %1316 = vmatpush3.bf16.msra.mxu0 (!%p171_p3), %v1486_v6  ;;  %v1495_v15 = vld [vmem:[%s1832_s1 + $0x98] sm:$0xff] (!%p171_p3)   ;;  %v1499_v19 = vld [vmem:[%s1832_s1 + $0xa0] sm:$0xff] (!%p171_p3)   ;;  %v1503_v23 = vld [vmem:[%s1832_s1 + $0xa8] sm:$0xff] (!%p171_p3)  }
   0xe   : > { %1368 = vmatpush3.bf16.msra.mxu1 %v1487_v7  ;;  %1317 = vmatprep.subr.bf16.mxu0 %v1488_v8  ;;  %s1840_s21 = smov (!%p206_p4, %s205_s21), 23  ;;  %v1504_v24 = vld [vmem:[%s1832_s1 + $0x70] sm:$0xff]   ;;  %v1508_v28 = vld [vmem:[%s1832_s1 + $0x78] sm:$0xff]   ;;  %v1518_v36 = vld [vmem:[%s1832_s1 + $0x100] sm:$0xff]  }
   0xf   : > { %1369 = vmatprep.subr.bf16.mxu1 %v1489_v9  ;;  %v1505_v25 = vld [vmem:[%s1832_s1 + $0xf0] sm:$0xff]   ;;  %s1455_s23 = smul.u32 20, %s1840_s21  ;;  %v1509_v29 = vld [vmem:[%s1832_s1 + $0xf8] sm:$0xff]   ;;  %v1525_v39 = vld [vmem:[%s1832_s1 + $0x108] sm:$0xff]   ;;  %s1178_s26 = sshll.u32 %s1840_s21, 2 }
  0x10   : > { %v1506_v26 = vld [vmem:[%s1832_s1 + $0x30] sm:$0xff]   ;;  %v1510_v30 = vld [vmem:[%s1832_s1 + $0x38] sm:$0xff]   ;;  %v1772_v4 = vld [vmem:[%s1833_s2] ss:$0 sm:$0xff]  ;;  %s1809_s29 = scalar_lea.vmem %s1834_s3, %s1178_s26 }
  0x11   : > { %1318 = vmatpush3.bf16.msra.mxu0 %v1490_v10  ;;  %v1507_v27 = vld [vmem:[%s1832_s1 + $0xb0] sm:$0xff]   ;;  %s1719_s6 = scalar_lea.vmem %s1831_s0, %s1455_s23  ;;  %v1511_v31 = vld [vmem:[%s1832_s1 + $0xb8] sm:$0xff]  }
  0x12   : > { %1370 = vmatpush3.bf16.msra.mxu1 %v1491_v11  ;;  %1319 = vmatprep.subr.bf16.mxu0 %v1492_v12  ;;  %v1512_v32 = vld [vmem:[%s1719_s6] ss:$20 sps:$4 sm:$0xff]   ;;  %v1514_v33 = vld [vmem:[%s1719_s6 + $0x4] ss:$20 sps:$4 sm:$0xff]   ;;  %v1515_v34 = vld [vmem:[%s1719_s6 + $0x8] ss:$20 sps:$4 sm:$0xff]  }
  0x13   : > { %1371 = vmatprep.subr.bf16.mxu1 %v1493_v13  ;;  %v1517_v35 = vld [vmem:[%s1719_s6 + $0xc] ss:$20 sps:$4 sm:$0xff]   ;;  %761 = vmatprep.mubr.bf16.mxu0 %v1514_v33  ;;  %v1521_v38 = vld [vmem:[%s1719_s6 + $0x34] ss:$20 sps:$4 sm:$0xff]   ;;  %v1524_v41 = vld [vmem:[%s1719_s6 + $0x30] ss:$20 sps:$4 sm:$0xff]  }
  0x14   : > { %842 = vmatprep.mubr.bf16.mxu1 %v1517_v35  ;;  %v1519_v37 = vld [vmem:[%s1719_s6 + $0x2c] ss:$20 sps:$4 sm:$0xff]   ;;  %v1523_v40 = vld [vmem:[%s1719_s6 + $0x28] ss:$20 sps:$4 sm:$0xff]   ;;  %v1538_v44 = vld [vmem:[%s1832_s1 + $0x110] sm:$0xff]  }
  0x15   : > { %1320 = vmatpush3.bf16.msra.mxu0 %v1494_v14  ;;  %v1526_v42 = vld [vmem:[%s1719_s6 + $0x54] ss:$20 sps:$4 sm:$0xff]   ;;  %v1528_v43 = vld [vmem:[%s1719_s6 + $0x5c] ss:$20 sps:$4 sm:$0xff]   ;;  %v1531_v46 = vld [vmem:[%s1719_s6 + $0x58] ss:$20 sps:$4 sm:$0xff]  }
  0x16   : > { %1372 = vmatpush3.bf16.msra.mxu1 %v1495_v15  ;;  %1321 = vmatprep.subr.bf16.mxu0 %v1496_v16  ;;  %v1530_v45 = vld [vmem:[%s1719_s6 + $0x50] ss:$20 sps:$4 sm:$0xff]   ;;  %v1545_v48 = vld [vmem:[%s1832_s1 + $0x118] sm:$0xff]   ;;  %v1537_v51 = vld [vmem:[%s1719_s6 + $0x80] ss:$20 sps:$4 sm:$0xff]  }
  0x17   : > { %1373 = vmatprep.subr.bf16.mxu1 %v1497_v17  ;;  %v1532_v47 = vld [vmem:[%s1719_s6 + $0x7c] ss:$20 sps:$4 sm:$0xff]   ;;  %v1534_v49 = vld [vmem:[%s1719_s6 + $0x84] ss:$20 sps:$4 sm:$0xff]   ;;  %v1541_v53 = vld [vmem:[%s1719_s6 + $0xac] ss:$20 sps:$4 sm:$0xff]  }
  0x18   : > { %v1536_v50 = vld [vmem:[%s1719_s6 + $0x78] ss:$20 sps:$4 sm:$0xff]   ;;  %v1543_v54 = vld [vmem:[%s1719_s6 + $0xa0] ss:$20 sps:$4 sm:$0xff]   ;;  %v1544_v55 = vld [vmem:[%s1719_s6 + $0xa8] ss:$20 sps:$4 sm:$0xff]  }
  0x19   : > { %1322 = vmatpush3.bf16.msra.mxu0 %v1498_v18  ;;  %v1539_v52 = vld [vmem:[%s1719_s6 + $0xa4] ss:$20 sps:$4 sm:$0xff]   ;;  %v1546_v56 = vld [vmem:[%s1719_s6 + $0xcc] ss:$20 sps:$4 sm:$0xff]   ;;  %v1548_v57 = vld [vmem:[%s1719_s6 + $0xd4] ss:$20 sps:$4 sm:$0xff]  }
  0x1a   : > { %1374 = vmatpush3.bf16.msra.mxu1 %v1499_v19  ;;  %1323 = vmatprep.subr.bf16.mxu0 %v1500_v20  ;;  %v1550_v58 = vld [vmem:[%s1719_s6 + $0xc8] ss:$20 sps:$4 sm:$0xff]   ;;  %v1551_v59 = vld [vmem:[%s1719_s6 + $0xd0] ss:$20 sps:$4 sm:$0xff]   ;;  %v1553_v61 = vld [vmem:[%s1719_s6 + $0x60] ss:$20 sps:$4 sm:$0xff]  }
  0x1b   : > { %1375 = vmatprep.subr.bf16.mxu1 %v1501_v21  ;;  %v1552_v60 = vld [vmem:[%s1719_s6 + $0x10] ss:$20 sps:$4 sm:$0xff]   ;;  %v1554_v62 = vld [vmem:[%s1719_s6 + $0x38] ss:$20 sps:$4 sm:$0xff]   ;;  %v1555_v63 = vld [vmem:[%s1719_s6 + $0x88] ss:$20 sps:$4 sm:$0xff]  }
  0x1c   : > { %v1556_v0 = vld [vmem:[%s1719_s6 + $0xb0] ss:$20 sps:$4 sm:$0xff]   ;;  %v1557_v1 = vld [vmem:[%s1719_s6 + $0xd8] ss:$20 sps:$4 sm:$0xff]  }
  0x1d   : > { %1324 = vmatpush3.bf16.msra.mxu0 %v1502_v22 }
  0x1e   : > { %1376 = vmatpush3.bf16.msra.mxu1 %v1503_v23  ;;  %1325 = vmatprep.subr.bf16.mxu0 %v1504_v24 }
  0x1f   : > { %1377 = vmatprep.subr.bf16.mxu1 %v1505_v25 }
  0x21   : > { %1326 = vmatpush3.bf16.msra.mxu0 %v1506_v26 }
  0x22   : > { %1378 = vmatpush3.bf16.msra.mxu1 %v1507_v27  ;;  %1327 = vmatprep.subr.bf16.mxu0 %v1508_v28 }
  0x23   : > { %1379 = vmatprep.subr.bf16.mxu1 %v1509_v29 }
  0x25   : > { %1328 = vmatpush3.bf16.msra.mxu0 %v1510_v30 }
  0x26   : > { %1380 = vmatpush3.bf16.msra.mxu1 %v1511_v31  ;;  %1427 = vmatprep.subr.bf16.mxu0 %v1518_v36 }
  0x27   : > { %1447 = vmatprep.subr.bf16.mxu1 %v1518_v36 }
  0x28   : > { %762 = vmatmul.mubr.bf16.vlgmr.msra.gmra.mrb[0].mxu0 %v1512_v32 }
  0x29   : > { %843 = vmatmul.mubr.bf16.vlgmr.msra.gmra.mrb[0].mxu1 %v1515_v34  ;;  %769 = vmatprep.mubr.bf16.mxu0 %v1519_v37 }
  0x2a   : > { %1451 = vmatpush3.bf16.msra.mxu1 %v1518_v36  ;;  %850 = vmatprep.mubr.bf16.mxu1 %v1521_v38 }
  0x2b   : > { %1428 = vmatpush3.bf16.msra.mxu0 %v1518_v36  ;;  %1448 = vmatprep.subr.bf16.mxu1 %v1525_v39 }
  0x2c   : > { %1429 = vmatprep.subr.bf16.mxu0 %v1525_v39 }
  0x2e   : > { %1452 = vmatpush3.bf16.msra.mxu1 %v1525_v39 }
  0x2f   : > { %1430 = vmatpush3.bf16.msra.mxu0 %v1525_v39  ;;  %1449 = vmatprep.subr.bf16.mxu1 %v1538_v44 }
  0x30   : > { %770 = vmatmul.mubr.bf16.gmra.mrb[4].mxu0 %v1523_v40  ;;  %1431 = vmatprep.subr.bf16.mxu0 %v1538_v44 }
  0x31   : > { %851 = vmatmul.mubr.bf16.gmra.mrb[4].mxu1 %v1524_v41  ;;  %777 = vmatprep.mubr.bf16.mxu0 %v1526_v42 }
  0x32   : > { %858 = vmatprep.mubr.bf16.mxu1 %v1528_v43  ;;  %1453 = vmatpush3.bf16.msra.mxu1 %v1538_v44 }
  0x33   : > { %1432 = vmatpush3.bf16.msra.mxu0 %v1538_v44  ;;  %1450 = vmatprep.subr.bf16.mxu1 %v1545_v48 }
  0x34   : > { %1433 = vmatprep.subr.bf16.mxu0 %v1545_v48 }
  0x36   : > { %1454 = vmatpush3.bf16.msra.mxu1 %v1545_v48 }
  0x37   : > { %1434 = vmatpush3.bf16.msra.mxu0 %v1545_v48 }
  0x38   : > { %778 = vmatmul.mubr.bf16.gmra.mrb[8].mxu0 %v1530_v45 }
  0x39   : > { %859 = vmatmul.mubr.bf16.gmra.mrb[8].mxu1 %v1531_v46  ;;  %785 = vmatprep.mubr.bf16.mxu0 %v1532_v47 }
  0x3a   : > { %866 = vmatprep.mubr.bf16.mxu1 %v1534_v49 }
  0x40   : > { %786 = vmatmul.mubr.bf16.gmra.mrb[12].mxu0 %v1536_v50 }
  0x41   : > { %867 = vmatmul.mubr.bf16.gmra.mrb[12].mxu1 %v1537_v51  ;;  %793 = vmatprep.mubr.bf16.mxu0 %v1539_v52 }
  0x42   : > { %874 = vmatprep.mubr.bf16.mxu1 %v1541_v53 }
  0x48   : > { %794 = vmatmul.mubr.bf16.gmra.mrb[16].mxu0 %v1543_v54 }
  0x49   : > { %875 = vmatmul.mubr.bf16.gmra.mrb[16].mxu1 %v1544_v55  ;;  %801 = vmatprep.mubr.bf16.mxu0 %v1546_v56 }
  0x4a   : > { %882 = vmatprep.mubr.bf16.mxu1 %v1548_v57 }
  0x50   : > { %802 = vmatmul.mubr.bf16.gmra.mrb[20].mxu0 %v1550_v58 }
  0x51   : > { %883 = vmatmul.mubr.bf16.gmra.mrb[20].mxu1 %v1551_v59  ;;  %1435 = vmatprep.mubr.msk.bf16.mxu0 %vm710_vm0, %v1552_v60 }
  0x52   : > { %1439 = vmatprep.mubr.msk.bf16.mxu1 %vm710_vm0, %v1553_v61 }
  0x58   : > { %1436 = vmatmul.mubr.msk.bf16.vlgmr.msra.gmra.mrb[24].mxu0 %vm710_vm0, %v1554_v62 }
  0x59   : > { %1440 = vmatmul.mubr.msk.bf16.vlgmr.msra.gmra.mrb[24].mxu1 %vm710_vm0, %v1555_v63 }
  0x5a   : > { %1443 = vmatprep.mubr.msk.bf16.mxu1 %vm710_vm0, %v1556_v0 }
  0x61   : > { %1444 = vmatmul.mubr.msk.bf16.gmra.mrb[28].mxu1 %vm710_vm0, %v1557_v1 }
  0xfb   : > { %v1329_v2 = vpop.f32.mrb[0].mxu0 }
  0xfc   : > { %v1381_v3 = vpop.f32.mrb[0].mxu1  ;;  %v1330_v5 = vpop.f32.mrb[1].mxu0 }
  0xfd   : > { %v1331_v6 = vadd.f32 %v1330_v5, %v1329_v2  ;;  %v1382_v7 = vpop.f32.mrb[1].mxu1  ;;  %v1332_v8 = vpop.f32.mrb[2].mxu0 }
  0xfe   : > { %v1383_v9 = vadd.f32 %v1382_v7, %v1381_v3  ;;  %v1384_v10 = vpop.f32.mrb[2].mxu1  ;;  %v1333_v11 = vpop.f32.mrb[3].mxu0 }
  0xff   : > { %v764_v12 = vadd.f32 %v1331_v6, %v1772_v4  ;;  %v1334_v13 = vadd.f32 %v1333_v11, %v1332_v8  ;;  %v1385_v14 = vpop.f32.mrb[3].mxu1 }
 0x100   : > { %v1386_v15 = vadd.f32 %v1385_v14, %v1384_v10 }
 0x101   : > { %v767_v16 = vadd.f32 %v1334_v13, %v1772_v4  ;;  %v1776_v17 = vadd.f32 %v1383_v9, %v764_v12 }
 0x103   : > { %v1335_v18 = vpop.f32.mrb[4].mxu0  ;;  %v1778_v19 = vadd.f32 %v1386_v15, %v767_v16 }
 0x104   : > { %v1387_v20 = vpop.f32.mrb[4].mxu1  ;;  %v1336_v21 = vpop.f32.mrb[5].mxu0 }
 0x105   : > { %v1337_v22 = vadd.f32 %v1336_v21, %v1335_v18  ;;  %v1388_v23 = vpop.f32.mrb[5].mxu1  ;;  %v1338_v24 = vpop.f32.mrb[6].mxu0 }
 0x106   : > { %v1389_v25 = vadd.f32 %v1388_v23, %v1387_v20  ;;  %v1390_v26 = vpop.f32.mrb[6].mxu1  ;;  %v1339_v27 = vpop.f32.mrb[7].mxu0 }
 0x107   : > { %v772_v28 = vadd.f32 %v1337_v22, %v1772_v4  ;;  %v1340_v29 = vadd.f32 %v1339_v27, %v1338_v24  ;;  %v1391_v30 = vpop.f32.mrb[7].mxu1 }
 0x108   : > { %v1392_v31 = vadd.f32 %v1391_v30, %v1390_v26 }
 0x109   : > { %v775_v32 = vadd.f32 %v1340_v29, %v1772_v4  ;;  %v1782_v33 = vadd.f32 %v1389_v25, %v772_v28 }
 0x10b   : > { %v1341_v34 = vpop.f32.mrb[8].mxu0  ;;  %v1784_v35 = vadd.f32 %v1392_v31, %v775_v32 }
 0x10c   : > { %v1393_v36 = vpop.f32.mrb[8].mxu1  ;;  %v1342_v37 = vpop.f32.mrb[9].mxu0 }
 0x10d   : > { %v1343_v38 = vadd.f32 %v1342_v37, %v1341_v34  ;;  %v1394_v39 = vpop.f32.mrb[9].mxu1  ;;  %v1344_v40 = vpop.f32.mrb[10].mxu0 }
 0x10e   : > { %v1395_v41 = vadd.f32 %v1394_v39, %v1393_v36  ;;  %v1396_v42 = vpop.f32.mrb[10].mxu1  ;;  %v1345_v43 = vpop.f32.mrb[11].mxu0 }
 0x10f   : > { %v780_v44 = vadd.f32 %v1343_v38, %v1772_v4  ;;  %v1346_v45 = vadd.f32 %v1345_v43, %v1344_v40  ;;  %v1397_v46 = vpop.f32.mrb[11].mxu1 }
 0x110   : > { %v1398_v47 = vadd.f32 %v1397_v46, %v1396_v42 }
 0x111   : > { %v783_v48 = vadd.f32 %v1346_v45, %v1772_v4  ;;  %v861_v49 = vadd.f32 %v1395_v41, %v780_v44 }
 0x113   : > { %v1347_v50 = vpop.f32.mrb[12].mxu0  ;;  %v1788_v51 = vadd.f32 %v1398_v47, %v783_v48 }
 0x114   : > { %v1399_v52 = vpop.f32.mrb[12].mxu1  ;;  %v1348_v53 = vpop.f32.mrb[13].mxu0 }
 0x115   : > { %v1349_v54 = vadd.f32 %v1348_v53, %v1347_v50  ;;  %v1400_v55 = vpop.f32.mrb[13].mxu1  ;;  %v1350_v56 = vpop.f32.mrb[14].mxu0 }
 0x116   : > { %v1401_v57 = vadd.f32 %v1400_v55, %v1399_v52  ;;  %v1402_v58 = vpop.f32.mrb[14].mxu1  ;;  %v1351_v59 = vpop.f32.mrb[15].mxu0 }
 0x117   : > { %v788_v60 = vadd.f32 %v1349_v54, %v1772_v4  ;;  %v1352_v61 = vadd.f32 %v1351_v59, %v1350_v56  ;;  %v1403_v62 = vpop.f32.mrb[15].mxu1 }
 0x118   : > { %v1404_v63 = vadd.f32 %v1403_v62, %v1402_v58 }
 0x119   : > { %v791_v0 = vadd.f32 %v1352_v61, %v1772_v4  ;;  %v869_v1 = vadd.f32 %v1401_v57, %v788_v60 }
 0x11b   : > { %v1353_v2 = vpop.f32.mrb[16].mxu0  ;;  %v872_v3 = vadd.f32 %v1404_v63, %v791_v0 }
 0x11c   : > { %v1405_v5 = vpop.f32.mrb[16].mxu1  ;;  %v1354_v6 = vpop.f32.mrb[17].mxu0 }
 0x11d   : > { %v1355_v7 = vadd.f32 %v1354_v6, %v1353_v2  ;;  %v1406_v8 = vpop.f32.mrb[17].mxu1  ;;  %v1356_v9 = vpop.f32.mrb[18].mxu0 }
 0x11e   : > { %v1407_v10 = vadd.f32 %v1406_v8, %v1405_v5  ;;  %v1408_v11 = vpop.f32.mrb[18].mxu1  ;;  %v1357_v12 = vpop.f32.mrb[19].mxu0 }
 0x11f   : > { %v796_v13 = vadd.f32 %v1355_v7, %v1772_v4  ;;  %v1358_v14 = vadd.f32 %v1357_v12, %v1356_v9  ;;  %v1409_v15 = vpop.f32.mrb[19].mxu1 }
 0x120   : > { %v1410_v16 = vadd.f32 %v1409_v15, %v1408_v11 }
 0x121   : > { %v799_v18 = vadd.f32 %v1358_v14, %v1772_v4  ;;  %v1794_v20 = vadd.f32 %v1407_v10, %v796_v13 }
 0x123   : > { %v1359_v21 = vpop.f32.mrb[20].mxu0  ;;  %v1796_v22 = vadd.f32 %v1410_v16, %v799_v18 }
 0x124   : > { %v1411_v23 = vpop.f32.mrb[20].mxu1  ;;  %v1360_v24 = vpop.f32.mrb[21].mxu0 }
 0x125   : > { %v1361_v25 = vadd.f32 %v1360_v24, %v1359_v21  ;;  %v1412_v26 = vpop.f32.mrb[21].mxu1  ;;  %v1362_v27 = vpop.f32.mrb[22].mxu0 }
 0x126   : > { %v1413_v28 = vadd.f32 %v1412_v26, %v1411_v23  ;;  %v1414_v29 = vpop.f32.mrb[22].mxu1  ;;  %v1363_v30 = vpop.f32.mrb[23].mxu0 }
 0x127   : > { %v804_v31 = vadd.f32 %v1361_v25, %v1772_v4  ;;  %v1364_v32 = vadd.f32 %v1363_v30, %v1362_v27  ;;  %v1415_v34 = vpop.f32.mrb[23].mxu1 }
 0x128   : > { %v1416_v36 = vadd.f32 %v1415_v34, %v1414_v29 }
 0x129   : > { %v807_v37 = vadd.f32 %v1364_v32, %v1772_v4  ;;  %v885_v38 = vadd.f32 %v1413_v28, %v804_v31 }
 0x12b   : > { %v1437_v39 = vpop.f32.mrb[24].mxu0  ;;  %v888_v40 = vadd.f32 %v1416_v36, %v807_v37 }
 0x12c   : > { %v934_v41 = vadd.f32 %v1437_v39, %v1782_v33  ;;  %v1441_v42 = vpop.f32.mrb[24].mxu1  ;;  %v925_v43 = vpop.f32.mrb[25].mxu0 }
 0x12d   : > { %v950_v44 = vadd.f32 %v1441_v42, %v869_v1  ;;  %v926_v45 = vadd.f32 %v925_v43, %v1776_v17  ;;  %v941_v46 = vpop.f32.mrb[25].mxu1  ;;  %v1438_v47 = vpop.f32.mrb[26].mxu0 }
 0x12e   : > { %v986_v48 = vmul.f32 0.01, %v934_v41  ;;  %v942_v50 = vadd.f32 %v941_v46, %v861_v49  ;;  %v937_v52 = vadd.f32 %v1438_v47, %v1784_v35  ;;  %v1442_v53 = vpop.f32.mrb[26].mxu1  ;;  %v928_v54 = vpop.f32.mrb[27].mxu0  ;;  %vm974_vm1 = vcmp.gt.f32.partialorder %v934_v41, 0.0 }
 0x12f   : > { %vm978_vm2 = vcmp.gt.f32.partialorder %v950_v44, 0.0  ;;  %v990_v4 = vmul.f32 0.01, %v950_v44  ;;  %v944_v55 = vpop.f32.mrb[27].mxu1  ;;  %vm972_vm4 = vcmp.gt.f32.partialorder %v926_v45, 0.0  ;;  %v953_v57 = vadd.f32 %v1442_v53, %v872_v3 }
 0x130   : > { %vm975_vm3 = vcmp.gt.f32.partialorder %v937_v52, 0.0  ;;  %v984_v33 = vmul.f32 0.01, %v926_v45  ;;  %v987_v56 = vmul.f32 0.01, %v937_v52  ;;  %v998_v58 = vsel %vm974_vm1, %v934_v41, %v986_v48 }
 0x131   : > { %vm976_vm5 = vcmp.gt.f32.partialorder %v942_v50, 0.0  ;;  %v929_v17 = vadd.f32 %v928_v54, %v1778_v19  ;;  %v945_v49 = vadd.f32 %v944_v55, %v1788_v51  ;;  %v988_v59 = vmul.f32 0.01, %v942_v50 }
 0x132   : > { %v999_v35 = vsel %vm975_vm3, %v937_v52, %v987_v56  ;;  %vm979_vm6 = vcmp.gt.f32.partialorder %v953_v57, 0.0  ;;  %v991_v60 = vmul.f32 0.01, %v953_v57  ;;  %v1002_v19 = vsel %vm978_vm2, %v950_v44, %v990_v4 }
 0x133   : > { %v1286_v61 = vpack.c.bf16 %v999_v35, %v998_v58  ;;  %vm973_vm7 = vcmp.gt.f32.partialorder %v929_v17, 0.0  ;;  %v985_v62 = vmul.f32 0.01, %v929_v17  ;;  %vm977_vm8 = vcmp.gt.f32.partialorder %v945_v49, 0.0 }
 0x134   : > { %v1445_v63 = vpop.f32.mrb[28].mxu1  ;;  %v1003_v0 = vsel %vm979_vm6, %v953_v57, %v991_v60  ;;  %v989_v51 = vmul.f32 0.01, %v945_v49  ;;  %v996_v3 = vsel %vm972_vm4, %v926_v45, %v984_v33  ;;  %v1000_v9 = vsel %vm976_vm5, %v942_v50, %v988_v59 }
 0x135   : > { %v966_v1 = vadd.f32 %v1445_v63, %v885_v38  ;;  %v957_v2 = vpop.f32.mrb[29].mxu1  ;;  %1308 = vst [vmem:[%s1809_s29 + $0x8] sm:$0xff] %v1286_v61   ;;  %v1296_v5 = vpack.c.bf16 %v1003_v0, %v1002_v19  ;;  %v997_v6 = vsel %vm973_vm7, %v929_v17, %v985_v62 }
 0x136   : > { %v958_v7 = vadd.f32 %v957_v2, %v1794_v20  ;;  %v1446_v8 = vpop.f32.mrb[30].mxu1  ;;  %v1281_v10 = vpack.c.bf16 %v997_v6, %v996_v3  ;;  %v1001_v11 = vsel %vm977_vm8, %v945_v49, %v989_v51 }
 0x137   : > { %v960_v12 = vpop.f32.mrb[31].mxu1  ;;  %1310 = vst [vmem:[%s1809_s29 + $0x18] sm:$0xff] %v1296_v5   ;;  %v1291_v13 = vpack.c.bf16 %v1001_v11, %v1000_v9  ;;  %v994_v14 = vmul.f32 0.01, %v966_v1  ;;  %v969_v15 = vadd.f32 %v1446_v8, %v888_v40  ;;  %vm982_vm9 = vcmp.gt.f32.partialorder %v966_v1, 0.0 }
 0x138   : > { %1282 = vst [vmem:[%s1809_s29] sm:$0xff] %v1281_v10   ;;  %v992_v16 = vmul.f32 0.01, %v958_v7  ;;  %v961_v18 = vadd.f32 %v960_v12, %v1796_v22  ;;  %vm980_vm10 = vcmp.gt.f32.partialorder %v958_v7, 0.0 }
 0x139   : > { %1309 = vst [vmem:[%s1809_s29 + $0x10] sm:$0xff] %v1291_v13   ;;  %vm983_vm11 = vcmp.gt.f32.partialorder %v969_v15, 0.0  ;;  %v995_v20 = vmul.f32 0.01, %v969_v15  ;;  %v1006_v23 = vsel %vm982_vm9, %v966_v1, %v994_v14 }
 0x13a   : > { %vm981_vm12 = vcmp.gt.f32.partialorder %v961_v18, 0.0  ;;  %v993_v21 = vmul.f32 0.01, %v961_v18  ;;  %v1004_v25 = vsel %vm980_vm10, %v958_v7, %v992_v16 }
 0x13b   : > { %v1007_v24 = vsel %vm983_vm11, %v969_v15, %v995_v20 }
 0x13c   : > { %v1306_v26 = vpack.c.bf16 %v1007_v24, %v1006_v23  ;;  %v1005_v27 = vsel %vm981_vm12, %v961_v18, %v993_v21 }
 0x13d   : > { %v1301_v28 = vpack.c.bf16 %v1005_v27, %v1004_v25 }
 0x13e   : > { %1312 = vst [vmem:[%s1809_s29 + $0x28] sm:$0xff] %v1306_v26  }
 0x13f   : > { %1311 = vst [vmem:[%s1809_s29 + $0x20] sm:$0xff] %v1301_v28  }
 0x140 PF: > { %s13_s14 = sadd.s32 1, %s1580_s14   ;;  %s1835_s12 = smov %s1576_s13 }
 0x141   : > { %p10_p5 = scmp.ge.s32.totalorder %s13_s14, 4   ;;  %s1836_s13 = smov %s1838_s15 }
 0x143   :  { %12 = sbr.rel (!%p10_p5) target bundleno = 2 (0x2), region = 68 }

// kernel: encoder_forward_pallas.8
= control target key start
LH: loop header
LB: loop body
LE: loop exit
PB: predicated region body
PF: predicated region fallthrough
CT: control target
= control target key end

     0   :  { %s2627_s12 = smov 0   ;;  %s2629_s13 = smov 0   ;;  %s3177_s0 = inlined_call_operand.vmem [shape: bf16[48,1152], index: 0, kind: input, shape index: {}]   ;;  %s3178_s1 = inlined_call_operand.vmem [shape: bf16[1152,256], index: 1, kind: input, shape index: {}]   ;;  %s3179_s2 = inlined_call_operand.vmem [shape: f32[1,256], index: 2, kind: input, shape index: {}]   ;;  %s3180_s3 = inlined_call_operand.vmem [shape: bf16[48,256], index: 3, kind: output, shape index: {}]  }
   0x1   :  { %s2631_s14 = smov 0   ;;  %s2633_s15 = smov 0  }
   0x2   :  { %s2635_s16 = smov 0  }
   0x3 LB: > { %s22_s17 = sadd.s32 1, %s2599_s15  ;;  %s2079_s18 = sadd.s32 4294967295, %s2603_s16   ;;  %s2603_s16 = sphi %s2635_s16, %s13_s16   ;;  %s2599_s15 = sphi %s2633_s15, %s3185_s15   ;;  %s2595_s14 = sphi %s2631_s14, %s3184_s14   ;;  %s2591_s13 = sphi %s2629_s13, %s3183_s13   ;;  %s2587_s12 = sphi %s2627_s12, %s3182_s12  }
   0x4   : > { %p23_p0 = scmp.ge.s32.totalorder %s22_s17, 2  ;;  %p65_p1 = scmp.ne.s32.totalorder %s2591_s13, %s2587_s12 }
   0x5   : > { %p66_p2 = scmp.eq.s32.totalorder %s2603_s16, 0  ;;  %p123_p4 = scmp.eq.s32.totalorder %s2079_s18, 1 }
   0x6   : > { %s3187_s17 = smov (%p23_p0, %s22_s17), 0  ;;  %s58_s20 = sadd.s32 1, %s2591_s13 }
   0x7   : > { %p67_p3 = por %p66_p2, %p65_p1  ;;  %s55_s19 = ssub.s32 %s2599_s15, %s3187_s17 }
   0x8   : > { %p56_p5 = scmp.eq.s32.totalorder %s55_s19, 0  ;;  %p2662_p6 = por %p123_p4, %p65_p1 }
   0x9   : > { %p2083_p7 = scmp.ge.s32.totalorder %s2603_s16, 2 }
   0xa   : > { %s2667_s22 = scalar_select %p56_p5, %s2591_s13, %s58_s20  }
   0xb   : > { %155 = sbr.rel (%p2083_p7) target bundleno = 118 (0x76), region = 20 }
  0x12   : > { %158 = sbr.rel (!%p67_p3) target bundleno = 118 (0x76), region = 24  ;;  %s160_s23 = sand.u32 (%p67_p3), 1, %s2591_s13  }
  0x13   : > { %s2084_s24 = sshll.u32 (%p67_p3), %s2599_s15, 2  ;;  %s2409_s25 = smul.u32 (%p67_p3), 576, %s160_s23 }
  0x14   : > { %s2675_s28 = scalar_lea.vmem (%p67_p3), %s3178_s1, %s2084_s24 }
  0x15   : > { %v180_v0 = vld [vmem:[%s2675_s28] sm:$0xf] (%p67_p3)  ;;  %v182_v1 = vld [vmem:[%s2675_s28 + $0x8] sm:$0xf] (%p67_p3)  ;;  %v184_v2 = vld [vmem:[%s2675_s28 + $0x10] sm:$0xf] (%p67_p3) }
  0x16   : > { %v186_v3 = vld [vmem:[%s2675_s28 + $0x18] sm:$0xf] (%p67_p3)  ;;  %v188_v4 = vld [vmem:[%s2675_s28 + $0x20] sm:$0xf] (%p67_p3)  ;;  %s2682_s29 = scalar_lea.vmem (%p67_p3), [#allocation2], %s2409_s25 }
  0x17   : > { %181 = vst [vmem:[%s2682_s29] sm:$0xf] (%p67_p3), %v180_v0  ;;  %183 = vst [vmem:[%s2682_s29 + $0x4] sm:$0xf] (%p67_p3), %v182_v1  ;;  %v190_v5 = vld [vmem:[%s2675_s28 + $0x28] sm:$0xf] (%p67_p3) }
  0x18   : > { %185 = vst [vmem:[%s2682_s29 + $0x8] sm:$0xf] (%p67_p3), %v184_v2  ;;  %187 = vst [vmem:[%s2682_s29 + $0xc] sm:$0xf] (%p67_p3), %v186_v3  ;;  %v192_v6 = vld [vmem:[%s2675_s28 + $0x30] sm:$0xf] (%p67_p3) }
  0x19   : > { %189 = vst [vmem:[%s2682_s29 + $0x10] sm:$0xf] %v188_v4  ;;  %v194_v7 = vld [vmem:[%s2675_s28 + $0x38] sm:$0xf]  ;;  %191 = vst [vmem:[%s2682_s29 + $0x14] sm:$0xf] %v190_v5 }
  0x1a   : > { %193 = vst [vmem:[%s2682_s29 + $0x18] sm:$0xf] %v192_v6  ;;  %195 = vst [vmem:[%s2682_s29 + $0x1c] sm:$0xf] %v194_v7  ;;  %v196_v8 = vld [vmem:[%s2675_s28 + $0x40] sm:$0xf] }
  0x1b   : > { %v198_v9 = vld [vmem:[%s2675_s28 + $0x48] sm:$0xf]  ;;  %v200_v10 = vld [vmem:[%s2675_s28 + $0x50] sm:$0xf]  ;;  %197 = vst [vmem:[%s2682_s29 + $0x20] sm:$0xf] %v196_v8 }
  0x1c   : > { %199 = vst [vmem:[%s2682_s29 + $0x24] sm:$0xf] %v198_v9  ;;  %201 = vst [vmem:[%s2682_s29 + $0x28] sm:$0xf] %v200_v10  ;;  %v202_v11 = vld [vmem:[%s2675_s28 + $0x58] sm:$0xf] }
  0x1d   : > { %v204_v12 = vld [vmem:[%s2675_s28 + $0x60] sm:$0xf]  ;;  %v206_v13 = vld [vmem:[%s2675_s28 + $0x68] sm:$0xf]  ;;  %203 = vst [vmem:[%s2682_s29 + $0x2c] sm:$0xf] %v202_v11 }
  0x1e   : > { %205 = vst [vmem:[%s2682_s29 + $0x30] sm:$0xf] %v204_v12  ;;  %207 = vst [vmem:[%s2682_s29 + $0x34] sm:$0xf] %v206_v13  ;;  %v208_v14 = vld [vmem:[%s2675_s28 + $0x70] sm:$0xf] }
  0x1f   : > { %v210_v15 = vld [vmem:[%s2675_s28 + $0x78] sm:$0xf]  ;;  %v212_v16 = vld [vmem:[%s2675_s28 + $0x80] sm:$0xf]  ;;  %209 = vst [vmem:[%s2682_s29 + $0x38] sm:$0xf] %v208_v14 }
  0x20   : > { %211 = vst [vmem:[%s2682_s29 + $0x3c] sm:$0xf] %v210_v15  ;;  %213 = vst [vmem:[%s2682_s29 + $0x40] sm:$0xf] %v212_v16  ;;  %v214_v17 = vld [vmem:[%s2675_s28 + $0x88] sm:$0xf] }
  0x21   : > { %v216_v18 = vld [vmem:[%s2675_s28 + $0x90] sm:$0xf]  ;;  %v218_v19 = vld [vmem:[%s2675_s28 + $0x98] sm:$0xf]  ;;  %215 = vst [vmem:[%s2682_s29 + $0x44] sm:$0xf] %v214_v17 }
  0x22   : > { %217 = vst [vmem:[%s2682_s29 + $0x48] sm:$0xf] %v216_v18  ;;  %219 = vst [vmem:[%s2682_s29 + $0x4c] sm:$0xf] %v218_v19  ;;  %v220_v20 = vld [vmem:[%s2675_s28 + $0xa0] sm:$0xf] }
  0x23   : > { %v222_v21 = vld [vmem:[%s2675_s28 + $0xa8] sm:$0xf]  ;;  %v224_v22 = vld [vmem:[%s2675_s28 + $0xb0] sm:$0xf]  ;;  %221 = vst [vmem:[%s2682_s29 + $0x50] sm:$0xf] %v220_v20 }
  0x24   : > { %223 = vst [vmem:[%s2682_s29 + $0x54] sm:$0xf] %v222_v21  ;;  %225 = vst [vmem:[%s2682_s29 + $0x58] sm:$0xf] %v224_v22  ;;  %v226_v23 = vld [vmem:[%s2675_s28 + $0xb8] sm:$0xf] }
  0x25   : > { %v228_v24 = vld [vmem:[%s2675_s28 + $0xc0] sm:$0xf]  ;;  %v230_v25 = vld [vmem:[%s2675_s28 + $0xc8] sm:$0xf]  ;;  %227 = vst [vmem:[%s2682_s29 + $0x5c] sm:$0xf] %v226_v23 }
  0x26   : > { %229 = vst [vmem:[%s2682_s29 + $0x60] sm:$0xf] %v228_v24  ;;  %231 = vst [vmem:[%s2682_s29 + $0x64] sm:$0xf] %v230_v25  ;;  %v232_v26 = vld [vmem:[%s2675_s28 + $0xd0] sm:$0xf] }
  0x27   : > { %v234_v27 = vld [vmem:[%s2675_s28 + $0xd8] sm:$0xf]  ;;  %v236_v28 = vld [vmem:[%s2675_s28 + $0xe0] sm:$0xf]  ;;  %233 = vst [vmem:[%s2682_s29 + $0x68] sm:$0xf] %v232_v26 }
  0x28   : > { %235 = vst [vmem:[%s2682_s29 + $0x6c] sm:$0xf] %v234_v27  ;;  %237 = vst [vmem:[%s2682_s29 + $0x70] sm:$0xf] %v236_v28  ;;  %v238_v29 = vld [vmem:[%s2675_s28 + $0xe8] sm:$0xf] }
  0x29   : > { %v240_v30 = vld [vmem:[%s2675_s28 + $0xf0] sm:$0xf]  ;;  %v242_v31 = vld [vmem:[%s2675_s28 + $0xf8] sm:$0xf]  ;;  %239 = vst [vmem:[%s2682_s29 + $0x74] sm:$0xf] %v238_v29 }
  0x2a   : > { %241 = vst [vmem:[%s2682_s29 + $0x78] sm:$0xf] %v240_v30  ;;  %243 = vst [vmem:[%s2682_s29 + $0x7c] sm:$0xf] %v242_v31  ;;  %v244_v32 = vld [vmem:[%s2675_s28 + $0x100] sm:$0xf] }
  0x2b   : > { %v246_v33 = vld [vmem:[%s2675_s28 + $0x108] sm:$0xf]  ;;  %v248_v34 = vld [vmem:[%s2675_s28 + $0x110] sm:$0xf]  ;;  %245 = vst [vmem:[%s2682_s29 + $0x80] sm:$0xf] %v244_v32 }
  0x2c   : > { %247 = vst [vmem:[%s2682_s29 + $0x84] sm:$0xf] %v246_v33  ;;  %249 = vst [vmem:[%s2682_s29 + $0x88] sm:$0xf] %v248_v34  ;;  %v250_v35 = vld [vmem:[%s2675_s28 + $0x118] sm:$0xf] }
  0x2d   : > { %v252_v36 = vld [vmem:[%s2675_s28 + $0x120] sm:$0xf]  ;;  %v254_v37 = vld [vmem:[%s2675_s28 + $0x128] sm:$0xf]  ;;  %251 = vst [vmem:[%s2682_s29 + $0x8c] sm:$0xf] %v250_v35 }
  0x2e   : > { %253 = vst [vmem:[%s2682_s29 + $0x90] sm:$0xf] %v252_v36  ;;  %255 = vst [vmem:[%s2682_s29 + $0x94] sm:$0xf] %v254_v37  ;;  %v256_v38 = vld [vmem:[%s2675_s28 + $0x130] sm:$0xf] }
  0x2f   : > { %v258_v39 = vld [vmem:[%s2675_s28 + $0x138] sm:$0xf]  ;;  %v260_v40 = vld [vmem:[%s2675_s28 + $0x140] sm:$0xf]  ;;  %257 = vst [vmem:[%s2682_s29 + $0x98] sm:$0xf] %v256_v38 }
  0x30   : > { %259 = vst [vmem:[%s2682_s29 + $0x9c] sm:$0xf] %v258_v39  ;;  %261 = vst [vmem:[%s2682_s29 + $0xa0] sm:$0xf] %v260_v40  ;;  %v262_v41 = vld [vmem:[%s2675_s28 + $0x148] sm:$0xf] }
  0x31   : > { %v264_v42 = vld [vmem:[%s2675_s28 + $0x150] sm:$0xf]  ;;  %v266_v43 = vld [vmem:[%s2675_s28 + $0x158] sm:$0xf]  ;;  %263 = vst [vmem:[%s2682_s29 + $0xa4] sm:$0xf] %v262_v41 }
  0x32   : > { %265 = vst [vmem:[%s2682_s29 + $0xa8] sm:$0xf] %v264_v42  ;;  %267 = vst [vmem:[%s2682_s29 + $0xac] sm:$0xf] %v266_v43  ;;  %v268_v44 = vld [vmem:[%s2675_s28 + $0x160] sm:$0xf] }
  0x33   : > { %v270_v45 = vld [vmem:[%s2675_s28 + $0x168] sm:$0xf]  ;;  %v272_v46 = vld [vmem:[%s2675_s28 + $0x170] sm:$0xf]  ;;  %269 = vst [vmem:[%s2682_s29 + $0xb0] sm:$0xf] %v268_v44 }
  0x34   : > { %271 = vst [vmem:[%s2682_s29 + $0xb4] sm:$0xf] %v270_v45  ;;  %273 = vst [vmem:[%s2682_s29 + $0xb8] sm:$0xf] %v272_v46  ;;  %v274_v47 = vld [vmem:[%s2675_s28 + $0x178] sm:$0xf] }
  0x35   : > { %v276_v48 = vld [vmem:[%s2675_s28 + $0x180] sm:$0xf]  ;;  %v278_v49 = vld [vmem:[%s2675_s28 + $0x188] sm:$0xf]  ;;  %275 = vst [vmem:[%s2682_s29 + $0xbc] sm:$0xf] %v274_v47 }
  0x36   : > { %277 = vst [vmem:[%s2682_s29 + $0xc0] sm:$0xf] %v276_v48  ;;  %279 = vst [vmem:[%s2682_s29 + $0xc4] sm:$0xf] %v278_v49  ;;  %v280_v50 = vld [vmem:[%s2675_s28 + $0x190] sm:$0xf] }
  0x37   : > { %v282_v51 = vld [vmem:[%s2675_s28 + $0x198] sm:$0xf]  ;;  %v284_v52 = vld [vmem:[%s2675_s28 + $0x1a0] sm:$0xf]  ;;  %281 = vst [vmem:[%s2682_s29 + $0xc8] sm:$0xf] %v280_v50 }
  0x38   : > { %283 = vst [vmem:[%s2682_s29 + $0xcc] sm:$0xf] %v282_v51  ;;  %285 = vst [vmem:[%s2682_s29 + $0xd0] sm:$0xf] %v284_v52  ;;  %v286_v53 = vld [vmem:[%s2675_s28 + $0x1a8] sm:$0xf] }
  0x39   : > { %v288_v54 = vld [vmem:[%s2675_s28 + $0x1b0] sm:$0xf]  ;;  %v290_v55 = vld [vmem:[%s2675_s28 + $0x1b8] sm:$0xf]  ;;  %287 = vst [vmem:[%s2682_s29 + $0xd4] sm:$0xf] %v286_v53 }
  0x3a   : > { %289 = vst [vmem:[%s2682_s29 + $0xd8] sm:$0xf] %v288_v54  ;;  %291 = vst [vmem:[%s2682_s29 + $0xdc] sm:$0xf] %v290_v55  ;;  %v292_v56 = vld [vmem:[%s2675_s28 + $0x1c0] sm:$0xf] }
  0x3b   : > { %v294_v57 = vld [vmem:[%s2675_s28 + $0x1c8] sm:$0xf]  ;;  %v296_v58 = vld [vmem:[%s2675_s28 + $0x1d0] sm:$0xf]  ;;  %293 = vst [vmem:[%s2682_s29 + $0xe0] sm:$0xf] %v292_v56 }
  0x3c   : > { %295 = vst [vmem:[%s2682_s29 + $0xe4] sm:$0xf] %v294_v57  ;;  %297 = vst [vmem:[%s2682_s29 + $0xe8] sm:$0xf] %v296_v58  ;;  %v298_v59 = vld [vmem:[%s2675_s28 + $0x1d8] sm:$0xf] }
  0x3d   : > { %v300_v60 = vld [vmem:[%s2675_s28 + $0x1e0] sm:$0xf]  ;;  %v302_v61 = vld [vmem:[%s2675_s28 + $0x1e8] sm:$0xf]  ;;  %299 = vst [vmem:[%s2682_s29 + $0xec] sm:$0xf] %v298_v59 }
  0x3e   : > { %301 = vst [vmem:[%s2682_s29 + $0xf0] sm:$0xf] %v300_v60  ;;  %303 = vst [vmem:[%s2682_s29 + $0xf4] sm:$0xf] %v302_v61  ;;  %v304_v62 = vld [vmem:[%s2675_s28 + $0x1f0] sm:$0xf] }
  0x3f   : > { %v306_v63 = vld [vmem:[%s2675_s28 + $0x1f8] sm:$0xf]  ;;  %v308_v0 = vld [vmem:[%s2675_s28 + $0x200] sm:$0xf]  ;;  %305 = vst [vmem:[%s2682_s29 + $0xf8] sm:$0xf] %v304_v62 }
  0x40   : > { %307 = vst [vmem:[%s2682_s29 + $0xfc] sm:$0xf] %v306_v63  ;;  %309 = vst [vmem:[%s2682_s29 + $0x100] sm:$0xf] %v308_v0  ;;  %v310_v1 = vld [vmem:[%s2675_s28 + $0x208] sm:$0xf] }
  0x41   : > { %v312_v2 = vld [vmem:[%s2675_s28 + $0x210] sm:$0xf]  ;;  %v314_v3 = vld [vmem:[%s2675_s28 + $0x218] sm:$0xf]  ;;  %311 = vst [vmem:[%s2682_s29 + $0x104] sm:$0xf] %v310_v1 }
  0x42   : > { %313 = vst [vmem:[%s2682_s29 + $0x108] sm:$0xf] %v312_v2  ;;  %315 = vst [vmem:[%s2682_s29 + $0x10c] sm:$0xf] %v314_v3  ;;  %v316_v4 = vld [vmem:[%s2675_s28 + $0x220] sm:$0xf] }
  0x43   : > { %v318_v5 = vld [vmem:[%s2675_s28 + $0x228] sm:$0xf]  ;;  %v320_v6 = vld [vmem:[%s2675_s28 + $0x230] sm:$0xf]  ;;  %317 = vst [vmem:[%s2682_s29 + $0x110] sm:$0xf] %v316_v4 }
  0x44   : > { %319 = vst [vmem:[%s2682_s29 + $0x114] sm:$0xf] %v318_v5  ;;  %321 = vst [vmem:[%s2682_s29 + $0x118] sm:$0xf] %v320_v6  ;;  %v322_v7 = vld [vmem:[%s2675_s28 + $0x238] sm:$0xf] }
  0x45   : > { %v324_v8 = vld [vmem:[%s2675_s28 + $0x240] sm:$0xf]  ;;  %v326_v9 = vld [vmem:[%s2675_s28 + $0x248] sm:$0xf]  ;;  %323 = vst [vmem:[%s2682_s29 + $0x11c] sm:$0xf] %v322_v7 }
  0x46   : > { %325 = vst [vmem:[%s2682_s29 + $0x120] sm:$0xf] %v324_v8  ;;  %327 = vst [vmem:[%s2682_s29 + $0x124] sm:$0xf] %v326_v9  ;;  %v328_v10 = vld [vmem:[%s2675_s28 + $0x250] sm:$0xf] }
  0x47   : > { %v330_v11 = vld [vmem:[%s2675_s28 + $0x258] sm:$0xf]  ;;  %v332_v12 = vld [vmem:[%s2675_s28 + $0x260] sm:$0xf]  ;;  %329 = vst [vmem:[%s2682_s29 + $0x128] sm:$0xf] %v328_v10 }
  0x48   : > { %331 = vst [vmem:[%s2682_s29 + $0x12c] sm:$0xf] %v330_v11  ;;  %333 = vst [vmem:[%s2682_s29 + $0x130] sm:$0xf] %v332_v12  ;;  %v334_v13 = vld [vmem:[%s2675_s28 + $0x268] sm:$0xf] }
  0x49   : > { %v336_v14 = vld [vmem:[%s2675_s28 + $0x270] sm:$0xf]  ;;  %v338_v15 = vld [vmem:[%s2675_s28 + $0x278] sm:$0xf]  ;;  %335 = vst [vmem:[%s2682_s29 + $0x134] sm:$0xf] %v334_v13 }
  0x4a   : > { %337 = vst [vmem:[%s2682_s29 + $0x138] sm:$0xf] %v336_v14  ;;  %339 = vst [vmem:[%s2682_s29 + $0x13c] sm:$0xf] %v338_v15  ;;  %v340_v16 = vld [vmem:[%s2675_s28 + $0x280] sm:$0xf] }
  0x4b   : > { %v342_v17 = vld [vmem:[%s2675_s28 + $0x288] sm:$0xf]  ;;  %v344_v18 = vld [vmem:[%s2675_s28 + $0x290] sm:$0xf]  ;;  %341 = vst [vmem:[%s2682_s29 + $0x140] sm:$0xf] %v340_v16 }
  0x4c   : > { %343 = vst [vmem:[%s2682_s29 + $0x144] sm:$0xf] %v342_v17  ;;  %345 = vst [vmem:[%s2682_s29 + $0x148] sm:$0xf] %v344_v18  ;;  %v346_v19 = vld [vmem:[%s2675_s28 + $0x298] sm:$0xf] }
  0x4d   : > { %v348_v20 = vld [vmem:[%s2675_s28 + $0x2a0] sm:$0xf]  ;;  %v350_v21 = vld [vmem:[%s2675_s28 + $0x2a8] sm:$0xf]  ;;  %347 = vst [vmem:[%s2682_s29 + $0x14c] sm:$0xf] %v346_v19 }
  0x4e   : > { %349 = vst [vmem:[%s2682_s29 + $0x150] sm:$0xf] %v348_v20  ;;  %351 = vst [vmem:[%s2682_s29 + $0x154] sm:$0xf] %v350_v21  ;;  %v352_v22 = vld [vmem:[%s2675_s28 + $0x2b0] sm:$0xf] }
  0x4f   : > { %v354_v23 = vld [vmem:[%s2675_s28 + $0x2b8] sm:$0xf]  ;;  %v356_v24 = vld [vmem:[%s2675_s28 + $0x2c0] sm:$0xf]  ;;  %353 = vst [vmem:[%s2682_s29 + $0x158] sm:$0xf] %v352_v22 }
  0x50   : > { %355 = vst [vmem:[%s2682_s29 + $0x15c] sm:$0xf] %v354_v23  ;;  %357 = vst [vmem:[%s2682_s29 + $0x160] sm:$0xf] %v356_v24  ;;  %v358_v25 = vld [vmem:[%s2675_s28 + $0x2c8] sm:$0xf] }
  0x51   : > { %v360_v26 = vld [vmem:[%s2675_s28 + $0x2d0] sm:$0xf]  ;;  %v362_v27 = vld [vmem:[%s2675_s28 + $0x2d8] sm:$0xf]  ;;  %359 = vst [vmem:[%s2682_s29 + $0x164] sm:$0xf] %v358_v25 }
  0x52   : > { %361 = vst [vmem:[%s2682_s29 + $0x168] sm:$0xf] %v360_v26  ;;  %363 = vst [vmem:[%s2682_s29 + $0x16c] sm:$0xf] %v362_v27  ;;  %v364_v28 = vld [vmem:[%s2675_s28 + $0x2e0] sm:$0xf] }
  0x53   : > { %v366_v29 = vld [vmem:[%s2675_s28 + $0x2e8] sm:$0xf]  ;;  %v368_v30 = vld [vmem:[%s2675_s28 + $0x2f0] sm:$0xf]  ;;  %365 = vst [vmem:[%s2682_s29 + $0x170] sm:$0xf] %v364_v28 }
  0x54   : > { %367 = vst [vmem:[%s2682_s29 + $0x174] sm:$0xf] %v366_v29  ;;  %369 = vst [vmem:[%s2682_s29 + $0x178] sm:$0xf] %v368_v30  ;;  %v370_v31 = vld [vmem:[%s2675_s28 + $0x2f8] sm:$0xf] }
  0x55   : > { %v372_v32 = vld [vmem:[%s2675_s28 + $0x300] sm:$0xf]  ;;  %v374_v33 = vld [vmem:[%s2675_s28 + $0x308] sm:$0xf]  ;;  %371 = vst [vmem:[%s2682_s29 + $0x17c] sm:$0xf] %v370_v31 }
  0x56   : > { %373 = vst [vmem:[%s2682_s29 + $0x180] sm:$0xf] %v372_v32  ;;  %375 = vst [vmem:[%s2682_s29 + $0x184] sm:$0xf] %v374_v33  ;;  %v376_v34 = vld [vmem:[%s2675_s28 + $0x310] sm:$0xf] }
  0x57   : > { %v378_v35 = vld [vmem:[%s2675_s28 + $0x318] sm:$0xf]  ;;  %v380_v36 = vld [vmem:[%s2675_s28 + $0x320] sm:$0xf]  ;;  %377 = vst [vmem:[%s2682_s29 + $0x188] sm:$0xf] %v376_v34 }
  0x58   : > { %379 = vst [vmem:[%s2682_s29 + $0x18c] sm:$0xf] %v378_v35  ;;  %381 = vst [vmem:[%s2682_s29 + $0x190] sm:$0xf] %v380_v36  ;;  %v382_v37 = vld [vmem:[%s2675_s28 + $0x328] sm:$0xf] }
  0x59   : > { %v384_v38 = vld [vmem:[%s2675_s28 + $0x330] sm:$0xf]  ;;  %v386_v39 = vld [vmem:[%s2675_s28 + $0x338] sm:$0xf]  ;;  %383 = vst [vmem:[%s2682_s29 + $0x194] sm:$0xf] %v382_v37 }
  0x5a   : > { %385 = vst [vmem:[%s2682_s29 + $0x198] sm:$0xf] %v384_v38  ;;  %387 = vst [vmem:[%s2682_s29 + $0x19c] sm:$0xf] %v386_v39  ;;  %v388_v40 = vld [vmem:[%s2675_s28 + $0x340] sm:$0xf] }
  0x5b   : > { %v390_v41 = vld [vmem:[%s2675_s28 + $0x348] sm:$0xf]  ;;  %v392_v42 = vld [vmem:[%s2675_s28 + $0x350] sm:$0xf]  ;;  %389 = vst [vmem:[%s2682_s29 + $0x1a0] sm:$0xf] %v388_v40 }
  0x5c   : > { %391 = vst [vmem:[%s2682_s29 + $0x1a4] sm:$0xf] %v390_v41  ;;  %393 = vst [vmem:[%s2682_s29 + $0x1a8] sm:$0xf] %v392_v42  ;;  %v394_v43 = vld [vmem:[%s2675_s28 + $0x358] sm:$0xf] }
  0x5d   : > { %v396_v44 = vld [vmem:[%s2675_s28 + $0x360] sm:$0xf]  ;;  %v398_v45 = vld [vmem:[%s2675_s28 + $0x368] sm:$0xf]  ;;  %395 = vst [vmem:[%s2682_s29 + $0x1ac] sm:$0xf] %v394_v43 }
  0x5e   : > { %397 = vst [vmem:[%s2682_s29 + $0x1b0] sm:$0xf] %v396_v44  ;;  %399 = vst [vmem:[%s2682_s29 + $0x1b4] sm:$0xf] %v398_v45  ;;  %v400_v46 = vld [vmem:[%s2675_s28 + $0x370] sm:$0xf] }
  0x5f   : > { %v402_v47 = vld [vmem:[%s2675_s28 + $0x378] sm:$0xf]  ;;  %v404_v48 = vld [vmem:[%s2675_s28 + $0x380] sm:$0xf]  ;;  %401 = vst [vmem:[%s2682_s29 + $0x1b8] sm:$0xf] %v400_v46 }
  0x60   : > { %403 = vst [vmem:[%s2682_s29 + $0x1bc] sm:$0xf] %v402_v47  ;;  %405 = vst [vmem:[%s2682_s29 + $0x1c0] sm:$0xf] %v404_v48  ;;  %v406_v49 = vld [vmem:[%s2675_s28 + $0x388] sm:$0xf] }
  0x61   : > { %v408_v50 = vld [vmem:[%s2675_s28 + $0x390] sm:$0xf]  ;;  %v410_v51 = vld [vmem:[%s2675_s28 + $0x398] sm:$0xf]  ;;  %407 = vst [vmem:[%s2682_s29 + $0x1c4] sm:$0xf] %v406_v49 }
  0x62   : > { %409 = vst [vmem:[%s2682_s29 + $0x1c8] sm:$0xf] %v408_v50  ;;  %411 = vst [vmem:[%s2682_s29 + $0x1cc] sm:$0xf] %v410_v51  ;;  %v412_v52 = vld [vmem:[%s2675_s28 + $0x3a0] sm:$0xf] }
  0x63   : > { %v414_v53 = vld [vmem:[%s2675_s28 + $0x3a8] sm:$0xf]  ;;  %v416_v54 = vld [vmem:[%s2675_s28 + $0x3b0] sm:$0xf]  ;;  %413 = vst [vmem:[%s2682_s29 + $0x1d0] sm:$0xf] %v412_v52 }
  0x64   : > { %415 = vst [vmem:[%s2682_s29 + $0x1d4] sm:$0xf] %v414_v53  ;;  %417 = vst [vmem:[%s2682_s29 + $0x1d8] sm:$0xf] %v416_v54  ;;  %v418_v55 = vld [vmem:[%s2675_s28 + $0x3b8] sm:$0xf] }
  0x65   : > { %v420_v56 = vld [vmem:[%s2675_s28 + $0x3c0] sm:$0xf]  ;;  %v422_v57 = vld [vmem:[%s2675_s28 + $0x3c8] sm:$0xf]  ;;  %419 = vst [vmem:[%s2682_s29 + $0x1dc] sm:$0xf] %v418_v55 }
  0x66   : > { %421 = vst [vmem:[%s2682_s29 + $0x1e0] sm:$0xf] %v420_v56  ;;  %423 = vst [vmem:[%s2682_s29 + $0x1e4] sm:$0xf] %v422_v57  ;;  %v424_v58 = vld [vmem:[%s2675_s28 + $0x3d0] sm:$0xf] }
  0x67   : > { %v426_v59 = vld [vmem:[%s2675_s28 + $0x3d8] sm:$0xf]  ;;  %v428_v60 = vld [vmem:[%s2675_s28 + $0x3e0] sm:$0xf]  ;;  %425 = vst [vmem:[%s2682_s29 + $0x1e8] sm:$0xf] %v424_v58 }
  0x68   : > { %427 = vst [vmem:[%s2682_s29 + $0x1ec] sm:$0xf] %v426_v59  ;;  %429 = vst [vmem:[%s2682_s29 + $0x1f0] sm:$0xf] %v428_v60  ;;  %v430_v61 = vld [vmem:[%s2675_s28 + $0x3e8] sm:$0xf] }
  0x69   : > { %v432_v62 = vld [vmem:[%s2675_s28 + $0x3f0] sm:$0xf]  ;;  %v434_v63 = vld [vmem:[%s2675_s28 + $0x3f8] sm:$0xf]  ;;  %431 = vst [vmem:[%s2682_s29 + $0x1f4] sm:$0xf] %v430_v61 }
  0x6a   : > { %433 = vst [vmem:[%s2682_s29 + $0x1f8] sm:$0xf] %v432_v62  ;;  %435 = vst [vmem:[%s2682_s29 + $0x1fc] sm:$0xf] %v434_v63  ;;  %v436_v0 = vld [vmem:[%s2675_s28 + $0x400] sm:$0xf] }
  0x6b   : > { %v438_v1 = vld [vmem:[%s2675_s28 + $0x408] sm:$0xf]  ;;  %v440_v2 = vld [vmem:[%s2675_s28 + $0x410] sm:$0xf]  ;;  %437 = vst [vmem:[%s2682_s29 + $0x200] sm:$0xf] %v436_v0 }
  0x6c   : > { %439 = vst [vmem:[%s2682_s29 + $0x204] sm:$0xf] %v438_v1  ;;  %441 = vst [vmem:[%s2682_s29 + $0x208] sm:$0xf] %v440_v2  ;;  %v442_v3 = vld [vmem:[%s2675_s28 + $0x418] sm:$0xf] }
  0x6d   : > { %v444_v4 = vld [vmem:[%s2675_s28 + $0x420] sm:$0xf]  ;;  %v446_v5 = vld [vmem:[%s2675_s28 + $0x428] sm:$0xf]  ;;  %443 = vst [vmem:[%s2682_s29 + $0x20c] sm:$0xf] %v442_v3 }
  0x6e   : > { %445 = vst [vmem:[%s2682_s29 + $0x210] sm:$0xf] %v444_v4  ;;  %447 = vst [vmem:[%s2682_s29 + $0x214] sm:$0xf] %v446_v5  ;;  %v448_v6 = vld [vmem:[%s2675_s28 + $0x430] sm:$0xf] }
  0x6f   : > { %v450_v7 = vld [vmem:[%s2675_s28 + $0x438] sm:$0xf]  ;;  %v452_v8 = vld [vmem:[%s2675_s28 + $0x440] sm:$0xf]  ;;  %449 = vst [vmem:[%s2682_s29 + $0x218] sm:$0xf] %v448_v6 }
  0x70   : > { %451 = vst [vmem:[%s2682_s29 + $0x21c] sm:$0xf] %v450_v7  ;;  %453 = vst [vmem:[%s2682_s29 + $0x220] sm:$0xf] %v452_v8  ;;  %v454_v9 = vld [vmem:[%s2675_s28 + $0x448] sm:$0xf] }
  0x71   : > { %v456_v10 = vld [vmem:[%s2675_s28 + $0x450] sm:$0xf]  ;;  %v458_v11 = vld [vmem:[%s2675_s28 + $0x458] sm:$0xf]  ;;  %455 = vst [vmem:[%s2682_s29 + $0x224] sm:$0xf] %v454_v9 }
  0x72   : > { %457 = vst [vmem:[%s2682_s29 + $0x228] sm:$0xf] %v456_v10  ;;  %459 = vst [vmem:[%s2682_s29 + $0x22c] sm:$0xf] %v458_v11  ;;  %v460_v12 = vld [vmem:[%s2675_s28 + $0x460] sm:$0xf] }
  0x73   : > { %v462_v13 = vld [vmem:[%s2675_s28 + $0x468] sm:$0xf]  ;;  %v464_v14 = vld [vmem:[%s2675_s28 + $0x470] sm:$0xf]  ;;  %461 = vst [vmem:[%s2682_s29 + $0x230] sm:$0xf] %v460_v12 }
  0x74   : > { %463 = vst [vmem:[%s2682_s29 + $0x234] sm:$0xf] %v462_v13  ;;  %465 = vst [vmem:[%s2682_s29 + $0x238] sm:$0xf] %v464_v14  ;;  %v466_v15 = vld [vmem:[%s2675_s28 + $0x478] sm:$0xf] }
  0x75   : > { %467 = vst [vmem:[%s2682_s29 + $0x23c] sm:$0xf] %v466_v15 }
  0x76 PF: > { %p2085_p8 = scmp.ge.s32.totalorder %s2603_s16, 1  ;;  %p783_p9 = scmp.lt.s32.totalorder %s2603_s16, 3 }
  0x78   : > { %p784_p10 = pnand %p2085_p8, %p783_p9 }
  0x79   : > { %s790_s30 = sand.u32 (!%p784_p10), 1, %s2587_s12   ;;  %v2488_v16 = vld [vmem:[%s3177_s0 + $0x4] ss:$36 sps:$4 sm:$0xff] (!%p784_p10)   ;;  %v2491_v17 = vld [vmem:[%s3177_s0 + $0xc] ss:$36 sps:$4 sm:$0xff] (!%p784_p10)   ;;  %vm2606_vm0 = vmmov (!%p784_p10), 0  }
  0x7a   : > { %787 = sbr.rel (%p784_p10) target bundleno = 463 (0x1cf), region = 69  ;;  %1616 = vmatprep.mubr.bf16.mxu0 (!%p784_p10), %v2488_v16  ;;  %1673 = vmatprep.mubr.bf16.mxu1 (!%p784_p10), %v2491_v17  ;;  %v2486_v48 = vld [vmem:[%s3177_s0] ss:$36 sps:$4 sm:$0xff] (!%p784_p10)   ;;  %v2489_v50 = vld [vmem:[%s3177_s0 + $0x8] ss:$36 sps:$4 sm:$0xff] (!%p784_p10)   ;;  %p828_p11 = scmp.lt.s32.totalorder (!%p784_p10), %s2595_s14, 1 }
  0x7b   : > { %s2410_s4 = smul.u32 (!%p784_p10), 576, %s790_s30  ;;  %v2504_v52 = vld [vmem:[%s3177_s0 + $0x4c] ss:$36 sps:$4 sm:$0xff] (!%p784_p10)   ;;  %v2509_v4 = vld [vmem:[%s3177_s0 + $0x54] ss:$36 sps:$4 sm:$0xff] (!%p784_p10)  }
  0x7c   : > { %v2506_v59 = vld [vmem:[%s3177_s0 + $0x48] ss:$36 sps:$4 sm:$0xff] (!%p784_p10)   ;;  %v2513_v7 = vld [vmem:[%s3177_s0 + $0x50] ss:$36 sps:$4 sm:$0xff] (!%p784_p10)   ;;  %v2523_v16 = vld [vmem:[%s3177_s0 + $0x9c] ss:$36 sps:$4 sm:$0xff] (!%p784_p10)  }
  0x7d   : > { %s2978_s9 = scalar_lea.vmem (!%p784_p10), [#allocation2], %s2410_s4  ;;  %v2518_v12 = vld [vmem:[%s3177_s0 + $0x94] ss:$36 sps:$4 sm:$0xff] (!%p784_p10)   ;;  %s2411_s18 = smul.u32 (!%p784_p10), 24, %s790_s30 }
  0x7e   : > { %v2454_v18 = vld [vmem:[%s2978_s9 + $0x40] sm:$0xff] (!%p784_p10)   ;;  %v2458_v22 = vld [vmem:[%s2978_s9 + $0x48] sm:$0xff] (!%p784_p10)   ;;  %v2462_v26 = vld [vmem:[%s2978_s9 + $0x50] sm:$0xff] (!%p784_p10)  }
  0x7f   : > { %v2455_v19 = vld [vmem:[%s2978_s9 + $0xc0] sm:$0xff] (!%p784_p10)   ;;  %2218 = vmatprep.subr.bf16.mxu0 (!%p784_p10), %v2454_v18  ;;  %v2459_v23 = vld [vmem:[%s2978_s9 + $0xc8] sm:$0xff] (!%p784_p10)   ;;  %v2463_v27 = vld [vmem:[%s2978_s9 + $0xd0] sm:$0xff] (!%p784_p10)   ;;  %s820_s12 = scalar_lea.vmem (!%p784_p10), [#allocation3], %s2411_s18 }
  0x80   : > { %v2456_v20 = vld [vmem:[%s2978_s9] sm:$0xff] (!%p784_p10)   ;;  %2252 = vmatprep.subr.bf16.mxu1 (!%p784_p10), %v2455_v19  ;;  %v2460_v24 = vld [vmem:[%s2978_s9 + $0x8] sm:$0xff] (!%p784_p10)   ;;  %v2464_v28 = vld [vmem:[%s2978_s9 + $0x10] sm:$0xff] (!%p784_p10)  }
  0x81   : > { %v2457_v21 = vld [vmem:[%s2978_s9 + $0x80] sm:$0xff]   ;;  %2219 = vmatpush3.bf16.msra.mxu0 %v2456_v20  ;;  %v2461_v25 = vld [vmem:[%s2978_s9 + $0x88] sm:$0xff]   ;;  %v2465_v29 = vld [vmem:[%s2978_s9 + $0x90] sm:$0xff]   ;;  %s829_s7 = scalar_select %p828_p11, %s2595_s14, 1 }
  0x82   : > { %2253 = vmatpush3.bf16.msra.mxu1 %v2457_v21  ;;  %2220 = vmatprep.subr.bf16.mxu0 %v2458_v22  ;;  %v2466_v30 = vld [vmem:[%s2978_s9 + $0x58] sm:$0xff]   ;;  %v2470_v34 = vld [vmem:[%s2978_s9 + $0x60] sm:$0xff]   ;;  %v2474_v38 = vld [vmem:[%s2978_s9 + $0x68] sm:$0xff]   ;;  %s2192_s30 = sshll.u32 (%p2662_p6), %s2595_s14, 2 }
  0x83   : > { %2254 = vmatprep.subr.bf16.mxu1 %v2459_v23  ;;  %v2467_v31 = vld [vmem:[%s2978_s9 + $0xd8] sm:$0xff]   ;;  %v2471_v35 = vld [vmem:[%s2978_s9 + $0xe0] sm:$0xff]   ;;  %v2475_v39 = vld [vmem:[%s2978_s9 + $0xe8] sm:$0xff]   ;;  %s830_s11 = scalar_lea.vmem %s3179_s2, %s829_s7  ;;  %s1928_s23 = scalar_lea.vmem (%p2662_p6), %s3180_s3, %s2192_s30 }
  0x84   : > { %v2468_v32 = vld [vmem:[%s2978_s9 + $0x18] sm:$0xff]   ;;  %v2472_v36 = vld [vmem:[%s2978_s9 + $0x20] sm:$0xff]   ;;  %v2476_v40 = vld [vmem:[%s2978_s9 + $0x28] sm:$0xff]  }
  0x85   : > { %2221 = vmatpush3.bf16.msra.mxu0 %v2460_v24  ;;  %v2469_v33 = vld [vmem:[%s2978_s9 + $0x98] sm:$0xff]   ;;  %v2473_v37 = vld [vmem:[%s2978_s9 + $0xa0] sm:$0xff]   ;;  %v2477_v41 = vld [vmem:[%s2978_s9 + $0xa8] sm:$0xff]  }
  0x86   : > { %2255 = vmatpush3.bf16.msra.mxu1 %v2461_v25  ;;  %2222 = vmatprep.subr.bf16.mxu0 %v2462_v26  ;;  %v2478_v42 = vld [vmem:[%s2978_s9 + $0x70] sm:$0xff]   ;;  %v2482_v46 = vld [vmem:[%s2978_s9 + $0x78] sm:$0xff]   ;;  %v2492_v53 = vld [vmem:[%s2978_s9 + $0x140] sm:$0xff]  }
  0x87   : > { %2256 = vmatprep.subr.bf16.mxu1 %v2463_v27  ;;  %v2479_v43 = vld [vmem:[%s2978_s9 + $0xf0] sm:$0xff]   ;;  %v2483_v47 = vld [vmem:[%s2978_s9 + $0xf8] sm:$0xff]   ;;  %v2493_v54 = vld [vmem:[%s2978_s9 + $0x1c0] sm:$0xff]  }
  0x88   : > { %v2480_v44 = vld [vmem:[%s2978_s9 + $0x30] sm:$0xff]   ;;  %v2484_v49 = vld [vmem:[%s2978_s9 + $0x38] sm:$0xff]   ;;  %v2494_v55 = vld [vmem:[%s2978_s9 + $0x100] sm:$0xff]  }
  0x89   : > { %2223 = vmatpush3.bf16.msra.mxu0 %v2464_v28  ;;  %v2481_v45 = vld [vmem:[%s2978_s9 + $0xb0] sm:$0xff]   ;;  %v2485_v51 = vld [vmem:[%s2978_s9 + $0xb8] sm:$0xff]   ;;  %v2495_v56 = vld [vmem:[%s2978_s9 + $0x180] sm:$0xff]  }
  0x8a   : > { %2257 = vmatpush3.bf16.msra.mxu1 %v2465_v29  ;;  %2224 = vmatprep.subr.bf16.mxu0 %v2466_v30  ;;  %v2496_v57 = vld [vmem:[%s2978_s9 + $0x148] sm:$0xff]   ;;  %v2500_v62 = vld [vmem:[%s2978_s9 + $0x150] sm:$0xff]   ;;  %v2507_v2 = vld [vmem:[%s2978_s9 + $0x158] sm:$0xff]   ;;  %v2605_v30 = vmov 0.0  }
  0x8b   : > { %2258 = vmatprep.subr.bf16.mxu1 %v2467_v31  ;;  %v2497_v58 = vld [vmem:[%s2978_s9 + $0x1c8] sm:$0xff]   ;;  %v2501_v63 = vld [vmem:[%s2978_s9 + $0x1d0] sm:$0xff]   ;;  %v2508_v3 = vld [vmem:[%s2978_s9 + $0x1d8] sm:$0xff]  }
  0x8c   : > { %v2498_v60 = vld [vmem:[%s2978_s9 + $0x108] sm:$0xff]   ;;  %v2502_v0 = vld [vmem:[%s2978_s9 + $0x110] sm:$0xff]   ;;  %v2511_v5 = vld [vmem:[%s2978_s9 + $0x118] sm:$0xff]  }
  0x8d   : > { %2225 = vmatpush3.bf16.msra.mxu0 %v2468_v32  ;;  %v2499_v61 = vld [vmem:[%s2978_s9 + $0x188] sm:$0xff]   ;;  %v2503_v1 = vld [vmem:[%s2978_s9 + $0x190] sm:$0xff]   ;;  %v2512_v6 = vld [vmem:[%s2978_s9 + $0x198] sm:$0xff]  }
  0x8e   : > { %2259 = vmatpush3.bf16.msra.mxu1 %v2469_v33  ;;  %2226 = vmatprep.subr.bf16.mxu0 %v2470_v34  ;;  %v2514_v8 = vld [vmem:[%s2978_s9 + $0x160] sm:$0xff]   ;;  %v2520_v13 = vld [vmem:[%s3177_s0 + $0x90] ss:$36 sps:$4 sm:$0xff]   ;;  %v2521_v14 = vld [vmem:[%s2978_s9 + $0x168] sm:$0xff]  }
  0x8f   : > { %2260 = vmatprep.subr.bf16.mxu1 %v2471_v35  ;;  %v2515_v9 = vld [vmem:[%s2978_s9 + $0x1e0] sm:$0xff]   ;;  %v2522_v15 = vld [vmem:[%s2978_s9 + $0x1e8] sm:$0xff]   ;;  %v2527_v19 = vld [vmem:[%s3177_s0 + $0x98] ss:$36 sps:$4 sm:$0xff]  }
  0x90   : > { %v2516_v10 = vld [vmem:[%s2978_s9 + $0x120] sm:$0xff]   ;;  %v2525_v17 = vld [vmem:[%s2978_s9 + $0x128] sm:$0xff]   ;;  %v2528_v20 = vld [vmem:[%s2978_s9 + $0x170] sm:$0xff]  }
  0x91   : > { %2227 = vmatpush3.bf16.msra.mxu0 %v2472_v36  ;;  %v2517_v11 = vld [vmem:[%s2978_s9 + $0x1a0] sm:$0xff]   ;;  %v2526_v18 = vld [vmem:[%s2978_s9 + $0x1a8] sm:$0xff]   ;;  %v2529_v21 = vld [vmem:[%s2978_s9 + $0x1f0] sm:$0xff]  }
  0x92   : > { %2261 = vmatpush3.bf16.msra.mxu1 %v2473_v37  ;;  %2228 = vmatprep.subr.bf16.mxu0 %v2474_v38  ;;  %v2530_v22 = vld [vmem:[%s2978_s9 + $0x130] sm:$0xff]   ;;  %v2532_v24 = vld [vmem:[%s2978_s9 + $0x178] sm:$0xff]   ;;  %v2542_v33 = vld [vmem:[%s2978_s9 + $0x200] sm:$0xff]  }
  0x93   : > { %2262 = vmatprep.subr.bf16.mxu1 %v2475_v39  ;;  %v2531_v23 = vld [vmem:[%s2978_s9 + $0x1b0] sm:$0xff]   ;;  %v2533_v25 = vld [vmem:[%s2978_s9 + $0x1f8] sm:$0xff]   ;;  %v2543_v34 = vld [vmem:[%s2978_s9 + $0x208] sm:$0xff]  }
  0x94   : > { %v2534_v26 = vld [vmem:[%s2978_s9 + $0x138] sm:$0xff]   ;;  %v2536_v28 = vld [vmem:[%s3177_s0 + $0x10] ss:$36 sps:$4 sm:$0xff]   ;;  %v2547_v36 = vld [vmem:[%s3177_s0 + $0x64] ss:$36 sps:$4 sm:$0xff]  }
  0x95   : > { %2229 = vmatpush3.bf16.msra.mxu0 %v2476_v40  ;;  %v2535_v27 = vld [vmem:[%s2978_s9 + $0x1b8] sm:$0xff]   ;;  %v2549_v38 = vld [vmem:[%s2978_s9 + $0x210] sm:$0xff]   ;;  %v2550_v39 = vld [vmem:[%s3177_s0 + $0x60] ss:$36 sps:$4 sm:$0xff]  }
  0x96   : > { %2263 = vmatpush3.bf16.msra.mxu1 %v2477_v41  ;;  %2230 = vmatprep.subr.bf16.mxu0 %v2478_v42  ;;  %v2538_v29 = vld [vmem:[%s3177_s0 + $0x14] ss:$36 sps:$4 sm:$0xff]   ;;  %v2541_v32 = vld [vmem:[%s3177_s0 + $0x1c] ss:$36 sps:$4 sm:$0xff]   ;;  %v2552_v40 = vld [vmem:[%s3177_s0 + $0xa4] ss:$36 sps:$4 sm:$0xff]  }
  0x97   : > { %2264 = vmatprep.subr.bf16.mxu1 %v2479_v43  ;;  %v2539_v31 = vld [vmem:[%s3177_s0 + $0x18] ss:$36 sps:$4 sm:$0xff]   ;;  %v2555_v41 = vld [vmem:[%s3177_s0 + $0xac] ss:$36 sps:$4 sm:$0xff]   ;;  %v2554_v43 = vld [vmem:[%s3177_s0 + $0xa0] ss:$36 sps:$4 sm:$0xff]  }
  0x98   : > { %v2544_v35 = vld [vmem:[%s3177_s0 + $0x5c] ss:$36 sps:$4 sm:$0xff]  }
  0x99   : > { %2231 = vmatpush3.bf16.msra.mxu0 %v2480_v44  ;;  %v2546_v37 = vld [vmem:[%s3177_s0 + $0x58] ss:$36 sps:$4 sm:$0xff]   ;;  %v2557_v44 = vld [vmem:[%s2978_s9 + $0x220] sm:$0xff]  }
  0x9a   : > { %2265 = vmatpush3.bf16.msra.mxu1 %v2481_v45  ;;  %2232 = vmatprep.subr.bf16.mxu0 %v2482_v46  ;;  %v2551_v42 = vld [vmem:[%s2978_s9 + $0x218] sm:$0xff]   ;;  %v2558_v45 = vld [vmem:[%s3177_s0 + $0xa8] ss:$36 sps:$4 sm:$0xff]  }
  0x9b   : > { %2266 = vmatprep.subr.bf16.mxu1 %v2483_v47  ;;  %v2559_v46 = vld [vmem:[%s2978_s9 + $0x228] sm:$0xff]   ;;  %v2560_v47 = vld [vmem:[%s2978_s9 + $0x230] sm:$0xff]  }
  0x9d   : > { %2233 = vmatpush3.bf16.msra.mxu0 %v2484_v49  ;;  %v2562_v49 = vld [vmem:[%s3177_s0 + $0x20] ss:$36 sps:$4 sm:$0xff]  }
  0x9e   : > { %2267 = vmatpush3.bf16.msra.mxu1 %v2485_v51  ;;  %2286 = vmatprep.subr.bf16.mxu0 %v2492_v53  ;;  %v2564_v51 = vld [vmem:[%s3177_s0 + $0xb0] ss:$36 sps:$4 sm:$0xff]  }
  0x9f   : > { %2320 = vmatprep.subr.bf16.mxu1 %v2493_v54  ;;  %v2086_v54 = vld [vmem:[%s830_s11] ss:$0 sm:$0xff] }
  0xa0   : > { %1617 = vmatmul.mubr.bf16.vlgmr.msra.gmra.mrb[0].mxu0 %v2486_v48  ;;  %v2561_v48 = vld [vmem:[%s2978_s9 + $0x238] sm:$0xff]  }
  0xa1   : > { %1674 = vmatmul.mubr.bf16.vlgmr.msra.gmra.mrb[0].mxu1 %v2489_v50  ;;  %2287 = vmatpush3.bf16.msra.mxu0 %v2494_v55  ;;  %v2563_v50 = vld [vmem:[%s3177_s0 + $0x68] ss:$36 sps:$4 sm:$0xff]  }
  0xa2   : > { %2321 = vmatpush3.bf16.msra.mxu1 %v2495_v56  ;;  %1624 = vmatprep.mubr.bf16.mxu0 %v2504_v52 }
  0xa3   : > { %2288 = vmatprep.subr.bf16.mxu0 %v2496_v57  ;;  %2322 = vmatprep.subr.bf16.mxu1 %v2497_v58 }
  0xa4   : > { %1681 = vmatprep.mubr.bf16.mxu1 %v2509_v4 }
  0xa5   : > { %2289 = vmatpush3.bf16.msra.mxu0 %v2498_v60 }
  0xa6   : > { %2323 = vmatpush3.bf16.msra.mxu1 %v2499_v61  ;;  %2290 = vmatprep.subr.bf16.mxu0 %v2500_v62 }
  0xa7   : > { %2324 = vmatprep.subr.bf16.mxu1 %v2501_v63 }
  0xa8   : > { %1625 = vmatmul.mubr.bf16.gmra.mrb[4].mxu0 %v2506_v59 }
  0xa9   : > { %2291 = vmatpush3.bf16.msra.mxu0 %v2502_v0  ;;  %1682 = vmatmul.mubr.bf16.gmra.mrb[4].mxu1 %v2513_v7 }
  0xaa   : > { %2325 = vmatpush3.bf16.msra.mxu1 %v2503_v1  ;;  %2292 = vmatprep.subr.bf16.mxu0 %v2507_v2 }
  0xab   : > { %2326 = vmatprep.subr.bf16.mxu1 %v2508_v3  ;;  %1632 = vmatprep.mubr.bf16.mxu0 %v2518_v12 }
  0xac   : > { %1689 = vmatprep.mubr.bf16.mxu1 %v2523_v16 }
  0xad   : > { %2293 = vmatpush3.bf16.msra.mxu0 %v2511_v5 }
  0xae   : > { %2327 = vmatpush3.bf16.msra.mxu1 %v2512_v6  ;;  %2294 = vmatprep.subr.bf16.mxu0 %v2514_v8 }
  0xaf   : > { %2328 = vmatprep.subr.bf16.mxu1 %v2515_v9 }
  0xb0   : > { %1633 = vmatmul.mubr.bf16.gmra.mrb[8].mxu0 %v2520_v13 }
  0xb1   : > { %2295 = vmatpush3.bf16.msra.mxu0 %v2516_v10  ;;  %1690 = vmatmul.mubr.bf16.gmra.mrb[8].mxu1 %v2527_v19 }
  0xb2   : > { %2329 = vmatpush3.bf16.msra.mxu1 %v2517_v11  ;;  %2296 = vmatprep.subr.bf16.mxu0 %v2521_v14 }
  0xb3   : > { %2330 = vmatprep.subr.bf16.mxu1 %v2522_v15  ;;  %1730 = vmatprep.mubr.bf16.mxu0 %v2538_v29 }
  0xb4   : > { %1787 = vmatprep.mubr.bf16.mxu1 %v2541_v32 }
  0xb5   : > { %2297 = vmatpush3.bf16.msra.mxu0 %v2525_v17 }
  0xb6   : > { %2331 = vmatpush3.bf16.msra.mxu1 %v2526_v18  ;;  %2298 = vmatprep.subr.bf16.mxu0 %v2528_v20 }
  0xb7   : > { %2332 = vmatprep.subr.bf16.mxu1 %v2529_v21 }
  0xb9   : > { %2299 = vmatpush3.bf16.msra.mxu0 %v2530_v22 }
  0xba   : > { %2333 = vmatpush3.bf16.msra.mxu1 %v2531_v23  ;;  %2300 = vmatprep.subr.bf16.mxu0 %v2532_v24 }
  0xbb   : > { %2334 = vmatprep.subr.bf16.mxu1 %v2533_v25 }
  0xbd   : > { %2301 = vmatpush3.bf16.msra.mxu0 %v2534_v26 }
  0xbe   : > { %2335 = vmatpush3.bf16.msra.mxu1 %v2535_v27  ;;  %2365 = vmatprep.subr.bf16.mxu0 %v2605_v30 }
  0xbf   : > { %2393 = vmatprep.subr.bf16.mxu1 %v2605_v30 }
  0xc0   : > { %1731 = vmatmul.mubr.bf16.vlgmr.msra.gmra.mrb[12].mxu0 %v2536_v28 }
  0xc1   : > { %1788 = vmatmul.mubr.bf16.vlgmr.msra.gmra.mrb[12].mxu1 %v2539_v31  ;;  %2366 = vmatpush3.bf16.msra.mxu0 %v2542_v33 }
  0xc2   : > { %2401 = vmatpush3.bf16.msra.mxu1 %v2542_v33  ;;  %2367 = vmatprep.subr.bf16.mxu0 %v2605_v30 }
  0xc3   : > { %2394 = vmatprep.subr.bf16.mxu1 %v2605_v30  ;;  %1738 = vmatprep.mubr.bf16.mxu0 %v2544_v35 }
  0xc4   : > { %1795 = vmatprep.mubr.bf16.mxu1 %v2547_v36 }
  0xc5   : > { %2368 = vmatpush3.bf16.msra.mxu0 %v2543_v34 }
  0xc6   : > { %2402 = vmatpush3.bf16.msra.mxu1 %v2543_v34  ;;  %2369 = vmatprep.subr.bf16.mxu0 %v2605_v30 }
  0xc7   : > { %2395 = vmatprep.subr.bf16.mxu1 %v2605_v30 }
  0xc8   : > { %1739 = vmatmul.mubr.bf16.gmra.mrb[16].mxu0 %v2546_v37 }
  0xc9   : > { %2370 = vmatpush3.bf16.msra.mxu0 %v2549_v38  ;;  %1796 = vmatmul.mubr.bf16.gmra.mrb[16].mxu1 %v2550_v39 }
  0xca   : > { %2403 = vmatpush3.bf16.msra.mxu1 %v2549_v38  ;;  %2371 = vmatprep.subr.bf16.mxu0 %v2605_v30 }
  0xcb   : > { %2396 = vmatprep.subr.bf16.mxu1 %v2605_v30  ;;  %1746 = vmatprep.mubr.bf16.mxu0 %v2552_v40 }
  0xcc   : > { %1803 = vmatprep.mubr.bf16.mxu1 %v2555_v41 }
  0xcd   : > { %2372 = vmatpush3.bf16.msra.mxu0 %v2551_v42 }
  0xce   : > { %2404 = vmatpush3.bf16.msra.mxu1 %v2551_v42  ;;  %2373 = vmatprep.subr.bf16.mxu0 %v2605_v30 }
  0xcf   : > { %2397 = vmatprep.subr.bf16.mxu1 %v2605_v30 }
  0xd0   : > { %1747 = vmatmul.mubr.bf16.gmra.mrb[20].mxu0 %v2554_v43 }
  0xd1   : > { %2374 = vmatpush3.bf16.msra.mxu0 %v2557_v44  ;;  %1804 = vmatmul.mubr.bf16.gmra.mrb[20].mxu1 %v2558_v45 }
  0xd2   : > { %2405 = vmatpush3.bf16.msra.mxu1 %v2557_v44  ;;  %2375 = vmatprep.subr.bf16.mxu0 %v2605_v30 }
  0xd3   : > { %2398 = vmatprep.subr.bf16.mxu1 %v2605_v30  ;;  %2381 = vmatprep.mubr.msk.bf16.mxu0 %vm2606_vm0, %v2605_v30 }
  0xd4   : > { %2385 = vmatprep.mubr.msk.bf16.mxu1 %vm2606_vm0, %v2605_v30 }
  0xd5   : > { %2376 = vmatpush3.bf16.msra.mxu0 %v2559_v46 }
  0xd6   : > { %2406 = vmatpush3.bf16.msra.mxu1 %v2559_v46  ;;  %2377 = vmatprep.subr.bf16.mxu0 %v2605_v30 }
  0xd7   : > { %2399 = vmatprep.subr.bf16.mxu1 %v2605_v30 }
  0xd9   : > { %2378 = vmatpush3.bf16.msra.mxu0 %v2560_v47 }
  0xda   : > { %2407 = vmatpush3.bf16.msra.mxu1 %v2560_v47  ;;  %2379 = vmatprep.subr.bf16.mxu0 %v2605_v30 }
  0xdb   : > { %2400 = vmatprep.subr.bf16.mxu1 %v2605_v30 }
  0xdd   : > { %2380 = vmatpush3.bf16.msra.mxu0 %v2561_v48 }
  0xde   : > { %2408 = vmatpush3.bf16.msra.mxu1 %v2561_v48 }
  0xe0   : > { %2382 = vmatmul.mubr.bf16.vlgmr.msra.gmra.mrb[24].mxu0 %v2562_v49 }
  0xe1   : > { %2386 = vmatmul.mubr.bf16.vlgmr.msra.gmra.mrb[24].mxu1 %v2563_v50 }
  0xe2   : > { %2389 = vmatprep.mubr.msk.bf16.mxu1 %vm2606_vm0, %v2605_v30 }
  0xe9   : > { %2390 = vmatmul.mubr.bf16.gmra.mrb[28].mxu1 %v2564_v51 }
 0x173   : > { %v2234_v52 = vpop.f32.mrb[0].mxu0 }
 0x174   : > { %v2268_v53 = vpop.f32.mrb[0].mxu1  ;;  %v2235_v55 = vpop.f32.mrb[1].mxu0 }
 0x175   : > { %v2236_v56 = vadd.f32 %v2235_v55, %v2234_v52  ;;  %v2269_v57 = vpop.f32.mrb[1].mxu1  ;;  %v2237_v58 = vpop.f32.mrb[2].mxu0 }
 0x176   : > { %v2270_v59 = vadd.f32 %v2269_v57, %v2268_v53  ;;  %v2271_v60 = vpop.f32.mrb[2].mxu1  ;;  %v2238_v61 = vpop.f32.mrb[3].mxu0 }
 0x177   : > { %v1619_v62 = vadd.f32 %v2236_v56, %v2086_v54  ;;  %v2239_v63 = vadd.f32 %v2238_v61, %v2237_v58  ;;  %v2272_v0 = vpop.f32.mrb[3].mxu1 }
 0x178   : > { %v2273_v1 = vadd.f32 %v2272_v0, %v2271_v60 }
 0x179   : > { %v1676_v2 = vadd.f32 %v2270_v59, %v1619_v62  ;;  %v1622_v3 = vadd.f32 %v2239_v63, %v2086_v54 }
 0x17b   : > { %v1679_v4 = vadd.f32 %v2273_v1, %v1622_v3  ;;  %v2240_v5 = vpop.f32.mrb[4].mxu0 }
 0x17c   : > { %v2241_v6 = vpop.f32.mrb[5].mxu0  ;;  %v2274_v12 = vpop.f32.mrb[4].mxu1 }
 0x17d   : > { %v2242_v7 = vadd.f32 %v2241_v6, %v2240_v5  ;;  %v2243_v8 = vpop.f32.mrb[6].mxu0  ;;  %v2275_v13 = vpop.f32.mrb[5].mxu1 }
 0x17e   : > { %v2244_v9 = vpop.f32.mrb[7].mxu0  ;;  %v2276_v15 = vadd.f32 %v2275_v13, %v2274_v12  ;;  %v2277_v16 = vpop.f32.mrb[6].mxu1 }
 0x17f   : > { %v2245_v10 = vadd.f32 %v2244_v9, %v2243_v8  ;;  %v1627_v11 = vadd.f32 %v2242_v7, %v2086_v54  ;;  %v2278_v17 = vpop.f32.mrb[7].mxu1 }
 0x180   : > { %v2279_v19 = vadd.f32 %v2278_v17, %v2277_v16 }
 0x181   : > { %v1630_v14 = vadd.f32 %v2245_v10, %v2086_v54  ;;  %v1684_v18 = vadd.f32 %v2276_v15, %v1627_v11 }
 0x183   : > { %v1687_v20 = vadd.f32 %v2279_v19, %v1630_v14  ;;  %v2246_v21 = vpop.f32.mrb[8].mxu0 }
 0x184   : > { %v2247_v22 = vpop.f32.mrb[9].mxu0  ;;  %v2280_v28 = vpop.f32.mrb[8].mxu1 }
 0x185   : > { %v2248_v23 = vadd.f32 %v2247_v22, %v2246_v21  ;;  %v2249_v24 = vpop.f32.mrb[10].mxu0  ;;  %v2281_v29 = vpop.f32.mrb[9].mxu1 }
 0x186   : > { %v2250_v25 = vpop.f32.mrb[11].mxu0  ;;  %v2282_v31 = vadd.f32 %v2281_v29, %v2280_v28  ;;  %v2283_v32 = vpop.f32.mrb[10].mxu1 }
 0x187   : > { %v2251_v26 = vadd.f32 %v2250_v25, %v2249_v24  ;;  %v1635_v27 = vadd.f32 %v2248_v23, %v2086_v54  ;;  %v2284_v33 = vpop.f32.mrb[11].mxu1 }
 0x188   : > { %v2285_v35 = vadd.f32 %v2284_v33, %v2283_v32 }
 0x189   : > { %v1638_v30 = vadd.f32 %v2251_v26, %v2086_v54  ;;  %v1692_v34 = vadd.f32 %v2282_v31, %v1635_v27 }
 0x18b   : > { %v1695_v36 = vadd.f32 %v2285_v35, %v1638_v30 }
 0x193   : > { %v2302_v37 = vpop.f32.mrb[12].mxu0 }
 0x194   : > { %v2336_v38 = vpop.f32.mrb[12].mxu1  ;;  %v2303_v39 = vpop.f32.mrb[13].mxu0 }
 0x195   : > { %v2304_v40 = vadd.f32 %v2303_v39, %v2302_v37  ;;  %v2337_v41 = vpop.f32.mrb[13].mxu1  ;;  %v2305_v42 = vpop.f32.mrb[14].mxu0 }
 0x196   : > { %v2338_v43 = vadd.f32 %v2337_v41, %v2336_v38  ;;  %v2339_v44 = vpop.f32.mrb[14].mxu1  ;;  %v2306_v45 = vpop.f32.mrb[15].mxu0 }
 0x197   : > { %v1733_v46 = vadd.f32 %v2304_v40, %v1676_v2  ;;  %v2307_v47 = vadd.f32 %v2306_v45, %v2305_v42  ;;  %v2340_v48 = vpop.f32.mrb[15].mxu1 }
 0x198   : > { %v2341_v49 = vadd.f32 %v2340_v48, %v2339_v44 }
 0x199   : > { %v1736_v50 = vadd.f32 %v2307_v47, %v1679_v4  ;;  %v1790_v51 = vadd.f32 %v2338_v43, %v1733_v46 }
 0x19b   : > { %v2308_v52 = vpop.f32.mrb[16].mxu0  ;;  %v1793_v53 = vadd.f32 %v2341_v49, %v1736_v50 }
 0x19c   : > { %v2309_v54 = vpop.f32.mrb[17].mxu0  ;;  %v2342_v55 = vpop.f32.mrb[16].mxu1 }
 0x19d   : > { %v2310_v56 = vadd.f32 %v2309_v54, %v2308_v52  ;;  %v2311_v57 = vpop.f32.mrb[18].mxu0  ;;  %v2343_v58 = vpop.f32.mrb[17].mxu1 }
 0x19e   : > { %v2312_v59 = vpop.f32.mrb[19].mxu0  ;;  %v2344_v60 = vadd.f32 %v2343_v58, %v2342_v55  ;;  %v2345_v61 = vpop.f32.mrb[18].mxu1 }
 0x19f   : > { %v1741_v62 = vadd.f32 %v2310_v56, %v1684_v18  ;;  %v2313_v63 = vadd.f32 %v2312_v59, %v2311_v57  ;;  %v2346_v0 = vpop.f32.mrb[19].mxu1 }
 0x1a0   : > { %v2347_v1 = vadd.f32 %v2346_v0, %v2345_v61 }
 0x1a1   : > { %v1744_v2 = vadd.f32 %v2313_v63, %v1687_v20  ;;  %v1798_v3 = vadd.f32 %v2344_v60, %v1741_v62 }
 0x1a3   : > { %v2314_v5 = vpop.f32.mrb[20].mxu0  ;;  %v1801_v6 = vadd.f32 %v2347_v1, %v1744_v2 }
 0x1a4   : > { %v2315_v4 = vpop.f32.mrb[21].mxu0  ;;  %v2348_v7 = vpop.f32.mrb[20].mxu1 }
 0x1a5   : > { %v2316_v8 = vadd.f32 %v2315_v4, %v2314_v5  ;;  %v2317_v9 = vpop.f32.mrb[22].mxu0  ;;  %v2349_v10 = vpop.f32.mrb[21].mxu1 }
 0x1a6   : > { %v2318_v11 = vpop.f32.mrb[23].mxu0  ;;  %v2350_v12 = vadd.f32 %v2349_v10, %v2348_v7  ;;  %v2351_v13 = vpop.f32.mrb[22].mxu1 }
 0x1a7   : > { %v1749_v14 = vadd.f32 %v2316_v8, %v1692_v34  ;;  %v2319_v15 = vadd.f32 %v2318_v11, %v2317_v9  ;;  %v2352_v16 = vpop.f32.mrb[23].mxu1 }
 0x1a8   : > { %v2353_v17 = vadd.f32 %v2352_v16, %v2351_v13 }
 0x1a9   : > { %v1752_v18 = vadd.f32 %v2319_v15, %v1695_v36  ;;  %v1806_v19 = vadd.f32 %v2350_v12, %v1749_v14 }
 0x1ab   : > { %v1809_v21 = vadd.f32 %v2353_v17, %v1752_v18 }
 0x1b3   : > { %v1846_v20 = vpop.f32.mrb[24].mxu0 }
 0x1b4   : > { %v1847_v22 = vadd.f32 %v1846_v20, %v1790_v51  ;;  %v1854_v23 = vpop.f32.mrb[24].mxu1  ;;  %v2383_v24 = vpop.f32.mrb[25].mxu0 }
 0x1b5   : > { %v1855_v25 = vadd.f32 %v1854_v23, %v1798_v3  ;;  %v2387_v26 = vpop.f32.mrb[25].mxu1  ;;  %v1849_v27 = vpop.f32.mrb[26].mxu0 }
 0x1b6   : > { %v1875_v28 = vmul.f32 0.01, %v1847_v22  ;;  %v1850_v29 = vadd.f32 %v1849_v27, %v1793_v53  ;;  %v1857_v30 = vpop.f32.mrb[26].mxu1  ;;  %v2384_v31 = vpop.f32.mrb[27].mxu0  ;;  %vm1869_vm1 = vcmp.gt.f32.partialorder %v1847_v22, 0.0 }
 0x1b7   : > { %v1877_v32 = vmul.f32 0.01, %v1855_v25  ;;  %v1858_v33 = vadd.f32 %v1857_v30, %v1801_v6  ;;  %v2388_v34 = vpop.f32.mrb[27].mxu1  ;;  %vm1871_vm2 = vcmp.gt.f32.partialorder %v1855_v25, 0.0 }
 0x1b8   : > { %vm1870_vm3 = vcmp.gt.f32.partialorder %v1850_v29, 0.0  ;;  %v1876_v35 = vmul.f32 0.01, %v1850_v29  ;;  %v1881_v37 = vsel %vm1869_vm1, %v1847_v22, %v1875_v28 }
 0x1b9   : > { %vm1872_vm4 = vcmp.gt.f32.partialorder %v1858_v33, 0.0  ;;  %v1878_v36 = vmul.f32 0.01, %v1858_v33  ;;  %v1883_v39 = vsel %vm1871_vm2, %v1855_v25, %v1877_v32 }
 0x1ba   : > { %v1882_v38 = vsel %vm1870_vm3, %v1850_v29, %v1876_v35 }
 0x1bb   : > { %v2204_v40 = vpack.c.bf16 %v1882_v38, %v1881_v37  ;;  %v1884_v41 = vsel %vm1872_vm4, %v1858_v33, %v1878_v36 }
 0x1bc   : > { %v2209_v42 = vpack.c.bf16 %v1884_v41, %v1883_v39  ;;  %v1862_v43 = vpop.f32.mrb[28].mxu1 }
 0x1bd   : > { %2205 = vst [vmem:[%s820_s12] sm:$0xff] %v2204_v40   ;;  %v1863_v44 = vadd.f32 %v1862_v43, %v1806_v19  ;;  %v2391_v45 = vpop.f32.mrb[29].mxu1 }
 0x1be   : > { %2216 = vst [vmem:[%s820_s12 + $0x8] sm:$0xff] %v2209_v42   ;;  %v1865_v46 = vpop.f32.mrb[30].mxu1 }
 0x1bf   : > { %v1879_v47 = vmul.f32 0.01, %v1863_v44  ;;  %v1866_v48 = vadd.f32 %v1865_v46, %v1809_v21  ;;  %v2392_v49 = vpop.f32.mrb[31].mxu1  ;;  %vm1873_vm5 = vcmp.gt.f32.partialorder %v1863_v44, 0.0 }
 0x1c0   : > { %1923 = sbr.rel (!%p2662_p6) target bundleno = 463 (0x1cf), region = 77 }
 0x1c1   : > { %vm1874_vm6 = vcmp.gt.f32.partialorder %v1866_v48, 0.0  ;;  %v1880_v50 = vmul.f32 0.01, %v1866_v48  ;;  %v1885_v51 = vsel %vm1873_vm5, %v1863_v44, %v1879_v47 }
 0x1c3   : > { %v1886_v52 = vsel %vm1874_vm6, %v1866_v48, %v1880_v50 }
 0x1c4   : > { %v2214_v53 = vpack.c.bf16 %v1886_v52, %v1885_v51  ;;  %v1944_v54 = vld [vmem:[%s820_s12] sm:$0xf] (%p2662_p6)  ;;  %v1946_v55 = vld [vmem:[%s820_s12 + $0x4] sm:$0xf] (%p2662_p6) }
 0x1c5   : > { %v1948_v56 = vld [vmem:[%s820_s12 + $0x8] sm:$0xf] (%p2662_p6)  ;;  %v1950_v57 = vld [vmem:[%s820_s12 + $0xc] sm:$0xf] (%p2662_p6)  ;;  %1945 = vst [vmem:[%s1928_s23] sm:$0xf] (%p2662_p6), %v1944_v54 }
 0x1c6   : > { %2217 = vst [vmem:[%s820_s12 + $0x10] sm:$0xff] %v2214_v53   ;;  %1947 = vst [vmem:[%s1928_s23 + $0x8] sm:$0xf] (%p2662_p6), %v1946_v55 }
 0x1c7   : > { %1949 = vst [vmem:[%s1928_s23 + $0x10] sm:$0xf] %v1948_v56  ;;  %1951 = vst [vmem:[%s1928_s23 + $0x18] sm:$0xf] %v1950_v57 }
 0x1cd   : > { %v1952_v58 = vld [vmem:[%s820_s12 + $0x10] sm:$0xf]  ;;  %v1954_v59 = vld [vmem:[%s820_s12 + $0x14] sm:$0xf] }
 0x1ce   : > { %1953 = vst [vmem:[%s1928_s23 + $0x20] sm:$0xf] %v1952_v58  ;;  %1955 = vst [vmem:[%s1928_s23 + $0x28] sm:$0xf] %v1954_v59 }
 0x1cf PF: > { %s13_s16 = sadd.s32 1, %s2603_s16   ;;  %s3182_s12 = smov %s2591_s13 }
 0x1d0   : > { %p10_p12 = scmp.ge.s32.totalorder %s13_s16, 4   ;;  %s3183_s13 = smov %s2667_s22 }
 0x1d1   : > { %s3184_s14 = smov %s2599_s15  ;;  %s3185_s15 = smov %s3187_s17 }
 0x1d2   :  { %12 = sbr.rel (!%p10_p12) target bundleno = 3 (0x3), region = 155 }

// kernel: encoder_forward_pallas.9
= control target key start
LH: loop header
LB: loop body
LE: loop exit
PB: predicated region body
PF: predicated region fallthrough
CT: control target
= control target key end

     0   :  { %vm6573_vm8 = vcmask 517120   ;;  %s11298_s1 = inlined_call_operand.vmem [shape: bf16[2304,512], index: 1, kind: input, shape index: {}]   ;;  %s11299_s0 = inlined_call_operand.vmem [shape: bf16[12,2304], index: 0, kind: input, shape index: {}]   ;;  %s11300_s3 = inlined_call_operand.vmem [shape: bf16[3072,64], index: 3, kind: input, shape index: {}]   ;;  %s11301_s2 = inlined_call_operand.vmem [shape: f32[1,512], index: 2, kind: input, shape index: {}]   ;;  %s11302_s4 = inlined_call_operand.vmem [shape: f32[1,64], index: 4, kind: input, shape index: {}]   ;;  %s11303_s5 = inlined_call_operand.vmem [shape: f32[2,64], index: 5, kind: output, shape index: {}]  }
   0x1   :  { %v7734_v0 = vld [vmem:[%s11298_s1 + $0x4] ss:$16 sps:$4 sm:$0xff]   ;;  %v7736_v1 = vld [vmem:[%s11298_s1 + $0xc] ss:$16 sps:$4 sm:$0xff]   ;;  %v7738_v2 = vld [vmem:[%s11298_s1] ss:$16 sps:$4 sm:$0xff]  }
   0x2   :  { %3607 = vmatprep.subr.bf16.mxu0 %v7734_v0  ;;  %v7739_v3 = vld [vmem:[%s11298_s1 + $0x8] ss:$16 sps:$4 sm:$0xff]   ;;  %3994 = vmatprep.subr.bf16.mxu1 %v7736_v1  ;;  %v7740_v4 = vld [vmem:[%s11298_s1 + $0x24] ss:$16 sps:$4 sm:$0xff]   ;;  %v7742_v5 = vld [vmem:[%s11298_s1 + $0x2c] ss:$16 sps:$4 sm:$0xff]  }
   0x3   :  { %3608 = vmatpush1.bf16.msra.mxu0 %v7738_v2  ;;  %3995 = vmatpush1.bf16.msra.mxu1 %v7739_v3  ;;  %v7744_v6 = vld [vmem:[%s11298_s1 + $0x20] ss:$16 sps:$4 sm:$0xff]   ;;  %v7745_v7 = vld [vmem:[%s11298_s1 + $0x28] ss:$16 sps:$4 sm:$0xff]   ;;  %v7746_v8 = vld [vmem:[%s11298_s1 + $0x44] ss:$16 sps:$4 sm:$0xff]  }
   0x4   :  { %3609 = vmatprep.subr.bf16.mxu0 %v7740_v4  ;;  %3996 = vmatprep.subr.bf16.mxu1 %v7742_v5  ;;  %v7748_v9 = vld [vmem:[%s11298_s1 + $0x4c] ss:$16 sps:$4 sm:$0xff]   ;;  %v7750_v10 = vld [vmem:[%s11298_s1 + $0x40] ss:$16 sps:$4 sm:$0xff]   ;;  %v7751_v11 = vld [vmem:[%s11298_s1 + $0x48] ss:$16 sps:$4 sm:$0xff]  }
   0x5   :  { %v7752_v12 = vld [vmem:[%s11298_s1 + $0x64] ss:$16 sps:$4 sm:$0xff]   ;;  %v7754_v13 = vld [vmem:[%s11298_s1 + $0x6c] ss:$16 sps:$4 sm:$0xff]   ;;  %v7756_v14 = vld [vmem:[%s11298_s1 + $0x60] ss:$16 sps:$4 sm:$0xff]  }
   0x6   :  { %v7757_v15 = vld [vmem:[%s11298_s1 + $0x68] ss:$16 sps:$4 sm:$0xff]   ;;  %v7758_v16 = vld [vmem:[%s11298_s1 + $0x84] ss:$16 sps:$4 sm:$0xff]   ;;  %v7760_v17 = vld [vmem:[%s11298_s1 + $0x8c] ss:$16 sps:$4 sm:$0xff]  }
   0x7   :  { %3610 = vmatpush1.bf16.msra.mxu0 %v7744_v6  ;;  %3997 = vmatpush1.bf16.msra.mxu1 %v7745_v7  ;;  %v7762_v18 = vld [vmem:[%s11298_s1 + $0x80] ss:$16 sps:$4 sm:$0xff]   ;;  %v7763_v19 = vld [vmem:[%s11298_s1 + $0x88] ss:$16 sps:$4 sm:$0xff]   ;;  %v7764_v20 = vld [vmem:[%s11298_s1 + $0xa4] ss:$16 sps:$4 sm:$0xff]  }
   0x8   :  { %3611 = vmatprep.subr.bf16.mxu0 %v7746_v8  ;;  %3998 = vmatprep.subr.bf16.mxu1 %v7748_v9  ;;  %v7766_v21 = vld [vmem:[%s11298_s1 + $0xac] ss:$16 sps:$4 sm:$0xff]   ;;  %v7768_v22 = vld [vmem:[%s11298_s1 + $0xa0] ss:$16 sps:$4 sm:$0xff]   ;;  %v7769_v23 = vld [vmem:[%s11298_s1 + $0xa8] ss:$16 sps:$4 sm:$0xff]  }
   0x9   :  { %v7770_v24 = vld [vmem:[%s11298_s1 + $0xc4] ss:$16 sps:$4 sm:$0xff]   ;;  %v7772_v25 = vld [vmem:[%s11298_s1 + $0xcc] ss:$16 sps:$4 sm:$0xff]   ;;  %v7774_v26 = vld [vmem:[%s11298_s1 + $0xc0] ss:$16 sps:$4 sm:$0xff]  }
   0xa   :  { %v7775_v27 = vld [vmem:[%s11298_s1 + $0xc8] ss:$16 sps:$4 sm:$0xff]   ;;  %v7776_v28 = vld [vmem:[%s11298_s1 + $0xe4] ss:$16 sps:$4 sm:$0xff]   ;;  %v7778_v29 = vld [vmem:[%s11298_s1 + $0xec] ss:$16 sps:$4 sm:$0xff]  }
   0xb   :  { %3612 = vmatpush1.bf16.msra.mxu0 %v7750_v10  ;;  %3999 = vmatpush1.bf16.msra.mxu1 %v7751_v11  ;;  %v7780_v30 = vld [vmem:[%s11298_s1 + $0xe0] ss:$16 sps:$4 sm:$0xff]   ;;  %v7781_v31 = vld [vmem:[%s11298_s1 + $0xe8] ss:$16 sps:$4 sm:$0xff]   ;;  %v7782_v32 = vld [vmem:[%s11298_s1 + $0x104] ss:$16 sps:$4 sm:$0xff]  }
   0xc   :  { %3613 = vmatprep.subr.bf16.mxu0 %v7752_v12  ;;  %4000 = vmatprep.subr.bf16.mxu1 %v7754_v13  ;;  %v7784_v33 = vld [vmem:[%s11298_s1 + $0x10c] ss:$16 sps:$4 sm:$0xff]   ;;  %v7786_v34 = vld [vmem:[%s11298_s1 + $0x100] ss:$16 sps:$4 sm:$0xff]   ;;  %v7787_v35 = vld [vmem:[%s11298_s1 + $0x108] ss:$16 sps:$4 sm:$0xff]  }
   0xd   :  { %v7788_v36 = vld [vmem:[%s11298_s1 + $0x124] ss:$16 sps:$4 sm:$0xff]   ;;  %v7790_v37 = vld [vmem:[%s11298_s1 + $0x12c] ss:$16 sps:$4 sm:$0xff]   ;;  %v7792_v38 = vld [vmem:[%s11298_s1 + $0x120] ss:$16 sps:$4 sm:$0xff]  }
   0xe   :  { %v7793_v39 = vld [vmem:[%s11298_s1 + $0x128] ss:$16 sps:$4 sm:$0xff]   ;;  %v7794_v40 = vld [vmem:[%s11298_s1 + $0x144] ss:$16 sps:$4 sm:$0xff]   ;;  %v7796_v41 = vld [vmem:[%s11298_s1 + $0x14c] ss:$16 sps:$4 sm:$0xff]  }
   0xf   :  { %3614 = vmatpush1.bf16.msra.mxu0 %v7756_v14  ;;  %4001 = vmatpush1.bf16.msra.mxu1 %v7757_v15  ;;  %v7798_v42 = vld [vmem:[%s11298_s1 + $0x140] ss:$16 sps:$4 sm:$0xff]   ;;  %v7799_v43 = vld [vmem:[%s11298_s1 + $0x148] ss:$16 sps:$4 sm:$0xff]   ;;  %v7800_v44 = vld [vmem:[%s11298_s1 + $0x164] ss:$16 sps:$4 sm:$0xff]  }
  0x10   :  { %3615 = vmatprep.subr.bf16.mxu0 %v7758_v16  ;;  %4002 = vmatprep.subr.bf16.mxu1 %v7760_v17  ;;  %v7802_v45 = vld [vmem:[%s11298_s1 + $0x16c] ss:$16 sps:$4 sm:$0xff]   ;;  %v7804_v46 = vld [vmem:[%s11298_s1 + $0x160] ss:$16 sps:$4 sm:$0xff]   ;;  %v7805_v47 = vld [vmem:[%s11298_s1 + $0x168] ss:$16 sps:$4 sm:$0xff]  }
  0x11   :  { %v7806_v48 = vld [vmem:[%s11298_s1 + $0x184] ss:$16 sps:$4 sm:$0xff]   ;;  %v7808_v50 = vld [vmem:[%s11298_s1 + $0x18c] ss:$16 sps:$4 sm:$0xff]   ;;  %v7810_v51 = vld [vmem:[%s11298_s1 + $0x180] ss:$16 sps:$4 sm:$0xff]  }
  0x12   :  { %v7832_v49 = vld [vmem:[%s11299_s0 + $0x4] ss:$72 sps:$4 sm:$0x3f]   ;;  %v7811_v52 = vld [vmem:[%s11298_s1 + $0x188] ss:$16 sps:$4 sm:$0xff]  }
  0x13   :  { %3616 = vmatpush1.bf16.msra.mxu0 %v7762_v18  ;;  %4003 = vmatpush1.bf16.msra.mxu1 %v7763_v19  ;;  %v7812_v53 = vld [vmem:[%s11298_s1 + $0x1a4] ss:$16 sps:$4 sm:$0xff]   ;;  %v7814_v54 = vld [vmem:[%s11298_s1 + $0x1ac] ss:$16 sps:$4 sm:$0xff]   ;;  %v7816_v55 = vld [vmem:[%s11298_s1 + $0x1a0] ss:$16 sps:$4 sm:$0xff]  }
  0x14   :  { %3617 = vmatprep.subr.bf16.mxu0 %v7764_v20  ;;  %4004 = vmatprep.subr.bf16.mxu1 %v7766_v21  ;;  %v7817_v56 = vld [vmem:[%s11298_s1 + $0x1a8] ss:$16 sps:$4 sm:$0xff]   ;;  %v7818_v57 = vld [vmem:[%s11298_s1 + $0x1c4] ss:$16 sps:$4 sm:$0xff]   ;;  %v7820_v58 = vld [vmem:[%s11298_s1 + $0x1cc] ss:$16 sps:$4 sm:$0xff]  }
  0x15   :  { %3639 = vmatprep.mubr.bf16.mxu0 %v7832_v49  ;;  %4026 = vmatprep.mubr.bf16.mxu1 %v7832_v49  ;;  %v7822_v59 = vld [vmem:[%s11298_s1 + $0x1c0] ss:$16 sps:$4 sm:$0xff]   ;;  %v7823_v60 = vld [vmem:[%s11298_s1 + $0x1c8] ss:$16 sps:$4 sm:$0xff]   ;;  %v7824_v61 = vld [vmem:[%s11298_s1 + $0x1e4] ss:$16 sps:$4 sm:$0xff]  }
  0x16   :  { %v7826_v62 = vld [vmem:[%s11298_s1 + $0x1ec] ss:$16 sps:$4 sm:$0xff]   ;;  %v7828_v63 = vld [vmem:[%s11298_s1 + $0x1e0] ss:$16 sps:$4 sm:$0xff]   ;;  %v7829_v0 = vld [vmem:[%s11298_s1 + $0x1e8] ss:$16 sps:$4 sm:$0xff]  }
  0x17   :  { %3618 = vmatpush1.bf16.msra.mxu0 %v7768_v22  ;;  %4005 = vmatpush1.bf16.msra.mxu1 %v7769_v23  ;;  %v7835_v1 = vld [vmem:[%s11298_s1 + $0x204] ss:$16 sps:$4 sm:$0xff]   ;;  %v7838_v2 = vld [vmem:[%s11298_s1 + $0x20c] ss:$16 sps:$4 sm:$0xff]   ;;  %v7833_v4 = vld [vmem:[%s11298_s1 + $0x200] ss:$16 sps:$4 sm:$0xff]  }
  0x18   :  { %3619 = vmatprep.subr.bf16.mxu0 %v7770_v24  ;;  %4006 = vmatprep.subr.bf16.mxu1 %v7772_v25  ;;  %v7830_v3 = vld [vmem:[%s11299_s0] ss:$72 sps:$4 sm:$0x3f]   ;;  %v7841_v6 = vld [vmem:[%s11298_s1 + $0x224] ss:$16 sps:$4 sm:$0xff]  }
  0x19   :  { %v7836_v5 = vld [vmem:[%s11298_s1 + $0x208] ss:$16 sps:$4 sm:$0xff]   ;;  %v7844_v7 = vld [vmem:[%s11298_s1 + $0x22c] ss:$16 sps:$4 sm:$0xff]   ;;  %v7839_v8 = vld [vmem:[%s11298_s1 + $0x220] ss:$16 sps:$4 sm:$0xff]  }
  0x1a   :  { %v7842_v9 = vld [vmem:[%s11298_s1 + $0x228] ss:$16 sps:$4 sm:$0xff]   ;;  %v7847_v10 = vld [vmem:[%s11298_s1 + $0x244] ss:$16 sps:$4 sm:$0xff]   ;;  %v7850_v11 = vld [vmem:[%s11298_s1 + $0x24c] ss:$16 sps:$4 sm:$0xff]  }
  0x1b   :  { %3620 = vmatpush1.bf16.msra.mxu0 %v7774_v26  ;;  %4007 = vmatpush1.bf16.msra.mxu1 %v7775_v27  ;;  %v7845_v12 = vld [vmem:[%s11298_s1 + $0x240] ss:$16 sps:$4 sm:$0xff]   ;;  %v7848_v13 = vld [vmem:[%s11298_s1 + $0x248] ss:$16 sps:$4 sm:$0xff]   ;;  %v7853_v14 = vld [vmem:[%s11298_s1 + $0x264] ss:$16 sps:$4 sm:$0xff]  }
  0x1c   :  { %3621 = vmatprep.subr.bf16.mxu0 %v7776_v28  ;;  %4008 = vmatprep.subr.bf16.mxu1 %v7778_v29  ;;  %v7856_v15 = vld [vmem:[%s11298_s1 + $0x26c] ss:$16 sps:$4 sm:$0xff]   ;;  %v7851_v16 = vld [vmem:[%s11298_s1 + $0x260] ss:$16 sps:$4 sm:$0xff]   ;;  %v7854_v17 = vld [vmem:[%s11298_s1 + $0x268] ss:$16 sps:$4 sm:$0xff]  }
  0x1d   :  { %v7859_v18 = vld [vmem:[%s11298_s1 + $0x284] ss:$16 sps:$4 sm:$0xff]   ;;  %v7862_v19 = vld [vmem:[%s11298_s1 + $0x28c] ss:$16 sps:$4 sm:$0xff]   ;;  %v7857_v20 = vld [vmem:[%s11298_s1 + $0x280] ss:$16 sps:$4 sm:$0xff]  }
  0x1e   :  { %v7860_v21 = vld [vmem:[%s11298_s1 + $0x288] ss:$16 sps:$4 sm:$0xff]   ;;  %v7865_v22 = vld [vmem:[%s11298_s1 + $0x2a4] ss:$16 sps:$4 sm:$0xff]   ;;  %v7868_v23 = vld [vmem:[%s11298_s1 + $0x2ac] ss:$16 sps:$4 sm:$0xff]  }
  0x1f   :  { %3622 = vmatpush1.bf16.msra.mxu0 %v7780_v30  ;;  %4009 = vmatpush1.bf16.msra.mxu1 %v7781_v31  ;;  %v7863_v24 = vld [vmem:[%s11298_s1 + $0x2a0] ss:$16 sps:$4 sm:$0xff]   ;;  %v7866_v25 = vld [vmem:[%s11298_s1 + $0x2a8] ss:$16 sps:$4 sm:$0xff]   ;;  %v7871_v26 = vld [vmem:[%s11298_s1 + $0x2c4] ss:$16 sps:$4 sm:$0xff]  }
  0x20   :  { %3623 = vmatprep.subr.bf16.mxu0 %v7782_v32  ;;  %4010 = vmatprep.subr.bf16.mxu1 %v7784_v33  ;;  %v7874_v27 = vld [vmem:[%s11298_s1 + $0x2cc] ss:$16 sps:$4 sm:$0xff]   ;;  %v7869_v28 = vld [vmem:[%s11298_s1 + $0x2c0] ss:$16 sps:$4 sm:$0xff]   ;;  %v7872_v29 = vld [vmem:[%s11298_s1 + $0x2c8] ss:$16 sps:$4 sm:$0xff]  }
  0x21   :  { %v7877_v30 = vld [vmem:[%s11298_s1 + $0x2e4] ss:$16 sps:$4 sm:$0xff]   ;;  %v7880_v32 = vld [vmem:[%s11298_s1 + $0x2ec] ss:$16 sps:$4 sm:$0xff]   ;;  %v7875_v33 = vld [vmem:[%s11298_s1 + $0x2e0] ss:$16 sps:$4 sm:$0xff]  }
  0x22   :  { %v7931_v31 = vld [vmem:[%s11299_s0 + $0xc] ss:$72 sps:$4 sm:$0x3f]   ;;  %v7899_v49 = vld [vmem:[%s11298_s1 + $0x360] ss:$16 sps:$4 sm:$0xff]  }
  0x23   :  { %3624 = vmatpush1.bf16.msra.mxu0 %v7786_v34  ;;  %4011 = vmatpush1.bf16.msra.mxu1 %v7787_v35  ;;  %v7878_v34 = vld [vmem:[%s11298_s1 + $0x2e8] ss:$16 sps:$4 sm:$0xff]   ;;  %v7883_v35 = vld [vmem:[%s11298_s1 + $0x304] ss:$16 sps:$4 sm:$0xff]  }
  0x24   :  { %3625 = vmatprep.subr.bf16.mxu0 %v7788_v36  ;;  %4012 = vmatprep.subr.bf16.mxu1 %v7790_v37  ;;  %v7886_v36 = vld [vmem:[%s11298_s1 + $0x30c] ss:$16 sps:$4 sm:$0xff]   ;;  %v7881_v37 = vld [vmem:[%s11298_s1 + $0x300] ss:$16 sps:$4 sm:$0xff]  }
  0x27   :  { %3626 = vmatpush1.bf16.msra.mxu0 %v7792_v38  ;;  %4013 = vmatpush1.bf16.msra.mxu1 %v7793_v39  ;;  %v7884_v38 = vld [vmem:[%s11298_s1 + $0x308] ss:$16 sps:$4 sm:$0xff]   ;;  %v7889_v39 = vld [vmem:[%s11298_s1 + $0x324] ss:$16 sps:$4 sm:$0xff]  }
  0x28   :  { %3627 = vmatprep.subr.bf16.mxu0 %v7794_v40  ;;  %4014 = vmatprep.subr.bf16.mxu1 %v7796_v41  ;;  %v7892_v40 = vld [vmem:[%s11298_s1 + $0x32c] ss:$16 sps:$4 sm:$0xff]   ;;  %v7887_v41 = vld [vmem:[%s11298_s1 + $0x320] ss:$16 sps:$4 sm:$0xff]  }
  0x2b   :  { %3628 = vmatpush1.bf16.msra.mxu0 %v7798_v42  ;;  %4015 = vmatpush1.bf16.msra.mxu1 %v7799_v43  ;;  %v7890_v42 = vld [vmem:[%s11298_s1 + $0x328] ss:$16 sps:$4 sm:$0xff]   ;;  %v7895_v43 = vld [vmem:[%s11298_s1 + $0x344] ss:$16 sps:$4 sm:$0xff]  }
  0x2c   :  { %3629 = vmatprep.subr.bf16.mxu0 %v7800_v44  ;;  %4016 = vmatprep.subr.bf16.mxu1 %v7802_v45  ;;  %v7898_v44 = vld [vmem:[%s11298_s1 + $0x34c] ss:$16 sps:$4 sm:$0xff]   ;;  %v7893_v45 = vld [vmem:[%s11298_s1 + $0x340] ss:$16 sps:$4 sm:$0xff]  }
  0x2f   :  { %3630 = vmatpush1.bf16.msra.mxu0 %v7804_v46  ;;  %4017 = vmatpush1.bf16.msra.mxu1 %v7805_v47  ;;  %v7896_v46 = vld [vmem:[%s11298_s1 + $0x348] ss:$16 sps:$4 sm:$0xff]   ;;  %v7901_v47 = vld [vmem:[%s11298_s1 + $0x364] ss:$16 sps:$4 sm:$0xff]  }
  0x30   :  { %3631 = vmatprep.subr.bf16.mxu0 %v7806_v48  ;;  %4018 = vmatprep.subr.bf16.mxu1 %v7808_v50  ;;  %v7904_v48 = vld [vmem:[%s11298_s1 + $0x36c] ss:$16 sps:$4 sm:$0xff]   ;;  %v7902_v50 = vld [vmem:[%s11298_s1 + $0x368] ss:$16 sps:$4 sm:$0xff]  }
  0x33   :  { %3632 = vmatpush1.bf16.msra.mxu0 %v7810_v51  ;;  %4019 = vmatpush1.bf16.msra.mxu1 %v7811_v52  ;;  %v7907_v51 = vld [vmem:[%s11298_s1 + $0x384] ss:$16 sps:$4 sm:$0xff]   ;;  %v7910_v52 = vld [vmem:[%s11298_s1 + $0x38c] ss:$16 sps:$4 sm:$0xff]  }
  0x34   :  { %3633 = vmatprep.subr.bf16.mxu0 %v7812_v53  ;;  %4020 = vmatprep.subr.bf16.mxu1 %v7814_v54  ;;  %v7905_v53 = vld [vmem:[%s11298_s1 + $0x380] ss:$16 sps:$4 sm:$0xff]   ;;  %v7908_v54 = vld [vmem:[%s11298_s1 + $0x388] ss:$16 sps:$4 sm:$0xff]  }
  0x37   :  { %3634 = vmatpush1.bf16.msra.mxu0 %v7816_v55  ;;  %4021 = vmatpush1.bf16.msra.mxu1 %v7817_v56  ;;  %v7913_v55 = vld [vmem:[%s11298_s1 + $0x3a4] ss:$16 sps:$4 sm:$0xff]   ;;  %v7916_v56 = vld [vmem:[%s11298_s1 + $0x3ac] ss:$16 sps:$4 sm:$0xff]  }
  0x38   :  { %3635 = vmatprep.subr.bf16.mxu0 %v7818_v57  ;;  %4022 = vmatprep.subr.bf16.mxu1 %v7820_v58  ;;  %v7911_v57 = vld [vmem:[%s11298_s1 + $0x3a0] ss:$16 sps:$4 sm:$0xff]   ;;  %v7914_v58 = vld [vmem:[%s11298_s1 + $0x3a8] ss:$16 sps:$4 sm:$0xff]  }
  0x3b   :  { %3636 = vmatpush1.bf16.msra.mxu0 %v7822_v59  ;;  %4023 = vmatpush1.bf16.msra.mxu1 %v7823_v60  ;;  %v7919_v59 = vld [vmem:[%s11298_s1 + $0x3c4] ss:$16 sps:$4 sm:$0xff]   ;;  %v7922_v60 = vld [vmem:[%s11298_s1 + $0x3cc] ss:$16 sps:$4 sm:$0xff]  }
  0x3c   :  { %3637 = vmatprep.subr.bf16.mxu0 %v7824_v61  ;;  %4024 = vmatprep.subr.bf16.mxu1 %v7826_v62  ;;  %v7917_v61 = vld [vmem:[%s11298_s1 + $0x3c0] ss:$16 sps:$4 sm:$0xff]   ;;  %v7920_v62 = vld [vmem:[%s11298_s1 + $0x3c8] ss:$16 sps:$4 sm:$0xff]  }
  0x3f   :  { %3638 = vmatpush1.bf16.msra.mxu0 %v7828_v63  ;;  %4025 = vmatpush1.bf16.msra.mxu1 %v7829_v0  ;;  %v7925_v63 = vld [vmem:[%s11298_s1 + $0x3e4] ss:$16 sps:$4 sm:$0xff]   ;;  %v7928_v0 = vld [vmem:[%s11298_s1 + $0x3ec] ss:$16 sps:$4 sm:$0xff]  }
  0x40   :  { %3650 = vmatprep.subr.bf16.mxu0 %v7835_v1  ;;  %4037 = vmatprep.subr.bf16.mxu1 %v7838_v2  ;;  %v7923_v1 = vld [vmem:[%s11298_s1 + $0x3e0] ss:$16 sps:$4 sm:$0xff]   ;;  %v7926_v2 = vld [vmem:[%s11298_s1 + $0x3e8] ss:$16 sps:$4 sm:$0xff]  }
  0x42   :  { %3640 = vmatmul.mubr.bf16.vlgmr.msra.gmra.mrb[0].mxu0 %v7830_v3  ;;  %4027 = vmatmul.mubr.bf16.vlgmr.msra.gmra.mrb[0].mxu1 %v7830_v3  ;;  %v7934_v3 = vld [vmem:[%s11298_s1 + $0x404] ss:$16 sps:$4 sm:$0xff]  }
  0x43   :  { %3651 = vmatpush1.bf16.msra.mxu0 %v7833_v4  ;;  %4038 = vmatpush1.bf16.msra.mxu1 %v7836_v5  ;;  %v7937_v4 = vld [vmem:[%s11298_s1 + $0x40c] ss:$16 sps:$4 sm:$0xff]   ;;  %v7929_v5 = vld [vmem:[%s11299_s0 + $0x8] ss:$72 sps:$4 sm:$0x3f]  }
  0x44   :  { %3652 = vmatprep.subr.bf16.mxu0 %v7841_v6  ;;  %4039 = vmatprep.subr.bf16.mxu1 %v7844_v7  ;;  %v7932_v6 = vld [vmem:[%s11298_s1 + $0x400] ss:$16 sps:$4 sm:$0xff]   ;;  %v7935_v7 = vld [vmem:[%s11298_s1 + $0x408] ss:$16 sps:$4 sm:$0xff]  }
  0x45   :  { %3682 = vmatprep.mubr.bf16.mxu0 %v7931_v31  ;;  %4069 = vmatprep.mubr.bf16.mxu1 %v7931_v31  ;;  %v7968_v31 = vld [vmem:[%s11298_s1 + $0x4c0] ss:$16 sps:$4 sm:$0xff]  }
  0x47   :  { %3653 = vmatpush1.bf16.msra.mxu0 %v7839_v8  ;;  %4040 = vmatpush1.bf16.msra.mxu1 %v7842_v9  ;;  %v7940_v8 = vld [vmem:[%s11298_s1 + $0x424] ss:$16 sps:$4 sm:$0xff]   ;;  %v7943_v9 = vld [vmem:[%s11298_s1 + $0x42c] ss:$16 sps:$4 sm:$0xff]  }
  0x48   :  { %3654 = vmatprep.subr.bf16.mxu0 %v7847_v10  ;;  %4041 = vmatprep.subr.bf16.mxu1 %v7850_v11  ;;  %v7938_v10 = vld [vmem:[%s11298_s1 + $0x420] ss:$16 sps:$4 sm:$0xff]   ;;  %v7941_v11 = vld [vmem:[%s11298_s1 + $0x428] ss:$16 sps:$4 sm:$0xff]  }
  0x4b   :  { %3655 = vmatpush1.bf16.msra.mxu0 %v7845_v12  ;;  %4042 = vmatpush1.bf16.msra.mxu1 %v7848_v13  ;;  %v7946_v12 = vld [vmem:[%s11298_s1 + $0x444] ss:$16 sps:$4 sm:$0xff]  }
  0x4c   :  { %3656 = vmatprep.subr.bf16.mxu0 %v7853_v14  ;;  %4043 = vmatprep.subr.bf16.mxu1 %v7856_v15  ;;  %v8030_v13 = vld [vmem:[%s11299_s0 + $0x14] ss:$72 sps:$4 sm:$0x3f]   ;;  %v7944_v15 = vld [vmem:[%s11298_s1 + $0x440] ss:$16 sps:$4 sm:$0xff]  }
  0x4d   :  { %v7949_v14 = vld [vmem:[%s11298_s1 + $0x44c] ss:$16 sps:$4 sm:$0xff]  }
  0x4f   :  { %3657 = vmatpush1.bf16.msra.mxu0 %v7851_v16  ;;  %4044 = vmatpush1.bf16.msra.mxu1 %v7854_v17  ;;  %v7947_v16 = vld [vmem:[%s11298_s1 + $0x448] ss:$16 sps:$4 sm:$0xff]   ;;  %v7952_v17 = vld [vmem:[%s11298_s1 + $0x464] ss:$16 sps:$4 sm:$0xff]  }
  0x50   :  { %3658 = vmatprep.subr.bf16.mxu0 %v7859_v18  ;;  %4045 = vmatprep.subr.bf16.mxu1 %v7862_v19  ;;  %v7955_v18 = vld [vmem:[%s11298_s1 + $0x46c] ss:$16 sps:$4 sm:$0xff]   ;;  %v7950_v19 = vld [vmem:[%s11298_s1 + $0x460] ss:$16 sps:$4 sm:$0xff]  }
  0x53   :  { %3659 = vmatpush1.bf16.msra.mxu0 %v7857_v20  ;;  %4046 = vmatpush1.bf16.msra.mxu1 %v7860_v21  ;;  %v7953_v20 = vld [vmem:[%s11298_s1 + $0x468] ss:$16 sps:$4 sm:$0xff]   ;;  %v7958_v21 = vld [vmem:[%s11298_s1 + $0x484] ss:$16 sps:$4 sm:$0xff]  }
  0x54   :  { %3660 = vmatprep.subr.bf16.mxu0 %v7865_v22  ;;  %4047 = vmatprep.subr.bf16.mxu1 %v7868_v23  ;;  %v7961_v22 = vld [vmem:[%s11298_s1 + $0x48c] ss:$16 sps:$4 sm:$0xff]   ;;  %v7956_v23 = vld [vmem:[%s11298_s1 + $0x480] ss:$16 sps:$4 sm:$0xff]  }
  0x57   :  { %3661 = vmatpush1.bf16.msra.mxu0 %v7863_v24  ;;  %4048 = vmatpush1.bf16.msra.mxu1 %v7866_v25  ;;  %v7959_v24 = vld [vmem:[%s11298_s1 + $0x488] ss:$16 sps:$4 sm:$0xff]   ;;  %v7964_v25 = vld [vmem:[%s11298_s1 + $0x4a4] ss:$16 sps:$4 sm:$0xff]  }
  0x58   :  { %3662 = vmatprep.subr.bf16.mxu0 %v7871_v26  ;;  %4049 = vmatprep.subr.bf16.mxu1 %v7874_v27  ;;  %v7967_v26 = vld [vmem:[%s11298_s1 + $0x4ac] ss:$16 sps:$4 sm:$0xff]   ;;  %v7962_v27 = vld [vmem:[%s11298_s1 + $0x4a0] ss:$16 sps:$4 sm:$0xff]  }
  0x5b   :  { %3663 = vmatpush1.bf16.msra.mxu0 %v7869_v28  ;;  %4050 = vmatpush1.bf16.msra.mxu1 %v7872_v29  ;;  %v7965_v28 = vld [vmem:[%s11298_s1 + $0x4a8] ss:$16 sps:$4 sm:$0xff]   ;;  %v7970_v29 = vld [vmem:[%s11298_s1 + $0x4c4] ss:$16 sps:$4 sm:$0xff]  }
  0x5c   :  { %3664 = vmatprep.subr.bf16.mxu0 %v7877_v30  ;;  %4051 = vmatprep.subr.bf16.mxu1 %v7880_v32  ;;  %v7973_v30 = vld [vmem:[%s11298_s1 + $0x4cc] ss:$16 sps:$4 sm:$0xff]   ;;  %v7971_v32 = vld [vmem:[%s11298_s1 + $0x4c8] ss:$16 sps:$4 sm:$0xff]  }
  0x5f   :  { %3665 = vmatpush1.bf16.msra.mxu0 %v7875_v33  ;;  %4052 = vmatpush1.bf16.msra.mxu1 %v7878_v34  ;;  %v7976_v33 = vld [vmem:[%s11298_s1 + $0x4e4] ss:$16 sps:$4 sm:$0xff]   ;;  %v7979_v34 = vld [vmem:[%s11298_s1 + $0x4ec] ss:$16 sps:$4 sm:$0xff]  }
  0x60   :  { %3666 = vmatprep.subr.bf16.mxu0 %v7883_v35  ;;  %4053 = vmatprep.subr.bf16.mxu1 %v7886_v36  ;;  %v7974_v35 = vld [vmem:[%s11298_s1 + $0x4e0] ss:$16 sps:$4 sm:$0xff]   ;;  %v7977_v36 = vld [vmem:[%s11298_s1 + $0x4e8] ss:$16 sps:$4 sm:$0xff]  }
  0x63   :  { %3667 = vmatpush1.bf16.msra.mxu0 %v7881_v37  ;;  %4054 = vmatpush1.bf16.msra.mxu1 %v7884_v38  ;;  %v7982_v37 = vld [vmem:[%s11298_s1 + $0x504] ss:$16 sps:$4 sm:$0xff]   ;;  %v7985_v38 = vld [vmem:[%s11298_s1 + $0x50c] ss:$16 sps:$4 sm:$0xff]  }
  0x64   :  { %3668 = vmatprep.subr.bf16.mxu0 %v7889_v39  ;;  %4055 = vmatprep.subr.bf16.mxu1 %v7892_v40  ;;  %v7980_v39 = vld [vmem:[%s11298_s1 + $0x500] ss:$16 sps:$4 sm:$0xff]   ;;  %v7983_v40 = vld [vmem:[%s11298_s1 + $0x508] ss:$16 sps:$4 sm:$0xff]  }
  0x67   :  { %3669 = vmatpush1.bf16.msra.mxu0 %v7887_v41  ;;  %4056 = vmatpush1.bf16.msra.mxu1 %v7890_v42  ;;  %v7988_v41 = vld [vmem:[%s11298_s1 + $0x524] ss:$16 sps:$4 sm:$0xff]   ;;  %v7991_v42 = vld [vmem:[%s11298_s1 + $0x52c] ss:$16 sps:$4 sm:$0xff]  }
  0x68   :  { %3670 = vmatprep.subr.bf16.mxu0 %v7895_v43  ;;  %4057 = vmatprep.subr.bf16.mxu1 %v7898_v44  ;;  %v7986_v43 = vld [vmem:[%s11298_s1 + $0x520] ss:$16 sps:$4 sm:$0xff]   ;;  %v7989_v44 = vld [vmem:[%s11298_s1 + $0x528] ss:$16 sps:$4 sm:$0xff]  }
  0x6b   :  { %3671 = vmatpush1.bf16.msra.mxu0 %v7893_v45  ;;  %4058 = vmatpush1.bf16.msra.mxu1 %v7896_v46  ;;  %v7994_v45 = vld [vmem:[%s11298_s1 + $0x544] ss:$16 sps:$4 sm:$0xff]   ;;  %v7997_v46 = vld [vmem:[%s11298_s1 + $0x54c] ss:$16 sps:$4 sm:$0xff]  }
  0x6c   :  { %3672 = vmatprep.subr.bf16.mxu0 %v7901_v47  ;;  %4059 = vmatprep.subr.bf16.mxu1 %v7904_v48  ;;  %v7992_v47 = vld [vmem:[%s11298_s1 + $0x540] ss:$16 sps:$4 sm:$0xff]   ;;  %v7995_v48 = vld [vmem:[%s11298_s1 + $0x548] ss:$16 sps:$4 sm:$0xff]  }
  0x6f   :  { %3673 = vmatpush1.bf16.msra.mxu0 %v7899_v49  ;;  %4060 = vmatpush1.bf16.msra.mxu1 %v7902_v50  ;;  %v8000_v49 = vld [vmem:[%s11298_s1 + $0x564] ss:$16 sps:$4 sm:$0xff]   ;;  %v8003_v50 = vld [vmem:[%s11298_s1 + $0x56c] ss:$16 sps:$4 sm:$0xff]  }
  0x70   :  { %3674 = vmatprep.subr.bf16.mxu0 %v7907_v51  ;;  %4061 = vmatprep.subr.bf16.mxu1 %v7910_v52  ;;  %v7998_v51 = vld [vmem:[%s11298_s1 + $0x560] ss:$16 sps:$4 sm:$0xff]   ;;  %v8001_v52 = vld [vmem:[%s11298_s1 + $0x568] ss:$16 sps:$4 sm:$0xff]  }
  0x73   :  { %3675 = vmatpush1.bf16.msra.mxu0 %v7905_v53  ;;  %4062 = vmatpush1.bf16.msra.mxu1 %v7908_v54  ;;  %v8006_v53 = vld [vmem:[%s11298_s1 + $0x584] ss:$16 sps:$4 sm:$0xff]   ;;  %v8009_v54 = vld [vmem:[%s11298_s1 + $0x58c] ss:$16 sps:$4 sm:$0xff]  }
  0x74   :  { %3676 = vmatprep.subr.bf16.mxu0 %v7913_v55  ;;  %4063 = vmatprep.subr.bf16.mxu1 %v7916_v56  ;;  %v8004_v55 = vld [vmem:[%s11298_s1 + $0x580] ss:$16 sps:$4 sm:$0xff]   ;;  %v8007_v56 = vld [vmem:[%s11298_s1 + $0x588] ss:$16 sps:$4 sm:$0xff]  }
  0x77   :  { %3677 = vmatpush1.bf16.msra.mxu0 %v7911_v57  ;;  %4064 = vmatpush1.bf16.msra.mxu1 %v7914_v58  ;;  %v8012_v57 = vld [vmem:[%s11298_s1 + $0x5a4] ss:$16 sps:$4 sm:$0xff]   ;;  %v8015_v58 = vld [vmem:[%s11298_s1 + $0x5ac] ss:$16 sps:$4 sm:$0xff]  }
  0x78   :  { %3678 = vmatprep.subr.bf16.mxu0 %v7919_v59  ;;  %4065 = vmatprep.subr.bf16.mxu1 %v7922_v60  ;;  %v8010_v59 = vld [vmem:[%s11298_s1 + $0x5a0] ss:$16 sps:$4 sm:$0xff]   ;;  %v8013_v60 = vld [vmem:[%s11298_s1 + $0x5a8] ss:$16 sps:$4 sm:$0xff]  }
  0x7b   :  { %3679 = vmatpush1.bf16.msra.mxu0 %v7917_v61  ;;  %4066 = vmatpush1.bf16.msra.mxu1 %v7920_v62  ;;  %v8018_v61 = vld [vmem:[%s11298_s1 + $0x5c4] ss:$16 sps:$4 sm:$0xff]   ;;  %v8021_v62 = vld [vmem:[%s11298_s1 + $0x5cc] ss:$16 sps:$4 sm:$0xff]  }
  0x7c   :  { %3680 = vmatprep.subr.bf16.mxu0 %v7925_v63  ;;  %4067 = vmatprep.subr.bf16.mxu1 %v7928_v0  ;;  %v8016_v63 = vld [vmem:[%s11298_s1 + $0x5c0] ss:$16 sps:$4 sm:$0xff]   ;;  %v8019_v0 = vld [vmem:[%s11298_s1 + $0x5c8] ss:$16 sps:$4 sm:$0xff]  }
  0x7f   :  { %3681 = vmatpush1.bf16.msra.mxu0 %v7923_v1  ;;  %4068 = vmatpush1.bf16.msra.mxu1 %v7926_v2  ;;  %v8024_v1 = vld [vmem:[%s11298_s1 + $0x5e4] ss:$16 sps:$4 sm:$0xff]   ;;  %v8027_v2 = vld [vmem:[%s11298_s1 + $0x5ec] ss:$16 sps:$4 sm:$0xff]  }
  0x80   :  { %3693 = vmatprep.subr.bf16.mxu0 %v7934_v3  ;;  %4080 = vmatprep.subr.bf16.mxu1 %v7937_v4  ;;  %v8022_v3 = vld [vmem:[%s11298_s1 + $0x5e0] ss:$16 sps:$4 sm:$0xff]   ;;  %v8025_v4 = vld [vmem:[%s11298_s1 + $0x5e8] ss:$16 sps:$4 sm:$0xff]  }
  0x82   :  { %3683 = vmatmul.mubr.bf16.vlgmr.msra.gmra.mrb[0].mxu0 %v7929_v5  ;;  %4070 = vmatmul.mubr.bf16.vlgmr.msra.gmra.mrb[0].mxu1 %v7929_v5  ;;  %v8033_v5 = vld [vmem:[%s11298_s1 + $0x604] ss:$16 sps:$4 sm:$0xff]  }
  0x83   :  { %3694 = vmatpush1.bf16.msra.mxu0 %v7932_v6  ;;  %4081 = vmatpush1.bf16.msra.mxu1 %v7935_v7  ;;  %v8036_v6 = vld [vmem:[%s11298_s1 + $0x60c] ss:$16 sps:$4 sm:$0xff]   ;;  %v8028_v7 = vld [vmem:[%s11299_s0 + $0x10] ss:$72 sps:$4 sm:$0x3f]  }
  0x84   :  { %3695 = vmatprep.subr.bf16.mxu0 %v7940_v8  ;;  %4082 = vmatprep.subr.bf16.mxu1 %v7943_v9  ;;  %v8031_v8 = vld [vmem:[%s11298_s1 + $0x600] ss:$16 sps:$4 sm:$0xff]   ;;  %v8034_v9 = vld [vmem:[%s11298_s1 + $0x608] ss:$16 sps:$4 sm:$0xff]  }
  0x85   :  { %3725 = vmatprep.mubr.bf16.mxu0 %v8030_v13  ;;  %4112 = vmatprep.mubr.bf16.mxu1 %v8030_v13  ;;  %v8037_v13 = vld [vmem:[%s11298_s1 + $0x620] ss:$16 sps:$4 sm:$0xff]  }
  0x87   :  { %3696 = vmatpush1.bf16.msra.mxu0 %v7938_v10  ;;  %4083 = vmatpush1.bf16.msra.mxu1 %v7941_v11  ;;  %v8039_v10 = vld [vmem:[%s11298_s1 + $0x624] ss:$16 sps:$4 sm:$0xff]   ;;  %v8042_v11 = vld [vmem:[%s11298_s1 + $0x62c] ss:$16 sps:$4 sm:$0xff]  }
  0x88   :  { %3697 = vmatprep.subr.bf16.mxu0 %v7946_v12  ;;  %4084 = vmatprep.subr.bf16.mxu1 %v7949_v14  ;;  %v8129_v12 = vld [vmem:[%s11299_s0 + $0x1c] ss:$72 sps:$4 sm:$0x3f]   ;;  %v8040_v14 = vld [vmem:[%s11298_s1 + $0x628] ss:$16 sps:$4 sm:$0xff]  }
  0x8b   :  { %3698 = vmatpush1.bf16.msra.mxu0 %v7944_v15  ;;  %4085 = vmatpush1.bf16.msra.mxu1 %v7947_v16  ;;  %v8045_v15 = vld [vmem:[%s11298_s1 + $0x644] ss:$16 sps:$4 sm:$0xff]   ;;  %v8048_v16 = vld [vmem:[%s11298_s1 + $0x64c] ss:$16 sps:$4 sm:$0xff]  }
  0x8c   :  { %3699 = vmatprep.subr.bf16.mxu0 %v7952_v17  ;;  %4086 = vmatprep.subr.bf16.mxu1 %v7955_v18  ;;  %v8043_v17 = vld [vmem:[%s11298_s1 + $0x640] ss:$16 sps:$4 sm:$0xff]   ;;  %v8046_v18 = vld [vmem:[%s11298_s1 + $0x648] ss:$16 sps:$4 sm:$0xff]  }
  0x8f   :  { %3700 = vmatpush1.bf16.msra.mxu0 %v7950_v19  ;;  %4087 = vmatpush1.bf16.msra.mxu1 %v7953_v20  ;;  %v8051_v19 = vld [vmem:[%s11298_s1 + $0x664] ss:$16 sps:$4 sm:$0xff]   ;;  %v8054_v20 = vld [vmem:[%s11298_s1 + $0x66c] ss:$16 sps:$4 sm:$0xff]  }
  0x90   :  { %3701 = vmatprep.subr.bf16.mxu0 %v7958_v21  ;;  %4088 = vmatprep.subr.bf16.mxu1 %v7961_v22  ;;  %v8049_v21 = vld [vmem:[%s11298_s1 + $0x660] ss:$16 sps:$4 sm:$0xff]   ;;  %v8052_v22 = vld [vmem:[%s11298_s1 + $0x668] ss:$16 sps:$4 sm:$0xff]  }
  0x93   :  { %3702 = vmatpush1.bf16.msra.mxu0 %v7956_v23  ;;  %4089 = vmatpush1.bf16.msra.mxu1 %v7959_v24  ;;  %v8057_v23 = vld [vmem:[%s11298_s1 + $0x684] ss:$16 sps:$4 sm:$0xff]   ;;  %v8060_v24 = vld [vmem:[%s11298_s1 + $0x68c] ss:$16 sps:$4 sm:$0xff]  }
  0x94   :  { %3703 = vmatprep.subr.bf16.mxu0 %v7964_v25  ;;  %4090 = vmatprep.subr.bf16.mxu1 %v7967_v26  ;;  %v8055_v25 = vld [vmem:[%s11298_s1 + $0x680] ss:$16 sps:$4 sm:$0xff]   ;;  %v8058_v26 = vld [vmem:[%s11298_s1 + $0x688] ss:$16 sps:$4 sm:$0xff]  }
  0x97   :  { %3704 = vmatpush1.bf16.msra.mxu0 %v7962_v27  ;;  %4091 = vmatpush1.bf16.msra.mxu1 %v7965_v28  ;;  %v8063_v27 = vld [vmem:[%s11298_s1 + $0x6a4] ss:$16 sps:$4 sm:$0xff]   ;;  %v8066_v28 = vld [vmem:[%s11298_s1 + $0x6ac] ss:$16 sps:$4 sm:$0xff]  }
  0x98   :  { %3705 = vmatprep.subr.bf16.mxu0 %v7970_v29  ;;  %4092 = vmatprep.subr.bf16.mxu1 %v7973_v30  ;;  %v8061_v29 = vld [vmem:[%s11298_s1 + $0x6a0] ss:$16 sps:$4 sm:$0xff]   ;;  %v8064_v30 = vld [vmem:[%s11298_s1 + $0x6a8] ss:$16 sps:$4 sm:$0xff]  }
  0x9b   :  { %3706 = vmatpush1.bf16.msra.mxu0 %v7968_v31  ;;  %4093 = vmatpush1.bf16.msra.mxu1 %v7971_v32  ;;  %v8069_v31 = vld [vmem:[%s11298_s1 + $0x6c4] ss:$16 sps:$4 sm:$0xff]   ;;  %v8072_v32 = vld [vmem:[%s11298_s1 + $0x6cc] ss:$16 sps:$4 sm:$0xff]  }
  0x9c   :  { %3707 = vmatprep.subr.bf16.mxu0 %v7976_v33  ;;  %4094 = vmatprep.subr.bf16.mxu1 %v7979_v34  ;;  %v8067_v33 = vld [vmem:[%s11298_s1 + $0x6c0] ss:$16 sps:$4 sm:$0xff]   ;;  %v8070_v34 = vld [vmem:[%s11298_s1 + $0x6c8] ss:$16 sps:$4 sm:$0xff]  }
  0x9f   :  { %3708 = vmatpush1.bf16.msra.mxu0 %v7974_v35  ;;  %4095 = vmatpush1.bf16.msra.mxu1 %v7977_v36  ;;  %v8075_v35 = vld [vmem:[%s11298_s1 + $0x6e4] ss:$16 sps:$4 sm:$0xff]   ;;  %v8078_v36 = vld [vmem:[%s11298_s1 + $0x6ec] ss:$16 sps:$4 sm:$0xff]  }
  0xa0   :  { %3709 = vmatprep.subr.bf16.mxu0 %v7982_v37  ;;  %4096 = vmatprep.subr.bf16.mxu1 %v7985_v38  ;;  %v8073_v37 = vld [vmem:[%s11298_s1 + $0x6e0] ss:$16 sps:$4 sm:$0xff]   ;;  %v8076_v38 = vld [vmem:[%s11298_s1 + $0x6e8] ss:$16 sps:$4 sm:$0xff]  }
  0xa3   :  { %3710 = vmatpush1.bf16.msra.mxu0 %v7980_v39  ;;  %4097 = vmatpush1.bf16.msra.mxu1 %v7983_v40  ;;  %v8081_v39 = vld [vmem:[%s11298_s1 + $0x704] ss:$16 sps:$4 sm:$0xff]   ;;  %v8084_v40 = vld [vmem:[%s11298_s1 + $0x70c] ss:$16 sps:$4 sm:$0xff]  }
  0xa4   :  { %3711 = vmatprep.subr.bf16.mxu0 %v7988_v41  ;;  %4098 = vmatprep.subr.bf16.mxu1 %v7991_v42  ;;  %v8079_v41 = vld [vmem:[%s11298_s1 + $0x700] ss:$16 sps:$4 sm:$0xff]   ;;  %v8082_v42 = vld [vmem:[%s11298_s1 + $0x708] ss:$16 sps:$4 sm:$0xff]  }
  0xa7   :  { %3712 = vmatpush1.bf16.msra.mxu0 %v7986_v43  ;;  %4099 = vmatpush1.bf16.msra.mxu1 %v7989_v44  ;;  %v8087_v43 = vld [vmem:[%s11298_s1 + $0x724] ss:$16 sps:$4 sm:$0xff]   ;;  %v8090_v44 = vld [vmem:[%s11298_s1 + $0x72c] ss:$16 sps:$4 sm:$0xff]  }
  0xa8   :  { %3713 = vmatprep.subr.bf16.mxu0 %v7994_v45  ;;  %4100 = vmatprep.subr.bf16.mxu1 %v7997_v46  ;;  %v8085_v45 = vld [vmem:[%s11298_s1 + $0x720] ss:$16 sps:$4 sm:$0xff]   ;;  %v8088_v46 = vld [vmem:[%s11298_s1 + $0x728] ss:$16 sps:$4 sm:$0xff]  }
  0xab   :  { %3714 = vmatpush1.bf16.msra.mxu0 %v7992_v47  ;;  %4101 = vmatpush1.bf16.msra.mxu1 %v7995_v48  ;;  %v8093_v47 = vld [vmem:[%s11298_s1 + $0x744] ss:$16 sps:$4 sm:$0xff]   ;;  %v8096_v48 = vld [vmem:[%s11298_s1 + $0x74c] ss:$16 sps:$4 sm:$0xff]  }
  0xac   :  { %3715 = vmatprep.subr.bf16.mxu0 %v8000_v49  ;;  %4102 = vmatprep.subr.bf16.mxu1 %v8003_v50  ;;  %v8091_v49 = vld [vmem:[%s11298_s1 + $0x740] ss:$16 sps:$4 sm:$0xff]   ;;  %v8094_v50 = vld [vmem:[%s11298_s1 + $0x748] ss:$16 sps:$4 sm:$0xff]  }
  0xaf   :  { %3716 = vmatpush1.bf16.msra.mxu0 %v7998_v51  ;;  %4103 = vmatpush1.bf16.msra.mxu1 %v8001_v52  ;;  %v8099_v51 = vld [vmem:[%s11298_s1 + $0x764] ss:$16 sps:$4 sm:$0xff]   ;;  %v8102_v52 = vld [vmem:[%s11298_s1 + $0x76c] ss:$16 sps:$4 sm:$0xff]  }
  0xb0   :  { %3717 = vmatprep.subr.bf16.mxu0 %v8006_v53  ;;  %4104 = vmatprep.subr.bf16.mxu1 %v8009_v54  ;;  %v8097_v53 = vld [vmem:[%s11298_s1 + $0x760] ss:$16 sps:$4 sm:$0xff]   ;;  %v8100_v54 = vld [vmem:[%s11298_s1 + $0x768] ss:$16 sps:$4 sm:$0xff]  }
  0xb3   :  { %3718 = vmatpush1.bf16.msra.mxu0 %v8004_v55  ;;  %4105 = vmatpush1.bf16.msra.mxu1 %v8007_v56  ;;  %v8105_v55 = vld [vmem:[%s11298_s1 + $0x784] ss:$16 sps:$4 sm:$0xff]   ;;  %v8108_v56 = vld [vmem:[%s11298_s1 + $0x78c] ss:$16 sps:$4 sm:$0xff]  }
  0xb4   :  { %3719 = vmatprep.subr.bf16.mxu0 %v8012_v57  ;;  %4106 = vmatprep.subr.bf16.mxu1 %v8015_v58  ;;  %v8103_v57 = vld [vmem:[%s11298_s1 + $0x780] ss:$16 sps:$4 sm:$0xff]   ;;  %v8106_v58 = vld [vmem:[%s11298_s1 + $0x788] ss:$16 sps:$4 sm:$0xff]  }
  0xb7   :  { %3720 = vmatpush1.bf16.msra.mxu0 %v8010_v59  ;;  %4107 = vmatpush1.bf16.msra.mxu1 %v8013_v60  ;;  %v8111_v59 = vld [vmem:[%s11298_s1 + $0x7a4] ss:$16 sps:$4 sm:$0xff]   ;;  %v8114_v60 = vld [vmem:[%s11298_s1 + $0x7ac] ss:$16 sps:$4 sm:$0xff]  }
  0xb8   :  { %3721 = vmatprep.subr.bf16.mxu0 %v8018_v61  ;;  %4108 = vmatprep.subr.bf16.mxu1 %v8021_v62  ;;  %v8109_v61 = vld [vmem:[%s11298_s1 + $0x7a0] ss:$16 sps:$4 sm:$0xff]   ;;  %v8112_v62 = vld [vmem:[%s11298_s1 + $0x7a8] ss:$16 sps:$4 sm:$0xff]  }
  0xbb   :  { %3722 = vmatpush1.bf16.msra.mxu0 %v8016_v63  ;;  %4109 = vmatpush1.bf16.msra.mxu1 %v8019_v0  ;;  %v8117_v63 = vld [vmem:[%s11298_s1 + $0x7c4] ss:$16 sps:$4 sm:$0xff]   ;;  %v8120_v0 = vld [vmem:[%s11298_s1 + $0x7cc] ss:$16 sps:$4 sm:$0xff]  }
  0xbc   :  { %3723 = vmatprep.subr.bf16.mxu0 %v8024_v1  ;;  %4110 = vmatprep.subr.bf16.mxu1 %v8027_v2  ;;  %v8115_v1 = vld [vmem:[%s11298_s1 + $0x7c0] ss:$16 sps:$4 sm:$0xff]   ;;  %v8118_v2 = vld [vmem:[%s11298_s1 + $0x7c8] ss:$16 sps:$4 sm:$0xff]  }
  0xbf   :  { %3724 = vmatpush1.bf16.msra.mxu0 %v8022_v3  ;;  %4111 = vmatpush1.bf16.msra.mxu1 %v8025_v4  ;;  %v8123_v3 = vld [vmem:[%s11298_s1 + $0x7e4] ss:$16 sps:$4 sm:$0xff]   ;;  %v8126_v4 = vld [vmem:[%s11298_s1 + $0x7ec] ss:$16 sps:$4 sm:$0xff]  }
  0xc0   :  { %3736 = vmatprep.subr.bf16.mxu0 %v8033_v5  ;;  %4123 = vmatprep.subr.bf16.mxu1 %v8036_v6  ;;  %v8121_v5 = vld [vmem:[%s11298_s1 + $0x7e0] ss:$16 sps:$4 sm:$0xff]   ;;  %v8124_v6 = vld [vmem:[%s11298_s1 + $0x7e8] ss:$16 sps:$4 sm:$0xff]  }
  0xc2   :  { %3726 = vmatmul.mubr.bf16.vlgmr.msra.gmra.mrb[0].mxu0 %v8028_v7  ;;  %4113 = vmatmul.mubr.bf16.vlgmr.msra.gmra.mrb[0].mxu1 %v8028_v7  ;;  %v8132_v7 = vld [vmem:[%s11298_s1 + $0x804] ss:$16 sps:$4 sm:$0xff]  }
  0xc3   :  { %3737 = vmatpush1.bf16.msra.mxu0 %v8031_v8  ;;  %4124 = vmatpush1.bf16.msra.mxu1 %v8034_v9  ;;  %v8135_v8 = vld [vmem:[%s11298_s1 + $0x80c] ss:$16 sps:$4 sm:$0xff]   ;;  %v8127_v9 = vld [vmem:[%s11299_s0 + $0x18] ss:$72 sps:$4 sm:$0x3f]  }
  0xc4   :  { %3738 = vmatprep.subr.bf16.mxu0 %v8039_v10  ;;  %4125 = vmatprep.subr.bf16.mxu1 %v8042_v11  ;;  %v8130_v10 = vld [vmem:[%s11298_s1 + $0x800] ss:$16 sps:$4 sm:$0xff]   ;;  %v8133_v11 = vld [vmem:[%s11298_s1 + $0x808] ss:$16 sps:$4 sm:$0xff]  }
  0xc5   :  { %3768 = vmatprep.mubr.bf16.mxu0 %v8129_v12  ;;  %4155 = vmatprep.mubr.bf16.mxu1 %v8129_v12  ;;  %v8138_v12 = vld [vmem:[%s11298_s1 + $0x824] ss:$16 sps:$4 sm:$0xff]  }
  0xc7   :  { %3739 = vmatpush1.bf16.msra.mxu0 %v8037_v13  ;;  %4126 = vmatpush1.bf16.msra.mxu1 %v8040_v14  ;;  %v8141_v13 = vld [vmem:[%s11298_s1 + $0x82c] ss:$16 sps:$4 sm:$0xff]  }
  0xc8   :  { %3740 = vmatprep.subr.bf16.mxu0 %v8045_v15  ;;  %4127 = vmatprep.subr.bf16.mxu1 %v8048_v16  ;;  %v8228_v14 = vld [vmem:[%s11299_s0 + $0x24] ss:$72 sps:$4 sm:$0x3f]   ;;  %v8136_v15 = vld [vmem:[%s11298_s1 + $0x820] ss:$16 sps:$4 sm:$0xff]  }
  0xc9   :  { %v8139_v16 = vld [vmem:[%s11298_s1 + $0x828] ss:$16 sps:$4 sm:$0xff]  }
  0xcb   :  { %3741 = vmatpush1.bf16.msra.mxu0 %v8043_v17  ;;  %4128 = vmatpush1.bf16.msra.mxu1 %v8046_v18  ;;  %v8144_v17 = vld [vmem:[%s11298_s1 + $0x844] ss:$16 sps:$4 sm:$0xff]   ;;  %v8147_v18 = vld [vmem:[%s11298_s1 + $0x84c] ss:$16 sps:$4 sm:$0xff]  }
  0xcc   :  { %3742 = vmatprep.subr.bf16.mxu0 %v8051_v19  ;;  %4129 = vmatprep.subr.bf16.mxu1 %v8054_v20  ;;  %v8142_v19 = vld [vmem:[%s11298_s1 + $0x840] ss:$16 sps:$4 sm:$0xff]   ;;  %v8145_v20 = vld [vmem:[%s11298_s1 + $0x848] ss:$16 sps:$4 sm:$0xff]  }
  0xcf   :  { %3743 = vmatpush1.bf16.msra.mxu0 %v8049_v21  ;;  %4130 = vmatpush1.bf16.msra.mxu1 %v8052_v22  ;;  %v8150_v21 = vld [vmem:[%s11298_s1 + $0x864] ss:$16 sps:$4 sm:$0xff]   ;;  %v8153_v22 = vld [vmem:[%s11298_s1 + $0x86c] ss:$16 sps:$4 sm:$0xff]  }
  0xd0   :  { %3744 = vmatprep.subr.bf16.mxu0 %v8057_v23  ;;  %4131 = vmatprep.subr.bf16.mxu1 %v8060_v24  ;;  %v8148_v23 = vld [vmem:[%s11298_s1 + $0x860] ss:$16 sps:$4 sm:$0xff]   ;;  %v8151_v24 = vld [vmem:[%s11298_s1 + $0x868] ss:$16 sps:$4 sm:$0xff]  }
  0xd3   :  { %3745 = vmatpush1.bf16.msra.mxu0 %v8055_v25  ;;  %4132 = vmatpush1.bf16.msra.mxu1 %v8058_v26  ;;  %v8156_v25 = vld [vmem:[%s11298_s1 + $0x884] ss:$16 sps:$4 sm:$0xff]   ;;  %v8159_v26 = vld [vmem:[%s11298_s1 + $0x88c] ss:$16 sps:$4 sm:$0xff]  }
  0xd4   :  { %3746 = vmatprep.subr.bf16.mxu0 %v8063_v27  ;;  %4133 = vmatprep.subr.bf16.mxu1 %v8066_v28  ;;  %v8154_v27 = vld [vmem:[%s11298_s1 + $0x880] ss:$16 sps:$4 sm:$0xff]   ;;  %v8157_v28 = vld [vmem:[%s11298_s1 + $0x888] ss:$16 sps:$4 sm:$0xff]  }
  0xd7   :  { %3747 = vmatpush1.bf16.msra.mxu0 %v8061_v29  ;;  %4134 = vmatpush1.bf16.msra.mxu1 %v8064_v30  ;;  %v8162_v29 = vld [vmem:[%s11298_s1 + $0x8a4] ss:$16 sps:$4 sm:$0xff]   ;;  %v8165_v30 = vld [vmem:[%s11298_s1 + $0x8ac] ss:$16 sps:$4 sm:$0xff]  }
  0xd8   :  { %3748 = vmatprep.subr.bf16.mxu0 %v8069_v31  ;;  %4135 = vmatprep.subr.bf16.mxu1 %v8072_v32  ;;  %v8160_v31 = vld [vmem:[%s11298_s1 + $0x8a0] ss:$16 sps:$4 sm:$0xff]   ;;  %v8163_v32 = vld [vmem:[%s11298_s1 + $0x8a8] ss:$16 sps:$4 sm:$0xff]  }
  0xdb   :  { %3749 = vmatpush1.bf16.msra.mxu0 %v8067_v33  ;;  %4136 = vmatpush1.bf16.msra.mxu1 %v8070_v34  ;;  %v8168_v33 = vld [vmem:[%s11298_s1 + $0x8c4] ss:$16 sps:$4 sm:$0xff]   ;;  %v8171_v34 = vld [vmem:[%s11298_s1 + $0x8cc] ss:$16 sps:$4 sm:$0xff]  }
  0xdc   :  { %3750 = vmatprep.subr.bf16.mxu0 %v8075_v35  ;;  %4137 = vmatprep.subr.bf16.mxu1 %v8078_v36  ;;  %v8166_v35 = vld [vmem:[%s11298_s1 + $0x8c0] ss:$16 sps:$4 sm:$0xff]   ;;  %v8169_v36 = vld [vmem:[%s11298_s1 + $0x8c8] ss:$16 sps:$4 sm:$0xff]  }
  0xdf   :  { %3751 = vmatpush1.bf16.msra.mxu0 %v8073_v37  ;;  %4138 = vmatpush1.bf16.msra.mxu1 %v8076_v38  ;;  %v8174_v37 = vld [vmem:[%s11298_s1 + $0x8e4] ss:$16 sps:$4 sm:$0xff]   ;;  %v8177_v38 = vld [vmem:[%s11298_s1 + $0x8ec] ss:$16 sps:$4 sm:$0xff]  }
  0xe0   :  { %3752 = vmatprep.subr.bf16.mxu0 %v8081_v39  ;;  %4139 = vmatprep.subr.bf16.mxu1 %v8084_v40  ;;  %v8172_v39 = vld [vmem:[%s11298_s1 + $0x8e0] ss:$16 sps:$4 sm:$0xff]   ;;  %v8175_v40 = vld [vmem:[%s11298_s1 + $0x8e8] ss:$16 sps:$4 sm:$0xff]  }
  0xe3   :  { %3753 = vmatpush1.bf16.msra.mxu0 %v8079_v41  ;;  %4140 = vmatpush1.bf16.msra.mxu1 %v8082_v42  ;;  %v8180_v41 = vld [vmem:[%s11298_s1 + $0x904] ss:$16 sps:$4 sm:$0xff]   ;;  %v8183_v42 = vld [vmem:[%s11298_s1 + $0x90c] ss:$16 sps:$4 sm:$0xff]  }
  0xe4   :  { %3754 = vmatprep.subr.bf16.mxu0 %v8087_v43  ;;  %4141 = vmatprep.subr.bf16.mxu1 %v8090_v44  ;;  %v8178_v43 = vld [vmem:[%s11298_s1 + $0x900] ss:$16 sps:$4 sm:$0xff]   ;;  %v8181_v44 = vld [vmem:[%s11298_s1 + $0x908] ss:$16 sps:$4 sm:$0xff]  }
  0xe7   :  { %3755 = vmatpush1.bf16.msra.mxu0 %v8085_v45  ;;  %4142 = vmatpush1.bf16.msra.mxu1 %v8088_v46  ;;  %v8186_v45 = vld [vmem:[%s11298_s1 + $0x924] ss:$16 sps:$4 sm:$0xff]   ;;  %v8189_v46 = vld [vmem:[%s11298_s1 + $0x92c] ss:$16 sps:$4 sm:$0xff]  }
  0xe8   :  { %3756 = vmatprep.subr.bf16.mxu0 %v8093_v47  ;;  %4143 = vmatprep.subr.bf16.mxu1 %v8096_v48  ;;  %v8184_v47 = vld [vmem:[%s11298_s1 + $0x920] ss:$16 sps:$4 sm:$0xff]   ;;  %v8187_v48 = vld [vmem:[%s11298_s1 + $0x928] ss:$16 sps:$4 sm:$0xff]  }
  0xeb   :  { %3757 = vmatpush1.bf16.msra.mxu0 %v8091_v49  ;;  %4144 = vmatpush1.bf16.msra.mxu1 %v8094_v50  ;;  %v8192_v49 = vld [vmem:[%s11298_s1 + $0x944] ss:$16 sps:$4 sm:$0xff]   ;;  %v8195_v50 = vld [vmem:[%s11298_s1 + $0x94c] ss:$16 sps:$4 sm:$0xff]  }
  0xec   :  { %3758 = vmatprep.subr.bf16.mxu0 %v8099_v51  ;;  %4145 = vmatprep.subr.bf16.mxu1 %v8102_v52  ;;  %v8190_v51 = vld [vmem:[%s11298_s1 + $0x940] ss:$16 sps:$4 sm:$0xff]   ;;  %v8193_v52 = vld [vmem:[%s11298_s1 + $0x948] ss:$16 sps:$4 sm:$0xff]  }
  0xef   :  { %3759 = vmatpush1.bf16.msra.mxu0 %v8097_v53  ;;  %4146 = vmatpush1.bf16.msra.mxu1 %v8100_v54  ;;  %v8198_v53 = vld [vmem:[%s11298_s1 + $0x964] ss:$16 sps:$4 sm:$0xff]   ;;  %v8201_v54 = vld [vmem:[%s11298_s1 + $0x96c] ss:$16 sps:$4 sm:$0xff]  }
  0xf0   :  { %3760 = vmatprep.subr.bf16.mxu0 %v8105_v55  ;;  %4147 = vmatprep.subr.bf16.mxu1 %v8108_v56  ;;  %v8196_v55 = vld [vmem:[%s11298_s1 + $0x960] ss:$16 sps:$4 sm:$0xff]   ;;  %v8199_v56 = vld [vmem:[%s11298_s1 + $0x968] ss:$16 sps:$4 sm:$0xff]  }
  0xf3   :  { %3761 = vmatpush1.bf16.msra.mxu0 %v8103_v57  ;;  %4148 = vmatpush1.bf16.msra.mxu1 %v8106_v58  ;;  %v8204_v57 = vld [vmem:[%s11298_s1 + $0x984] ss:$16 sps:$4 sm:$0xff]   ;;  %v8207_v58 = vld [vmem:[%s11298_s1 + $0x98c] ss:$16 sps:$4 sm:$0xff]  }
  0xf4   :  { %3762 = vmatprep.subr.bf16.mxu0 %v8111_v59  ;;  %4149 = vmatprep.subr.bf16.mxu1 %v8114_v60  ;;  %v8202_v59 = vld [vmem:[%s11298_s1 + $0x980] ss:$16 sps:$4 sm:$0xff]   ;;  %v8205_v60 = vld [vmem:[%s11298_s1 + $0x988] ss:$16 sps:$4 sm:$0xff]  }
  0xf7   :  { %3763 = vmatpush1.bf16.msra.mxu0 %v8109_v61  ;;  %4150 = vmatpush1.bf16.msra.mxu1 %v8112_v62  ;;  %v8210_v61 = vld [vmem:[%s11298_s1 + $0x9a4] ss:$16 sps:$4 sm:$0xff]   ;;  %v8213_v62 = vld [vmem:[%s11298_s1 + $0x9ac] ss:$16 sps:$4 sm:$0xff]  }
  0xf8   :  { %3764 = vmatprep.subr.bf16.mxu0 %v8117_v63  ;;  %4151 = vmatprep.subr.bf16.mxu1 %v8120_v0  ;;  %v8208_v63 = vld [vmem:[%s11298_s1 + $0x9a0] ss:$16 sps:$4 sm:$0xff]   ;;  %v8211_v0 = vld [vmem:[%s11298_s1 + $0x9a8] ss:$16 sps:$4 sm:$0xff]  }
  0xfb   :  { %3765 = vmatpush1.bf16.msra.mxu0 %v8115_v1  ;;  %4152 = vmatpush1.bf16.msra.mxu1 %v8118_v2  ;;  %v8216_v1 = vld [vmem:[%s11298_s1 + $0x9c4] ss:$16 sps:$4 sm:$0xff]   ;;  %v8219_v2 = vld [vmem:[%s11298_s1 + $0x9cc] ss:$16 sps:$4 sm:$0xff]  }
  0xfc   :  { %3766 = vmatprep.subr.bf16.mxu0 %v8123_v3  ;;  %4153 = vmatprep.subr.bf16.mxu1 %v8126_v4  ;;  %v8214_v3 = vld [vmem:[%s11298_s1 + $0x9c0] ss:$16 sps:$4 sm:$0xff]   ;;  %v8217_v4 = vld [vmem:[%s11298_s1 + $0x9c8] ss:$16 sps:$4 sm:$0xff]  }
  0xff   :  { %3767 = vmatpush1.bf16.msra.mxu0 %v8121_v5  ;;  %4154 = vmatpush1.bf16.msra.mxu1 %v8124_v6  ;;  %v8222_v5 = vld [vmem:[%s11298_s1 + $0x9e4] ss:$16 sps:$4 sm:$0xff]   ;;  %v8225_v6 = vld [vmem:[%s11298_s1 + $0x9ec] ss:$16 sps:$4 sm:$0xff]  }
 0x100   :  { %3779 = vmatprep.subr.bf16.mxu0 %v8132_v7  ;;  %4166 = vmatprep.subr.bf16.mxu1 %v8135_v8  ;;  %v8220_v7 = vld [vmem:[%s11298_s1 + $0x9e0] ss:$16 sps:$4 sm:$0xff]   ;;  %v8223_v8 = vld [vmem:[%s11298_s1 + $0x9e8] ss:$16 sps:$4 sm:$0xff]  }
 0x102   :  { %3769 = vmatmul.mubr.bf16.vlgmr.msra.gmra.mrb[0].mxu0 %v8127_v9  ;;  %4156 = vmatmul.mubr.bf16.vlgmr.msra.gmra.mrb[0].mxu1 %v8127_v9  ;;  %v8226_v9 = vld [vmem:[%s11299_s0 + $0x20] ss:$72 sps:$4 sm:$0x3f]  }
 0x103   :  { %3780 = vmatpush1.bf16.msra.mxu0 %v8130_v10  ;;  %4167 = vmatpush1.bf16.msra.mxu1 %v8133_v11  ;;  %v8231_v10 = vld [vmem:[%s11298_s1 + $0xa04] ss:$16 sps:$4 sm:$0xff]   ;;  %v8234_v11 = vld [vmem:[%s11298_s1 + $0xa0c] ss:$16 sps:$4 sm:$0xff]  }
 0x104   :  { %3781 = vmatprep.subr.bf16.mxu0 %v8138_v12  ;;  %4168 = vmatprep.subr.bf16.mxu1 %v8141_v13  ;;  %v8229_v12 = vld [vmem:[%s11298_s1 + $0xa00] ss:$16 sps:$4 sm:$0xff]   ;;  %v8232_v13 = vld [vmem:[%s11298_s1 + $0xa08] ss:$16 sps:$4 sm:$0xff]  }
 0x105   :  { %3811 = vmatprep.mubr.bf16.mxu0 %v8228_v14  ;;  %4198 = vmatprep.mubr.bf16.mxu1 %v8228_v14  ;;  %v8237_v14 = vld [vmem:[%s11298_s1 + $0xa24] ss:$16 sps:$4 sm:$0xff]  }
 0x107   :  { %3782 = vmatpush1.bf16.msra.mxu0 %v8136_v15  ;;  %4169 = vmatpush1.bf16.msra.mxu1 %v8139_v16  ;;  %v8240_v15 = vld [vmem:[%s11298_s1 + $0xa2c] ss:$16 sps:$4 sm:$0xff]  }
 0x108   :  { %3783 = vmatprep.subr.bf16.mxu0 %v8144_v17  ;;  %4170 = vmatprep.subr.bf16.mxu1 %v8147_v18  ;;  %v8327_v16 = vld [vmem:[%s11299_s0 + $0x2c] ss:$72 sps:$4 sm:$0x3f]   ;;  %v8235_v17 = vld [vmem:[%s11298_s1 + $0xa20] ss:$16 sps:$4 sm:$0xff]  }
 0x109   :  { %v8238_v18 = vld [vmem:[%s11298_s1 + $0xa28] ss:$16 sps:$4 sm:$0xff]  }
 0x10b   :  { %3784 = vmatpush1.bf16.msra.mxu0 %v8142_v19  ;;  %4171 = vmatpush1.bf16.msra.mxu1 %v8145_v20  ;;  %v8243_v19 = vld [vmem:[%s11298_s1 + $0xa44] ss:$16 sps:$4 sm:$0xff]   ;;  %v8246_v20 = vld [vmem:[%s11298_s1 + $0xa4c] ss:$16 sps:$4 sm:$0xff]  }
 0x10c   :  { %3785 = vmatprep.subr.bf16.mxu0 %v8150_v21  ;;  %4172 = vmatprep.subr.bf16.mxu1 %v8153_v22  ;;  %v8241_v21 = vld [vmem:[%s11298_s1 + $0xa40] ss:$16 sps:$4 sm:$0xff]   ;;  %v8244_v22 = vld [vmem:[%s11298_s1 + $0xa48] ss:$16 sps:$4 sm:$0xff]  }
 0x10f   :  { %3786 = vmatpush1.bf16.msra.mxu0 %v8148_v23  ;;  %4173 = vmatpush1.bf16.msra.mxu1 %v8151_v24  ;;  %v8249_v23 = vld [vmem:[%s11298_s1 + $0xa64] ss:$16 sps:$4 sm:$0xff]   ;;  %v8252_v24 = vld [vmem:[%s11298_s1 + $0xa6c] ss:$16 sps:$4 sm:$0xff]  }
 0x110   :  { %3787 = vmatprep.subr.bf16.mxu0 %v8156_v25  ;;  %4174 = vmatprep.subr.bf16.mxu1 %v8159_v26  ;;  %v8247_v25 = vld [vmem:[%s11298_s1 + $0xa60] ss:$16 sps:$4 sm:$0xff]   ;;  %v8250_v26 = vld [vmem:[%s11298_s1 + $0xa68] ss:$16 sps:$4 sm:$0xff]  }
 0x113   :  { %3788 = vmatpush1.bf16.msra.mxu0 %v8154_v27  ;;  %4175 = vmatpush1.bf16.msra.mxu1 %v8157_v28  ;;  %v8255_v27 = vld [vmem:[%s11298_s1 + $0xa84] ss:$16 sps:$4 sm:$0xff]   ;;  %v8258_v28 = vld [vmem:[%s11298_s1 + $0xa8c] ss:$16 sps:$4 sm:$0xff]  }
 0x114   :  { %3789 = vmatprep.subr.bf16.mxu0 %v8162_v29  ;;  %4176 = vmatprep.subr.bf16.mxu1 %v8165_v30  ;;  %v8253_v29 = vld [vmem:[%s11298_s1 + $0xa80] ss:$16 sps:$4 sm:$0xff]   ;;  %v8256_v30 = vld [vmem:[%s11298_s1 + $0xa88] ss:$16 sps:$4 sm:$0xff]  }
 0x117   :  { %3790 = vmatpush1.bf16.msra.mxu0 %v8160_v31  ;;  %4177 = vmatpush1.bf16.msra.mxu1 %v8163_v32  ;;  %v8261_v31 = vld [vmem:[%s11298_s1 + $0xaa4] ss:$16 sps:$4 sm:$0xff]   ;;  %v8264_v32 = vld [vmem:[%s11298_s1 + $0xaac] ss:$16 sps:$4 sm:$0xff]  }
 0x118   :  { %3791 = vmatprep.subr.bf16.mxu0 %v8168_v33  ;;  %4178 = vmatprep.subr.bf16.mxu1 %v8171_v34  ;;  %v8259_v33 = vld [vmem:[%s11298_s1 + $0xaa0] ss:$16 sps:$4 sm:$0xff]   ;;  %v8262_v34 = vld [vmem:[%s11298_s1 + $0xaa8] ss:$16 sps:$4 sm:$0xff]  }
 0x11b   :  { %3792 = vmatpush1.bf16.msra.mxu0 %v8166_v35  ;;  %4179 = vmatpush1.bf16.msra.mxu1 %v8169_v36  ;;  %v8267_v35 = vld [vmem:[%s11298_s1 + $0xac4] ss:$16 sps:$4 sm:$0xff]   ;;  %v8270_v36 = vld [vmem:[%s11298_s1 + $0xacc] ss:$16 sps:$4 sm:$0xff]  }
 0x11c   :  { %3793 = vmatprep.subr.bf16.mxu0 %v8174_v37  ;;  %4180 = vmatprep.subr.bf16.mxu1 %v8177_v38  ;;  %v8265_v37 = vld [vmem:[%s11298_s1 + $0xac0] ss:$16 sps:$4 sm:$0xff]   ;;  %v8268_v38 = vld [vmem:[%s11298_s1 + $0xac8] ss:$16 sps:$4 sm:$0xff]  }
 0x11f   :  { %3794 = vmatpush1.bf16.msra.mxu0 %v8172_v39  ;;  %4181 = vmatpush1.bf16.msra.mxu1 %v8175_v40  ;;  %v8273_v39 = vld [vmem:[%s11298_s1 + $0xae4] ss:$16 sps:$4 sm:$0xff]   ;;  %v8276_v40 = vld [vmem:[%s11298_s1 + $0xaec] ss:$16 sps:$4 sm:$0xff]  }
 0x120   :  { %3795 = vmatprep.subr.bf16.mxu0 %v8180_v41  ;;  %4182 = vmatprep.subr.bf16.mxu1 %v8183_v42  ;;  %v8271_v41 = vld [vmem:[%s11298_s1 + $0xae0] ss:$16 sps:$4 sm:$0xff]   ;;  %v8274_v42 = vld [vmem:[%s11298_s1 + $0xae8] ss:$16 sps:$4 sm:$0xff]  }
 0x123   :  { %3796 = vmatpush1.bf16.msra.mxu0 %v8178_v43  ;;  %4183 = vmatpush1.bf16.msra.mxu1 %v8181_v44  ;;  %v8279_v43 = vld [vmem:[%s11298_s1 + $0xb04] ss:$16 sps:$4 sm:$0xff]   ;;  %v8282_v44 = vld [vmem:[%s11298_s1 + $0xb0c] ss:$16 sps:$4 sm:$0xff]  }
 0x124   :  { %3797 = vmatprep.subr.bf16.mxu0 %v8186_v45  ;;  %4184 = vmatprep.subr.bf16.mxu1 %v8189_v46  ;;  %v8277_v45 = vld [vmem:[%s11298_s1 + $0xb00] ss:$16 sps:$4 sm:$0xff]   ;;  %v8280_v46 = vld [vmem:[%s11298_s1 + $0xb08] ss:$16 sps:$4 sm:$0xff]  }
 0x127   :  { %3798 = vmatpush1.bf16.msra.mxu0 %v8184_v47  ;;  %4185 = vmatpush1.bf16.msra.mxu1 %v8187_v48  ;;  %v8285_v47 = vld [vmem:[%s11298_s1 + $0xb24] ss:$16 sps:$4 sm:$0xff]   ;;  %v8288_v48 = vld [vmem:[%s11298_s1 + $0xb2c] ss:$16 sps:$4 sm:$0xff]  }
 0x128   :  { %3799 = vmatprep.subr.bf16.mxu0 %v8192_v49  ;;  %4186 = vmatprep.subr.bf16.mxu1 %v8195_v50  ;;  %v8283_v49 = vld [vmem:[%s11298_s1 + $0xb20] ss:$16 sps:$4 sm:$0xff]   ;;  %v8286_v50 = vld [vmem:[%s11298_s1 + $0xb28] ss:$16 sps:$4 sm:$0xff]  }
 0x12b   :  { %3800 = vmatpush1.bf16.msra.mxu0 %v8190_v51  ;;  %4187 = vmatpush1.bf16.msra.mxu1 %v8193_v52  ;;  %v8291_v51 = vld [vmem:[%s11298_s1 + $0xb44] ss:$16 sps:$4 sm:$0xff]   ;;  %v8294_v52 = vld [vmem:[%s11298_s1 + $0xb4c] ss:$16 sps:$4 sm:$0xff]  }
 0x12c   :  { %3801 = vmatprep.subr.bf16.mxu0 %v8198_v53  ;;  %4188 = vmatprep.subr.bf16.mxu1 %v8201_v54  ;;  %v8289_v53 = vld [vmem:[%s11298_s1 + $0xb40] ss:$16 sps:$4 sm:$0xff]   ;;  %v8292_v54 = vld [vmem:[%s11298_s1 + $0xb48] ss:$16 sps:$4 sm:$0xff]  }
 0x12f   :  { %3802 = vmatpush1.bf16.msra.mxu0 %v8196_v55  ;;  %4189 = vmatpush1.bf16.msra.mxu1 %v8199_v56  ;;  %v8297_v55 = vld [vmem:[%s11298_s1 + $0xb64] ss:$16 sps:$4 sm:$0xff]   ;;  %v8300_v56 = vld [vmem:[%s11298_s1 + $0xb6c] ss:$16 sps:$4 sm:$0xff]  }
 0x130   :  { %3803 = vmatprep.subr.bf16.mxu0 %v8204_v57  ;;  %4190 = vmatprep.subr.bf16.mxu1 %v8207_v58  ;;  %v8295_v57 = vld [vmem:[%s11298_s1 + $0xb60] ss:$16 sps:$4 sm:$0xff]   ;;  %v8298_v58 = vld [vmem:[%s11298_s1 + $0xb68] ss:$16 sps:$4 sm:$0xff]  }
 0x133   :  { %3804 = vmatpush1.bf16.msra.mxu0 %v8202_v59  ;;  %4191 = vmatpush1.bf16.msra.mxu1 %v8205_v60  ;;  %v8303_v59 = vld [vmem:[%s11298_s1 + $0xb84] ss:$16 sps:$4 sm:$0xff]   ;;  %v8306_v60 = vld [vmem:[%s11298_s1 + $0xb8c] ss:$16 sps:$4 sm:$0xff]  }
 0x134   :  { %3805 = vmatprep.subr.bf16.mxu0 %v8210_v61  ;;  %4192 = vmatprep.subr.bf16.mxu1 %v8213_v62  ;;  %v8301_v61 = vld [vmem:[%s11298_s1 + $0xb80] ss:$16 sps:$4 sm:$0xff]   ;;  %v8304_v62 = vld [vmem:[%s11298_s1 + $0xb88] ss:$16 sps:$4 sm:$0xff]  }
 0x137   :  { %3806 = vmatpush1.bf16.msra.mxu0 %v8208_v63  ;;  %4193 = vmatpush1.bf16.msra.mxu1 %v8211_v0  ;;  %v8309_v63 = vld [vmem:[%s11298_s1 + $0xba4] ss:$16 sps:$4 sm:$0xff]   ;;  %v8312_v0 = vld [vmem:[%s11298_s1 + $0xbac] ss:$16 sps:$4 sm:$0xff]  }
 0x138   :  { %3807 = vmatprep.subr.bf16.mxu0 %v8216_v1  ;;  %4194 = vmatprep.subr.bf16.mxu1 %v8219_v2  ;;  %v8307_v1 = vld [vmem:[%s11298_s1 + $0xba0] ss:$16 sps:$4 sm:$0xff]   ;;  %v8310_v2 = vld [vmem:[%s11298_s1 + $0xba8] ss:$16 sps:$4 sm:$0xff]  }
 0x13b   :  { %3808 = vmatpush1.bf16.msra.mxu0 %v8214_v3  ;;  %4195 = vmatpush1.bf16.msra.mxu1 %v8217_v4  ;;  %v8315_v3 = vld [vmem:[%s11298_s1 + $0xbc4] ss:$16 sps:$4 sm:$0xff]   ;;  %v8318_v4 = vld [vmem:[%s11298_s1 + $0xbcc] ss:$16 sps:$4 sm:$0xff]  }
 0x13c   :  { %3809 = vmatprep.subr.bf16.mxu0 %v8222_v5  ;;  %4196 = vmatprep.subr.bf16.mxu1 %v8225_v6  ;;  %v8313_v5 = vld [vmem:[%s11298_s1 + $0xbc0] ss:$16 sps:$4 sm:$0xff]   ;;  %v8316_v6 = vld [vmem:[%s11298_s1 + $0xbc8] ss:$16 sps:$4 sm:$0xff]  }
 0x13f   :  { %3810 = vmatpush1.bf16.msra.mxu0 %v8220_v7  ;;  %4197 = vmatpush1.bf16.msra.mxu1 %v8223_v8  ;;  %v8321_v7 = vld [vmem:[%s11298_s1 + $0xbe4] ss:$16 sps:$4 sm:$0xff]   ;;  %v8324_v8 = vld [vmem:[%s11298_s1 + $0xbec] ss:$16 sps:$4 sm:$0xff]  }
 0x140   :  { %3822 = vmatprep.subr.bf16.mxu0 %v8231_v10  ;;  %4209 = vmatprep.subr.bf16.mxu1 %v8234_v11  ;;  %v8322_v10 = vld [vmem:[%s11298_s1 + $0xbe8] ss:$16 sps:$4 sm:$0xff]   ;;  %v8330_v11 = vld [vmem:[%s11298_s1 + $0xc04] ss:$16 sps:$4 sm:$0xff]  }
 0x142   :  { %3812 = vmatmul.mubr.bf16.vlgmr.msra.gmra.mrb[0].mxu0 %v8226_v9  ;;  %4199 = vmatmul.mubr.bf16.vlgmr.msra.gmra.mrb[0].mxu1 %v8226_v9  ;;  %v8319_v9 = vld [vmem:[%s11298_s1 + $0xbe0] ss:$16 sps:$4 sm:$0xff]  }
 0x143   :  { %3823 = vmatpush1.bf16.msra.mxu0 %v8229_v12  ;;  %4210 = vmatpush1.bf16.msra.mxu1 %v8232_v13  ;;  %v8333_v12 = vld [vmem:[%s11298_s1 + $0xc0c] ss:$16 sps:$4 sm:$0xff]   ;;  %v8325_v13 = vld [vmem:[%s11299_s0 + $0x28] ss:$72 sps:$4 sm:$0x3f]  }
 0x144   :  { %3824 = vmatprep.subr.bf16.mxu0 %v8237_v14  ;;  %4211 = vmatprep.subr.bf16.mxu1 %v8240_v15  ;;  %v8328_v14 = vld [vmem:[%s11298_s1 + $0xc00] ss:$16 sps:$4 sm:$0xff]   ;;  %v8331_v15 = vld [vmem:[%s11298_s1 + $0xc08] ss:$16 sps:$4 sm:$0xff]  }
 0x145   :  { %3854 = vmatprep.mubr.bf16.mxu0 %v8327_v16  ;;  %4241 = vmatprep.mubr.bf16.mxu1 %v8327_v16  ;;  %v8336_v16 = vld [vmem:[%s11298_s1 + $0xc24] ss:$16 sps:$4 sm:$0xff]  }
 0x147   :  { %3825 = vmatpush1.bf16.msra.mxu0 %v8235_v17  ;;  %4212 = vmatpush1.bf16.msra.mxu1 %v8238_v18  ;;  %v8339_v17 = vld [vmem:[%s11298_s1 + $0xc2c] ss:$16 sps:$4 sm:$0xff]  }
 0x148   :  { %3826 = vmatprep.subr.bf16.mxu0 %v8243_v19  ;;  %4213 = vmatprep.subr.bf16.mxu1 %v8246_v20  ;;  %v8426_v18 = vld [vmem:[%s11299_s0 + $0x34] ss:$72 sps:$4 sm:$0x3f]   ;;  %v8334_v19 = vld [vmem:[%s11298_s1 + $0xc20] ss:$16 sps:$4 sm:$0xff]  }
 0x149   :  { %v8337_v20 = vld [vmem:[%s11298_s1 + $0xc28] ss:$16 sps:$4 sm:$0xff]  }
 0x14b   :  { %3827 = vmatpush1.bf16.msra.mxu0 %v8241_v21  ;;  %4214 = vmatpush1.bf16.msra.mxu1 %v8244_v22  ;;  %v8342_v21 = vld [vmem:[%s11298_s1 + $0xc44] ss:$16 sps:$4 sm:$0xff]   ;;  %v8345_v22 = vld [vmem:[%s11298_s1 + $0xc4c] ss:$16 sps:$4 sm:$0xff]  }
 0x14c   :  { %3828 = vmatprep.subr.bf16.mxu0 %v8249_v23  ;;  %4215 = vmatprep.subr.bf16.mxu1 %v8252_v24  ;;  %v8340_v23 = vld [vmem:[%s11298_s1 + $0xc40] ss:$16 sps:$4 sm:$0xff]   ;;  %v8343_v24 = vld [vmem:[%s11298_s1 + $0xc48] ss:$16 sps:$4 sm:$0xff]  }
 0x14f   :  { %3829 = vmatpush1.bf16.msra.mxu0 %v8247_v25  ;;  %4216 = vmatpush1.bf16.msra.mxu1 %v8250_v26  ;;  %v8348_v25 = vld [vmem:[%s11298_s1 + $0xc64] ss:$16 sps:$4 sm:$0xff]   ;;  %v8351_v26 = vld [vmem:[%s11298_s1 + $0xc6c] ss:$16 sps:$4 sm:$0xff]  }
 0x150   :  { %3830 = vmatprep.subr.bf16.mxu0 %v8255_v27  ;;  %4217 = vmatprep.subr.bf16.mxu1 %v8258_v28  ;;  %v8346_v27 = vld [vmem:[%s11298_s1 + $0xc60] ss:$16 sps:$4 sm:$0xff]   ;;  %v8349_v28 = vld [vmem:[%s11298_s1 + $0xc68] ss:$16 sps:$4 sm:$0xff]  }
 0x153   :  { %3831 = vmatpush1.bf16.msra.mxu0 %v8253_v29  ;;  %4218 = vmatpush1.bf16.msra.mxu1 %v8256_v30  ;;  %v8354_v29 = vld [vmem:[%s11298_s1 + $0xc84] ss:$16 sps:$4 sm:$0xff]   ;;  %v8357_v30 = vld [vmem:[%s11298_s1 + $0xc8c] ss:$16 sps:$4 sm:$0xff]  }
 0x154   :  { %3832 = vmatprep.subr.bf16.mxu0 %v8261_v31  ;;  %4219 = vmatprep.subr.bf16.mxu1 %v8264_v32  ;;  %v8352_v31 = vld [vmem:[%s11298_s1 + $0xc80] ss:$16 sps:$4 sm:$0xff]   ;;  %v8355_v32 = vld [vmem:[%s11298_s1 + $0xc88] ss:$16 sps:$4 sm:$0xff]  }
 0x157   :  { %3833 = vmatpush1.bf16.msra.mxu0 %v8259_v33  ;;  %4220 = vmatpush1.bf16.msra.mxu1 %v8262_v34  ;;  %v8360_v33 = vld [vmem:[%s11298_s1 + $0xca4] ss:$16 sps:$4 sm:$0xff]   ;;  %v8363_v34 = vld [vmem:[%s11298_s1 + $0xcac] ss:$16 sps:$4 sm:$0xff]  }
 0x158   :  { %3834 = vmatprep.subr.bf16.mxu0 %v8267_v35  ;;  %4221 = vmatprep.subr.bf16.mxu1 %v8270_v36  ;;  %v8358_v35 = vld [vmem:[%s11298_s1 + $0xca0] ss:$16 sps:$4 sm:$0xff]   ;;  %v8361_v36 = vld [vmem:[%s11298_s1 + $0xca8] ss:$16 sps:$4 sm:$0xff]  }
 0x15b   :  { %3835 = vmatpush1.bf16.msra.mxu0 %v8265_v37  ;;  %4222 = vmatpush1.bf16.msra.mxu1 %v8268_v38  ;;  %v8366_v37 = vld [vmem:[%s11298_s1 + $0xcc4] ss:$16 sps:$4 sm:$0xff]   ;;  %v8369_v38 = vld [vmem:[%s11298_s1 + $0xccc] ss:$16 sps:$4 sm:$0xff]  }
 0x15c   :  { %3836 = vmatprep.subr.bf16.mxu0 %v8273_v39  ;;  %4223 = vmatprep.subr.bf16.mxu1 %v8276_v40  ;;  %v8364_v39 = vld [vmem:[%s11298_s1 + $0xcc0] ss:$16 sps:$4 sm:$0xff]   ;;  %v8367_v40 = vld [vmem:[%s11298_s1 + $0xcc8] ss:$16 sps:$4 sm:$0xff]  }
 0x15f   :  { %3837 = vmatpush1.bf16.msra.mxu0 %v8271_v41  ;;  %4224 = vmatpush1.bf16.msra.mxu1 %v8274_v42  ;;  %v8372_v41 = vld [vmem:[%s11298_s1 + $0xce4] ss:$16 sps:$4 sm:$0xff]   ;;  %v8375_v42 = vld [vmem:[%s11298_s1 + $0xcec] ss:$16 sps:$4 sm:$0xff]  }
 0x160   :  { %3838 = vmatprep.subr.bf16.mxu0 %v8279_v43  ;;  %4225 = vmatprep.subr.bf16.mxu1 %v8282_v44  ;;  %v8370_v43 = vld [vmem:[%s11298_s1 + $0xce0] ss:$16 sps:$4 sm:$0xff]   ;;  %v8373_v44 = vld [vmem:[%s11298_s1 + $0xce8] ss:$16 sps:$4 sm:$0xff]  }
 0x163   :  { %3839 = vmatpush1.bf16.msra.mxu0 %v8277_v45  ;;  %4226 = vmatpush1.bf16.msra.mxu1 %v8280_v46  ;;  %v8378_v45 = vld [vmem:[%s11298_s1 + $0xd04] ss:$16 sps:$4 sm:$0xff]   ;;  %v8381_v46 = vld [vmem:[%s11298_s1 + $0xd0c] ss:$16 sps:$4 sm:$0xff]  }
 0x164   :  { %3840 = vmatprep.subr.bf16.mxu0 %v8285_v47  ;;  %4227 = vmatprep.subr.bf16.mxu1 %v8288_v48  ;;  %v8376_v47 = vld [vmem:[%s11298_s1 + $0xd00] ss:$16 sps:$4 sm:$0xff]   ;;  %v8379_v48 = vld [vmem:[%s11298_s1 + $0xd08] ss:$16 sps:$4 sm:$0xff]  }
 0x167   :  { %3841 = vmatpush1.bf16.msra.mxu0 %v8283_v49  ;;  %4228 = vmatpush1.bf16.msra.mxu1 %v8286_v50  ;;  %v8384_v49 = vld [vmem:[%s11298_s1 + $0xd24] ss:$16 sps:$4 sm:$0xff]   ;;  %v8387_v50 = vld [vmem:[%s11298_s1 + $0xd2c] ss:$16 sps:$4 sm:$0xff]  }
 0x168   :  { %3842 = vmatprep.subr.bf16.mxu0 %v8291_v51  ;;  %4229 = vmatprep.subr.bf16.mxu1 %v8294_v52  ;;  %v8382_v51 = vld [vmem:[%s11298_s1 + $0xd20] ss:$16 sps:$4 sm:$0xff]   ;;  %v8385_v52 = vld [vmem:[%s11298_s1 + $0xd28] ss:$16 sps:$4 sm:$0xff]  }
 0x16b   :  { %3843 = vmatpush1.bf16.msra.mxu0 %v8289_v53  ;;  %4230 = vmatpush1.bf16.msra.mxu1 %v8292_v54  ;;  %v8390_v53 = vld [vmem:[%s11298_s1 + $0xd44] ss:$16 sps:$4 sm:$0xff]   ;;  %v8393_v54 = vld [vmem:[%s11298_s1 + $0xd4c] ss:$16 sps:$4 sm:$0xff]  }
 0x16c   :  { %3844 = vmatprep.subr.bf16.mxu0 %v8297_v55  ;;  %4231 = vmatprep.subr.bf16.mxu1 %v8300_v56  ;;  %v8388_v55 = vld [vmem:[%s11298_s1 + $0xd40] ss:$16 sps:$4 sm:$0xff]   ;;  %v8391_v56 = vld [vmem:[%s11298_s1 + $0xd48] ss:$16 sps:$4 sm:$0xff]  }
 0x16f   :  { %3845 = vmatpush1.bf16.msra.mxu0 %v8295_v57  ;;  %4232 = vmatpush1.bf16.msra.mxu1 %v8298_v58  ;;  %v8396_v57 = vld [vmem:[%s11298_s1 + $0xd64] ss:$16 sps:$4 sm:$0xff]   ;;  %v8399_v58 = vld [vmem:[%s11298_s1 + $0xd6c] ss:$16 sps:$4 sm:$0xff]  }
 0x170   :  { %3846 = vmatprep.subr.bf16.mxu0 %v8303_v59  ;;  %4233 = vmatprep.subr.bf16.mxu1 %v8306_v60  ;;  %v8394_v59 = vld [vmem:[%s11298_s1 + $0xd60] ss:$16 sps:$4 sm:$0xff]   ;;  %v8397_v60 = vld [vmem:[%s11298_s1 + $0xd68] ss:$16 sps:$4 sm:$0xff]  }
 0x173   :  { %3847 = vmatpush1.bf16.msra.mxu0 %v8301_v61  ;;  %4234 = vmatpush1.bf16.msra.mxu1 %v8304_v62  ;;  %v8402_v61 = vld [vmem:[%s11298_s1 + $0xd84] ss:$16 sps:$4 sm:$0xff]   ;;  %v8405_v62 = vld [vmem:[%s11298_s1 + $0xd8c] ss:$16 sps:$4 sm:$0xff]  }
 0x174   :  { %3848 = vmatprep.subr.bf16.mxu0 %v8309_v63  ;;  %4235 = vmatprep.subr.bf16.mxu1 %v8312_v0  ;;  %v8400_v63 = vld [vmem:[%s11298_s1 + $0xd80] ss:$16 sps:$4 sm:$0xff]   ;;  %v8403_v0 = vld [vmem:[%s11298_s1 + $0xd88] ss:$16 sps:$4 sm:$0xff]  }
 0x177   :  { %3849 = vmatpush1.bf16.msra.mxu0 %v8307_v1  ;;  %4236 = vmatpush1.bf16.msra.mxu1 %v8310_v2  ;;  %v8408_v1 = vld [vmem:[%s11298_s1 + $0xda4] ss:$16 sps:$4 sm:$0xff]   ;;  %v8411_v2 = vld [vmem:[%s11298_s1 + $0xdac] ss:$16 sps:$4 sm:$0xff]  }
 0x178   :  { %3850 = vmatprep.subr.bf16.mxu0 %v8315_v3  ;;  %4237 = vmatprep.subr.bf16.mxu1 %v8318_v4  ;;  %v8406_v3 = vld [vmem:[%s11298_s1 + $0xda0] ss:$16 sps:$4 sm:$0xff]   ;;  %v8409_v4 = vld [vmem:[%s11298_s1 + $0xda8] ss:$16 sps:$4 sm:$0xff]  }
 0x17b   :  { %3851 = vmatpush1.bf16.msra.mxu0 %v8313_v5  ;;  %4238 = vmatpush1.bf16.msra.mxu1 %v8316_v6  ;;  %v8414_v5 = vld [vmem:[%s11298_s1 + $0xdc4] ss:$16 sps:$4 sm:$0xff]   ;;  %v8417_v6 = vld [vmem:[%s11298_s1 + $0xdcc] ss:$16 sps:$4 sm:$0xff]  }
 0x17c   :  { %3852 = vmatprep.subr.bf16.mxu0 %v8321_v7  ;;  %4239 = vmatprep.subr.bf16.mxu1 %v8324_v8  ;;  %v8412_v7 = vld [vmem:[%s11298_s1 + $0xdc0] ss:$16 sps:$4 sm:$0xff]   ;;  %v8415_v8 = vld [vmem:[%s11298_s1 + $0xdc8] ss:$16 sps:$4 sm:$0xff]  }
 0x17f   :  { %3853 = vmatpush1.bf16.msra.mxu0 %v8319_v9  ;;  %4240 = vmatpush1.bf16.msra.mxu1 %v8322_v10  ;;  %v8420_v9 = vld [vmem:[%s11298_s1 + $0xde4] ss:$16 sps:$4 sm:$0xff]   ;;  %v8423_v10 = vld [vmem:[%s11298_s1 + $0xdec] ss:$16 sps:$4 sm:$0xff]  }
 0x180   :  { %3865 = vmatprep.subr.bf16.mxu0 %v8330_v11  ;;  %4252 = vmatprep.subr.bf16.mxu1 %v8333_v12  ;;  %v8418_v11 = vld [vmem:[%s11298_s1 + $0xde0] ss:$16 sps:$4 sm:$0xff]   ;;  %v8421_v12 = vld [vmem:[%s11298_s1 + $0xde8] ss:$16 sps:$4 sm:$0xff]  }
 0x182   :  { %3855 = vmatmul.mubr.bf16.vlgmr.msra.gmra.mrb[0].mxu0 %v8325_v13  ;;  %4242 = vmatmul.mubr.bf16.vlgmr.msra.gmra.mrb[0].mxu1 %v8325_v13  ;;  %v8429_v13 = vld [vmem:[%s11298_s1 + $0xe04] ss:$16 sps:$4 sm:$0xff]  }
 0x183   :  { %3866 = vmatpush1.bf16.msra.mxu0 %v8328_v14  ;;  %4253 = vmatpush1.bf16.msra.mxu1 %v8331_v15  ;;  %v8432_v14 = vld [vmem:[%s11298_s1 + $0xe0c] ss:$16 sps:$4 sm:$0xff]   ;;  %v8424_v15 = vld [vmem:[%s11299_s0 + $0x30] ss:$72 sps:$4 sm:$0x3f]  }
 0x184   :  { %3867 = vmatprep.subr.bf16.mxu0 %v8336_v16  ;;  %4254 = vmatprep.subr.bf16.mxu1 %v8339_v17  ;;  %v8427_v16 = vld [vmem:[%s11298_s1 + $0xe00] ss:$16 sps:$4 sm:$0xff]   ;;  %v8430_v17 = vld [vmem:[%s11298_s1 + $0xe08] ss:$16 sps:$4 sm:$0xff]  }
 0x185   :  { %3897 = vmatprep.mubr.bf16.mxu0 %v8426_v18  ;;  %4284 = vmatprep.mubr.bf16.mxu1 %v8426_v18  ;;  %v8435_v18 = vld [vmem:[%s11298_s1 + $0xe24] ss:$16 sps:$4 sm:$0xff]  }
 0x187   :  { %3868 = vmatpush1.bf16.msra.mxu0 %v8334_v19  ;;  %4255 = vmatpush1.bf16.msra.mxu1 %v8337_v20  ;;  %v8438_v19 = vld [vmem:[%s11298_s1 + $0xe2c] ss:$16 sps:$4 sm:$0xff]  }
 0x188   :  { %3869 = vmatprep.subr.bf16.mxu0 %v8342_v21  ;;  %4256 = vmatprep.subr.bf16.mxu1 %v8345_v22  ;;  %v8525_v20 = vld [vmem:[%s11299_s0 + $0x3c] ss:$72 sps:$4 sm:$0x3f]   ;;  %v8433_v21 = vld [vmem:[%s11298_s1 + $0xe20] ss:$16 sps:$4 sm:$0xff]  }
 0x189   :  { %v8436_v22 = vld [vmem:[%s11298_s1 + $0xe28] ss:$16 sps:$4 sm:$0xff]  }
 0x18b   :  { %3870 = vmatpush1.bf16.msra.mxu0 %v8340_v23  ;;  %4257 = vmatpush1.bf16.msra.mxu1 %v8343_v24  ;;  %v8441_v23 = vld [vmem:[%s11298_s1 + $0xe44] ss:$16 sps:$4 sm:$0xff]   ;;  %v8444_v24 = vld [vmem:[%s11298_s1 + $0xe4c] ss:$16 sps:$4 sm:$0xff]  }
 0x18c   :  { %3871 = vmatprep.subr.bf16.mxu0 %v8348_v25  ;;  %4258 = vmatprep.subr.bf16.mxu1 %v8351_v26  ;;  %v8439_v25 = vld [vmem:[%s11298_s1 + $0xe40] ss:$16 sps:$4 sm:$0xff]   ;;  %v8442_v26 = vld [vmem:[%s11298_s1 + $0xe48] ss:$16 sps:$4 sm:$0xff]  }
 0x18f   :  { %3872 = vmatpush1.bf16.msra.mxu0 %v8346_v27  ;;  %4259 = vmatpush1.bf16.msra.mxu1 %v8349_v28  ;;  %v8447_v27 = vld [vmem:[%s11298_s1 + $0xe64] ss:$16 sps:$4 sm:$0xff]   ;;  %v8450_v28 = vld [vmem:[%s11298_s1 + $0xe6c] ss:$16 sps:$4 sm:$0xff]  }
 0x190   :  { %3873 = vmatprep.subr.bf16.mxu0 %v8354_v29  ;;  %4260 = vmatprep.subr.bf16.mxu1 %v8357_v30  ;;  %v8445_v29 = vld [vmem:[%s11298_s1 + $0xe60] ss:$16 sps:$4 sm:$0xff]   ;;  %v8448_v30 = vld [vmem:[%s11298_s1 + $0xe68] ss:$16 sps:$4 sm:$0xff]  }
 0x193   :  { %3874 = vmatpush1.bf16.msra.mxu0 %v8352_v31  ;;  %4261 = vmatpush1.bf16.msra.mxu1 %v8355_v32  ;;  %v8453_v31 = vld [vmem:[%s11298_s1 + $0xe84] ss:$16 sps:$4 sm:$0xff]   ;;  %v8456_v32 = vld [vmem:[%s11298_s1 + $0xe8c] ss:$16 sps:$4 sm:$0xff]  }
 0x194   :  { %3875 = vmatprep.subr.bf16.mxu0 %v8360_v33  ;;  %4262 = vmatprep.subr.bf16.mxu1 %v8363_v34  ;;  %v8451_v33 = vld [vmem:[%s11298_s1 + $0xe80] ss:$16 sps:$4 sm:$0xff]   ;;  %v8454_v34 = vld [vmem:[%s11298_s1 + $0xe88] ss:$16 sps:$4 sm:$0xff]  }
 0x197   :  { %3876 = vmatpush1.bf16.msra.mxu0 %v8358_v35  ;;  %4263 = vmatpush1.bf16.msra.mxu1 %v8361_v36  ;;  %v8459_v35 = vld [vmem:[%s11298_s1 + $0xea4] ss:$16 sps:$4 sm:$0xff]   ;;  %v8462_v36 = vld [vmem:[%s11298_s1 + $0xeac] ss:$16 sps:$4 sm:$0xff]  }
 0x198   :  { %3877 = vmatprep.subr.bf16.mxu0 %v8366_v37  ;;  %4264 = vmatprep.subr.bf16.mxu1 %v8369_v38  ;;  %v8457_v37 = vld [vmem:[%s11298_s1 + $0xea0] ss:$16 sps:$4 sm:$0xff]   ;;  %v8460_v38 = vld [vmem:[%s11298_s1 + $0xea8] ss:$16 sps:$4 sm:$0xff]  }
 0x19b   :  { %3878 = vmatpush1.bf16.msra.mxu0 %v8364_v39  ;;  %4265 = vmatpush1.bf16.msra.mxu1 %v8367_v40  ;;  %v8465_v39 = vld [vmem:[%s11298_s1 + $0xec4] ss:$16 sps:$4 sm:$0xff]   ;;  %v8468_v40 = vld [vmem:[%s11298_s1 + $0xecc] ss:$16 sps:$4 sm:$0xff]  }
 0x19c   :  { %3879 = vmatprep.subr.bf16.mxu0 %v8372_v41  ;;  %4266 = vmatprep.subr.bf16.mxu1 %v8375_v42  ;;  %v8463_v41 = vld [vmem:[%s11298_s1 + $0xec0] ss:$16 sps:$4 sm:$0xff]   ;;  %v8466_v42 = vld [vmem:[%s11298_s1 + $0xec8] ss:$16 sps:$4 sm:$0xff]  }
 0x19f   :  { %3880 = vmatpush1.bf16.msra.mxu0 %v8370_v43  ;;  %4267 = vmatpush1.bf16.msra.mxu1 %v8373_v44  ;;  %v8471_v43 = vld [vmem:[%s11298_s1 + $0xee4] ss:$16 sps:$4 sm:$0xff]   ;;  %v8474_v44 = vld [vmem:[%s11298_s1 + $0xeec] ss:$16 sps:$4 sm:$0xff]  }
 0x1a0   :  { %3881 = vmatprep.subr.bf16.mxu0 %v8378_v45  ;;  %4268 = vmatprep.subr.bf16.mxu1 %v8381_v46  ;;  %v8469_v45 = vld [vmem:[%s11298_s1 + $0xee0] ss:$16 sps:$4 sm:$0xff]   ;;  %v8472_v46 = vld [vmem:[%s11298_s1 + $0xee8] ss:$16 sps:$4 sm:$0xff]  }
 0x1a3   :  { %3882 = vmatpush1.bf16.msra.mxu0 %v8376_v47  ;;  %4269 = vmatpush1.bf16.msra.mxu1 %v8379_v48  ;;  %v8477_v47 = vld [vmem:[%s11298_s1 + $0xf04] ss:$16 sps:$4 sm:$0xff]   ;;  %v8480_v48 = vld [vmem:[%s11298_s1 + $0xf0c] ss:$16 sps:$4 sm:$0xff]  }
 0x1a4   :  { %3883 = vmatprep.subr.bf16.mxu0 %v8384_v49  ;;  %4270 = vmatprep.subr.bf16.mxu1 %v8387_v50  ;;  %v8475_v49 = vld [vmem:[%s11298_s1 + $0xf00] ss:$16 sps:$4 sm:$0xff]   ;;  %v8478_v50 = vld [vmem:[%s11298_s1 + $0xf08] ss:$16 sps:$4 sm:$0xff]  }
 0x1a7   :  { %3884 = vmatpush1.bf16.msra.mxu0 %v8382_v51  ;;  %4271 = vmatpush1.bf16.msra.mxu1 %v8385_v52  ;;  %v8483_v51 = vld [vmem:[%s11298_s1 + $0xf24] ss:$16 sps:$4 sm:$0xff]   ;;  %v8486_v52 = vld [vmem:[%s11298_s1 + $0xf2c] ss:$16 sps:$4 sm:$0xff]  }
 0x1a8   :  { %3885 = vmatprep.subr.bf16.mxu0 %v8390_v53  ;;  %4272 = vmatprep.subr.bf16.mxu1 %v8393_v54  ;;  %v8481_v53 = vld [vmem:[%s11298_s1 + $0xf20] ss:$16 sps:$4 sm:$0xff]   ;;  %v8484_v54 = vld [vmem:[%s11298_s1 + $0xf28] ss:$16 sps:$4 sm:$0xff]  }
 0x1ab   :  { %3886 = vmatpush1.bf16.msra.mxu0 %v8388_v55  ;;  %4273 = vmatpush1.bf16.msra.mxu1 %v8391_v56  ;;  %v8489_v55 = vld [vmem:[%s11298_s1 + $0xf44] ss:$16 sps:$4 sm:$0xff]   ;;  %v8492_v56 = vld [vmem:[%s11298_s1 + $0xf4c] ss:$16 sps:$4 sm:$0xff]  }
 0x1ac   :  { %3887 = vmatprep.subr.bf16.mxu0 %v8396_v57  ;;  %4274 = vmatprep.subr.bf16.mxu1 %v8399_v58  ;;  %v8487_v57 = vld [vmem:[%s11298_s1 + $0xf40] ss:$16 sps:$4 sm:$0xff]   ;;  %v8490_v58 = vld [vmem:[%s11298_s1 + $0xf48] ss:$16 sps:$4 sm:$0xff]  }
 0x1af   :  { %3888 = vmatpush1.bf16.msra.mxu0 %v8394_v59  ;;  %4275 = vmatpush1.bf16.msra.mxu1 %v8397_v60  ;;  %v8495_v59 = vld [vmem:[%s11298_s1 + $0xf64] ss:$16 sps:$4 sm:$0xff]   ;;  %v8498_v60 = vld [vmem:[%s11298_s1 + $0xf6c] ss:$16 sps:$4 sm:$0xff]  }
 0x1b0   :  { %3889 = vmatprep.subr.bf16.mxu0 %v8402_v61  ;;  %4276 = vmatprep.subr.bf16.mxu1 %v8405_v62  ;;  %v8493_v61 = vld [vmem:[%s11298_s1 + $0xf60] ss:$16 sps:$4 sm:$0xff]   ;;  %v8496_v62 = vld [vmem:[%s11298_s1 + $0xf68] ss:$16 sps:$4 sm:$0xff]  }
 0x1b3   :  { %3890 = vmatpush1.bf16.msra.mxu0 %v8400_v63  ;;  %4277 = vmatpush1.bf16.msra.mxu1 %v8403_v0  ;;  %v8501_v63 = vld [vmem:[%s11298_s1 + $0xf84] ss:$16 sps:$4 sm:$0xff]   ;;  %v8504_v0 = vld [vmem:[%s11298_s1 + $0xf8c] ss:$16 sps:$4 sm:$0xff]  }
 0x1b4   :  { %3891 = vmatprep.subr.bf16.mxu0 %v8408_v1  ;;  %4278 = vmatprep.subr.bf16.mxu1 %v8411_v2  ;;  %v8499_v1 = vld [vmem:[%s11298_s1 + $0xf80] ss:$16 sps:$4 sm:$0xff]   ;;  %v8502_v2 = vld [vmem:[%s11298_s1 + $0xf88] ss:$16 sps:$4 sm:$0xff]  }
 0x1b7   :  { %3892 = vmatpush1.bf16.msra.mxu0 %v8406_v3  ;;  %4279 = vmatpush1.bf16.msra.mxu1 %v8409_v4  ;;  %v8507_v3 = vld [vmem:[%s11298_s1 + $0xfa4] ss:$16 sps:$4 sm:$0xff]   ;;  %v8510_v4 = vld [vmem:[%s11298_s1 + $0xfac] ss:$16 sps:$4 sm:$0xff]  }
 0x1b8   :  { %3893 = vmatprep.subr.bf16.mxu0 %v8414_v5  ;;  %4280 = vmatprep.subr.bf16.mxu1 %v8417_v6  ;;  %v8505_v5 = vld [vmem:[%s11298_s1 + $0xfa0] ss:$16 sps:$4 sm:$0xff]   ;;  %v8508_v6 = vld [vmem:[%s11298_s1 + $0xfa8] ss:$16 sps:$4 sm:$0xff]  }
 0x1bb   :  { %3894 = vmatpush1.bf16.msra.mxu0 %v8412_v7  ;;  %4281 = vmatpush1.bf16.msra.mxu1 %v8415_v8  ;;  %v8513_v7 = vld [vmem:[%s11298_s1 + $0xfc4] ss:$16 sps:$4 sm:$0xff]   ;;  %v8516_v8 = vld [vmem:[%s11298_s1 + $0xfcc] ss:$16 sps:$4 sm:$0xff]  }
 0x1bc   :  { %3895 = vmatprep.subr.bf16.mxu0 %v8420_v9  ;;  %4282 = vmatprep.subr.bf16.mxu1 %v8423_v10  ;;  %v8511_v9 = vld [vmem:[%s11298_s1 + $0xfc0] ss:$16 sps:$4 sm:$0xff]   ;;  %v8514_v10 = vld [vmem:[%s11298_s1 + $0xfc8] ss:$16 sps:$4 sm:$0xff]  }
 0x1bf   :  { %3896 = vmatpush1.bf16.msra.mxu0 %v8418_v11  ;;  %4283 = vmatpush1.bf16.msra.mxu1 %v8421_v12  ;;  %v8519_v11 = vld [vmem:[%s11298_s1 + $0xfe4] ss:$16 sps:$4 sm:$0xff]   ;;  %v8522_v12 = vld [vmem:[%s11298_s1 + $0xfec] ss:$16 sps:$4 sm:$0xff]  }
 0x1c0   :  { %3908 = vmatprep.subr.bf16.mxu0 %v8429_v13  ;;  %4295 = vmatprep.subr.bf16.mxu1 %v8432_v14  ;;  %v8517_v13 = vld [vmem:[%s11298_s1 + $0xfe0] ss:$16 sps:$4 sm:$0xff]   ;;  %v8520_v14 = vld [vmem:[%s11298_s1 + $0xfe8] ss:$16 sps:$4 sm:$0xff]  }
 0x1c2   :  { %3898 = vmatmul.mubr.bf16.vlgmr.msra.gmra.mrb[0].mxu0 %v8424_v15  ;;  %4285 = vmatmul.mubr.bf16.vlgmr.msra.gmra.mrb[0].mxu1 %v8424_v15  ;;  %v8528_v15 = vld [vmem:[%s11298_s1 + $0x1004] ss:$16 sps:$4 sm:$0xff]  }
 0x1c3   :  { %3909 = vmatpush1.bf16.msra.mxu0 %v8427_v16  ;;  %4296 = vmatpush1.bf16.msra.mxu1 %v8430_v17  ;;  %v8531_v16 = vld [vmem:[%s11298_s1 + $0x100c] ss:$16 sps:$4 sm:$0xff]   ;;  %v8523_v17 = vld [vmem:[%s11299_s0 + $0x38] ss:$72 sps:$4 sm:$0x3f]  }
 0x1c4   :  { %3910 = vmatprep.subr.bf16.mxu0 %v8435_v18  ;;  %4297 = vmatprep.subr.bf16.mxu1 %v8438_v19  ;;  %v8526_v18 = vld [vmem:[%s11298_s1 + $0x1000] ss:$16 sps:$4 sm:$0xff]   ;;  %v8529_v19 = vld [vmem:[%s11298_s1 + $0x1008] ss:$16 sps:$4 sm:$0xff]  }
 0x1c5   :  { %3940 = vmatprep.mubr.bf16.mxu0 %v8525_v20  ;;  %4327 = vmatprep.mubr.bf16.mxu1 %v8525_v20  ;;  %v8534_v20 = vld [vmem:[%s11298_s1 + $0x1024] ss:$16 sps:$4 sm:$0xff]  }
 0x1c7   :  { %3911 = vmatpush1.bf16.msra.mxu0 %v8433_v21  ;;  %4298 = vmatpush1.bf16.msra.mxu1 %v8436_v22  ;;  %v8537_v21 = vld [vmem:[%s11298_s1 + $0x102c] ss:$16 sps:$4 sm:$0xff]  }
 0x1c8   :  { %3912 = vmatprep.subr.bf16.mxu0 %v8441_v23  ;;  %4299 = vmatprep.subr.bf16.mxu1 %v8444_v24  ;;  %v8624_v22 = vld [vmem:[%s11299_s0 + $0x44] ss:$72 sps:$4 sm:$0x3f]   ;;  %v8532_v23 = vld [vmem:[%s11298_s1 + $0x1020] ss:$16 sps:$4 sm:$0xff]  }
 0x1c9   :  { %v8535_v24 = vld [vmem:[%s11298_s1 + $0x1028] ss:$16 sps:$4 sm:$0xff]  }
 0x1cb   :  { %3913 = vmatpush1.bf16.msra.mxu0 %v8439_v25  ;;  %4300 = vmatpush1.bf16.msra.mxu1 %v8442_v26  ;;  %v8540_v25 = vld [vmem:[%s11298_s1 + $0x1044] ss:$16 sps:$4 sm:$0xff]   ;;  %v8543_v26 = vld [vmem:[%s11298_s1 + $0x104c] ss:$16 sps:$4 sm:$0xff]  }
 0x1cc   :  { %3914 = vmatprep.subr.bf16.mxu0 %v8447_v27  ;;  %4301 = vmatprep.subr.bf16.mxu1 %v8450_v28  ;;  %v8538_v27 = vld [vmem:[%s11298_s1 + $0x1040] ss:$16 sps:$4 sm:$0xff]   ;;  %v8541_v28 = vld [vmem:[%s11298_s1 + $0x1048] ss:$16 sps:$4 sm:$0xff]  }
 0x1cf   :  { %3915 = vmatpush1.bf16.msra.mxu0 %v8445_v29  ;;  %4302 = vmatpush1.bf16.msra.mxu1 %v8448_v30  ;;  %v8546_v29 = vld [vmem:[%s11298_s1 + $0x1064] ss:$16 sps:$4 sm:$0xff]   ;;  %v8549_v30 = vld [vmem:[%s11298_s1 + $0x106c] ss:$16 sps:$4 sm:$0xff]  }
 0x1d0   :  { %3916 = vmatprep.subr.bf16.mxu0 %v8453_v31  ;;  %4303 = vmatprep.subr.bf16.mxu1 %v8456_v32  ;;  %v8544_v31 = vld [vmem:[%s11298_s1 + $0x1060] ss:$16 sps:$4 sm:$0xff]   ;;  %v8547_v32 = vld [vmem:[%s11298_s1 + $0x1068] ss:$16 sps:$4 sm:$0xff]  }
 0x1d3   :  { %3917 = vmatpush1.bf16.msra.mxu0 %v8451_v33  ;;  %4304 = vmatpush1.bf16.msra.mxu1 %v8454_v34  ;;  %v8552_v33 = vld [vmem:[%s11298_s1 + $0x1084] ss:$16 sps:$4 sm:$0xff]   ;;  %v8555_v34 = vld [vmem:[%s11298_s1 + $0x108c] ss:$16 sps:$4 sm:$0xff]  }
 0x1d4   :  { %3918 = vmatprep.subr.bf16.mxu0 %v8459_v35  ;;  %4305 = vmatprep.subr.bf16.mxu1 %v8462_v36  ;;  %v8550_v35 = vld [vmem:[%s11298_s1 + $0x1080] ss:$16 sps:$4 sm:$0xff]   ;;  %v8553_v36 = vld [vmem:[%s11298_s1 + $0x1088] ss:$16 sps:$4 sm:$0xff]  }
 0x1d7   :  { %3919 = vmatpush1.bf16.msra.mxu0 %v8457_v37  ;;  %4306 = vmatpush1.bf16.msra.mxu1 %v8460_v38  ;;  %v8558_v37 = vld [vmem:[%s11298_s1 + $0x10a4] ss:$16 sps:$4 sm:$0xff]   ;;  %v8561_v38 = vld [vmem:[%s11298_s1 + $0x10ac] ss:$16 sps:$4 sm:$0xff]  }
 0x1d8   :  { %3920 = vmatprep.subr.bf16.mxu0 %v8465_v39  ;;  %4307 = vmatprep.subr.bf16.mxu1 %v8468_v40  ;;  %v8556_v39 = vld [vmem:[%s11298_s1 + $0x10a0] ss:$16 sps:$4 sm:$0xff]   ;;  %v8559_v40 = vld [vmem:[%s11298_s1 + $0x10a8] ss:$16 sps:$4 sm:$0xff]  }
 0x1db   :  { %3921 = vmatpush1.bf16.msra.mxu0 %v8463_v41  ;;  %4308 = vmatpush1.bf16.msra.mxu1 %v8466_v42  ;;  %v8564_v41 = vld [vmem:[%s11298_s1 + $0x10c4] ss:$16 sps:$4 sm:$0xff]   ;;  %v8567_v42 = vld [vmem:[%s11298_s1 + $0x10cc] ss:$16 sps:$4 sm:$0xff]  }
 0x1dc   :  { %3922 = vmatprep.subr.bf16.mxu0 %v8471_v43  ;;  %4309 = vmatprep.subr.bf16.mxu1 %v8474_v44  ;;  %v8562_v43 = vld [vmem:[%s11298_s1 + $0x10c0] ss:$16 sps:$4 sm:$0xff]   ;;  %v8565_v44 = vld [vmem:[%s11298_s1 + $0x10c8] ss:$16 sps:$4 sm:$0xff]  }
 0x1df   :  { %3923 = vmatpush1.bf16.msra.mxu0 %v8469_v45  ;;  %4310 = vmatpush1.bf16.msra.mxu1 %v8472_v46  ;;  %v8570_v45 = vld [vmem:[%s11298_s1 + $0x10e4] ss:$16 sps:$4 sm:$0xff]   ;;  %v8573_v46 = vld [vmem:[%s11298_s1 + $0x10ec] ss:$16 sps:$4 sm:$0xff]  }
 0x1e0   :  { %3924 = vmatprep.subr.bf16.mxu0 %v8477_v47  ;;  %4311 = vmatprep.subr.bf16.mxu1 %v8480_v48  ;;  %v8568_v47 = vld [vmem:[%s11298_s1 + $0x10e0] ss:$16 sps:$4 sm:$0xff]   ;;  %v8571_v48 = vld [vmem:[%s11298_s1 + $0x10e8] ss:$16 sps:$4 sm:$0xff]  }
 0x1e3   :  { %3925 = vmatpush1.bf16.msra.mxu0 %v8475_v49  ;;  %4312 = vmatpush1.bf16.msra.mxu1 %v8478_v50  ;;  %v8576_v49 = vld [vmem:[%s11298_s1 + $0x1104] ss:$16 sps:$4 sm:$0xff]   ;;  %v8579_v50 = vld [vmem:[%s11298_s1 + $0x110c] ss:$16 sps:$4 sm:$0xff]  }
 0x1e4   :  { %3926 = vmatprep.subr.bf16.mxu0 %v8483_v51  ;;  %4313 = vmatprep.subr.bf16.mxu1 %v8486_v52  ;;  %v8574_v51 = vld [vmem:[%s11298_s1 + $0x1100] ss:$16 sps:$4 sm:$0xff]   ;;  %v8577_v52 = vld [vmem:[%s11298_s1 + $0x1108] ss:$16 sps:$4 sm:$0xff]  }
 0x1e7   :  { %3927 = vmatpush1.bf16.msra.mxu0 %v8481_v53  ;;  %4314 = vmatpush1.bf16.msra.mxu1 %v8484_v54  ;;  %v8582_v53 = vld [vmem:[%s11298_s1 + $0x1124] ss:$16 sps:$4 sm:$0xff]   ;;  %v8585_v54 = vld [vmem:[%s11298_s1 + $0x112c] ss:$16 sps:$4 sm:$0xff]  }
 0x1e8   :  { %3928 = vmatprep.subr.bf16.mxu0 %v8489_v55  ;;  %4315 = vmatprep.subr.bf16.mxu1 %v8492_v56  ;;  %v8580_v55 = vld [vmem:[%s11298_s1 + $0x1120] ss:$16 sps:$4 sm:$0xff]   ;;  %v8583_v56 = vld [vmem:[%s11298_s1 + $0x1128] ss:$16 sps:$4 sm:$0xff]  }
 0x1eb   :  { %3929 = vmatpush1.bf16.msra.mxu0 %v8487_v57  ;;  %4316 = vmatpush1.bf16.msra.mxu1 %v8490_v58  ;;  %v8588_v57 = vld [vmem:[%s11298_s1 + $0x1144] ss:$16 sps:$4 sm:$0xff]   ;;  %v8591_v58 = vld [vmem:[%s11298_s1 + $0x114c] ss:$16 sps:$4 sm:$0xff]  }
 0x1ec   :  { %3930 = vmatprep.subr.bf16.mxu0 %v8495_v59  ;;  %4317 = vmatprep.subr.bf16.mxu1 %v8498_v60  ;;  %v8586_v59 = vld [vmem:[%s11298_s1 + $0x1140] ss:$16 sps:$4 sm:$0xff]   ;;  %v8589_v60 = vld [vmem:[%s11298_s1 + $0x1148] ss:$16 sps:$4 sm:$0xff]  }
 0x1ef   :  { %3931 = vmatpush1.bf16.msra.mxu0 %v8493_v61  ;;  %4318 = vmatpush1.bf16.msra.mxu1 %v8496_v62  ;;  %v8594_v61 = vld [vmem:[%s11298_s1 + $0x1164] ss:$16 sps:$4 sm:$0xff]   ;;  %v8597_v62 = vld [vmem:[%s11298_s1 + $0x116c] ss:$16 sps:$4 sm:$0xff]  }
 0x1f0   :  { %3932 = vmatprep.subr.bf16.mxu0 %v8501_v63  ;;  %4319 = vmatprep.subr.bf16.mxu1 %v8504_v0  ;;  %v8592_v63 = vld [vmem:[%s11298_s1 + $0x1160] ss:$16 sps:$4 sm:$0xff]   ;;  %v8595_v0 = vld [vmem:[%s11298_s1 + $0x1168] ss:$16 sps:$4 sm:$0xff]  }
 0x1f3   :  { %3933 = vmatpush1.bf16.msra.mxu0 %v8499_v1  ;;  %4320 = vmatpush1.bf16.msra.mxu1 %v8502_v2  ;;  %v8600_v1 = vld [vmem:[%s11298_s1 + $0x1184] ss:$16 sps:$4 sm:$0xff]   ;;  %v8603_v2 = vld [vmem:[%s11298_s1 + $0x118c] ss:$16 sps:$4 sm:$0xff]  }
 0x1f4   :  { %3934 = vmatprep.subr.bf16.mxu0 %v8507_v3  ;;  %4321 = vmatprep.subr.bf16.mxu1 %v8510_v4  ;;  %v8598_v3 = vld [vmem:[%s11298_s1 + $0x1180] ss:$16 sps:$4 sm:$0xff]   ;;  %v8601_v4 = vld [vmem:[%s11298_s1 + $0x1188] ss:$16 sps:$4 sm:$0xff]  }
 0x1f7   :  { %3935 = vmatpush1.bf16.msra.mxu0 %v8505_v5  ;;  %4322 = vmatpush1.bf16.msra.mxu1 %v8508_v6  ;;  %v8606_v5 = vld [vmem:[%s11298_s1 + $0x11a4] ss:$16 sps:$4 sm:$0xff]   ;;  %v8609_v6 = vld [vmem:[%s11298_s1 + $0x11ac] ss:$16 sps:$4 sm:$0xff]  }
 0x1f8   :  { %3936 = vmatprep.subr.bf16.mxu0 %v8513_v7  ;;  %4323 = vmatprep.subr.bf16.mxu1 %v8516_v8  ;;  %v8604_v7 = vld [vmem:[%s11298_s1 + $0x11a0] ss:$16 sps:$4 sm:$0xff]   ;;  %v8607_v8 = vld [vmem:[%s11298_s1 + $0x11a8] ss:$16 sps:$4 sm:$0xff]  }
 0x1fb   :  { %3937 = vmatpush1.bf16.msra.mxu0 %v8511_v9  ;;  %4324 = vmatpush1.bf16.msra.mxu1 %v8514_v10  ;;  %v8612_v9 = vld [vmem:[%s11298_s1 + $0x11c4] ss:$16 sps:$4 sm:$0xff]   ;;  %v8615_v10 = vld [vmem:[%s11298_s1 + $0x11cc] ss:$16 sps:$4 sm:$0xff]  }
 0x1fc   :  { %3938 = vmatprep.subr.bf16.mxu0 %v8519_v11  ;;  %4325 = vmatprep.subr.bf16.mxu1 %v8522_v12  ;;  %v8610_v11 = vld [vmem:[%s11298_s1 + $0x11c0] ss:$16 sps:$4 sm:$0xff]   ;;  %v8613_v12 = vld [vmem:[%s11298_s1 + $0x11c8] ss:$16 sps:$4 sm:$0xff]  }
 0x1ff   :  { %3939 = vmatpush1.bf16.msra.mxu0 %v8517_v13  ;;  %4326 = vmatpush1.bf16.msra.mxu1 %v8520_v14  ;;  %v8618_v13 = vld [vmem:[%s11298_s1 + $0x11e4] ss:$16 sps:$4 sm:$0xff]   ;;  %v8621_v14 = vld [vmem:[%s11298_s1 + $0x11ec] ss:$16 sps:$4 sm:$0xff]  }
 0x200   :  { %3951 = vmatprep.subr.bf16.mxu0 %v8528_v15  ;;  %4338 = vmatprep.subr.bf16.mxu1 %v8531_v16  ;;  %v8616_v15 = vld [vmem:[%s11298_s1 + $0x11e0] ss:$16 sps:$4 sm:$0xff]   ;;  %v8619_v16 = vld [vmem:[%s11298_s1 + $0x11e8] ss:$16 sps:$4 sm:$0xff]  }
 0x202   :  { %3941 = vmatmul.mubr.bf16.vlgmr.msra.gmra.mrb[0].mxu0 %v8523_v17  ;;  %4328 = vmatmul.mubr.bf16.vlgmr.msra.gmra.mrb[0].mxu1 %v8523_v17  ;;  %v8625_v17 = vld [vmem:[%s11300_s3 + $0x140] sm:$0xff]  }
 0x203   :  { %3952 = vmatpush1.bf16.msra.mxu0 %v8526_v18  ;;  %4339 = vmatpush1.bf16.msra.mxu1 %v8529_v19  ;;  %v8626_v18 = vld [vmem:[%s11300_s3 + $0x1c0] sm:$0xff]  }
 0x204   :  { %3953 = vmatprep.subr.bf16.mxu0 %v8534_v20  ;;  %4340 = vmatprep.subr.bf16.mxu1 %v8537_v21  ;;  %v8622_v19 = vld [vmem:[%s11299_s0 + $0x40] ss:$72 sps:$4 sm:$0x3f]  }
 0x205   :  { %3983 = vmatprep.mubr.bf16.mxu0 %v8624_v22  ;;  %4370 = vmatprep.mubr.bf16.mxu1 %v8624_v22  ;;  %v8627_v20 = vld [vmem:[%s11300_s3 + $0x100] sm:$0xff]   ;;  %v8629_v22 = vld [vmem:[%s11300_s3 + $0x148] sm:$0xff]  }
 0x206   :  { %v8628_v21 = vld [vmem:[%s11300_s3 + $0x180] sm:$0xff]  }
 0x207   :  { %3954 = vmatpush1.bf16.msra.mxu0 %v8532_v23  ;;  %4341 = vmatpush1.bf16.msra.mxu1 %v8535_v24  ;;  %v8630_v23 = vld [vmem:[%s11300_s3 + $0x1c8] sm:$0xff]  }
 0x208   :  { %3955 = vmatprep.subr.bf16.mxu0 %v8540_v25  ;;  %4342 = vmatprep.subr.bf16.mxu1 %v8543_v26  ;;  %v8631_v24 = vld [vmem:[%s11300_s3 + $0x108] sm:$0xff]   ;;  %v8633_v26 = vld [vmem:[%s11300_s3 + $0x150] sm:$0xff]  }
 0x209   :  { %v8632_v25 = vld [vmem:[%s11300_s3 + $0x188] sm:$0xff]  }
 0x20b   :  { %3956 = vmatpush1.bf16.msra.mxu0 %v8538_v27  ;;  %4343 = vmatpush1.bf16.msra.mxu1 %v8541_v28  ;;  %v8634_v27 = vld [vmem:[%s11300_s3 + $0x1d0] sm:$0xff]  }
 0x20c   :  { %3957 = vmatprep.subr.bf16.mxu0 %v8546_v29  ;;  %4344 = vmatprep.subr.bf16.mxu1 %v8549_v30  ;;  %v8635_v28 = vld [vmem:[%s11300_s3 + $0x110] sm:$0xff]   ;;  %v8637_v30 = vld [vmem:[%s11300_s3 + $0x158] sm:$0xff]  }
 0x20d   :  { %v8636_v29 = vld [vmem:[%s11300_s3 + $0x190] sm:$0xff]  }
 0x20f   :  { %3958 = vmatpush1.bf16.msra.mxu0 %v8544_v31  ;;  %4345 = vmatpush1.bf16.msra.mxu1 %v8547_v32  ;;  %v8638_v31 = vld [vmem:[%s11300_s3 + $0x1d8] sm:$0xff]  }
 0x210   :  { %3959 = vmatprep.subr.bf16.mxu0 %v8552_v33  ;;  %4346 = vmatprep.subr.bf16.mxu1 %v8555_v34  ;;  %v8639_v32 = vld [vmem:[%s11300_s3 + $0x118] sm:$0xff]   ;;  %v8641_v34 = vld [vmem:[%s11300_s3 + $0x160] sm:$0xff]  }
 0x211   :  { %v8640_v33 = vld [vmem:[%s11300_s3 + $0x198] sm:$0xff]  }
 0x213   :  { %3960 = vmatpush1.bf16.msra.mxu0 %v8550_v35  ;;  %4347 = vmatpush1.bf16.msra.mxu1 %v8553_v36  ;;  %v8642_v35 = vld [vmem:[%s11300_s3 + $0x1e0] sm:$0xff]  }
 0x214   :  { %3961 = vmatprep.subr.bf16.mxu0 %v8558_v37  ;;  %4348 = vmatprep.subr.bf16.mxu1 %v8561_v38  ;;  %v8643_v36 = vld [vmem:[%s11300_s3 + $0x120] sm:$0xff]   ;;  %v8645_v38 = vld [vmem:[%s11300_s3 + $0x168] sm:$0xff]  }
 0x215   :  { %v8644_v37 = vld [vmem:[%s11300_s3 + $0x1a0] sm:$0xff]  }
 0x217   :  { %3962 = vmatpush1.bf16.msra.mxu0 %v8556_v39  ;;  %4349 = vmatpush1.bf16.msra.mxu1 %v8559_v40  ;;  %v8646_v39 = vld [vmem:[%s11300_s3 + $0x1e8] sm:$0xff]  }
 0x218   :  { %3963 = vmatprep.subr.bf16.mxu0 %v8564_v41  ;;  %4350 = vmatprep.subr.bf16.mxu1 %v8567_v42  ;;  %v8647_v40 = vld [vmem:[%s11300_s3 + $0x128] sm:$0xff]   ;;  %v8649_v42 = vld [vmem:[%s11300_s3 + $0x170] sm:$0xff]  }
 0x219   :  { %v8648_v41 = vld [vmem:[%s11300_s3 + $0x1a8] sm:$0xff]  }
 0x21b   :  { %3964 = vmatpush1.bf16.msra.mxu0 %v8562_v43  ;;  %4351 = vmatpush1.bf16.msra.mxu1 %v8565_v44  ;;  %v8650_v43 = vld [vmem:[%s11300_s3 + $0x1f0] sm:$0xff]  }
 0x21c   :  { %3965 = vmatprep.subr.bf16.mxu0 %v8570_v45  ;;  %4352 = vmatprep.subr.bf16.mxu1 %v8573_v46  ;;  %v8651_v44 = vld [vmem:[%s11300_s3 + $0x130] sm:$0xff]   ;;  %v8653_v46 = vld [vmem:[%s11300_s3 + $0x178] sm:$0xff]  }
 0x21d   :  { %v8652_v45 = vld [vmem:[%s11300_s3 + $0x1b0] sm:$0xff]  }
 0x21f   :  { %3966 = vmatpush1.bf16.msra.mxu0 %v8568_v47  ;;  %4353 = vmatpush1.bf16.msra.mxu1 %v8571_v48  ;;  %v8654_v47 = vld [vmem:[%s11300_s3 + $0x1f8] sm:$0xff]  }
 0x220   :  { %3967 = vmatprep.subr.bf16.mxu0 %v8576_v49  ;;  %4354 = vmatprep.subr.bf16.mxu1 %v8579_v50  ;;  %v8655_v48 = vld [vmem:[%s11300_s3 + $0x138] sm:$0xff]   ;;  %v8661_v50 = vld [vmem:[%s11300_s3 + $0x40] sm:$0xff]  }
 0x221   :  { %v8656_v49 = vld [vmem:[%s11300_s3 + $0x1b8] sm:$0xff]  }
 0x223   :  { %3968 = vmatpush1.bf16.msra.mxu0 %v8574_v51  ;;  %4355 = vmatpush1.bf16.msra.mxu1 %v8577_v52  ;;  %v8662_v51 = vld [vmem:[%s11300_s3 + $0xc0] sm:$0xff]   ;;  %v617_v52 = vlaneseq }
 0x224   :  { %3969 = vmatprep.subr.bf16.mxu0 %v8582_v53  ;;  %4356 = vmatprep.subr.bf16.mxu1 %v8585_v54 }
 0x225   :  { %v618_v53 = vshrl.u32 %v617_v52, 7 }
 0x227   :  { %3970 = vmatpush1.bf16.msra.mxu0 %v8580_v55  ;;  %4357 = vmatpush1.bf16.msra.mxu1 %v8583_v56  ;;  %v619_v54 = vsub.s32 0, %v618_v53  ;;  %v627_v55 = vsub.s32 2, %v618_v53  ;;  %v615_v56 = vld [vmem:[%s11301_s2] sm:$0xf] }
 0x228   :  { %3971 = vmatprep.subr.bf16.mxu0 %v8588_v57  ;;  %4358 = vmatprep.subr.bf16.mxu1 %v8591_v58  ;;  %v623_v57 = vsub.s32 1, %v618_v53  ;;  %v631_v58 = vsub.s32 3, %v618_v53  ;;  %v8671_v53 = vld [vmem:[%s11300_s3 + $0x8] sm:$0xff]  }
 0x22b   :  { %3972 = vmatpush1.bf16.msra.mxu0 %v8586_v59  ;;  %4359 = vmatpush1.bf16.msra.mxu1 %v8589_v60  ;;  %v620_v59 = vrot.slane %v615_v56, %v619_v54  ;;  %v628_v60 = vrot.slane %v615_v56, %v627_v55  ;;  %v8672_v54 = vld [vmem:[%s11300_s3 + $0x88] sm:$0xff]   ;;  %v8673_v55 = vld [vmem:[%s11300_s3 + $0x50] sm:$0xff]  }
 0x22c   :  { %3973 = vmatprep.subr.bf16.mxu0 %v8594_v61  ;;  %4360 = vmatprep.subr.bf16.mxu1 %v8597_v62  ;;  %v624_v61 = vrot.slane %v615_v56, %v623_v57  ;;  %v632_v62 = vrot.slane %v615_v56, %v631_v58  ;;  %v8674_v56 = vld [vmem:[%s11300_s3 + $0xd0] sm:$0xff]  }
 0x22d   :  { %v8675_v57 = vld [vmem:[%s11300_s3 + $0x10] sm:$0xff]  }
 0x22e   :  { %v8676_v58 = vld [vmem:[%s11300_s3 + $0x90] sm:$0xff]  }
 0x22f   :  { %3974 = vmatpush1.bf16.msra.mxu0 %v8592_v63  ;;  %4361 = vmatpush1.bf16.msra.mxu1 %v8595_v0 }
 0x230   :  { %3975 = vmatprep.subr.bf16.mxu0 %v8600_v1  ;;  %4362 = vmatprep.subr.bf16.mxu1 %v8603_v2 }
 0x233   :  { %3976 = vmatpush1.bf16.msra.mxu0 %v8598_v3  ;;  %4363 = vmatpush1.bf16.msra.mxu1 %v8601_v4 }
 0x234   :  { %3977 = vmatprep.subr.bf16.mxu0 %v8606_v5  ;;  %4364 = vmatprep.subr.bf16.mxu1 %v8609_v6 }
 0x237   :  { %3978 = vmatpush1.bf16.msra.mxu0 %v8604_v7  ;;  %4365 = vmatpush1.bf16.msra.mxu1 %v8607_v8 }
 0x238   :  { %3979 = vmatprep.subr.bf16.mxu0 %v8612_v9  ;;  %4366 = vmatprep.subr.bf16.mxu1 %v8615_v10 }
 0x23b   :  { %3980 = vmatpush1.bf16.msra.mxu0 %v8610_v11  ;;  %4367 = vmatpush1.bf16.msra.mxu1 %v8613_v12 }
 0x23c   :  { %3981 = vmatprep.subr.bf16.mxu0 %v8618_v13  ;;  %4368 = vmatprep.subr.bf16.mxu1 %v8621_v14 }
 0x23f   :  { %3982 = vmatpush1.bf16.msra.mxu0 %v8616_v15  ;;  %4369 = vmatpush1.bf16.msra.mxu1 %v8619_v16 }
 0x240   :  { %7398 = vmatprep.subr.bf16.mxu0 %v8625_v17  ;;  %7420 = vmatprep.subr.bf16.mxu1 %v8626_v18 }
 0x242   :  { %3984 = vmatmul.mubr.bf16.vlgmr.msra.gmra.mrb[0].mxu0 %v8622_v19  ;;  %4371 = vmatmul.mubr.bf16.vlgmr.msra.gmra.mrb[0].mxu1 %v8622_v19 }
 0x243   :  { %7399 = vmatpush3.bf16.msra.mxu0 %v8627_v20  ;;  %7421 = vmatpush3.bf16.msra.mxu1 %v8628_v21 }
 0x244   :  { %7400 = vmatprep.subr.bf16.mxu0 %v8629_v22  ;;  %7422 = vmatprep.subr.bf16.mxu1 %v8630_v23 }
 0x247   :  { %7401 = vmatpush3.bf16.msra.mxu0 %v8631_v24  ;;  %7423 = vmatpush3.bf16.msra.mxu1 %v8632_v25 }
 0x248   :  { %7402 = vmatprep.subr.bf16.mxu0 %v8633_v26  ;;  %7424 = vmatprep.subr.bf16.mxu1 %v8634_v27 }
 0x24b   :  { %7403 = vmatpush3.bf16.msra.mxu0 %v8635_v28  ;;  %7425 = vmatpush3.bf16.msra.mxu1 %v8636_v29 }
 0x24c   :  { %7404 = vmatprep.subr.bf16.mxu0 %v8637_v30  ;;  %7426 = vmatprep.subr.bf16.mxu1 %v8638_v31 }
 0x24f   :  { %7405 = vmatpush3.bf16.msra.mxu0 %v8639_v32  ;;  %7427 = vmatpush3.bf16.msra.mxu1 %v8640_v33 }
 0x250   :  { %7406 = vmatprep.subr.bf16.mxu0 %v8641_v34  ;;  %7428 = vmatprep.subr.bf16.mxu1 %v8642_v35 }
 0x253   :  { %7407 = vmatpush3.bf16.msra.mxu0 %v8643_v36  ;;  %7429 = vmatpush3.bf16.msra.mxu1 %v8644_v37 }
 0x254   :  { %7408 = vmatprep.subr.bf16.mxu0 %v8645_v38  ;;  %7430 = vmatprep.subr.bf16.mxu1 %v8646_v39 }
 0x257   :  { %7409 = vmatpush3.bf16.msra.mxu0 %v8647_v40  ;;  %7431 = vmatpush3.bf16.msra.mxu1 %v8648_v41  ;;  %v8663_v41 = vld [vmem:[%s11300_s3] sm:$0xff]  }
 0x258   :  { %7410 = vmatprep.subr.bf16.mxu0 %v8649_v42  ;;  %7432 = vmatprep.subr.bf16.mxu1 %v8650_v43  ;;  %v8664_v42 = vld [vmem:[%s11300_s3 + $0x80] sm:$0xff]  }
 0x25b   :  { %7411 = vmatpush3.bf16.msra.mxu0 %v8651_v44  ;;  %7433 = vmatpush3.bf16.msra.mxu1 %v8652_v45 }
 0x25c   :  { %7412 = vmatprep.subr.bf16.mxu0 %v8653_v46  ;;  %7434 = vmatprep.subr.bf16.mxu1 %v8654_v47 }
 0x25f   :  { %7413 = vmatpush3.bf16.msra.mxu0 %v8655_v48  ;;  %7435 = vmatpush3.bf16.msra.mxu1 %v8656_v49  ;;  %v8669_v49 = vld [vmem:[%s11300_s3 + $0x48] sm:$0xff]  }
 0x260   :  { %7442 = vmatprep.subr.bf16.mxu0 %v8661_v50  ;;  %7464 = vmatprep.subr.bf16.mxu1 %v8662_v51  ;;  %v8670_v50 = vld [vmem:[%s11300_s3 + $0xc8] sm:$0xff]  }
 0x315   :  { %v3985_v63 = vpop.f32.mrb[0].mxu0  ;;  %v4372_v0 = vpop.f32.mrb[0].mxu1 }
 0x316   :  { %v7662_v1 = vadd.f32 %v3985_v63, %v620_v59  ;;  %v7666_v2 = vadd.f32 %v4372_v0, %v628_v60  ;;  %v3987_v3 = vpop.f32.mrb[1].mxu0  ;;  %v4374_v4 = vpop.f32.mrb[1].mxu1  ;;  %v8681_v63 = vld [vmem:[%s11300_s3 + $0x60] sm:$0xff]  }
 0x317   :  { %v7663_v5 = vadd.f32 %v3987_v3, %v624_v61  ;;  %v7667_v6 = vadd.f32 %v4374_v4, %v632_v62  ;;  %v3989_v7 = vpop.f32.mrb[2].mxu0  ;;  %v4376_v8 = vpop.f32.mrb[2].mxu1  ;;  %v8682_v0 = vld [vmem:[%s11300_s3 + $0xe0] sm:$0xff]   ;;  %v8685_v3 = vld [vmem:[%s11300_s3 + $0x68] sm:$0xff]  }
 0x318   :  { %vm4381_vm0 = vcmp.gt.f32.partialorder %v7662_v1, 0.0  ;;  %v4389_v9 = vmul.f32 0.01, %v7662_v1  ;;  %vm4383_vm1 = vcmp.gt.f32.partialorder %v7666_v2, 0.0  ;;  %v4391_v10 = vmul.f32 0.01, %v7666_v2 }
 0x319   :  { %vm4382_vm2 = vcmp.gt.f32.partialorder %v7663_v5, 0.0  ;;  %v4390_v11 = vmul.f32 0.01, %v7663_v5  ;;  %vm4384_vm3 = vcmp.gt.f32.partialorder %v7667_v6, 0.0  ;;  %v4392_v12 = vmul.f32 0.01, %v7667_v6 }
 0x31a   :  { %v4397_v13 = vsel %vm4381_vm0, %v7662_v1, %v4389_v9  ;;  %v4399_v14 = vsel %vm4383_vm1, %v7666_v2, %v4391_v10  ;;  %v7664_v15 = vadd.f32 %v3989_v7, %v620_v59  ;;  %v7668_v16 = vadd.f32 %v4376_v8, %v628_v60  ;;  %v3991_v17 = vpop.f32.mrb[3].mxu0  ;;  %v4378_v18 = vpop.f32.mrb[3].mxu1  ;;  %v8677_v59 = vld [vmem:[%s11300_s3 + $0x58] sm:$0xff]   ;;  %v8683_v1 = vld [vmem:[%s11300_s3 + $0x20] sm:$0xff]   ;;  %v8686_v4 = vld [vmem:[%s11300_s3 + $0xe8] sm:$0xff]  }
 0x31b   :  { %v4398_v19 = vsel %vm4382_vm2, %v7663_v5, %v4390_v11  ;;  %v4400_v20 = vsel %vm4384_vm3, %v7667_v6, %v4392_v12  ;;  %v7665_v21 = vadd.f32 %v3991_v17, %v624_v61  ;;  %v7669_v22 = vadd.f32 %v4378_v18, %v632_v62  ;;  %v8678_v60 = vld [vmem:[%s11300_s3 + $0xd8] sm:$0xff]   ;;  %v8684_v2 = vld [vmem:[%s11300_s3 + $0xa0] sm:$0xff]   ;;  %v8687_v5 = vld [vmem:[%s11300_s3 + $0x28] sm:$0xff]  }
 0x31c   :  { %v7394_v23 = vpack.c.bf16 %v4398_v19, %v4397_v13  ;;  %v7395_v24 = vpack.c.bf16 %v4400_v20, %v4399_v14  ;;  %vm4385_vm4 = vcmp.gt.f32.partialorder %v7664_v15, 0.0  ;;  %v4393_v25 = vmul.f32 0.01, %v7664_v15  ;;  %v8679_v61 = vld [vmem:[%s11300_s3 + $0x18] sm:$0xff]   ;;  %v8688_v6 = vld [vmem:[%s11300_s3 + $0xa8] sm:$0xff]   ;;  %v8689_v7 = vld [vmem:[%s11300_s3 + $0x70] sm:$0xff]  }
 0x31d   :  { %vm4387_vm5 = vcmp.gt.f32.partialorder %v7668_v16, 0.0  ;;  %v4395_v26 = vmul.f32 0.01, %v7668_v16  ;;  %vm4386_vm6 = vcmp.gt.f32.partialorder %v7665_v21, 0.0  ;;  %v4394_v27 = vmul.f32 0.01, %v7665_v21 }
 0x31e   :  { %4429 = vst [vmem:[#allocation2] sm:$0xff] %v7394_v23  ;;  %4430 = vst [vmem:[#allocation2 + $0x8] sm:$0xff] %v7395_v24  ;;  %v4401_v28 = vsel %vm4385_vm4, %v7664_v15, %v4393_v25  ;;  %vm4388_vm7 = vcmp.gt.f32.partialorder %v7669_v22, 0.0  ;;  %v4396_v29 = vmul.f32 0.01, %v7669_v22  ;;  %v8680_v62 = vld [vmem:[%s11300_s3 + $0x98] sm:$0xff]  }
 0x31f   :  { %v4403_v30 = vsel %vm4387_vm5, %v7668_v16, %v4395_v26  ;;  %v4402_v31 = vsel %vm4386_vm6, %v7665_v21, %v4394_v27  ;;  %v8690_v8 = vld [vmem:[%s11300_s3 + $0xf0] sm:$0xff]   ;;  %v8693_v11 = vld [vmem:[%s11300_s3 + $0x78] sm:$0xff]   ;;  %v8697_v17 = vld [vmem:[%s11300_s3 + $0x240] sm:$0xff]  }
 0x320   :  { %v7396_v32 = vpack.c.bf16 %v4402_v31, %v4401_v28  ;;  %v4404_v33 = vsel %vm4388_vm7, %v7669_v22, %v4396_v29  ;;  %v8691_v9 = vld [vmem:[%s11300_s3 + $0x30] sm:$0xff]   ;;  %v8694_v12 = vld [vmem:[%s11300_s3 + $0xf8] sm:$0xff]   ;;  %v8698_v18 = vld [vmem:[%s11300_s3 + $0x2c0] sm:$0xff]  }
 0x321   :  { %v7397_v34 = vpack.c.bf16 %v4404_v33, %v4403_v30  ;;  %v8692_v10 = vld [vmem:[%s11300_s3 + $0xb0] sm:$0xff]   ;;  %v8695_v14 = vld [vmem:[%s11300_s3 + $0x38] sm:$0xff]   ;;  %v8699_v21 = vld [vmem:[%s11300_s3 + $0x200] sm:$0xff]  }
 0x322   :  { %4431 = vst [vmem:[#allocation2 + $0x10] sm:$0x33] %v7396_v32  ;;  %v8696_v15 = vld [vmem:[%s11300_s3 + $0xb8] sm:$0xff]   ;;  %v8702_v24 = vld [vmem:[%s11300_s3 + $0x280] sm:$0xff]   ;;  %v8705_v26 = vld [vmem:[%s11300_s3 + $0x248] sm:$0xff]  }
 0x323   :  { %4432 = vst [vmem:[#allocation2 + $0x18] sm:$0x33] %v7397_v34  ;;  %v8706_v27 = vld [vmem:[%s11300_s3 + $0x2c8] sm:$0xff]   ;;  %v8709_v31 = vld [vmem:[%s11300_s3 + $0x250] sm:$0xff]  }
 0x324   :  { %v8707_v29 = vld [vmem:[%s11300_s3 + $0x208] sm:$0xff]   ;;  %v8710_v32 = vld [vmem:[%s11300_s3 + $0x2d0] sm:$0xff]  }
 0x325   :  { %v4499_v35 = vld [vmem:[#allocation2] sm:$0x22]  ;;  %v4500_v36 = vld [vmem:[#allocation2 + $0x8] sm:$0x22]  ;;  %v10764_v43 = vld [vmem:[#allocation2] sm:$0x11] }
 0x326   :  { %v7177_v37 = vcombine.low %v4499_v35, %v4499_v35  ;;  %v7178_v38 = vcombine.high %v4499_v35, %v4499_v35  ;;  %v7179_v39 = vcombine.low %v4500_v36, %v4500_v36  ;;  %v7180_v40 = vcombine.high %v4500_v36, %v4500_v36  ;;  %v10766_v48 = vld [vmem:[#allocation2 + $0x8] sm:$0x11]  ;;  %v10850_v13 = vld [vmem:[#allocation2] sm:$0x44]  ;;  %v10858_v16 = vld [vmem:[#allocation2 + $0x8] sm:$0x44] }
 0x327   :  { %v7214_v51 = vcombine.high %v10764_v43, %v10764_v43  ;;  %v7216_v52 = vcombine.high %v10766_v48, %v10766_v48  ;;  %v7250_v19 = vcombine.high %v10850_v13, %v10850_v13  ;;  %v7252_v20 = vcombine.high %v10858_v16, %v10858_v16  ;;  %v8708_v30 = vld [vmem:[%s11300_s3 + $0x288] sm:$0xff]   ;;  %v8711_v33 = vld [vmem:[%s11300_s3 + $0x210] sm:$0xff]   ;;  %v8713_v35 = vld [vmem:[%s11300_s3 + $0x258] sm:$0xff]  }
 0x328   :  { %v4575_v44 = vrot.slane %v7177_v37, 1  ;;  %v4576_v45 = vrot.slane %v7178_v38, 1  ;;  %v4577_v46 = vrot.slane %v7179_v39, 1  ;;  %v4578_v47 = vrot.slane %v7180_v40, 1  ;;  %v8712_v34 = vld [vmem:[%s11300_s3 + $0x290] sm:$0xff]   ;;  %v8714_v36 = vld [vmem:[%s11300_s3 + $0x2d8] sm:$0xff]  }
 0x329   :  { %v7213_v22 = vcombine.low %v10764_v43, %v10764_v43  ;;  %v7215_v23 = vcombine.low %v10766_v48, %v10766_v48  ;;  %v5218_v25 = vrot.slane %v7250_v19, 2  ;;  %v5220_v28 = vrot.slane %v7252_v20, 2  ;;  %v8715_v37 = vld [vmem:[%s11300_s3 + $0x218] sm:$0xff]   ;;  %v8717_v39 = vld [vmem:[%s11300_s3 + $0x260] sm:$0xff]   ;;  %v8721_v43 = vld [vmem:[%s11300_s3 + $0x268] sm:$0xff]  }
 0x32a   :  { %4807 = vmatprep.mubr.bf16.mxu0 %v4576_v45  ;;  %4847 = vmatprep.mubr.bf16.mxu1 %v4578_v47  ;;  %v8716_v38 = vld [vmem:[%s11300_s3 + $0x298] sm:$0xff]   ;;  %v8718_v40 = vld [vmem:[%s11300_s3 + $0x2e0] sm:$0xff]   ;;  %v8723_v45 = vld [vmem:[%s11300_s3 + $0x228] sm:$0xff]  }
 0x32b   :  { %4808 = vmatmul.mubr.bf16.vlgmr.msra.gmra.mrb[4].mxu0 %v4575_v44  ;;  %4848 = vmatmul.mubr.bf16.vlgmr.msra.gmra.mrb[4].mxu1 %v4577_v46  ;;  %v8722_v44 = vld [vmem:[%s11300_s3 + $0x2e8] sm:$0xff]   ;;  %v8725_v47 = vld [vmem:[%s11300_s3 + $0x270] sm:$0xff]   ;;  %v8755_v19 = vld [vmem:[%s11300_s3 + $0x320] sm:$0xff]  }
 0x32c   :  { %7443 = vmatpush3.bf16.msra.mxu0 %v8663_v41  ;;  %7465 = vmatpush3.bf16.msra.mxu1 %v8664_v42  ;;  %v8719_v41 = vld [vmem:[%s11300_s3 + $0x220] sm:$0xff]   ;;  %v8724_v46 = vld [vmem:[%s11300_s3 + $0x2a8] sm:$0xff]   ;;  %v8726_v48 = vld [vmem:[%s11300_s3 + $0x2f0] sm:$0xff]  }
 0x32d   :  { %5093 = vmatprep.mubr.bf16.mxu0 %v7214_v51  ;;  %5133 = vmatprep.mubr.bf16.mxu1 %v7216_v52  ;;  %v8720_v42 = vld [vmem:[%s11300_s3 + $0x2a0] sm:$0xff]   ;;  %v8729_v51 = vld [vmem:[%s11300_s3 + $0x278] sm:$0xff]  }
 0x32e   :  { %7444 = vmatprep.subr.bf16.mxu0 %v8669_v49  ;;  %7466 = vmatprep.subr.bf16.mxu1 %v8670_v50  ;;  %v8727_v49 = vld [vmem:[%s11300_s3 + $0x230] sm:$0xff]   ;;  %v8730_v52 = vld [vmem:[%s11300_s3 + $0x2f8] sm:$0xff]   ;;  %v8756_v20 = vld [vmem:[%s11300_s3 + $0x3a0] sm:$0xff]  }
 0x32f   :  { %v8728_v50 = vld [vmem:[%s11300_s3 + $0x2b0] sm:$0xff]  }
 0x330   :  { %7445 = vmatpush3.bf16.msra.mxu0 %v8671_v53  ;;  %7467 = vmatpush3.bf16.msra.mxu1 %v8672_v54  ;;  %v8731_v53 = vld [vmem:[%s11300_s3 + $0x238] sm:$0xff]   ;;  %v10961_v54 = vld [vmem:[#allocation2] sm:$0x88] }
 0x331   :  { %7446 = vmatprep.subr.bf16.mxu0 %v8673_v55  ;;  %7468 = vmatprep.subr.bf16.mxu1 %v8674_v56  ;;  %v7249_v55 = vcombine.low %v10850_v13, %v10850_v13  ;;  %v8732_v56 = vld [vmem:[%s11300_s3 + $0x2b8] sm:$0xff]  }
 0x332   :  { %v8749_v13 = vld [vmem:[%s11300_s3 + $0x358] sm:$0xff]  }
 0x334   :  { %7447 = vmatpush3.bf16.msra.mxu0 %v8675_v57  ;;  %7469 = vmatpush3.bf16.msra.mxu1 %v8676_v58  ;;  %v8733_v57 = vld [vmem:[%s11300_s3 + $0x340] sm:$0xff]   ;;  %v10971_v58 = vld [vmem:[#allocation2 + $0x8] sm:$0x88] }
 0x335   :  { %7448 = vmatprep.subr.bf16.mxu0 %v8677_v59  ;;  %7470 = vmatprep.subr.bf16.mxu1 %v8678_v60  ;;  %v7251_v59 = vcombine.low %v10858_v16, %v10858_v16  ;;  %v8734_v60 = vld [vmem:[%s11300_s3 + $0x3c0] sm:$0xff]   ;;  %v8752_v16 = vld [vmem:[%s11300_s3 + $0x398] sm:$0xff]  }
 0x338   :  { %7449 = vmatpush3.bf16.msra.mxu0 %v8679_v61  ;;  %7471 = vmatpush3.bf16.msra.mxu1 %v8680_v62  ;;  %v7286_v61 = vcombine.high %v10961_v54, %v10961_v54  ;;  %v8735_v62 = vld [vmem:[%s11300_s3 + $0x300] sm:$0xff]  }
 0x339   :  { %7450 = vmatprep.subr.bf16.mxu0 %v8681_v63  ;;  %7472 = vmatprep.subr.bf16.mxu1 %v8682_v0  ;;  %v7288_v63 = vcombine.high %v10971_v58, %v10971_v58  ;;  %v5217_v0 = vrot.slane %v7249_v55, 2  ;;  %v8787_v55 = vld [vmem:[%s11300_s3 + $0x418] sm:$0xff]  }
 0x33c   :  { %7451 = vmatpush3.bf16.msra.mxu0 %v8683_v1  ;;  %7473 = vmatpush3.bf16.msra.mxu1 %v8684_v2  ;;  %v8738_v1 = vld [vmem:[%s11300_s3 + $0x380] sm:$0xff]   ;;  %v5219_v2 = vrot.slane %v7251_v59, 2 }
 0x33d   :  { %7452 = vmatprep.subr.bf16.mxu0 %v8685_v3  ;;  %7474 = vmatprep.subr.bf16.mxu1 %v8686_v4  ;;  %v8741_v3 = vld [vmem:[%s11300_s3 + $0x348] sm:$0xff]   ;;  %v5575_v4 = vrot.slane %v7286_v61, 3  ;;  %v8791_v59 = vld [vmem:[%s11300_s3 + $0x420] sm:$0xff]  }
 0x33e   :  { %v8793_v61 = vld [vmem:[%s11300_s3 + $0x468] sm:$0xff]  }
 0x340   :  { %7453 = vmatpush3.bf16.msra.mxu0 %v8687_v5  ;;  %7475 = vmatpush3.bf16.msra.mxu1 %v8688_v6  ;;  %v8742_v5 = vld [vmem:[%s11300_s3 + $0x3c8] sm:$0xff]   ;;  %v5577_v6 = vrot.slane %v7288_v63, 3 }
 0x341   :  { %7454 = vmatprep.subr.bf16.mxu0 %v8689_v7  ;;  %7476 = vmatprep.subr.bf16.mxu1 %v8690_v8  ;;  %v8743_v7 = vld [vmem:[%s11300_s3 + $0x308] sm:$0xff]  }
 0x342   :  { %v8744_v8 = vld [vmem:[%s11300_s3 + $0x388] sm:$0xff]  }
 0x343   :  { %v8795_v63 = vld [vmem:[%s11300_s3 + $0x428] sm:$0xff]  }
 0x344   :  { %7455 = vmatpush3.bf16.msra.mxu0 %v8691_v9  ;;  %7477 = vmatpush3.bf16.msra.mxu1 %v8692_v10  ;;  %v8745_v9 = vld [vmem:[%s11300_s3 + $0x350] sm:$0xff]  }
 0x345   :  { %7456 = vmatprep.subr.bf16.mxu0 %v8693_v11  ;;  %7478 = vmatprep.subr.bf16.mxu1 %v8694_v12  ;;  %v8746_v10 = vld [vmem:[%s11300_s3 + $0x3d0] sm:$0xff]  }
 0x346   :  { %v8747_v11 = vld [vmem:[%s11300_s3 + $0x310] sm:$0xff]  }
 0x347   :  { %v8748_v12 = vld [vmem:[%s11300_s3 + $0x390] sm:$0xff]  }
 0x348   :  { %7457 = vmatpush3.bf16.msra.mxu0 %v8695_v14  ;;  %7479 = vmatpush3.bf16.msra.mxu1 %v8696_v15  ;;  %v8750_v14 = vld [vmem:[%s11300_s3 + $0x3d8] sm:$0xff]  }
 0x349   :  { %7486 = vmatprep.subr.bf16.mxu0 %v8697_v17  ;;  %7508 = vmatprep.subr.bf16.mxu1 %v8698_v18  ;;  %v8751_v15 = vld [vmem:[%s11300_s3 + $0x318] sm:$0xff]   ;;  %v8753_v17 = vld [vmem:[%s11300_s3 + $0x360] sm:$0xff]  }
 0x34a   :  { %v8754_v18 = vld [vmem:[%s11300_s3 + $0x3e0] sm:$0xff]  }
 0x34b   :  { %5094 = vmatmul.mubr.bf16.vlgmr.msra.gmra.mrb[8].mxu0 %v7213_v22  ;;  %5134 = vmatmul.mubr.bf16.vlgmr.msra.gmra.mrb[8].mxu1 %v7215_v23  ;;  %v8758_v22 = vld [vmem:[%s11300_s3 + $0x3e8] sm:$0xff]  }
 0x34c   :  { %7487 = vmatpush3.bf16.msra.mxu0 %v8699_v21  ;;  %5449 = vmatprep.mubr.bf16.mxu0 %v5218_v25  ;;  %v8757_v21 = vld [vmem:[%s11300_s3 + $0x368] sm:$0xff]   ;;  %v8761_v25 = vld [vmem:[%s11300_s3 + $0x370] sm:$0xff]  }
 0x34d   :  { %7509 = vmatpush3.bf16.msra.mxu1 %v8702_v24  ;;  %5489 = vmatprep.mubr.bf16.mxu1 %v5220_v28  ;;  %v8759_v23 = vld [vmem:[%s11300_s3 + $0x328] sm:$0xff]   ;;  %v8764_v28 = vld [vmem:[%s11300_s3 + $0x3b0] sm:$0xff]  }
 0x34e   :  { %7488 = vmatprep.subr.bf16.mxu0 %v8705_v26  ;;  %7510 = vmatprep.subr.bf16.mxu1 %v8706_v27  ;;  %v8760_v24 = vld [vmem:[%s11300_s3 + $0x3a8] sm:$0xff]   ;;  %v8762_v26 = vld [vmem:[%s11300_s3 + $0x3f0] sm:$0xff]  }
 0x34f   :  { %v8763_v27 = vld [vmem:[%s11300_s3 + $0x330] sm:$0xff]  }
 0x350   :  { %7489 = vmatpush3.bf16.msra.mxu0 %v8707_v29  ;;  %v8765_v29 = vld [vmem:[%s11300_s3 + $0x378] sm:$0xff]  }
 0x351   :  { %7511 = vmatpush3.bf16.msra.mxu1 %v8708_v30  ;;  %7490 = vmatprep.subr.bf16.mxu0 %v8709_v31  ;;  %v8766_v30 = vld [vmem:[%s11300_s3 + $0x3f8] sm:$0xff]  }
 0x352   :  { %7512 = vmatprep.subr.bf16.mxu1 %v8710_v32  ;;  %v8767_v31 = vld [vmem:[%s11300_s3 + $0x338] sm:$0xff]   ;;  %v7285_v32 = vcombine.low %v10961_v54, %v10961_v54 }
 0x353   :  { %v8786_v54 = vld [vmem:[%s11300_s3 + $0x4d8] sm:$0xff]  }
 0x354   :  { %7491 = vmatpush3.bf16.msra.mxu0 %v8711_v33  ;;  %v8768_v33 = vld [vmem:[%s11300_s3 + $0x3b8] sm:$0xff]  }
 0x355   :  { %7513 = vmatpush3.bf16.msra.mxu1 %v8712_v34  ;;  %7492 = vmatprep.subr.bf16.mxu0 %v8713_v35  ;;  %v8769_v34 = vld [vmem:[%s11300_s3 + $0x440] sm:$0xff]   ;;  %v7287_v35 = vcombine.low %v10971_v58, %v10971_v58 }
 0x356   :  { %7514 = vmatprep.subr.bf16.mxu1 %v8714_v36  ;;  %v8770_v36 = vld [vmem:[%s11300_s3 + $0x4c0] sm:$0xff]  }
 0x357   :  { %v8790_v58 = vld [vmem:[%s11300_s3 + $0x4e0] sm:$0xff]  }
 0x358   :  { %7493 = vmatpush3.bf16.msra.mxu0 %v8715_v37  ;;  %v8771_v37 = vld [vmem:[%s11300_s3 + $0x400] sm:$0xff]  }
 0x359   :  { %7515 = vmatpush3.bf16.msra.mxu1 %v8716_v38  ;;  %7494 = vmatprep.subr.bf16.mxu0 %v8717_v39  ;;  %v11085_v38 = vld [vmem:[#allocation2 + $0x10] sm:$0x11]  ;;  %v5574_v39 = vrot.slane %v7285_v32, 3  ;;  %v8824_v32 = vld [vmem:[%s11300_s3 + $0x598] sm:$0xff]  }
 0x35a   :  { %7516 = vmatprep.subr.bf16.mxu1 %v8718_v40  ;;  %v8774_v40 = vld [vmem:[%s11300_s3 + $0x480] sm:$0xff]  }
 0x35c   :  { %7495 = vmatpush3.bf16.msra.mxu0 %v8719_v41  ;;  %v11090_v41 = vld [vmem:[#allocation2 + $0x18] sm:$0x11] }
 0x35d   :  { %7517 = vmatpush3.bf16.msra.mxu1 %v8720_v42  ;;  %7496 = vmatprep.subr.bf16.mxu0 %v8721_v43  ;;  %v5576_v42 = vrot.slane %v7287_v35, 3  ;;  %v8777_v43 = vld [vmem:[%s11300_s3 + $0x448] sm:$0xff]   ;;  %v8827_v35 = vld [vmem:[%s11300_s3 + $0x520] sm:$0xff]  }
 0x35e   :  { %7518 = vmatprep.subr.bf16.mxu1 %v8722_v44  ;;  %v7322_v44 = vcombine.high %v11085_v38, %v11085_v38 }
 0x360   :  { %7497 = vmatpush3.bf16.msra.mxu0 %v8723_v45  ;;  %v8778_v45 = vld [vmem:[%s11300_s3 + $0x4c8] sm:$0xff]  }
 0x361   :  { %7519 = vmatpush3.bf16.msra.mxu1 %v8724_v46  ;;  %7498 = vmatprep.subr.bf16.mxu0 %v8725_v47  ;;  %v7324_v46 = vcombine.high %v11090_v41, %v11090_v41  ;;  %v8779_v47 = vld [vmem:[%s11300_s3 + $0x408] sm:$0xff]  }
 0x362   :  { %7520 = vmatprep.subr.bf16.mxu1 %v8726_v48  ;;  %v8780_v48 = vld [vmem:[%s11300_s3 + $0x488] sm:$0xff]  }
 0x364   :  { %7499 = vmatpush3.bf16.msra.mxu0 %v8727_v49  ;;  %v8781_v49 = vld [vmem:[%s11300_s3 + $0x450] sm:$0xff]  }
 0x365   :  { %7521 = vmatpush3.bf16.msra.mxu1 %v8728_v50  ;;  %7500 = vmatprep.subr.bf16.mxu0 %v8729_v51  ;;  %v8782_v50 = vld [vmem:[%s11300_s3 + $0x4d0] sm:$0xff]  }
 0x366   :  { %7522 = vmatprep.subr.bf16.mxu1 %v8730_v52  ;;  %v8783_v51 = vld [vmem:[%s11300_s3 + $0x410] sm:$0xff]  }
 0x367   :  { %v8784_v52 = vld [vmem:[%s11300_s3 + $0x490] sm:$0xff]  }
 0x368   :  { %7501 = vmatpush3.bf16.msra.mxu0 %v8731_v53  ;;  %v8785_v53 = vld [vmem:[%s11300_s3 + $0x458] sm:$0xff]  }
 0x369   :  { %7523 = vmatpush3.bf16.msra.mxu1 %v8732_v56  ;;  %7530 = vmatprep.subr.bf16.mxu0 %v8733_v57  ;;  %v8788_v56 = vld [vmem:[%s11300_s3 + $0x498] sm:$0xff]   ;;  %v8789_v57 = vld [vmem:[%s11300_s3 + $0x460] sm:$0xff]  }
 0x36a   :  { %7552 = vmatprep.subr.bf16.mxu1 %v8734_v60  ;;  %v8792_v60 = vld [vmem:[%s11300_s3 + $0x4a0] sm:$0xff]  }
 0x36b   :  { %5450 = vmatmul.mubr.bf16.vlgmr.msra.gmra.mrb[12].mxu0 %v5217_v0  ;;  %v8796_v0 = vld [vmem:[%s11300_s3 + $0x4a8] sm:$0xff]  }
 0x36c   :  { %5490 = vmatmul.mubr.bf16.vlgmr.msra.gmra.mrb[12].mxu1 %v5219_v2  ;;  %7531 = vmatpush3.bf16.msra.mxu0 %v8735_v62  ;;  %v8794_v62 = vld [vmem:[%s11300_s3 + $0x4e8] sm:$0xff]   ;;  %v8798_v2 = vld [vmem:[%s11300_s3 + $0x4f0] sm:$0xff]  }
 0x36d   :  { %5806 = vmatprep.mubr.bf16.mxu0 %v5575_v4  ;;  %7553 = vmatpush3.bf16.msra.mxu1 %v8738_v1  ;;  %v8797_v1 = vld [vmem:[%s11300_s3 + $0x470] sm:$0xff]  }
 0x36e   :  { %5846 = vmatprep.mubr.bf16.mxu1 %v5577_v6  ;;  %7532 = vmatprep.subr.bf16.mxu0 %v8741_v3  ;;  %v8799_v3 = vld [vmem:[%s11300_s3 + $0x430] sm:$0xff]   ;;  %v8802_v6 = vld [vmem:[%s11300_s3 + $0x4f8] sm:$0xff]  }
 0x36f   :  { %7554 = vmatprep.subr.bf16.mxu1 %v8742_v5  ;;  %v8800_v4 = vld [vmem:[%s11300_s3 + $0x4b0] sm:$0xff]   ;;  %v8801_v5 = vld [vmem:[%s11300_s3 + $0x478] sm:$0xff]  }
 0x370   :  { %7533 = vmatpush3.bf16.msra.mxu0 %v8743_v7  ;;  %v8803_v7 = vld [vmem:[%s11300_s3 + $0x438] sm:$0xff]  }
 0x371   :  { %7555 = vmatpush3.bf16.msra.mxu1 %v8744_v8  ;;  %7534 = vmatprep.subr.bf16.mxu0 %v8745_v9  ;;  %v11177_v8 = vld [vmem:[#allocation2 + $0x10] sm:$0x22]  ;;  %v8804_v9 = vld [vmem:[%s11300_s3 + $0x4b8] sm:$0xff]  }
 0x372   :  { %7556 = vmatprep.subr.bf16.mxu1 %v8746_v10  ;;  %v8805_v10 = vld [vmem:[%s11300_s3 + $0x540] sm:$0xff]  }
 0x374   :  { %7535 = vmatpush3.bf16.msra.mxu0 %v8747_v11  ;;  %v11185_v11 = vld [vmem:[#allocation2 + $0x18] sm:$0x22] }
 0x375   :  { %7557 = vmatpush3.bf16.msra.mxu1 %v8748_v12  ;;  %7536 = vmatprep.subr.bf16.mxu0 %v8749_v13  ;;  %v8806_v12 = vld [vmem:[%s11300_s3 + $0x5c0] sm:$0xff]   ;;  %v7358_v13 = vcombine.high %v11177_v8, %v11177_v8 }
 0x376   :  { %7558 = vmatprep.subr.bf16.mxu1 %v8750_v14  ;;  %v8807_v14 = vld [vmem:[%s11300_s3 + $0x500] sm:$0xff]  }
 0x378   :  { %7537 = vmatpush3.bf16.msra.mxu0 %v8751_v15  ;;  %v7360_v15 = vcombine.high %v11185_v11, %v11185_v11 }
 0x379   :  { %7559 = vmatpush3.bf16.msra.mxu1 %v8752_v16  ;;  %7538 = vmatprep.subr.bf16.mxu0 %v8753_v17  ;;  %v7321_v16 = vcombine.low %v11085_v38, %v11085_v38  ;;  %v8810_v17 = vld [vmem:[%s11300_s3 + $0x580] sm:$0xff]   ;;  %v8830_v38 = vld [vmem:[%s11300_s3 + $0x5e8] sm:$0xff]  }
 0x37a   :  { %7560 = vmatprep.subr.bf16.mxu1 %v8754_v18  ;;  %v7323_v18 = vcombine.low %v11090_v41, %v11090_v41  ;;  %v8833_v41 = vld [vmem:[%s11300_s3 + $0x570] sm:$0xff]  }
 0x37c   :  { %7539 = vmatpush3.bf16.msra.mxu0 %v8755_v19  ;;  %v8813_v19 = vld [vmem:[%s11300_s3 + $0x548] sm:$0xff]  }
 0x37d   :  { %7561 = vmatpush3.bf16.msra.mxu1 %v8756_v20  ;;  %7540 = vmatprep.subr.bf16.mxu0 %v8757_v21  ;;  %v6285_v20 = vrot.slane %v7358_v13, 1  ;;  %v8814_v21 = vld [vmem:[%s11300_s3 + $0x5c8] sm:$0xff]  }
 0x37e   :  { %7562 = vmatprep.subr.bf16.mxu1 %v8758_v22  ;;  %v6287_v22 = vrot.slane %v7360_v15, 1 }
 0x380   :  { %7541 = vmatpush3.bf16.msra.mxu0 %v8759_v23  ;;  %v8815_v23 = vld [vmem:[%s11300_s3 + $0x508] sm:$0xff]  }
 0x381   :  { %7563 = vmatpush3.bf16.msra.mxu1 %v8760_v24  ;;  %7542 = vmatprep.subr.bf16.mxu0 %v8761_v25  ;;  %v8816_v24 = vld [vmem:[%s11300_s3 + $0x588] sm:$0xff]   ;;  %v8817_v25 = vld [vmem:[%s11300_s3 + $0x550] sm:$0xff]  }
 0x382   :  { %7564 = vmatprep.subr.bf16.mxu1 %v8762_v26  ;;  %v8818_v26 = vld [vmem:[%s11300_s3 + $0x5d0] sm:$0xff]  }
 0x384   :  { %7543 = vmatpush3.bf16.msra.mxu0 %v8763_v27  ;;  %v8819_v27 = vld [vmem:[%s11300_s3 + $0x510] sm:$0xff]  }
 0x385   :  { %7565 = vmatpush3.bf16.msra.mxu1 %v8764_v28  ;;  %7544 = vmatprep.subr.bf16.mxu0 %v8765_v29  ;;  %v8820_v28 = vld [vmem:[%s11300_s3 + $0x590] sm:$0xff]   ;;  %v8821_v29 = vld [vmem:[%s11300_s3 + $0x558] sm:$0xff]  }
 0x386   :  { %7566 = vmatprep.subr.bf16.mxu1 %v8766_v30  ;;  %v8822_v30 = vld [vmem:[%s11300_s3 + $0x5d8] sm:$0xff]  }
 0x388   :  { %7545 = vmatpush3.bf16.msra.mxu0 %v8767_v31  ;;  %v8823_v31 = vld [vmem:[%s11300_s3 + $0x518] sm:$0xff]  }
 0x389   :  { %7567 = vmatpush3.bf16.msra.mxu1 %v8768_v33  ;;  %7574 = vmatprep.subr.bf16.mxu0 %v8769_v34  ;;  %v8825_v33 = vld [vmem:[%s11300_s3 + $0x560] sm:$0xff]  }
 0x38a   :  { %7596 = vmatprep.subr.bf16.mxu1 %v8770_v36  ;;  %v8826_v34 = vld [vmem:[%s11300_s3 + $0x5e0] sm:$0xff]  }
 0x38b   :  { %5807 = vmatmul.mubr.bf16.vlgmr.msra.gmra.mrb[16].mxu0 %v5574_v39  ;;  %v8828_v36 = vld [vmem:[%s11300_s3 + $0x5a0] sm:$0xff]   ;;  %v8831_v39 = vld [vmem:[%s11300_s3 + $0x528] sm:$0xff]  }
 0x38c   :  { %5847 = vmatmul.mubr.bf16.vlgmr.msra.gmra.mrb[16].mxu1 %v5576_v42  ;;  %7575 = vmatpush3.bf16.msra.mxu0 %v8771_v37  ;;  %v8829_v37 = vld [vmem:[%s11300_s3 + $0x568] sm:$0xff]   ;;  %v8834_v42 = vld [vmem:[%s11300_s3 + $0x5f0] sm:$0xff]  }
 0x38d   :  { %6159 = vmatprep.mubr.bf16.mxu0 %v7322_v44  ;;  %7597 = vmatpush3.bf16.msra.mxu1 %v8774_v40  ;;  %v8832_v40 = vld [vmem:[%s11300_s3 + $0x5a8] sm:$0xff]   ;;  %v8836_v44 = vld [vmem:[%s11300_s3 + $0x5b0] sm:$0xff]  }
 0x38e   :  { %6199 = vmatprep.mubr.bf16.mxu1 %v7324_v46  ;;  %7576 = vmatprep.subr.bf16.mxu0 %v8777_v43  ;;  %v8835_v43 = vld [vmem:[%s11300_s3 + $0x530] sm:$0xff]   ;;  %v8838_v46 = vld [vmem:[%s11300_s3 + $0x5f8] sm:$0xff]  }
 0x38f   :  { %7598 = vmatprep.subr.bf16.mxu1 %v8778_v45  ;;  %v8837_v45 = vld [vmem:[%s11300_s3 + $0x578] sm:$0xff]  }
 0x390   :  { %7577 = vmatpush3.bf16.msra.mxu0 %v8779_v47  ;;  %v8839_v47 = vld [vmem:[%s11300_s3 + $0x538] sm:$0xff]  }
 0x391   :  { %7599 = vmatpush3.bf16.msra.mxu1 %v8780_v48  ;;  %7578 = vmatprep.subr.bf16.mxu0 %v8781_v49  ;;  %v7357_v48 = vcombine.low %v11177_v8, %v11177_v8  ;;  %v8840_v49 = vld [vmem:[%s11300_s3 + $0x5b8] sm:$0xff]  }
 0x392   :  { %7600 = vmatprep.subr.bf16.mxu1 %v8782_v50  ;;  %v7359_v50 = vcombine.low %v11185_v11, %v11185_v11 }
 0x394   :  { %7579 = vmatpush3.bf16.msra.mxu0 %v8783_v51  ;;  %v6284_v51 = vrot.slane %v7357_v48, 1 }
 0x395   :  { %7601 = vmatpush3.bf16.msra.mxu1 %v8784_v52  ;;  %7580 = vmatprep.subr.bf16.mxu0 %v8785_v53  ;;  %v6286_v52 = vrot.slane %v7359_v50, 1 }
 0x396   :  { %7602 = vmatprep.subr.bf16.mxu1 %v8786_v54 }
 0x398   :  { %7581 = vmatpush3.bf16.msra.mxu0 %v8787_v55 }
 0x399   :  { %7603 = vmatpush3.bf16.msra.mxu1 %v8788_v56  ;;  %7582 = vmatprep.subr.bf16.mxu0 %v8789_v57 }
 0x39a   :  { %7604 = vmatprep.subr.bf16.mxu1 %v8790_v58 }
 0x39c   :  { %7583 = vmatpush3.bf16.msra.mxu0 %v8791_v59 }
 0x39d   :  { %7605 = vmatpush3.bf16.msra.mxu1 %v8792_v60  ;;  %7584 = vmatprep.subr.bf16.mxu0 %v8793_v61 }
 0x39e   :  { %7606 = vmatprep.subr.bf16.mxu1 %v8794_v62 }
 0x3a0   :  { %7585 = vmatpush3.bf16.msra.mxu0 %v8795_v63 }
 0x3a1   :  { %7607 = vmatpush3.bf16.msra.mxu1 %v8796_v0  ;;  %7586 = vmatprep.subr.bf16.mxu0 %v8797_v1 }
 0x3a2   :  { %7608 = vmatprep.subr.bf16.mxu1 %v8798_v2 }
 0x3a4   :  { %7587 = vmatpush3.bf16.msra.mxu0 %v8799_v3 }
 0x3a5   :  { %7609 = vmatpush3.bf16.msra.mxu1 %v8800_v4  ;;  %7588 = vmatprep.subr.bf16.mxu0 %v8801_v5 }
 0x3a6   :  { %7610 = vmatprep.subr.bf16.mxu1 %v8802_v6 }
 0x3a8   :  { %7589 = vmatpush3.bf16.msra.mxu0 %v8803_v7 }
 0x3a9   :  { %7611 = vmatpush3.bf16.msra.mxu1 %v8804_v9  ;;  %7618 = vmatprep.subr.bf16.mxu0 %v8805_v10 }
 0x3aa   :  { %7640 = vmatprep.subr.bf16.mxu1 %v8806_v12 }
 0x3ab   :  { %6160 = vmatmul.mubr.bf16.vlgmr.msra.gmra.mrb[20].mxu0 %v7321_v16 }
 0x3ac   :  { %6200 = vmatmul.mubr.bf16.vlgmr.msra.gmra.mrb[20].mxu1 %v7323_v18  ;;  %7619 = vmatpush3.bf16.msra.mxu0 %v8807_v14 }
 0x3ad   :  { %6516 = vmatprep.mubr.bf16.mxu0 %v6285_v20  ;;  %7641 = vmatpush3.bf16.msra.mxu1 %v8810_v17 }
 0x3ae   :  { %6556 = vmatprep.mubr.bf16.mxu1 %v6287_v22  ;;  %7620 = vmatprep.subr.bf16.mxu0 %v8813_v19 }
 0x3af   :  { %7642 = vmatprep.subr.bf16.mxu1 %v8814_v21 }
 0x3b0   :  { %7621 = vmatpush3.bf16.msra.mxu0 %v8815_v23 }
 0x3b1   :  { %7643 = vmatpush3.bf16.msra.mxu1 %v8816_v24  ;;  %7622 = vmatprep.subr.bf16.mxu0 %v8817_v25 }
 0x3b2   :  { %7644 = vmatprep.subr.bf16.mxu1 %v8818_v26 }
 0x3b4   :  { %7623 = vmatpush3.bf16.msra.mxu0 %v8819_v27 }
 0x3b5   :  { %7645 = vmatpush3.bf16.msra.mxu1 %v8820_v28  ;;  %7624 = vmatprep.subr.bf16.mxu0 %v8821_v29 }
 0x3b6   :  { %7646 = vmatprep.subr.bf16.mxu1 %v8822_v30 }
 0x3b8   :  { %7625 = vmatpush3.bf16.msra.mxu0 %v8823_v31 }
 0x3b9   :  { %7647 = vmatpush3.bf16.msra.mxu1 %v8824_v32  ;;  %7626 = vmatprep.subr.bf16.mxu0 %v8825_v33 }
 0x3ba   :  { %7648 = vmatprep.subr.bf16.mxu1 %v8826_v34 }
 0x3bc   :  { %7627 = vmatpush3.bf16.msra.mxu0 %v8827_v35 }
 0x3bd   :  { %7649 = vmatpush3.bf16.msra.mxu1 %v8828_v36  ;;  %7628 = vmatprep.subr.bf16.mxu0 %v8829_v37 }
 0x3be   :  { %7650 = vmatprep.subr.bf16.mxu1 %v8830_v38 }
 0x3c0   :  { %7629 = vmatpush3.bf16.msra.mxu0 %v8831_v39 }
 0x3c1   :  { %7651 = vmatpush3.bf16.msra.mxu1 %v8832_v40  ;;  %7630 = vmatprep.subr.bf16.mxu0 %v8833_v41 }
 0x3c2   :  { %7652 = vmatprep.subr.bf16.mxu1 %v8834_v42 }
 0x3c4   :  { %7631 = vmatpush3.bf16.msra.mxu0 %v8835_v43 }
 0x3c5   :  { %7653 = vmatpush3.bf16.msra.mxu1 %v8836_v44  ;;  %7632 = vmatprep.subr.bf16.mxu0 %v8837_v45 }
 0x3c6   :  { %7654 = vmatprep.subr.bf16.mxu1 %v8838_v46 }
 0x3c8   :  { %7633 = vmatpush3.bf16.msra.mxu0 %v8839_v47 }
 0x3c9   :  { %7655 = vmatpush3.bf16.msra.mxu1 %v8840_v49 }
 0x3cb   :  { %6517 = vmatmul.mubr.bf16.vlgmr.msra.gmra.mrb[24].mxu0 %v6284_v51 }
 0x3cc   :  { %6557 = vmatmul.mubr.bf16.vlgmr.msra.gmra.mrb[24].mxu1 %v6286_v52 }
 0x3fe   :  { %v7414_v53 = vpop.f32.mrb[4].mxu0  ;;  %v7436_v54 = vpop.f32.mrb[4].mxu1 }
 0x3ff   :  { %v7415_v55 = vpop.f32.mrb[5].mxu0  ;;  %v7437_v56 = vpop.f32.mrb[5].mxu1 }
 0x400   :  { %v7416_v57 = vadd.f32 %v7415_v55, %v7414_v53  ;;  %v7438_v58 = vadd.f32 %v7437_v56, %v7436_v54  ;;  %v7417_v59 = vpop.f32.mrb[6].mxu0  ;;  %v7439_v60 = vpop.f32.mrb[6].mxu1 }
 0x401   :  { %v7418_v61 = vpop.f32.mrb[7].mxu0  ;;  %v7440_v62 = vpop.f32.mrb[7].mxu1  ;;  %v7393_v59 = vld [vmem:[%s11302_s4] ss:$0 sm:$0xff] }
 0x402   :  { %v4850_v63 = vadd.f32 %v7438_v58, %v7416_v57 }
 0x41e   :  { %v7458_v0 = vpop.f32.mrb[8].mxu0  ;;  %v7480_v1 = vpop.f32.mrb[8].mxu1 }
 0x41f   :  { %v7459_v2 = vpop.f32.mrb[9].mxu0  ;;  %v7481_v3 = vpop.f32.mrb[9].mxu1 }
 0x420   :  { %v7460_v4 = vadd.f32 %v7459_v2, %v7458_v0  ;;  %v7482_v5 = vadd.f32 %v7481_v3, %v7480_v1  ;;  %v7461_v6 = vpop.f32.mrb[10].mxu0  ;;  %v7483_v7 = vpop.f32.mrb[10].mxu1 }
 0x421   :  { %v7462_v8 = vpop.f32.mrb[11].mxu0  ;;  %v7484_v9 = vpop.f32.mrb[11].mxu1 }
 0x422   :  { %v5096_v10 = vadd.f32 %v7460_v4, %v4850_v63 }
 0x424   :  { %v5136_v11 = vadd.f32 %v7482_v5, %v5096_v10 }
 0x43e   :  { %v7502_v12 = vpop.f32.mrb[12].mxu0 }
 0x43f   :  { %v7524_v13 = vpop.f32.mrb[12].mxu1  ;;  %v7503_v14 = vpop.f32.mrb[13].mxu0 }
 0x440   :  { %v7504_v15 = vadd.f32 %v7503_v14, %v7502_v12  ;;  %v7525_v16 = vpop.f32.mrb[13].mxu1  ;;  %v7505_v17 = vpop.f32.mrb[14].mxu0 }
 0x441   :  { %v7526_v18 = vadd.f32 %v7525_v16, %v7524_v13  ;;  %v7527_v19 = vpop.f32.mrb[14].mxu1  ;;  %v7506_v20 = vpop.f32.mrb[15].mxu0 }
 0x442   :  { %v7528_v21 = vpop.f32.mrb[15].mxu1 }
 0x443   :  { %v5492_v22 = vadd.f32 %v7526_v18, %v7504_v15 }
 0x445   :  { %v5497_v23 = vadd.f32 %v5492_v22, %v5136_v11 }
 0x45e   :  { %v7546_v24 = vpop.f32.mrb[16].mxu0 }
 0x45f   :  { %v7568_v25 = vpop.f32.mrb[16].mxu1  ;;  %v7547_v26 = vpop.f32.mrb[17].mxu0 }
 0x460   :  { %v7548_v27 = vadd.f32 %v7547_v26, %v7546_v24  ;;  %v7569_v28 = vpop.f32.mrb[17].mxu1  ;;  %v7549_v29 = vpop.f32.mrb[18].mxu0 }
 0x461   :  { %v7570_v30 = vadd.f32 %v7569_v28, %v7568_v25  ;;  %v7571_v31 = vpop.f32.mrb[18].mxu1  ;;  %v7550_v32 = vpop.f32.mrb[19].mxu0 }
 0x462   :  { %v7572_v33 = vpop.f32.mrb[19].mxu1 }
 0x463   :  { %v5849_v34 = vadd.f32 %v7570_v30, %v7548_v27 }
 0x465   :  { %v5854_v35 = vadd.f32 %v5849_v34, %v5497_v23 }
 0x47e   :  { %v7590_v36 = vpop.f32.mrb[20].mxu0 }
 0x47f   :  { %v7612_v37 = vpop.f32.mrb[20].mxu1  ;;  %v7591_v38 = vpop.f32.mrb[21].mxu0 }
 0x480   :  { %v7592_v39 = vadd.f32 %v7591_v38, %v7590_v36  ;;  %v7613_v40 = vpop.f32.mrb[21].mxu1  ;;  %v7593_v41 = vpop.f32.mrb[22].mxu0 }
 0x481   :  { %v7614_v42 = vadd.f32 %v7613_v40, %v7612_v37  ;;  %v7615_v43 = vpop.f32.mrb[22].mxu1  ;;  %v7594_v44 = vpop.f32.mrb[23].mxu0 }
 0x482   :  { %v7616_v45 = vpop.f32.mrb[23].mxu1 }
 0x483   :  { %v6202_v46 = vadd.f32 %v7614_v42, %v7592_v39 }
 0x485   :  { %v6207_v47 = vadd.f32 %v6202_v46, %v5854_v35 }
 0x49e   :  { %v7634_v48 = vpop.f32.mrb[24].mxu0 }
 0x49f   :  { %v7656_v49 = vpop.f32.mrb[24].mxu1  ;;  %v7635_v50 = vpop.f32.mrb[25].mxu0 }
 0x4a0   :  { %v7636_v51 = vadd.f32 %v7635_v50, %v7634_v48  ;;  %v7657_v52 = vpop.f32.mrb[25].mxu1  ;;  %v7637_v53 = vpop.f32.mrb[26].mxu0 }
 0x4a1   :  { %v7658_v54 = vadd.f32 %v7657_v52, %v7656_v49  ;;  %v7659_v55 = vpop.f32.mrb[26].mxu1  ;;  %v7638_v56 = vpop.f32.mrb[27].mxu0 }
 0x4a2   :  { %v7660_v57 = vpop.f32.mrb[27].mxu1 }
 0x4a3   :  { %v6559_v58 = vadd.f32 %v7658_v54, %v7636_v51 }
 0x4a5   :  { %v6564_v60 = vadd.f32 %v6559_v58, %v6207_v47 }
 0x4a7   :  { %v6572_v61 = vadd.f32 %v7393_v59, %v6564_v60 }
 0x4a9   :  { %6574 = vst.msk [vmem:[%s11303_s5] sm:$0x3] %vm6573_vm8, %v6572_v61 }

</bundles_post_ra>
